<compile_context>
chip_gen: v7x
topology: tpu7x:2x2x1
jax: 0.10.0
libtpu: 0.0.40
codegen_flags: <defaults>
</compile_context>

<pallas_src>
import jax
import jax.numpy as jnp
from jax.experimental import pallas as pl
from jax.experimental.pallas import tpu as pltpu

F32 = jnp.float32
BF16 = jnp.bfloat16

# real / padded model dims
F_REAL, F_PAD = 33, 128        # node features
H_REAL, H_PAD = 66, 128        # SSM hidden / per-head GAT width
C_REAL, C_PAD = 132, 256       # conv2/conv3 width
FC_DIM = 1024
OUT_DIM = 128

# bf16 weight-blob row offsets (blob width 512)
ROW_SSM = 0            # (128, 512)  [gate | GRU r | GRU z | GRU n]
ROW_C1 = 128           # (128, 512)  [lin_l(256) | lin_r(256)]
ROW_C2 = 256           # (256, 512)
ROW_C3 = 512           # (256, 512)
ROW_FC1A = 768         # (256, 512)  pro_fc1 cols   0:512
ROW_FC1B = 1024        # (256, 512)  pro_fc1 cols 512:1024
W_ROWS = 1280

# f32 bias/att blob rows (blob shape (16, 1024))
VR_SSM_B, VR_SSM_BHN = 0, 1
VR_C1_BLR, VR_C1_ATT, VR_C1_BIAS = 2, 3, 4
VR_C2_BLR, VR_C2_ATT, VR_C2_BIAS = 5, 6, 7
VR_C3_BLR, VR_C3_ATT, VR_C3_BIAS = 8, 9, 10
VR_FC1_B, VR_FC2_B = 11, 12
V_ROWS = 16


# --------------------------------------------------------------------------- kernel
def fused_kernel(x_ref, adj_ref, pool_ref, w_ref, fc2w_ref, v_ref, fvec_ref,
                 fw1_hbm, fw2_hbm, out_ref,
                 x12_prev, f1_buf, f2_buf, sem):
    i = pl.program_id(0)

    # Prefetch the shared final-head weights while branch 0 computes.
    @pl.when(i == 0)
    def _():
        pltpu.make_async_copy(fw1_hbm, f1_buf, sem.at[0]).start()
        pltpu.make_async_copy(fw2_hbm, f2_buf, sem.at[1]).start()

    x = x_ref[...]                      # (N, 128) f32, zero beyond col 33
    adj = adj_ref[...]                  # (N, N)   f32 dense adjacency (row = target)

    # ---- SelectiveStateSpaceModel (sequence_length == 1, h0 == 0) -----------------
    # One merged bf16 matmul: [gate | GRU_r | GRU_z | GRU_n] input projections.
    y = jnp.dot(x.astype(BF16), w_ref[ROW_SSM:ROW_SSM + F_PAD, :],
                preferred_element_type=F32) + v_ref[VR_SSM_B:VR_SSM_B + 1, 0:4 * H_PAD]
    gate = jax.nn.sigmoid(y[:, 0:H_PAD])
    r = jax.nn.sigmoid(y[:, H_PAD:2 * H_PAD])
    z = jax.nn.sigmoid(y[:, 2 * H_PAD:3 * H_PAD])
    n = jnp.tanh(y[:, 3 * H_PAD:4 * H_PAD]
                 + r * v_ref[VR_SSM_BHN:VR_SSM_BHN + 1, 0:H_PAD])
    # h' = (1 - z) * n  (+ z * h0 == 0).  The reference softmax acts on a size-1 axis
    # and is identically 1, so its attention block is dead code (exact removal).
    h = gate * ((1.0 - z) * n)                                   # (N, 128)

    # ---- dense GATv2Conv layers ----------------------------------------------------
    def gat_layer(h_in, w_row, vr_blr, vr_att, vr_bias, heads, chunk, apply_relu):
        hc = heads * chunk                                        # == 256 for all layers
        cin = h_in.shape[-1]
        yy = jnp.dot(h_in.astype(BF16), w_ref[w_row:w_row + cin, :],
                     preferred_element_type=F32) + v_ref[vr_blr:vr_blr + 1, 0:2 * hc]
        xl = yy[:, 0:hc]                                          # lin_l (messages)
        xr = yy[:, hc:2 * hc]                                     # lin_r (queries)
        att = v_ref[vr_att:vr_att + 1, 0:hc].astype(BF16)
        # Pairwise scores in bf16 (half the register/VMEM footprint); edge mask,
        # max-subtraction and softmax stay in f32 for numerical safety.
        s = xr[:, None, :].astype(BF16) + xl[None, :, :].astype(BF16)   # (N, N, hc)
        s = jnp.where(s > 0, s, 0.2 * s)                          # leaky_relu(0.2)
        s = s * att
        outs = []
        for hd in range(heads):                                   # static (<= 2)
            e = jnp.sum(s[:, :, hd * chunk:(hd + 1) * chunk].astype(F32), axis=-1)
            e = jnp.where(adj > 0.0, e, -1e30)                    # mask non-edges
            e = e - jnp.max(e, axis=-1, keepdims=True)
            p = jnp.exp(e)
            alpha = p * pl.reciprocal(jnp.sum(p, axis=-1, keepdims=True), approx=True)
            outs.append(jnp.dot(alpha.astype(BF16),
                                xl[:, hd * chunk:(hd + 1) * chunk].astype(BF16),
                                preferred_element_type=F32))      # (N, chunk)
        out = outs[0] if heads == 1 else jnp.concatenate(outs, axis=-1)
        out = out + v_ref[vr_bias:vr_bias + 1, 0:hc]
        return jnp.maximum(out, 0.0) if apply_relu else out

    h = gat_layer(h, ROW_C1, VR_C1_BLR, VR_C1_ATT, VR_C1_BIAS, 2, H_PAD, True)   # (N, 256)
    h = gat_layer(h, ROW_C2, VR_C2_BLR, VR_C2_ATT, VR_C2_BIAS, 1, C_PAD, True)   # (N, 256)
    h = gat_layer(h, ROW_C3, VR_C3_BLR, VR_C3_ATT, VR_C3_BIAS, 1, C_PAD, False)  # (N, 256)

    # ---- global_mean_pool + pro_fc1 + pro_fc2 ---------------------------------------
    pooled = jnp.dot(pool_ref[...], h, preferred_element_type=F32)       # (G, 256)
    pb = pooled.astype(BF16)
    ta = jnp.maximum(jnp.dot(pb, w_ref[ROW_FC1A:ROW_FC1A + C_PAD, :],
                             preferred_element_type=F32)
                     + v_ref[VR_FC1_B:VR_FC1_B + 1, 0:512], 0.0)         # (G, 512)
    tb = jnp.maximum(jnp.dot(pb, w_ref[ROW_FC1B:ROW_FC1B + C_PAD, :],
                             preferred_element_type=F32)
                     + v_ref[VR_FC1_B:VR_FC1_B + 1, 512:1024], 0.0)      # (G, 512)
    # TODO(synk): dropout is treated as eval-mode identity (deterministic kernel).
    x12 = (jnp.dot(ta.astype(BF16), fc2w_ref[0:512, :], preferred_element_type=F32)
           + jnp.dot(tb.astype(BF16), fc2w_ref[512:1024, :], preferred_element_type=F32)
           + v_ref[VR_FC2_B:VR_FC2_B + 1, 0:OUT_DIM])                    # (G, 128)

    @pl.when(i == 0)
    def _():
        x12_prev[...] = x12                                       # carry x1 to step 1

    # ---- final shared head (runs once, after both branches) --------------------------
    @pl.when(i == 1)
    def _():
        pltpu.make_async_copy(fw1_hbm, f1_buf, sem.at[0]).wait()
        pltpu.make_async_copy(fw2_hbm, f2_buf, sem.at[1]).wait()
        xc = jnp.concatenate([x12_prev[...], x12], axis=-1)       # (G, 256) = [x1 | x2]
        h1 = jnp.maximum(jnp.dot(xc.astype(BF16), f1_buf[...],
                                 preferred_element_type=F32)
                         + fvec_ref[0:1, :], 0.0)                 # (G, 1024)
        h2 = jnp.maximum(jnp.dot(h1.astype(BF16), f2_buf[...],
                                 preferred_element_type=F32)
                         + fvec_ref[1:2, 0:512], 0.0)             # (G, 512)
        # TODO(synk): final-head dropout is also eval-mode identity.
        logit = (jnp.sum(h2 * fvec_ref[2:3, 0:512], axis=-1, keepdims=True)
                 + fvec_ref[3:4, 0:1])                            # (G, 1)
        out_ref[...] = jax.nn.sigmoid(logit)


# --------------------------------------------------------------------------- wrapper
def model_forward(blob_w, fc2_w, blob_v, f_w1, f_w2, f_vec, x, adj, pool):
    G = pool.shape[1]

    def branch_spec(arr):
        shp = arr.shape
        nd = len(shp)
        return pl.BlockSpec((None,) + shp[1:],
                            lambda i, nd=nd: (i,) + (0,) * (nd - 1))

    in_specs = [branch_spec(x), branch_spec(adj), branch_spec(pool),
                branch_spec(blob_w), branch_spec(fc2_w), branch_spec(blob_v),
                pl.BlockSpec(f_vec.shape, lambda i: (0, 0)),
                pl.BlockSpec(memory_space=pl.ANY),    # final fc1 weights stay in HBM
                pl.BlockSpec(memory_space=pl.ANY)]    # final fc2 weights stay in HBM

    return pl.pallas_call(
        fused_kernel,
        out_shape=jax.ShapeDtypeStruct((G, 1), F32),
        grid=(2,),
        in_specs=in_specs,
        out_specs=pl.BlockSpec((G, 1), lambda i: (0, 0)),
        scratch_shapes=[
            pltpu.VMEM((G, OUT_DIM), F32),            # branch-0 embedding (x1)
            pltpu.VMEM(f_w1.shape, BF16),             # prefetched final fc1 weights
            pltpu.VMEM(f_w2.shape, BF16),             # prefetched final fc2 weights
            pltpu.SemaphoreType.DMA((2,)),
        ],
        compiler_params=pltpu.CompilerParams(
            dimension_semantics=("arbitrary",),       # cross-step carry + manual prefetch
            vmem_limit_bytes=32 * 1024 * 1024),
    )(x, adj, pool, blob_w, fc2_w, blob_v, f_vec, f_w1, f_w2)


# --------------------------------------------------------------------------- params
def _linear_init(key, out_f, in_f):
    k1, k2 = jax.random.split(key)
    bound = 1.0 / float(in_f) ** 0.5
    w = jax.random.uniform(k1, (out_f, in_f), F32, -bound, bound)   # torch layout (out, in)
    b = jax.random.uniform(k2, (out_f,), F32, -bound, bound)
    return w, b


def _place_per_head(vec, heads, out_real, chunk):
    """(heads*out_real,) -> (heads*chunk,) with per-head zero padding."""
    out = jnp.zeros((heads * chunk,), F32)
    for hd in range(heads):
        out = out.at[hd * chunk:hd * chunk + out_real].set(
            vec[hd * out_real:(hd + 1) * out_real])
    return out


def _place_w_per_head(wmat, heads, out_real, chunk):
    """torch (heads*out_real, in_real) -> (in_real, heads*chunk) lane-padded."""
    in_real = wmat.shape[1]
    out = jnp.zeros((in_real, heads * chunk), F32)
    for hd in range(heads):
        out = out.at[:, hd * chunk:hd * chunk + out_real].set(
            wmat[hd * out_real:(hd + 1) * out_real].T)
    return out


def make_branch_params(key):
    """Packed parameter blobs for one ProteinGraphModule (random torch-style init)."""
    W = jnp.zeros((W_ROWS, 512), F32)
    V = jnp.zeros((V_ROWS, 1024), F32)
    ks = jax.random.split(key, 9)

    # --- SSM: gate Linear(99, 66) + GRUCell(33, 66) ---------------------------------
    gw, gb = _linear_init(ks[0], H_REAL, F_REAL + H_REAL)
    hb = 1.0 / float(H_REAL) ** 0.5
    w_ih = jax.random.uniform(ks[1], (3 * H_REAL, F_REAL), F32, -hb, hb)
    b_ih = jax.random.uniform(ks[2], (3 * H_REAL,), F32, -hb, hb)
    b_hh = jax.random.uniform(ks[3], (3 * H_REAL,), F32, -hb, hb)
    # gate: only x-columns matter (h0 == 0); merged column groups [gate | r | z | n].
    W = W.at[ROW_SSM:ROW_SSM + F_REAL, 0:H_REAL].set(gw[:, :F_REAL].T)
    V = V.at[VR_SSM_B, 0:H_REAL].set(gb)
    for g in range(3):                                     # GRU r / z / n input proj.
        W = W.at[ROW_SSM:ROW_SSM + F_REAL,
                 (g + 1) * H_PAD:(g + 1) * H_PAD + H_REAL].set(
                     w_ih[g * H_REAL:(g + 1) * H_REAL].T)
    V = V.at[VR_SSM_B, H_PAD:H_PAD + H_REAL].set(b_ih[0:H_REAL] + b_hh[0:H_REAL])
    V = V.at[VR_SSM_B, 2 * H_PAD:2 * H_PAD + H_REAL].set(
        b_ih[H_REAL:2 * H_REAL] + b_hh[H_REAL:2 * H_REAL])
    V = V.at[VR_SSM_B, 3 * H_PAD:3 * H_PAD + H_REAL].set(b_ih[2 * H_REAL:3 * H_REAL])
    V = V.at[VR_SSM_BHN, 0:H_REAL].set(b_hh[2 * H_REAL:3 * H_REAL])
    # (weight_hh and the SSM attention layers are dead code for h0 == 0, seq_len == 1.)

    # --- GATv2 layers ----------------------------------------------------------------
    def fill_gat(Wb, Vb, k, w_row, vr_blr, vr_att, vr_bias, in_map, out_real, heads, chunk):
        kk = jax.random.split(k, 4)
        in_real = int(in_map.shape[0])
        lw, lb = _linear_init(kk[0], heads * out_real, in_real)
        rw, rb = _linear_init(kk[1], heads * out_real, in_real)
        att = jax.random.uniform(kk[2], (heads * out_real,), F32, -0.1, 0.1)
        bias = jax.random.uniform(kk[3], (heads * out_real,), F32, -0.1, 0.1)
        hc = heads * chunk
        rows = jnp.concatenate([_place_w_per_head(lw, heads, out_real, chunk),
                                _place_w_per_head(rw, heads, out_real, chunk)], axis=1)
        Wb = Wb.at[w_row + in_map].set(rows)
        Vb = Vb.at[vr_blr, 0:hc].set(_place_per_head(lb, heads, out_real, chunk))
        Vb = Vb.at[vr_blr, hc:2 * hc].set(_place_per_head(rb, heads, out_real, chunk))
        Vb = Vb.at[vr_att, 0:hc].set(_place_per_head(att, heads, out_real, chunk))
        Vb = Vb.at[vr_bias, 0:hc].set(_place_per_head(bias, heads, out_real, chunk))
        return Wb, Vb

    W, V = fill_gat(W, V, ks[4], ROW_C1, VR_C1_BLR, VR_C1_ATT, VR_C1_BIAS,
                    in_map=jnp.arange(H_REAL), out_real=H_REAL, heads=2, chunk=H_PAD)
    W, V = fill_gat(W, V, ks[5], ROW_C2, VR_C2_BLR, VR_C2_ATT, VR_C2_BIAS,
                    in_map=jnp.concatenate([jnp.arange(H_REAL), H_PAD + jnp.arange(H_REAL)]),
                    out_real=C_REAL, heads=1, chunk=C_PAD)
    W, V = fill_gat(W, V, ks[6], ROW_C3, VR_C3_BLR, VR_C3_ATT, VR_C3_BIAS,
                    in_map=jnp.arange(C_REAL), out_real=C_REAL, heads=1, chunk=C_PAD)

    # --- pro_fc1 / pro_fc2 --------------------------------------------------------------
    w1, b1 = _linear_init(ks[7], FC_DIM, C_REAL)
    w2, b2 = _linear_init(ks[8], OUT_DIM, FC_DIM)
    fc1 = jnp.zeros((C_PAD, FC_DIM), F32).at[:C_REAL].set(w1.T)
    W = W.at[ROW_FC1A:ROW_FC1A + C_PAD].set(fc1[:, 0:512])
    W = W.at[ROW_FC1B:ROW_FC1B + C_PAD].set(fc1[:, 512:1024])
    V = V.at[VR_FC1_B, 0:FC_DIM].set(b1)
    V = V.at[VR_FC2_B, 0:OUT_DIM].set(b2)
    fc2_w = w2.T.astype(BF16)                                  # (1024, 128)
    return W.astype(BF16), fc2_w, V


def make_final_params(key):
    ks = jax.random.split(key, 3)
    w1, b1 = _linear_init(ks[0], FC_DIM, 2 * OUT_DIM)          # final_fc1 (256 -> 1024)
    w2, b2 = _linear_init(ks[1], 512, FC_DIM)                  # final_fc2 (1024 -> 512)
    wo, bo = _linear_init(ks[2], 1, 512)                       # out       (512 -> 1)
    f_w1 = w1.T.astype(BF16)                                   # (256, 1024)
    f_w2 = w2.T.astype(BF16)                                   # (1024, 512)
    f_vec = jnp.zeros((4, 1024), F32)
    f_vec = f_vec.at[0, 0:FC_DIM].set(b1)
    f_vec = f_vec.at[1, 0:512].set(b2)
    f_vec = f_vec.at[2, 0:512].set(wo[0])
    f_vec = f_vec.at[3, 0].set(bo[0])
    return f_w1, f_w2, f_vec


# --------------------------------------------------------------------------- graph glue
def build_adj(edge_index, n):
    adj = jnp.zeros((n, n), F32)
    adj = adj.at[edge_index[1], edge_index[0]].set(1.0)    # edge j->i  => adj[i, j] = 1
    adj = adj.at[jnp.arange(n), jnp.arange(n)].set(1.0)    # self loops (GATv2 default)
    return adj


def build_pool(batch, n, g):
    onehot = (batch[None, :] == jnp.arange(g)[:, None]).astype(F32)   # (G, N)
    counts = jnp.maximum(onehot.sum(axis=1, keepdims=True), 1.0)
    return onehot / counts


# --------------------------------------------------------------------------- main
if __name__ == "__main__":
    key = jax.random.PRNGKey(0)
    kb1, kb2, kf, kd1, kd2 = jax.random.split(key, 5)

    N, E, G = 16, 24, 2          # nodes per protein batch, edges, graphs per batch

    w_a, fc2_a, v_a = make_branch_params(kb1)     # protein1 module
    w_b, fc2_b, v_b = make_branch_params(kb2)     # protein2 module
    blob_w = jnp.stack([w_a, w_b])                # (2, 1280, 512) bf16
    fc2_w = jnp.stack([fc2_a, fc2_b])             # (2, 1024, 128) bf16
    blob_v = jnp.stack([v_a, v_b])                # (2, 16, 1024)  f32
    f_w1, f_w2, f_vec = make_final_params(kf)

    def make_graph(k):
        kx, ke = jax.random.split(k)
        xr = jax.random.normal(kx, (N, F_REAL), F32)
        x_pad = jnp.zeros((N, F_PAD), F32).at[:, :F_REAL].set(xr)
        # edges kept within each of the two 8-node graphs
        src0 = jax.random.randint(ke, (E // 2,), 0, 8)
        dst0 = jax.random.randint(jax.random.fold_in(ke, 1), (E // 2,), 0, 8)
        src1 = jax.random.randint(jax.random.fold_in(ke, 2), (E // 2,), 8, 16)
        dst1 = jax.random.randint(jax.random.fold_in(ke, 3), (E // 2,), 8, 16)
        edge_index = jnp.stack([jnp.concatenate([src0, src1]),
                                jnp.concatenate([dst0, dst1])]).astype(jnp.int32)
        batch = jnp.concatenate([jnp.zeros(8, jnp.int32), jnp.ones(8, jnp.int32)])
        return x_pad, build_adj(edge_index, N), build_pool(batch, N, G)

    g1 = make_graph(kd1)
    g2 = make_graph(kd2)
    x = jnp.stack([g1[0], g2[0]])          # (2, N, 128)
    adj = jnp.stack([g1[1], g2[1]])        # (2, N, N)
    pool = jnp.stack([g1[2], g2[2]])       # (2, G, N)

    out = model_forward(blob_w, fc2_w, blob_v, f_w1, f_w2, f_vec, x, adj, pool)
    out = jax.block_until_ready(out)
    assert out.shape == (G, 1)
    assert bool(jnp.all(jnp.isfinite(out)))
    assert bool(jnp.all((out >= 0.0) & (out <= 1.0)))
    print("KERNEL_OK")
</pallas_src>

<mosaic_0001>
module attributes {stable_mosaic.version = 11 : i64} {
  func.func @fused_kernel(%arg0: i32, %arg1: memref<1x16x128xf32, #tpu.memory_space<vmem>>, %arg2: memref<1x16x16xf32, #tpu.memory_space<vmem>>, %arg3: memref<1x2x16xf32, #tpu.memory_space<vmem>>, %arg4: memref<1x1280x512xbf16, #tpu.memory_space<vmem>>, %arg5: memref<1x1024x128xbf16, #tpu.memory_space<vmem>>, %arg6: memref<1x16x1024xf32, #tpu.memory_space<vmem>>, %arg7: memref<4x1024xf32, #tpu.memory_space<vmem>>, %arg8: memref<256x1024xbf16, #tpu.memory_space<any>>, %arg9: memref<1024x512xbf16, #tpu.memory_space<any>>, %arg10: memref<2x1xf32, #tpu.memory_space<vmem>>, %arg11: memref<2x128xf32, #tpu.memory_space<vmem>>, %arg12: memref<256x1024xbf16, #tpu.memory_space<vmem>>, %arg13: memref<1024x512xbf16, #tpu.memory_space<vmem>>, %arg14: memref<2x!tpu.dma_semaphore, #tpu.memory_space<semaphore_mem>>) attributes {dimension_semantics = [#tpu.dimension_semantics<arbitrary>], iteration_bounds = array<i64: 2>, scalar_prefetch = 0 : i64, scratch_operands = 4 : i64, tpu.core_type = #tpu.core_type<tc>, window_params = [{transform_indices = @transform_0, window_bounds = array<i64: 1, 16, 128>}, {transform_indices = @transform_1, window_bounds = array<i64: 1, 16, 16>}, {transform_indices = @transform_2, window_bounds = array<i64: 1, 2, 16>}, {transform_indices = @transform_3, window_bounds = array<i64: 1, 1280, 512>}, {transform_indices = @transform_4, window_bounds = array<i64: 1, 1024, 128>}, {transform_indices = @transform_5, window_bounds = array<i64: 1, 16, 1024>}, {pipeline_mode = #tpu.pipeline_mode<synchronous>, transform_indices = @transform_6, window_bounds = array<i64: 4, 1024>}, {}, {}, {pipeline_mode = #tpu.pipeline_mode<synchronous>, transform_indices = @transform_9, window_bounds = array<i64: 2, 1>}]} {
    %c0_i32 = arith.constant 0 : i32
    %0 = arith.cmpi eq, %arg0, %c0_i32 : i32
    %1 = arith.extui %0 : i1 to i32
    %c0_i32_0 = arith.constant 0 : i32
    %2 = arith.cmpi ne, %1, %c0_i32_0 : i32
    scf.if %2 {
      %c0_i32_107 = arith.constant 0 : i32
      %266 = tpu.memref_slice %arg14[%c0_i32_107] : memref<2x!tpu.dma_semaphore, #tpu.memory_space<semaphore_mem>> -> memref<1x!tpu.dma_semaphore, #tpu.memory_space<semaphore_mem>>
      %267 = tpu.memref_squeeze %266 : memref<1x!tpu.dma_semaphore, #tpu.memory_space<semaphore_mem>> -> memref<!tpu.dma_semaphore, #tpu.memory_space<semaphore_mem>>
      tpu.enqueue_dma source(%arg8 : memref<256x1024xbf16, #tpu.memory_space<any>>) target(%arg12 : memref<256x1024xbf16, #tpu.memory_space<vmem>>) target_semaphore(%267 : memref<!tpu.dma_semaphore, #tpu.memory_space<semaphore_mem>>)
      %c1_i32_108 = arith.constant 1 : i32
      %268 = tpu.memref_slice %arg14[%c1_i32_108] : memref<2x!tpu.dma_semaphore, #tpu.memory_space<semaphore_mem>> -> memref<1x!tpu.dma_semaphore, #tpu.memory_space<semaphore_mem>>
      %269 = tpu.memref_squeeze %268 : memref<1x!tpu.dma_semaphore, #tpu.memory_space<semaphore_mem>> -> memref<!tpu.dma_semaphore, #tpu.memory_space<semaphore_mem>>
      tpu.enqueue_dma source(%arg9 : memref<1024x512xbf16, #tpu.memory_space<any>>) target(%arg13 : memref<1024x512xbf16, #tpu.memory_space<vmem>>) target_semaphore(%269 : memref<!tpu.dma_semaphore, #tpu.memory_space<semaphore_mem>>)
    } else {
    }
    %c0 = arith.constant 0 : index
    %c0_1 = arith.constant 0 : index
    %c0_2 = arith.constant 0 : index
    %3 = vector.load %arg1[%c0, %c0_1, %c0_2] : memref<1x16x128xf32, #tpu.memory_space<vmem>>, vector<1x16x128xf32>
    %4 = vector.shape_cast %3 : vector<1x16x128xf32> to vector<16x128xf32>
    %c0_3 = arith.constant 0 : index
    %c0_4 = arith.constant 0 : index
    %c0_5 = arith.constant 0 : index
    %5 = vector.load %arg2[%c0_3, %c0_4, %c0_5] : memref<1x16x16xf32, #tpu.memory_space<vmem>>, vector<1x16x16xf32>
    %6 = vector.shape_cast %5 : vector<1x16x16xf32> to vector<16x16xf32>
    %7 = arith.truncf %4 : vector<16x128xf32> to vector<16x128xbf16>
    %c0_6 = arith.constant 0 : index
    %c0_7 = arith.constant 0 : index
    %c0_8 = arith.constant 0 : index
    %8 = vector.load %arg4[%c0_6, %c0_7, %c0_8] : memref<1x1280x512xbf16, #tpu.memory_space<vmem>>, vector<1x128x512xbf16>
    %9 = vector.shape_cast %8 : vector<1x128x512xbf16> to vector<128x512xbf16>
    %cst = arith.constant dense<0.000000e+00> : vector<16x512xf32>
    %10 = tpu.matmul %7, %9, %cst {dimension_numbers = #tpu.dot_dimension_numbers<[1], [0], [0], [1], [0, 0, 1, 1], [], []>} : vector<16x128xbf16>, vector<128x512xbf16>, vector<16x512xf32> -> vector<16x512xf32>
    %c0_9 = arith.constant 0 : index
    %c0_10 = arith.constant 0 : index
    %c0_11 = arith.constant 0 : index
    %11 = vector.load %arg6[%c0_9, %c0_10, %c0_11] : memref<1x16x1024xf32, #tpu.memory_space<vmem>>, vector<1x1x512xf32>
    %12 = vector.shape_cast %11 : vector<1x1x512xf32> to vector<1x512xf32>
    %13 = vector.broadcast %12 : vector<1x512xf32> to vector<16x512xf32>
    %14 = arith.addf %10, %13 : vector<16x512xf32>
    %15 = vector.extract_strided_slice %14 {offsets = [0, 0], sizes = [16, 128], strides = [1, 1]} : vector<16x512xf32> to vector<16x128xf32>
    %16 = arith.negf %15 : vector<16x128xf32>
    %17 = math.exp %16 : vector<16x128xf32>
    %cst_12 = arith.constant 1.000000e+00 : f32
    %18 = vector.broadcast %cst_12 : f32 to vector<16x128xf32>
    %19 = arith.addf %18, %17 : vector<16x128xf32>
    %20 = arith.divf %18, %19 : vector<16x128xf32>
    %21 = vector.extract_strided_slice %14 {offsets = [0, 128], sizes = [16, 128], strides = [1, 1]} : vector<16x512xf32> to vector<16x128xf32>
    %22 = arith.negf %21 : vector<16x128xf32>
    %23 = math.exp %22 : vector<16x128xf32>
    %cst_13 = arith.constant 1.000000e+00 : f32
    %24 = vector.broadcast %cst_13 : f32 to vector<16x128xf32>
    %25 = arith.addf %24, %23 : vector<16x128xf32>
    %26 = arith.divf %24, %25 : vector<16x128xf32>
    %27 = vector.extract_strided_slice %14 {offsets = [0, 256], sizes = [16, 128], strides = [1, 1]} : vector<16x512xf32> to vector<16x128xf32>
    %28 = arith.negf %27 : vector<16x128xf32>
    %29 = math.exp %28 : vector<16x128xf32>
    %cst_14 = arith.constant 1.000000e+00 : f32
    %30 = vector.broadcast %cst_14 : f32 to vector<16x128xf32>
    %31 = arith.addf %30, %29 : vector<16x128xf32>
    %32 = arith.divf %30, %31 : vector<16x128xf32>
    %33 = vector.extract_strided_slice %14 {offsets = [0, 384], sizes = [16, 128], strides = [1, 1]} : vector<16x512xf32> to vector<16x128xf32>
    %c0_15 = arith.constant 0 : index
    %c1 = arith.constant 1 : index
    %c0_16 = arith.constant 0 : index
    %34 = vector.load %arg6[%c0_15, %c1, %c0_16] : memref<1x16x1024xf32, #tpu.memory_space<vmem>>, vector<1x1x128xf32>
    %35 = vector.shape_cast %34 : vector<1x1x128xf32> to vector<1x128xf32>
    %36 = vector.broadcast %35 : vector<1x128xf32> to vector<16x128xf32>
    %37 = arith.mulf %26, %36 : vector<16x128xf32>
    %38 = arith.addf %33, %37 : vector<16x128xf32>
    %39 = math.tanh %38 : vector<16x128xf32>
    %cst_17 = arith.constant 1.000000e+00 : f32
    %40 = vector.broadcast %cst_17 : f32 to vector<16x128xf32>
    %41 = arith.subf %40, %32 : vector<16x128xf32>
    %42 = arith.mulf %41, %39 : vector<16x128xf32>
    %43 = arith.mulf %20, %42 : vector<16x128xf32>
    %44 = arith.truncf %43 : vector<16x128xf32> to vector<16x128xbf16>
    %c0_18 = arith.constant 0 : index
    %c128 = arith.constant 128 : index
    %c0_19 = arith.constant 0 : index
    %45 = vector.load %arg4[%c0_18, %c128, %c0_19] : memref<1x1280x512xbf16, #tpu.memory_space<vmem>>, vector<1x128x512xbf16>
    %46 = vector.shape_cast %45 : vector<1x128x512xbf16> to vector<128x512xbf16>
    %cst_20 = arith.constant dense<0.000000e+00> : vector<16x512xf32>
    %47 = tpu.matmul %44, %46, %cst_20 {dimension_numbers = #tpu.dot_dimension_numbers<[1], [0], [0], [1], [0, 0, 1, 1], [], []>} : vector<16x128xbf16>, vector<128x512xbf16>, vector<16x512xf32> -> vector<16x512xf32>
    %c0_21 = arith.constant 0 : index
    %c2 = arith.constant 2 : index
    %c0_22 = arith.constant 0 : index
    %48 = vector.load %arg6[%c0_21, %c2, %c0_22] : memref<1x16x1024xf32, #tpu.memory_space<vmem>>, vector<1x1x512xf32>
    %49 = vector.shape_cast %48 : vector<1x1x512xf32> to vector<1x512xf32>
    %50 = vector.broadcast %49 : vector<1x512xf32> to vector<16x512xf32>
    %51 = arith.addf %47, %50 : vector<16x512xf32>
    %52 = vector.extract_strided_slice %51 {offsets = [0, 0], sizes = [16, 256], strides = [1, 1]} : vector<16x512xf32> to vector<16x256xf32>
    %53 = vector.extract_strided_slice %51 {offsets = [0, 256], sizes = [16, 256], strides = [1, 1]} : vector<16x512xf32> to vector<16x256xf32>
    %c0_23 = arith.constant 0 : index
    %c3 = arith.constant 3 : index
    %c0_24 = arith.constant 0 : index
    %54 = vector.load %arg6[%c0_23, %c3, %c0_24] : memref<1x16x1024xf32, #tpu.memory_space<vmem>>, vector<1x1x256xf32>
    %55 = vector.shape_cast %54 : vector<1x1x256xf32> to vector<1x256xf32>
    %56 = arith.truncf %55 : vector<1x256xf32> to vector<1x256xbf16>
    %57 = vector.shape_cast %53 : vector<16x256xf32> to vector<16x1x256xf32>
    %58 = arith.truncf %57 : vector<16x1x256xf32> to vector<16x1x256xbf16>
    %59 = vector.shape_cast %52 : vector<16x256xf32> to vector<1x16x256xf32>
    %60 = arith.truncf %59 : vector<1x16x256xf32> to vector<1x16x256xbf16>
    %61 = vector.broadcast %58 : vector<16x1x256xbf16> to vector<16x16x256xbf16>
    %62 = vector.broadcast %60 : vector<1x16x256xbf16> to vector<16x16x256xbf16>
    %63 = arith.addf %61, %62 : vector<16x16x256xbf16>
    %cst_25 = arith.constant 0.000000e+00 : bf16
    %64 = vector.broadcast %cst_25 : bf16 to vector<16x16x256xbf16>
    %65 = arith.cmpf ogt, %63, %64 : vector<16x16x256xbf16>
    %cst_26 = arith.constant 2.001950e-01 : bf16
    %66 = vector.broadcast %cst_26 : bf16 to vector<16x16x256xbf16>
    %67 = arith.mulf %66, %63 : vector<16x16x256xbf16>
    %68 = arith.select %65, %63, %67 : vector<16x16x256xi1>, vector<16x16x256xbf16>
    %69 = vector.shape_cast %56 : vector<1x256xbf16> to vector<1x1x256xbf16>
    %70 = vector.broadcast %69 : vector<1x1x256xbf16> to vector<16x16x256xbf16>
    %71 = arith.mulf %68, %70 : vector<16x16x256xbf16>
    %72 = vector.extract_strided_slice %71 {offsets = [0, 0, 0], sizes = [16, 16, 128], strides = [1, 1, 1]} : vector<16x16x256xbf16> to vector<16x16x128xbf16>
    %73 = arith.extf %72 : vector<16x16x128xbf16> to vector<16x16x128xf32>
    %cst_27 = arith.constant dense<0.000000e+00> : vector<16x16xf32>
    %74 = vector.multi_reduction <add>, %73, %cst_27 [2] : vector<16x16x128xf32> to vector<16x16xf32>
    %cst_28 = arith.constant 0.000000e+00 : f32
    %75 = vector.broadcast %cst_28 : f32 to vector<16x16xf32>
    %76 = arith.cmpf ogt, %6, %75 : vector<16x16xf32>
    %cst_29 = arith.constant -1.000000e+30 : f32
    %77 = vector.broadcast %cst_29 : f32 to vector<16x16xf32>
    %78 = arith.select %76, %74, %77 : vector<16x16xi1>, vector<16x16xf32>
    %cst_30 = arith.constant dense<0xFF800000> : vector<16xf32>
    %79 = vector.multi_reduction <maximumf>, %78, %cst_30 [1] : vector<16x16xf32> to vector<16xf32>
    %80 = vector.shape_cast %79 : vector<16xf32> to vector<16x1xf32>
    %81 = vector.broadcast %80 : vector<16x1xf32> to vector<16x16xf32>
    %82 = arith.subf %78, %81 : vector<16x16xf32>
    %83 = math.exp %82 : vector<16x16xf32>
    %cst_31 = arith.constant dense<0.000000e+00> : vector<16xf32>
    %84 = vector.multi_reduction <add>, %83, %cst_31 [1] : vector<16x16xf32> to vector<16xf32>
    %85 = vector.shape_cast %84 : vector<16xf32> to vector<16x1xf32>
    %86 = tpu.reciprocal %85 {approx = true} : vector<16x1xf32> -> vector<16x1xf32>
    %87 = vector.broadcast %86 : vector<16x1xf32> to vector<16x16xf32>
    %88 = arith.mulf %83, %87 : vector<16x16xf32>
    %89 = arith.truncf %88 : vector<16x16xf32> to vector<16x16xbf16>
    %90 = vector.extract_strided_slice %52 {offsets = [0, 0], sizes = [16, 128], strides = [1, 1]} : vector<16x256xf32> to vector<16x128xf32>
    %91 = arith.truncf %90 : vector<16x128xf32> to vector<16x128xbf16>
    %cst_32 = arith.constant dense<0.000000e+00> : vector<16x128xf32>
    %92 = tpu.matmul %89, %91, %cst_32 {dimension_numbers = #tpu.dot_dimension_numbers<[1], [0], [0], [1], [0, 0, 1, 1], [], []>} : vector<16x16xbf16>, vector<16x128xbf16>, vector<16x128xf32> -> vector<16x128xf32>
    %93 = vector.extract_strided_slice %71 {offsets = [0, 0, 128], sizes = [16, 16, 128], strides = [1, 1, 1]} : vector<16x16x256xbf16> to vector<16x16x128xbf16>
    %94 = arith.extf %93 : vector<16x16x128xbf16> to vector<16x16x128xf32>
    %cst_33 = arith.constant dense<0.000000e+00> : vector<16x16xf32>
    %95 = vector.multi_reduction <add>, %94, %cst_33 [2] : vector<16x16x128xf32> to vector<16x16xf32>
    %cst_34 = arith.constant 0.000000e+00 : f32
    %96 = vector.broadcast %cst_34 : f32 to vector<16x16xf32>
    %97 = arith.cmpf ogt, %6, %96 : vector<16x16xf32>
    %cst_35 = arith.constant -1.000000e+30 : f32
    %98 = vector.broadcast %cst_35 : f32 to vector<16x16xf32>
    %99 = arith.select %97, %95, %98 : vector<16x16xi1>, vector<16x16xf32>
    %cst_36 = arith.constant dense<0xFF800000> : vector<16xf32>
    %100 = vector.multi_reduction <maximumf>, %99, %cst_36 [1] : vector<16x16xf32> to vector<16xf32>
    %101 = vector.shape_cast %100 : vector<16xf32> to vector<16x1xf32>
    %102 = vector.broadcast %101 : vector<16x1xf32> to vector<16x16xf32>
    %103 = arith.subf %99, %102 : vector<16x16xf32>
    %104 = math.exp %103 : vector<16x16xf32>
    %cst_37 = arith.constant dense<0.000000e+00> : vector<16xf32>
    %105 = vector.multi_reduction <add>, %104, %cst_37 [1] : vector<16x16xf32> to vector<16xf32>
    %106 = vector.shape_cast %105 : vector<16xf32> to vector<16x1xf32>
    %107 = tpu.reciprocal %106 {approx = true} : vector<16x1xf32> -> vector<16x1xf32>
    %108 = vector.broadcast %107 : vector<16x1xf32> to vector<16x16xf32>
    %109 = arith.mulf %104, %108 : vector<16x16xf32>
    %110 = arith.truncf %109 : vector<16x16xf32> to vector<16x16xbf16>
    %111 = vector.extract_strided_slice %52 {offsets = [0, 128], sizes = [16, 128], strides = [1, 1]} : vector<16x256xf32> to vector<16x128xf32>
    %112 = arith.truncf %111 : vector<16x128xf32> to vector<16x128xbf16>
    %cst_38 = arith.constant dense<0.000000e+00> : vector<16x128xf32>
    %113 = tpu.matmul %110, %112, %cst_38 {dimension_numbers = #tpu.dot_dimension_numbers<[1], [0], [0], [1], [0, 0, 1, 1], [], []>} : vector<16x16xbf16>, vector<16x128xbf16>, vector<16x128xf32> -> vector<16x128xf32>
    %114 = tpu.concatenate %92, %113 in 1 : vector<16x128xf32>, vector<16x128xf32> -> vector<16x256xf32>
    %c0_39 = arith.constant 0 : index
    %c4 = arith.constant 4 : index
    %c0_40 = arith.constant 0 : index
    %115 = vector.load %arg6[%c0_39, %c4, %c0_40] : memref<1x16x1024xf32, #tpu.memory_space<vmem>>, vector<1x1x256xf32>
    %116 = vector.shape_cast %115 : vector<1x1x256xf32> to vector<1x256xf32>
    %117 = vector.broadcast %116 : vector<1x256xf32> to vector<16x256xf32>
    %118 = arith.addf %114, %117 : vector<16x256xf32>
    %cst_41 = arith.constant 0.000000e+00 : f32
    %119 = vector.broadcast %cst_41 : f32 to vector<16x256xf32>
    %120 = arith.maximumf %118, %119 : vector<16x256xf32>
    %121 = arith.truncf %120 : vector<16x256xf32> to vector<16x256xbf16>
    %c0_42 = arith.constant 0 : index
    %c256 = arith.constant 256 : index
    %c0_43 = arith.constant 0 : index
    %122 = vector.load %arg4[%c0_42, %c256, %c0_43] : memref<1x1280x512xbf16, #tpu.memory_space<vmem>>, vector<1x256x512xbf16>
    %123 = vector.shape_cast %122 : vector<1x256x512xbf16> to vector<256x512xbf16>
    %cst_44 = arith.constant dense<0.000000e+00> : vector<16x512xf32>
    %124 = tpu.matmul %121, %123, %cst_44 {dimension_numbers = #tpu.dot_dimension_numbers<[1], [0], [0], [1], [0, 0, 1, 1], [], []>} : vector<16x256xbf16>, vector<256x512xbf16>, vector<16x512xf32> -> vector<16x512xf32>
    %c0_45 = arith.constant 0 : index
    %c5 = arith.constant 5 : index
    %c0_46 = arith.constant 0 : index
    %125 = vector.load %arg6[%c0_45, %c5, %c0_46] : memref<1x16x1024xf32, #tpu.memory_space<vmem>>, vector<1x1x512xf32>
    %126 = vector.shape_cast %125 : vector<1x1x512xf32> to vector<1x512xf32>
    %127 = vector.broadcast %126 : vector<1x512xf32> to vector<16x512xf32>
    %128 = arith.addf %124, %127 : vector<16x512xf32>
    %129 = vector.extract_strided_slice %128 {offsets = [0, 0], sizes = [16, 256], strides = [1, 1]} : vector<16x512xf32> to vector<16x256xf32>
    %130 = vector.extract_strided_slice %128 {offsets = [0, 256], sizes = [16, 256], strides = [1, 1]} : vector<16x512xf32> to vector<16x256xf32>
    %c0_47 = arith.constant 0 : index
    %c6 = arith.constant 6 : index
    %c0_48 = arith.constant 0 : index
    %131 = vector.load %arg6[%c0_47, %c6, %c0_48] : memref<1x16x1024xf32, #tpu.memory_space<vmem>>, vector<1x1x256xf32>
    %132 = vector.shape_cast %131 : vector<1x1x256xf32> to vector<1x256xf32>
    %133 = arith.truncf %132 : vector<1x256xf32> to vector<1x256xbf16>
    %134 = vector.shape_cast %130 : vector<16x256xf32> to vector<16x1x256xf32>
    %135 = arith.truncf %134 : vector<16x1x256xf32> to vector<16x1x256xbf16>
    %136 = vector.shape_cast %129 : vector<16x256xf32> to vector<1x16x256xf32>
    %137 = arith.truncf %136 : vector<1x16x256xf32> to vector<1x16x256xbf16>
    %138 = vector.broadcast %135 : vector<16x1x256xbf16> to vector<16x16x256xbf16>
    %139 = vector.broadcast %137 : vector<1x16x256xbf16> to vector<16x16x256xbf16>
    %140 = arith.addf %138, %139 : vector<16x16x256xbf16>
    %cst_49 = arith.constant 0.000000e+00 : bf16
    %141 = vector.broadcast %cst_49 : bf16 to vector<16x16x256xbf16>
    %142 = arith.cmpf ogt, %140, %141 : vector<16x16x256xbf16>
    %cst_50 = arith.constant 2.001950e-01 : bf16
    %143 = vector.broadcast %cst_50 : bf16 to vector<16x16x256xbf16>
    %144 = arith.mulf %143, %140 : vector<16x16x256xbf16>
    %145 = arith.select %142, %140, %144 : vector<16x16x256xi1>, vector<16x16x256xbf16>
    %146 = vector.shape_cast %133 : vector<1x256xbf16> to vector<1x1x256xbf16>
    %147 = vector.broadcast %146 : vector<1x1x256xbf16> to vector<16x16x256xbf16>
    %148 = arith.mulf %145, %147 : vector<16x16x256xbf16>
    %149 = arith.extf %148 : vector<16x16x256xbf16> to vector<16x16x256xf32>
    %cst_51 = arith.constant dense<0.000000e+00> : vector<16x16xf32>
    %150 = vector.multi_reduction <add>, %149, %cst_51 [2] : vector<16x16x256xf32> to vector<16x16xf32>
    %cst_52 = arith.constant 0.000000e+00 : f32
    %151 = vector.broadcast %cst_52 : f32 to vector<16x16xf32>
    %152 = arith.cmpf ogt, %6, %151 : vector<16x16xf32>
    %cst_53 = arith.constant -1.000000e+30 : f32
    %153 = vector.broadcast %cst_53 : f32 to vector<16x16xf32>
    %154 = arith.select %152, %150, %153 : vector<16x16xi1>, vector<16x16xf32>
    %cst_54 = arith.constant dense<0xFF800000> : vector<16xf32>
    %155 = vector.multi_reduction <maximumf>, %154, %cst_54 [1] : vector<16x16xf32> to vector<16xf32>
    %156 = vector.shape_cast %155 : vector<16xf32> to vector<16x1xf32>
    %157 = vector.broadcast %156 : vector<16x1xf32> to vector<16x16xf32>
    %158 = arith.subf %154, %157 : vector<16x16xf32>
    %159 = math.exp %158 : vector<16x16xf32>
    %cst_55 = arith.constant dense<0.000000e+00> : vector<16xf32>
    %160 = vector.multi_reduction <add>, %159, %cst_55 [1] : vector<16x16xf32> to vector<16xf32>
    %161 = vector.shape_cast %160 : vector<16xf32> to vector<16x1xf32>
    %162 = tpu.reciprocal %161 {approx = true} : vector<16x1xf32> -> vector<16x1xf32>
    %163 = vector.broadcast %162 : vector<16x1xf32> to vector<16x16xf32>
    %164 = arith.mulf %159, %163 : vector<16x16xf32>
    %165 = arith.truncf %164 : vector<16x16xf32> to vector<16x16xbf16>
    %166 = arith.truncf %129 : vector<16x256xf32> to vector<16x256xbf16>
    %cst_56 = arith.constant dense<0.000000e+00> : vector<16x256xf32>
    %167 = tpu.matmul %165, %166, %cst_56 {dimension_numbers = #tpu.dot_dimension_numbers<[1], [0], [0], [1], [0, 0, 1, 1], [], []>} : vector<16x16xbf16>, vector<16x256xbf16>, vector<16x256xf32> -> vector<16x256xf32>
    %c0_57 = arith.constant 0 : index
    %c7 = arith.constant 7 : index
    %c0_58 = arith.constant 0 : index
    %168 = vector.load %arg6[%c0_57, %c7, %c0_58] : memref<1x16x1024xf32, #tpu.memory_space<vmem>>, vector<1x1x256xf32>
    %169 = vector.shape_cast %168 : vector<1x1x256xf32> to vector<1x256xf32>
    %170 = vector.broadcast %169 : vector<1x256xf32> to vector<16x256xf32>
    %171 = arith.addf %167, %170 : vector<16x256xf32>
    %cst_59 = arith.constant 0.000000e+00 : f32
    %172 = vector.broadcast %cst_59 : f32 to vector<16x256xf32>
    %173 = arith.maximumf %171, %172 : vector<16x256xf32>
    %174 = arith.truncf %173 : vector<16x256xf32> to vector<16x256xbf16>
    %c0_60 = arith.constant 0 : index
    %c512 = arith.constant 512 : index
    %c0_61 = arith.constant 0 : index
    %175 = vector.load %arg4[%c0_60, %c512, %c0_61] : memref<1x1280x512xbf16, #tpu.memory_space<vmem>>, vector<1x256x512xbf16>
    %176 = vector.shape_cast %175 : vector<1x256x512xbf16> to vector<256x512xbf16>
    %cst_62 = arith.constant dense<0.000000e+00> : vector<16x512xf32>
    %177 = tpu.matmul %174, %176, %cst_62 {dimension_numbers = #tpu.dot_dimension_numbers<[1], [0], [0], [1], [0, 0, 1, 1], [], []>} : vector<16x256xbf16>, vector<256x512xbf16>, vector<16x512xf32> -> vector<16x512xf32>
    %c0_63 = arith.constant 0 : index
    %c8 = arith.constant 8 : index
    %c0_64 = arith.constant 0 : index
    %178 = vector.load %arg6[%c0_63, %c8, %c0_64] : memref<1x16x1024xf32, #tpu.memory_space<vmem>>, vector<1x1x512xf32>
    %179 = vector.shape_cast %178 : vector<1x1x512xf32> to vector<1x512xf32>
    %180 = vector.broadcast %179 : vector<1x512xf32> to vector<16x512xf32>
    %181 = arith.addf %177, %180 : vector<16x512xf32>
    %182 = vector.extract_strided_slice %181 {offsets = [0, 0], sizes = [16, 256], strides = [1, 1]} : vector<16x512xf32> to vector<16x256xf32>
    %183 = vector.extract_strided_slice %181 {offsets = [0, 256], sizes = [16, 256], strides = [1, 1]} : vector<16x512xf32> to vector<16x256xf32>
    %c0_65 = arith.constant 0 : index
    %c9 = arith.constant 9 : index
    %c0_66 = arith.constant 0 : index
    %184 = vector.load %arg6[%c0_65, %c9, %c0_66] : memref<1x16x1024xf32, #tpu.memory_space<vmem>>, vector<1x1x256xf32>
    %185 = vector.shape_cast %184 : vector<1x1x256xf32> to vector<1x256xf32>
    %186 = arith.truncf %185 : vector<1x256xf32> to vector<1x256xbf16>
    %187 = vector.shape_cast %183 : vector<16x256xf32> to vector<16x1x256xf32>
    %188 = arith.truncf %187 : vector<16x1x256xf32> to vector<16x1x256xbf16>
    %189 = vector.shape_cast %182 : vector<16x256xf32> to vector<1x16x256xf32>
    %190 = arith.truncf %189 : vector<1x16x256xf32> to vector<1x16x256xbf16>
    %191 = vector.broadcast %188 : vector<16x1x256xbf16> to vector<16x16x256xbf16>
    %192 = vector.broadcast %190 : vector<1x16x256xbf16> to vector<16x16x256xbf16>
    %193 = arith.addf %191, %192 : vector<16x16x256xbf16>
    %cst_67 = arith.constant 0.000000e+00 : bf16
    %194 = vector.broadcast %cst_67 : bf16 to vector<16x16x256xbf16>
    %195 = arith.cmpf ogt, %193, %194 : vector<16x16x256xbf16>
    %cst_68 = arith.constant 2.001950e-01 : bf16
    %196 = vector.broadcast %cst_68 : bf16 to vector<16x16x256xbf16>
    %197 = arith.mulf %196, %193 : vector<16x16x256xbf16>
    %198 = arith.select %195, %193, %197 : vector<16x16x256xi1>, vector<16x16x256xbf16>
    %199 = vector.shape_cast %186 : vector<1x256xbf16> to vector<1x1x256xbf16>
    %200 = vector.broadcast %199 : vector<1x1x256xbf16> to vector<16x16x256xbf16>
    %201 = arith.mulf %198, %200 : vector<16x16x256xbf16>
    %202 = arith.extf %201 : vector<16x16x256xbf16> to vector<16x16x256xf32>
    %cst_69 = arith.constant dense<0.000000e+00> : vector<16x16xf32>
    %203 = vector.multi_reduction <add>, %202, %cst_69 [2] : vector<16x16x256xf32> to vector<16x16xf32>
    %cst_70 = arith.constant 0.000000e+00 : f32
    %204 = vector.broadcast %cst_70 : f32 to vector<16x16xf32>
    %205 = arith.cmpf ogt, %6, %204 : vector<16x16xf32>
    %cst_71 = arith.constant -1.000000e+30 : f32
    %206 = vector.broadcast %cst_71 : f32 to vector<16x16xf32>
    %207 = arith.select %205, %203, %206 : vector<16x16xi1>, vector<16x16xf32>
    %cst_72 = arith.constant dense<0xFF800000> : vector<16xf32>
    %208 = vector.multi_reduction <maximumf>, %207, %cst_72 [1] : vector<16x16xf32> to vector<16xf32>
    %209 = vector.shape_cast %208 : vector<16xf32> to vector<16x1xf32>
    %210 = vector.broadcast %209 : vector<16x1xf32> to vector<16x16xf32>
    %211 = arith.subf %207, %210 : vector<16x16xf32>
    %212 = math.exp %211 : vector<16x16xf32>
    %cst_73 = arith.constant dense<0.000000e+00> : vector<16xf32>
    %213 = vector.multi_reduction <add>, %212, %cst_73 [1] : vector<16x16xf32> to vector<16xf32>
    %214 = vector.shape_cast %213 : vector<16xf32> to vector<16x1xf32>
    %215 = tpu.reciprocal %214 {approx = true} : vector<16x1xf32> -> vector<16x1xf32>
    %216 = vector.broadcast %215 : vector<16x1xf32> to vector<16x16xf32>
    %217 = arith.mulf %212, %216 : vector<16x16xf32>
    %218 = arith.truncf %217 : vector<16x16xf32> to vector<16x16xbf16>
    %219 = arith.truncf %182 : vector<16x256xf32> to vector<16x256xbf16>
    %cst_74 = arith.constant dense<0.000000e+00> : vector<16x256xf32>
    %220 = tpu.matmul %218, %219, %cst_74 {dimension_numbers = #tpu.dot_dimension_numbers<[1], [0], [0], [1], [0, 0, 1, 1], [], []>} : vector<16x16xbf16>, vector<16x256xbf16>, vector<16x256xf32> -> vector<16x256xf32>
    %c0_75 = arith.constant 0 : index
    %c10 = arith.constant 10 : index
    %c0_76 = arith.constant 0 : index
    %221 = vector.load %arg6[%c0_75, %c10, %c0_76] : memref<1x16x1024xf32, #tpu.memory_space<vmem>>, vector<1x1x256xf32>
    %222 = vector.shape_cast %221 : vector<1x1x256xf32> to vector<1x256xf32>
    %223 = vector.broadcast %222 : vector<1x256xf32> to vector<16x256xf32>
    %224 = arith.addf %220, %223 : vector<16x256xf32>
    %c0_77 = arith.constant 0 : index
    %c0_78 = arith.constant 0 : index
    %c0_79 = arith.constant 0 : index
    %225 = vector.load %arg3[%c0_77, %c0_78, %c0_79] : memref<1x2x16xf32, #tpu.memory_space<vmem>>, vector<1x2x16xf32>
    %226 = vector.shape_cast %225 : vector<1x2x16xf32> to vector<2x16xf32>
    %cst_80 = arith.constant dense<0.000000e+00> : vector<2x256xf32>
    %227 = tpu.matmul %226, %224, %cst_80 {dimension_numbers = #tpu.dot_dimension_numbers<[1], [0], [0], [1], [0, 0, 1, 1], [], []>} : vector<2x16xf32>, vector<16x256xf32>, vector<2x256xf32> -> vector<2x256xf32>
    %228 = arith.truncf %227 : vector<2x256xf32> to vector<2x256xbf16>
    %c0_81 = arith.constant 0 : index
    %c768 = arith.constant 768 : index
    %c0_82 = arith.constant 0 : index
    %229 = vector.load %arg4[%c0_81, %c768, %c0_82] : memref<1x1280x512xbf16, #tpu.memory_space<vmem>>, vector<1x256x512xbf16>
    %230 = vector.shape_cast %229 : vector<1x256x512xbf16> to vector<256x512xbf16>
    %cst_83 = arith.constant dense<0.000000e+00> : vector<2x512xf32>
    %231 = tpu.matmul %228, %230, %cst_83 {dimension_numbers = #tpu.dot_dimension_numbers<[1], [0], [0], [1], [0, 0, 1, 1], [], []>} : vector<2x256xbf16>, vector<256x512xbf16>, vector<2x512xf32> -> vector<2x512xf32>
    %c0_84 = arith.constant 0 : index
    %c11 = arith.constant 11 : index
    %c0_85 = arith.constant 0 : index
    %232 = vector.load %arg6[%c0_84, %c11, %c0_85] : memref<1x16x1024xf32, #tpu.memory_space<vmem>>, vector<1x1x512xf32>
    %233 = vector.shape_cast %232 : vector<1x1x512xf32> to vector<1x512xf32>
    %234 = vector.broadcast %233 : vector<1x512xf32> to vector<2x512xf32>
    %235 = arith.addf %231, %234 : vector<2x512xf32>
    %cst_86 = arith.constant 0.000000e+00 : f32
    %236 = vector.broadcast %cst_86 : f32 to vector<2x512xf32>
    %237 = arith.maximumf %235, %236 : vector<2x512xf32>
    %c0_87 = arith.constant 0 : index
    %c1024 = arith.constant 1024 : index
    %c0_88 = arith.constant 0 : index
    %238 = vector.load %arg4[%c0_87, %c1024, %c0_88] : memref<1x1280x512xbf16, #tpu.memory_space<vmem>>, vector<1x256x512xbf16>
    %239 = vector.shape_cast %238 : vector<1x256x512xbf16> to vector<256x512xbf16>
    %cst_89 = arith.constant dense<0.000000e+00> : vector<2x512xf32>
    %240 = tpu.matmul %228, %239, %cst_89 {dimension_numbers = #tpu.dot_dimension_numbers<[1], [0], [0], [1], [0, 0, 1, 1], [], []>} : vector<2x256xbf16>, vector<256x512xbf16>, vector<2x512xf32> -> vector<2x512xf32>
    %c0_90 = arith.constant 0 : index
    %c11_91 = arith.constant 11 : index
    %c512_92 = arith.constant 512 : index
    %241 = vector.load %arg6[%c0_90, %c11_91, %c512_92] : memref<1x16x1024xf32, #tpu.memory_space<vmem>>, vector<1x1x512xf32>
    %242 = vector.shape_cast %241 : vector<1x1x512xf32> to vector<1x512xf32>
    %243 = vector.broadcast %242 : vector<1x512xf32> to vector<2x512xf32>
    %244 = arith.addf %240, %243 : vector<2x512xf32>
    %cst_93 = arith.constant 0.000000e+00 : f32
    %245 = vector.broadcast %cst_93 : f32 to vector<2x512xf32>
    %246 = arith.maximumf %244, %245 : vector<2x512xf32>
    %247 = arith.truncf %237 : vector<2x512xf32> to vector<2x512xbf16>
    %c0_94 = arith.constant 0 : index
    %c0_95 = arith.constant 0 : index
    %c0_96 = arith.constant 0 : index
    %248 = vector.load %arg5[%c0_94, %c0_95, %c0_96] : memref<1x1024x128xbf16, #tpu.memory_space<vmem>>, vector<1x512x128xbf16>
    %249 = vector.shape_cast %248 : vector<1x512x128xbf16> to vector<512x128xbf16>
    %cst_97 = arith.constant dense<0.000000e+00> : vector<2x128xf32>
    %250 = tpu.matmul %247, %249, %cst_97 {dimension_numbers = #tpu.dot_dimension_numbers<[1], [0], [0], [1], [0, 0, 1, 1], [], []>} : vector<2x512xbf16>, vector<512x128xbf16>, vector<2x128xf32> -> vector<2x128xf32>
    %251 = arith.truncf %246 : vector<2x512xf32> to vector<2x512xbf16>
    %c0_98 = arith.constant 0 : index
    %c512_99 = arith.constant 512 : index
    %c0_100 = arith.constant 0 : index
    %252 = vector.load %arg5[%c0_98, %c512_99, %c0_100] : memref<1x1024x128xbf16, #tpu.memory_space<vmem>>, vector<1x512x128xbf16>
    %253 = vector.shape_cast %252 : vector<1x512x128xbf16> to vector<512x128xbf16>
    %cst_101 = arith.constant dense<0.000000e+00> : vector<2x128xf32>
    %254 = tpu.matmul %251, %253, %cst_101 {dimension_numbers = #tpu.dot_dimension_numbers<[1], [0], [0], [1], [0, 0, 1, 1], [], []>} : vector<2x512xbf16>, vector<512x128xbf16>, vector<2x128xf32> -> vector<2x128xf32>
    %255 = arith.addf %250, %254 : vector<2x128xf32>
    %c0_102 = arith.constant 0 : index
    %c12 = arith.constant 12 : index
    %c0_103 = arith.constant 0 : index
    %256 = vector.load %arg6[%c0_102, %c12, %c0_103] : memref<1x16x1024xf32, #tpu.memory_space<vmem>>, vector<1x1x128xf32>
    %257 = vector.shape_cast %256 : vector<1x1x128xf32> to vector<1x128xf32>
    %258 = vector.broadcast %257 : vector<1x128xf32> to vector<2x128xf32>
    %259 = arith.addf %255, %258 : vector<2x128xf32>
    %c0_i32_104 = arith.constant 0 : i32
    %260 = arith.cmpi eq, %arg0, %c0_i32_104 : i32
    %261 = arith.extui %260 : i1 to i32
    %c0_i32_105 = arith.constant 0 : i32
    %262 = arith.cmpi ne, %261, %c0_i32_105 : i32
    scf.if %262 {
      %c0_107 = arith.constant 0 : index
      %c0_108 = arith.constant 0 : index
      %266 = vector.load %arg11[%c0_107, %c0_108] : memref<2x128xf32, #tpu.memory_space<vmem>>, vector<2x128xf32>
      tpu.vector_store %arg11[%c0_107, %c0_108], %259 {strides = array<i32>} : memref<2x128xf32, #tpu.memory_space<vmem>>, vector<2x128xf32>,
    } else {
    }
    %c1_i32 = arith.constant 1 : i32
    %263 = arith.cmpi eq, %arg0, %c1_i32 : i32
    %264 = arith.extui %263 : i1 to i32
    %c0_i32_106 = arith.constant 0 : i32
    %265 = arith.cmpi ne, %264, %c0_i32_106 : i32
    scf.if %265 {
      %c0_i32_107 = arith.constant 0 : i32
      %266 = tpu.memref_slice %arg14[%c0_i32_107] : memref<2x!tpu.dma_semaphore, #tpu.memory_space<semaphore_mem>> -> memref<1x!tpu.dma_semaphore, #tpu.memory_space<semaphore_mem>>
      %267 = tpu.memref_squeeze %266 : memref<1x!tpu.dma_semaphore, #tpu.memory_space<semaphore_mem>> -> memref<!tpu.dma_semaphore, #tpu.memory_space<semaphore_mem>>
      tpu.wait_dma2 semaphore(%267 : memref<!tpu.dma_semaphore, #tpu.memory_space<semaphore_mem>>) src(%arg8 : memref<256x1024xbf16, #tpu.memory_space<any>>) dst(%arg12 : memref<256x1024xbf16, #tpu.memory_space<vmem>>)
      %c1_i32_108 = arith.constant 1 : i32
      %268 = tpu.memref_slice %arg14[%c1_i32_108] : memref<2x!tpu.dma_semaphore, #tpu.memory_space<semaphore_mem>> -> memref<1x!tpu.dma_semaphore, #tpu.memory_space<semaphore_mem>>
      %269 = tpu.memref_squeeze %268 : memref<1x!tpu.dma_semaphore, #tpu.memory_space<semaphore_mem>> -> memref<!tpu.dma_semaphore, #tpu.memory_space<semaphore_mem>>
      tpu.wait_dma2 semaphore(%269 : memref<!tpu.dma_semaphore, #tpu.memory_space<semaphore_mem>>) src(%arg9 : memref<1024x512xbf16, #tpu.memory_space<any>>) dst(%arg13 : memref<1024x512xbf16, #tpu.memory_space<vmem>>)
      %c0_109 = arith.constant 0 : index
      %c0_110 = arith.constant 0 : index
      %270 = vector.load %arg11[%c0_109, %c0_110] : memref<2x128xf32, #tpu.memory_space<vmem>>, vector<2x128xf32>
      %271 = tpu.concatenate %270, %259 in 1 : vector<2x128xf32>, vector<2x128xf32> -> vector<2x256xf32>
      %272 = arith.truncf %271 : vector<2x256xf32> to vector<2x256xbf16>
      %c0_111 = arith.constant 0 : index
      %c0_112 = arith.constant 0 : index
      %273 = vector.load %arg12[%c0_111, %c0_112] : memref<256x1024xbf16, #tpu.memory_space<vmem>>, vector<256x1024xbf16>
      %cst_113 = arith.constant dense<0.000000e+00> : vector<2x1024xf32>
      %274 = tpu.matmul %272, %273, %cst_113 {dimension_numbers = #tpu.dot_dimension_numbers<[1], [0], [0], [1], [0, 0, 1, 1], [], []>} : vector<2x256xbf16>, vector<256x1024xbf16>, vector<2x1024xf32> -> vector<2x1024xf32>
      %c0_114 = arith.constant 0 : index
      %c0_115 = arith.constant 0 : index
      %275 = vector.load %arg7[%c0_114, %c0_115] : memref<4x1024xf32, #tpu.memory_space<vmem>>, vector<1x1024xf32>
      %276 = vector.broadcast %275 : vector<1x1024xf32> to vector<2x1024xf32>
      %277 = arith.addf %274, %276 : vector<2x1024xf32>
      %cst_116 = arith.constant 0.000000e+00 : f32
      %278 = vector.broadcast %cst_116 : f32 to vector<2x1024xf32>
      %279 = arith.maximumf %277, %278 : vector<2x1024xf32>
      %280 = arith.truncf %279 : vector<2x1024xf32> to vector<2x1024xbf16>
      %c0_117 = arith.constant 0 : index
      %c0_118 = arith.constant 0 : index
      %281 = vector.load %arg13[%c0_117, %c0_118] : memref<1024x512xbf16, #tpu.memory_space<vmem>>, vector<1024x512xbf16>
      %cst_119 = arith.constant dense<0.000000e+00> : vector<2x512xf32>
      %282 = tpu.matmul %280, %281, %cst_119 {dimension_numbers = #tpu.dot_dimension_numbers<[1], [0], [0], [1], [0, 0, 1, 1], [], []>} : vector<2x1024xbf16>, vector<1024x512xbf16>, vector<2x512xf32> -> vector<2x512xf32>
      %c1_120 = arith.constant 1 : index
      %c0_121 = arith.constant 0 : index
      %283 = vector.load %arg7[%c1_120, %c0_121] : memref<4x1024xf32, #tpu.memory_space<vmem>>, vector<1x512xf32>
      %284 = vector.broadcast %283 : vector<1x512xf32> to vector<2x512xf32>
      %285 = arith.addf %282, %284 : vector<2x512xf32>
      %cst_122 = arith.constant 0.000000e+00 : f32
      %286 = vector.broadcast %cst_122 : f32 to vector<2x512xf32>
      %287 = arith.maximumf %285, %286 : vector<2x512xf32>
      %c2_123 = arith.constant 2 : index
      %c0_124 = arith.constant 0 : index
      %288 = vector.load %arg7[%c2_123, %c0_124] : memref<4x1024xf32, #tpu.memory_space<vmem>>, vector<1x512xf32>
      %289 = vector.broadcast %288 : vector<1x512xf32> to vector<2x512xf32>
      %290 = arith.mulf %287, %289 : vector<2x512xf32>
      %cst_125 = arith.constant dense<0.000000e+00> : vector<2xf32>
      %291 = vector.multi_reduction <add>, %290, %cst_125 [1] : vector<2x512xf32> to vector<2xf32>
      %292 = vector.shape_cast %291 : vector<2xf32> to vector<2x1xf32>
      %c3_126 = arith.constant 3 : index
      %c0_127 = arith.constant 0 : index
      %293 = vector.load %arg7[%c3_126, %c0_127] : memref<4x1024xf32, #tpu.memory_space<vmem>>, vector<1x1xf32>
      %294 = vector.broadcast %293 : vector<1x1xf32> to vector<2x1xf32>
      %295 = arith.addf %292, %294 : vector<2x1xf32>
      %296 = arith.negf %295 : vector<2x1xf32>
      %297 = math.exp %296 : vector<2x1xf32>
      %cst_128 = arith.constant 1.000000e+00 : f32
      %298 = vector.broadcast %cst_128 : f32 to vector<2x1xf32>
      %299 = arith.addf %298, %297 : vector<2x1xf32>
      %300 = arith.divf %298, %299 : vector<2x1xf32>
      %c0_129 = arith.constant 0 : index
      %c0_130 = arith.constant 0 : index
      %301 = vector.load %arg10[%c0_129, %c0_130] : memref<2x1xf32, #tpu.memory_space<vmem>>, vector<2x1xf32>
      tpu.vector_store %arg10[%c0_129, %c0_130], %300 {strides = array<i32>} : memref<2x1xf32, #tpu.memory_space<vmem>>, vector<2x1xf32>,
    } else {
    }
    return
  }
  func.func @transform_0(%arg0: i32) -> (i32, i32, i32) {
    %c0_i32 = arith.constant 0 : i32
    %c0_i32_0 = arith.constant 0 : i32
    %c0_i32_1 = arith.constant 0 : i32
    return %arg0, %c0_i32, %c0_i32_0 : i32, i32, i32
  }
  func.func @transform_1(%arg0: i32) -> (i32, i32, i32) {
    %c0_i32 = arith.constant 0 : i32
    %c0_i32_0 = arith.constant 0 : i32
    %c0_i32_1 = arith.constant 0 : i32
    return %arg0, %c0_i32, %c0_i32_0 : i32, i32, i32
  }
  func.func @transform_2(%arg0: i32) -> (i32, i32, i32) {
    %c0_i32 = arith.constant 0 : i32
    %c0_i32_0 = arith.constant 0 : i32
    %c0_i32_1 = arith.constant 0 : i32
    return %arg0, %c0_i32, %c0_i32_0 : i32, i32, i32
  }
  func.func @transform_3(%arg0: i32) -> (i32, i32, i32) {
    %c0_i32 = arith.constant 0 : i32
    %c0_i32_0 = arith.constant 0 : i32
    %c0_i32_1 = arith.constant 0 : i32
    return %arg0, %c0_i32, %c0_i32_0 : i32, i32, i32
  }
  func.func @transform_4(%arg0: i32) -> (i32, i32, i32) {
    %c0_i32 = arith.constant 0 : i32
    %c0_i32_0 = arith.constant 0 : i32
    %c0_i32_1 = arith.constant 0 : i32
    return %arg0, %c0_i32, %c0_i32_0 : i32, i32, i32
  }
  func.func @transform_5(%arg0: i32) -> (i32, i32, i32) {
    %c0_i32 = arith.constant 0 : i32
    %c0_i32_0 = arith.constant 0 : i32
    %c0_i32_1 = arith.constant 0 : i32
    return %arg0, %c0_i32, %c0_i32_0 : i32, i32, i32
  }
  func.func @transform_6(%arg0: i32) -> (i32, i32) {
    %c0_i32 = arith.constant 0 : i32
    %c0_i32_0 = arith.constant 0 : i32
    %c0_i32_1 = arith.constant 0 : i32
    return %c0_i32, %c0_i32_0 : i32, i32
  }
  func.func @transform_9(%arg0: i32) -> (i32, i32) {
    %c0_i32 = arith.constant 0 : i32
    %c0_i32_0 = arith.constant 0 : i32
    %c0_i32_1 = arith.constant 0 : i32
    return %c0_i32, %c0_i32_0 : i32, i32
  }
}

</mosaic_0001>

<bundles_post_ra>
// kernel: tpu_custom_call.1
= control target key start
LH: loop header
LB: loop body
LE: loop exit
PB: predicated region body
PF: predicated region fallthrough
CT: control target
= control target key end

     0   :  { %s12874_s0 = inlined_call_operand.hbm [shape: f32[2,16,128], index: 0, kind: input, shape index: {}]   ;;  %s12875_s1 = inlined_call_operand.hbm [shape: f32[2,16,16], index: 1, kind: input, shape index: {}]   ;;  %s12876_s2 = inlined_call_operand.hbm [shape: f32[2,2,16], index: 2, kind: input, shape index: {}]   ;;  %s12877_s3 = inlined_call_operand.hbm [shape: bf16[2,1280,512], index: 3, kind: input, shape index: {}]   ;;  %s12878_s4 = inlined_call_operand.hbm [shape: bf16[2,1024,128], index: 4, kind: input, shape index: {}]   ;;  %s12879_s5 = inlined_call_operand.hbm [shape: f32[2,16,1024], index: 5, kind: input, shape index: {}]   ;;  %s12880_s6 = inlined_call_operand.hbm [shape: f32[4,1024], index: 6, kind: input, shape index: {}]   ;;  %s12881_s7 = inlined_call_operand.hbm [shape: bf16[256,1024], index: 7, kind: input, shape index: {}]   ;;  %s12882_s8 = inlined_call_operand.hbm [shape: bf16[1024,512], index: 8, kind: input, shape index: {}]   ;;  %s12883_s9 = inlined_call_operand.vmem [shape: f32[2,1], index: 9, kind: output, shape index: {}]  }
   0x1   :  { %12903 = sst [smem:[#allocation33_spill]] %s12874_s0 }
   0x2   :  { %12904 = sst [smem:[#allocation34_spill]] %s12875_s1 }
   0x3   :  { %12905 = sst [smem:[#allocation35_spill]] %s12877_s3 }
   0x4   :  { %12906 = sst [smem:[#allocation36_spill]] %s12880_s6 }
   0x5   :  { %12907 = sst [smem:[#allocation37_spill]] %s12883_s9 }
   0x6   :  { %14 = vsyncpa [#allocation7], 0 }
   0x7   :  { %16 = vsyncpa [#allocation7 + $0x1], 0 }
   0x8   :  { %17 = vsyncpa [#allocation9], 0 }
   0x9   :  { %19 = vsyncpa [#allocation9 + $0x1], 0 }
   0xa   :  { %20 = vsyncpa [#allocation12], 0 }
   0xb   :  { %22 = vsyncpa [#allocation12 + $0x1], 0 }
   0xc   :  { %23 = vsyncpa [#allocation15], 0 }
   0xd   :  { %25 = vsyncpa [#allocation15 + $0x1], 0  ;;  %s10581_s30 = smov 0   ;;  %s10583_s10 = smov 0  }
   0xe   :  { %s10585_s11 = smov 0   ;;  %s10587_s12 = smov 0  }
   0xf LB: > { %12908 = sst [smem:[#allocation29_spill]] %s10493_s11  ;;  %s10600_s13 = sadd.s32 4294967295, %s10497_s12   ;;  %s10497_s12 = sphi %s10587_s12, %s13004_s12   ;;  %s10493_s11 = sphi %s10585_s11, %s13006_s11   ;;  %s10489_s10 = sphi %s10583_s10, %s13008_s10   ;;  %s10485_s30 = sphi %s10581_s30, %s13007_s30  }
  0x10   : > { %s10603_s14 = sadd.s32 1, %s10497_s12   ;;  %s38_s16 = sadd.s32 1, %s10493_s11 }
  0x11   : > { %12909 = sst [smem:[#allocation30_spill]] %s10603_s14  ;;  %s35_s15 = ssub.s32 %s10497_s12, %s10603_s14 }
  0x12   : > { %p36_p0 = scmp.eq.s32.totalorder %s35_s15, 0  ;;  %p45_p1 = scmp.ne.s32.totalorder %s10493_s11, %s10489_s10 }
  0x13   : > { %p46_p2 = scmp.eq.s32.totalorder %s10497_s12, 0  ;;  %p51_p3 = scmp.ne.s32.totalorder %s10489_s10, %s10485_s30 }
  0x14   : > { %s10613_s17 = scalar_select %p36_p0, %s10493_s11, %s38_s16  }
  0x15   : > { %p10615_p4 = por %p46_p2, %p45_p1  ;;  %p12884_p5 = scmp.eq.s32.totalorder %s10600_s13, 0 }
  0x16   : > { %12910 = sst [smem:[#allocation31_spill]] %s10613_s17  ;;  %p8917_p6 = scmp.ge.s32.totalorder %s10497_s12, 1 }
  0x17   : > { %p234_p7 = scmp.lt.s32.totalorder %s10497_s12, 3  ;;  %p10624_p8 = por %p12884_p5, %p51_p3 }
  0x18   : > { %s10499_s21 = smov [#allocation16]   ;;  %p9566_p12 = scmp.lt.s32.totalorder %s10497_s12, 2 }
  0x19   : > { %s12912_s19 = scalar_select %p10624_p8, 1, 0 }
  0x1a   : > { %p10629_p10 = pnand %p8917_p6, %p234_p7  ;;  %s247_s22 = sshll.u32 %s10499_s21, 4  ;;  %s248_s22 = int_to_ptr.vmem [resolvable:$true] %s247_s22 }
  0x1b   : > { %s10637_s23 = sand.u32 1, %s10493_s11   ;;  %p10648_p0 = pnand %p9566_p12, %p10615_p4 }
  0x1c   : > { %s12913_s20 = scalar_select %p10629_p10, 1, 0 }
  0x1d   : > { %p9542_p11 = pneg %p10629_p10  ;;  %s12888_s27 = sshll.u32 %s10497_s12, 8 }
  0x1e   : > { %s12915_s26 = scalar_select %p10648_p0, 1, 0 }
  0x1f   : > { %p10641_p13 = pnand %p9542_p11, %p12884_p5  ;;  %s12916_s6 = sld [smem:[#allocation36_spill]] }
  0x21   : > { %p10237_p2 = pneg %p10641_p13 }
  0x25   : > { %s10235_s30 = scalar_lea.hbm %s12916_s6, 512 }
  0x26   : > { %p10236_p1 = scmp.ne.s32.totalorder %s12916_s6, %s10235_s30  ;;  %p10242_p4 = scmp.lt.u32.totalorder %s10235_s30, %s12916_s6 }
  0x28   : > { %p10238_p3 = pnand %p10237_p2, %p10236_p1 }
  0x2a   : > { %p10239_p6 = pneg %p10238_p3 }
  0x2c   : > { %p10244_p7 = pnand %p10242_p4, %p10239_p6 }
  0x2e   : > { %10247 = shalt.err (!%p10244_p7)
}
  0x2f   : > { %s10248_s18 = scalar_lea.vmem %s248_s22, 512  ;;  %p10256_p5 = scmp.lt.s32.totalorder %s248_s22, %s248_s22 }
  0x30   : > { %p10249_p11 = scmp.ne.s32.totalorder %s248_s22, %s10248_s18  ;;  %p10257_p8 = scmp.lt.s32.totalorder %s10248_s18, %s10248_s18 }
  0x32   : > { %p10251_p12 = pnand %p10249_p11, %p10237_p2  ;;  %p10258_p10 = por %p10257_p8, %p10256_p5 }
  0x34   : > { %p10252_p9 = pneg %p10251_p12 }
  0x36   : > { %p10259_p0 = pnand %p10258_p10, %p10252_p9 }
  0x38   : > { %10262 = shalt.err (!%p10259_p0)
}
  0x39   : > { %9545 = dma.hbm_to_vmem [thread:$0]  (!%p10641_p13), %s12916_s6, 512, %s248_s22, [#allocation15]  }
  0x3a   : > { %s10670_s25 = sand.u32 1, %s10497_s12   ;;  %s12917_s1 = sld [smem:[#allocation34_spill]] }
  0x3b   : > { %s12918_s21 = sshll.u32 %s10637_s23, 4  ;;  %s12892_s22 = scalar_lea.sflag [#allocation9], %s10670_s25 }
  0x3c   : > { %s283_s24 = scalar_lea.vmem [#allocation8], %s12918_s21  ;;  %p12919_p8 = scmp.ne.s32.totalorder %s12915_s26, 0 }
  0x3d   : > { %s290_s18 = sshll.u32 %s283_s24, 4  ;;  %s10681_s18 = int_to_ptr.vmem [resolvable:$true] %s290_s18 }
  0x3e   : > { %p10689_p9 = pneg %p12919_p8 }
  0x40   : > { %s10677_s16 = scalar_lea.hbm %s12917_s1, %s12888_s27  ;;  %s10268_s21 = scalar_lea.hbm %s12917_s1, 512 }
  0x41   : > { %s10263_s29 = scalar_lea.hbm %s10677_s16, 256  ;;  %p10269_p0 = scmp.lt.u32.totalorder %s10677_s16, %s12917_s1 }
  0x42   : > { %p10264_p5 = scmp.ne.s32.totalorder %s10677_s16, %s10263_s29  ;;  %p10270_p1 = scmp.lt.u32.totalorder %s10268_s21, %s10263_s29 }
  0x43   : > { %p10272_p3 = scmp.lt.u32.totalorder %s10263_s29, %s10677_s16 }
  0x44   : > { %p10266_p10 = pnand %p10689_p9, %p10264_p5  ;;  %p10271_p2 = por %p10270_p1, %p10269_p0 }
  0x46   : > { %p10267_p13 = pneg %p10266_p10  ;;  %p10273_p6 = por %p10272_p3, %p10271_p2 }
  0x48   : > { %p10274_p4 = pnand %p10273_p6, %p10267_p13 }
  0x4a   : > { %10277 = shalt.err (!%p10274_p4)
}
  0x4b   : > { %s10278_s28 = scalar_lea.vmem %s10681_s18, 256  ;;  %s10500_s30 = smov [#allocation8]  }
  0x4c   : > { %p10279_p7 = scmp.ne.s32.totalorder %s10681_s18, %s10278_s28  ;;  %s10283_s15 = sshll.u32 %s10500_s30, 4  ;;  %s10284_s15 = int_to_ptr.vmem [resolvable:$false] %s10283_s15 }
  0x4d   : > { %s10285_s27 = scalar_lea.vmem %s10284_s15, 512  ;;  %p10286_p5 = scmp.lt.s32.totalorder %s10681_s18, %s10284_s15 }
  0x4e   : > { %p10281_p11 = pnand %p10279_p7, %p10689_p9  ;;  %p10287_p10 = scmp.lt.s32.totalorder %s10285_s27, %s10278_s28 }
  0x50   : > { %p10282_p12 = pneg %p10281_p11  ;;  %p10288_p0 = por %p10287_p10, %p10286_p5 }
  0x52   : > { %p10289_p1 = pnand %p10288_p0, %p10282_p12 }
  0x54   : > { %10292 = shalt.err (!%p10289_p1)
}
  0x55   : > { %s12893_s29 = smov 128   ;;  %s12894_s21 = smov 8  }
  0x56   : > { %9552 = dma.hbm_to_vmem [thread:$0]  (!%p12919_p8), %s10677_s16, 256, %s10681_s18, %s12892_s22, %s12893_s29, %s12893_s29, %s12894_s21  }
  0x57   : > { %s9502_s28 = smul.u32 40960, %s10497_s12  ;;  %s12922_s3 = sld [smem:[#allocation35_spill]] }
  0x58   : > { %s12921_s24 = smul.u32 2560, %s10637_s23  ;;  %s12895_s11 = scalar_lea.sflag [#allocation12], %s10670_s25 }
  0x5a   : > { %s322_s30 = scalar_lea.vmem [#allocation11], %s12921_s24 }
  0x5b   : > { %s329_s15 = sshll.u32 %s322_s30, 4  ;;  %s10725_s15 = int_to_ptr.vmem [resolvable:$true] %s329_s15 }
  0x5d   : > { %s10723_s17 = scalar_lea.hbm %s12922_s3, %s9502_s28  ;;  %s10298_s24 = scalar_lea.hbm %s12922_s3, 81920 }
  0x5e   : > { %s10293_s14 = scalar_lea.hbm %s10723_s17, 40960  ;;  %p10299_p6 = scmp.lt.u32.totalorder %s10723_s17, %s12922_s3 }
  0x5f   : > { %p10294_p13 = scmp.ne.s32.totalorder %s10723_s17, %s10293_s14  ;;  %p10300_p4 = scmp.lt.u32.totalorder %s10298_s24, %s10293_s14 }
  0x60   : > { %p10302_p11 = scmp.lt.u32.totalorder %s10293_s14, %s10723_s17 }
  0x61   : > { %p10296_p2 = pnand %p10294_p13, %p10689_p9  ;;  %p10301_p7 = por %p10300_p4, %p10299_p6 }
  0x63   : > { %p10297_p3 = pneg %p10296_p2  ;;  %p10303_p12 = por %p10302_p11, %p10301_p7 }
  0x65   : > { %p10304_p5 = pnand %p10303_p12, %p10297_p3 }
  0x67   : > { %10307 = shalt.err (!%p10304_p5)
}
  0x68   : > { %s10308_s28 = scalar_lea.vmem %s10725_s15, 40960  ;;  %s10503_s27 = smov [#allocation11]  }
  0x69   : > { %p10309_p10 = scmp.ne.s32.totalorder %s10725_s15, %s10308_s28  ;;  %s10313_s16 = sshll.u32 %s10503_s27, 4  ;;  %s10314_s16 = int_to_ptr.vmem [resolvable:$false] %s10313_s16 }
  0x6a   : > { %s10315_s18 = scalar_lea.vmem %s10314_s16, 81920  ;;  %p10316_p13 = scmp.lt.s32.totalorder %s10725_s15, %s10314_s16 }
  0x6b   : > { %p10311_p0 = pnand %p10309_p10, %p10689_p9  ;;  %p10317_p2 = scmp.lt.s32.totalorder %s10315_s18, %s10308_s28 }
  0x6d   : > { %p10312_p1 = pneg %p10311_p0  ;;  %p10318_p6 = por %p10317_p2, %p10316_p13 }
  0x6f   : > { %p10319_p4 = pnand %p10318_p6, %p10312_p1 }
  0x71   : > { %10322 = shalt.err (!%p10319_p4)
}
  0x72   : > { %s10504_s14 = smov 256   ;;  %s10505_s24 = smov 16  }
  0x73   : > { %9558 = dma.hbm_to_vmem [thread:$0]  (!%p12919_p8), %s10723_s17, 40960, %s10725_s15, %s12895_s11, %s10504_s14, %s10504_s14, %s10505_s24  }
  0x74   : > { %s12923_s30 = sshll.u32 %s10497_s12, 8  ;;  %s12924_s0 = sld [smem:[#allocation33_spill]] }
  0x75   : > { %s12925_s16 = sshll.u32 %s10637_s23, 4  ;;  %s8926_s29 = sshll.u32 %s10637_s23, 1 }
  0x76   : > { %s262_s18 = scalar_lea.vmem [#allocation6], %s12925_s16  ;;  %s259_s21 = scalar_lea.sflag [#allocation7], %s10637_s23 }
  0x77   : > { %s269_s22 = sshll.u32 %s262_s18, 4  ;;  %s10761_s22 = int_to_ptr.vmem [resolvable:$true] %s269_s22 }
  0x7a   : > { %s10756_s27 = scalar_lea.hbm %s12924_s0, %s12923_s30  ;;  %s10328_s14 = scalar_lea.hbm %s12924_s0, 512 }
  0x7b   : > { %s10323_s3 = scalar_lea.hbm %s10756_s27, 256  ;;  %p10329_p12 = scmp.lt.u32.totalorder %s10756_s27, %s12924_s0 }
  0x7c   : > { %p10324_p3 = scmp.ne.s32.totalorder %s10756_s27, %s10323_s3  ;;  %p10330_p5 = scmp.lt.u32.totalorder %s10328_s14, %s10323_s3 }
  0x7d   : > { %p10332_p0 = scmp.lt.u32.totalorder %s10323_s3, %s10756_s27 }
  0x7e   : > { %p10326_p7 = pnand %p10324_p3, %p10689_p9  ;;  %p10331_p10 = por %p10330_p5, %p10329_p12 }
  0x80   : > { %p10327_p11 = pneg %p10326_p7  ;;  %p10333_p1 = por %p10332_p0, %p10331_p10 }
  0x82   : > { %p10334_p13 = pnand %p10333_p1, %p10327_p11 }
  0x84   : > { %10337 = shalt.err (!%p10334_p13)
}
  0x85   : > { %s10338_s1 = scalar_lea.vmem %s10761_s22, 256  ;;  %s10506_s28 = smov [#allocation6]  }
  0x86   : > { %p10339_p2 = scmp.ne.s32.totalorder %s10761_s22, %s10338_s1  ;;  %s10343_s16 = sshll.u32 %s10506_s28, 4  ;;  %s10344_s16 = int_to_ptr.vmem [resolvable:$false] %s10343_s16 }
  0x87   : > { %s10345_s18 = scalar_lea.vmem %s10344_s16, 512  ;;  %p10346_p3 = scmp.lt.s32.totalorder %s10761_s22, %s10344_s16 }
  0x88   : > { %p10341_p6 = pnand %p10339_p2, %p10689_p9  ;;  %p10347_p7 = scmp.lt.s32.totalorder %s10345_s18, %s10338_s1 }
  0x8a   : > { %p10342_p4 = pneg %p10341_p6  ;;  %p10348_p12 = por %p10347_p7, %p10346_p3 }
  0x8c   : > { %p10349_p5 = pnand %p10348_p12, %p10342_p4 }
  0x8e   : > { %10352 = shalt.err (!%p10349_p5)
}
  0x8f   : > { %s12926_s3 = smov 8   ;;  %s12927_s17 = smov 128  }
  0x90   : > { %9549 = dma.hbm_to_vmem [thread:$0]  (!%p12919_p8), %s10756_s27, 256, %s10761_s22, %s259_s21, %s12927_s17, %s12927_s17, %s12926_s3  }
  0x91   : > { %s8927_s15 = sshll.u32 %s10497_s12, 5  ;;  %s304_s14 = scalar_lea.vmem [#allocation10], %s8926_s29 }
  0x92   : > { %s311_s24 = sshll.u32 %s304_s14, 4  ;;  %s309_s28 = scalar_lea.hbm %s12876_s2, %s8927_s15  ;;  %s312_s24 = int_to_ptr.vmem [resolvable:$true] %s311_s24 }
  0x93   : > { %s10353_s16 = scalar_lea.hbm %s309_s28, 32  ;;  %s10358_s0 = scalar_lea.hbm %s12876_s2, 64 }
  0x94   : > { %p10354_p11 = scmp.ne.s32.totalorder %s309_s28, %s10353_s16  ;;  %p10359_p1 = scmp.lt.u32.totalorder %s309_s28, %s12876_s2 }
  0x95   : > { %p10360_p13 = scmp.lt.u32.totalorder %s10358_s0, %s10353_s16  ;;  %p10362_p6 = scmp.lt.u32.totalorder %s10353_s16, %s309_s28 }
  0x96   : > { %p10356_p10 = pnand %p10354_p11, %p10689_p9 }
  0x97   : > { %p10361_p2 = por %p10360_p13, %p10359_p1 }
  0x98   : > { %p10357_p0 = pneg %p10356_p10 }
  0x99   : > { %p10363_p4 = por %p10362_p6, %p10361_p2 }
  0x9b   : > { %p10364_p3 = pnand %p10363_p4, %p10357_p0 }
  0x9d   : > { %10367 = shalt.err (!%p10364_p3)
}
  0x9e   : > { %s10368_s29 = scalar_lea.vmem %s312_s24, 32  ;;  %s10507_s21 = smov [#allocation10]  }
  0x9f   : > { %p10369_p7 = scmp.ne.s32.totalorder %s312_s24, %s10368_s29  ;;  %s10373_s27 = sshll.u32 %s10507_s21, 4  ;;  %s10374_s27 = int_to_ptr.vmem [resolvable:$false] %s10373_s27 }
  0xa0   : > { %s10375_s11 = scalar_lea.vmem %s10374_s27, 64  ;;  %p10376_p11 = scmp.lt.s32.totalorder %s312_s24, %s10374_s27 }
  0xa1   : > { %p10371_p12 = pnand %p10369_p7, %p10689_p9  ;;  %p10377_p10 = scmp.lt.s32.totalorder %s10375_s11, %s10368_s29 }
  0xa3   : > { %p10372_p5 = pneg %p10371_p12  ;;  %p10378_p8 = por %p10377_p10, %p10376_p11 }
  0xa5   : > { %p10379_p1 = pnand %p10378_p8, %p10372_p5 }
  0xa7   : > { %10382 = shalt.err (!%p10379_p1)
}
  0xa8   : > { %p12928_p13 = scmp.ne.s32.totalorder %s12915_s26, 0  ;;  %s12929_s0 = scalar_lea.sflag [#allocation9], %s10670_s25 }
  0xa9   : > { %s8929_s9 = sshll.u32 %s10637_s23, 9  ;;  %s9363_s3 = sshll.u32 %s10497_s12, 13 }
  0xaa   : > { %9555 = dma.hbm_to_vmem [thread:$0]  (!%p12928_p13), %s309_s28, 32, %s312_s24, %s12929_s0  }
  0xab   : > { %s10815_s14 = scalar_lea.hbm %s12878_s4, %s9363_s3  ;;  %s343_s30 = scalar_lea.vmem [#allocation13], %s8929_s9 }
  0xac   : > { %s350_s1 = sshll.u32 %s343_s30, 4  ;;  %s10383_s16 = scalar_lea.hbm %s10815_s14, 8192  ;;  %s10817_s1 = int_to_ptr.vmem [resolvable:$true] %s350_s1 }
  0xad   : > { %p10384_p8 = scmp.ne.s32.totalorder %s10815_s14, %s10383_s16  ;;  %s10388_s18 = scalar_lea.hbm %s12878_s4, 16384 }
  0xae   : > { %p10389_p6 = scmp.lt.u32.totalorder %s10815_s14, %s12878_s4  ;;  %p10390_p4 = scmp.lt.u32.totalorder %s10388_s18, %s10383_s16 }
  0xaf   : > { %p10386_p0 = pnand %p10384_p8, %p10689_p9  ;;  %p10392_p7 = scmp.lt.u32.totalorder %s10383_s16, %s10815_s14 }
  0xb0   : > { %p10391_p3 = por %p10390_p4, %p10389_p6 }
  0xb1   : > { %p10387_p2 = pneg %p10386_p0 }
  0xb2   : > { %p10393_p12 = por %p10392_p7, %p10391_p3 }
  0xb4   : > { %p10394_p5 = pnand %p10393_p12, %p10387_p2 }
  0xb6   : > { %10397 = shalt.err (!%p10394_p5)
}
  0xb7   : > { %s10398_s21 = scalar_lea.vmem %s10817_s1, 8192  ;;  %s10508_s27 = smov [#allocation13]  }
  0xb8   : > { %p10399_p11 = scmp.ne.s32.totalorder %s10817_s1, %s10398_s21  ;;  %s10403_s11 = sshll.u32 %s10508_s27, 4  ;;  %s10404_s11 = int_to_ptr.vmem [resolvable:$false] %s10403_s11 }
  0xb9   : > { %s10405_s0 = scalar_lea.vmem %s10404_s11, 16384  ;;  %p10406_p8 = scmp.lt.s32.totalorder %s10817_s1, %s10404_s11 }
  0xba   : > { %p10401_p10 = pnand %p10399_p11, %p10689_p9  ;;  %p10407_p0 = scmp.lt.s32.totalorder %s10405_s0, %s10398_s21 }
  0xbc   : > { %p10402_p1 = pneg %p10401_p10  ;;  %p10408_p6 = por %p10407_p0, %p10406_p8 }
  0xbe   : > { %p10409_p4 = pnand %p10408_p6, %p10402_p1 }
  0xc0   : > { %10412 = shalt.err (!%p10409_p4)
}
  0xc1   : > { %s10509_s9 = smov 64   ;;  %s10510_s3 = smov 4  }
  0xc2   : > { %s12930_s17 = scalar_lea.sflag [#allocation12], %s10670_s25  ;;  %s8932_s15 = sshll.u32 %s10637_s23, 7 }
  0xc3   : > { %9561 = dma.hbm_to_vmem [thread:$0]  (!%p12928_p13), %s10815_s14, 8192, %s10817_s1, %s12930_s17, %s10509_s9, %s10509_s9, %s10510_s3  }
  0xc4   : > { %s9364_s30 = sshll.u32 %s10497_s12, 11  ;;  %s364_s18 = scalar_lea.vmem [#allocation14], %s8932_s15 }
  0xc5   : > { %s10849_s28 = scalar_lea.hbm %s12879_s5, %s9364_s30  ;;  %s371_s22 = sshll.u32 %s364_s18, 4  ;;  %s10851_s22 = int_to_ptr.vmem [resolvable:$true] %s371_s22 }
  0xc6   : > { %s361_s29 = scalar_lea.sflag [#allocation15], %s10670_s25  ;;  %s10413_s21 = scalar_lea.hbm %s10849_s28, 2048 }
  0xc7   : > { %p10414_p2 = scmp.ne.s32.totalorder %s10849_s28, %s10413_s21  ;;  %s10418_s14 = scalar_lea.hbm %s12879_s5, 4096 }
  0xc8   : > { %p10419_p12 = scmp.lt.u32.totalorder %s10849_s28, %s12879_s5  ;;  %p10420_p5 = scmp.lt.u32.totalorder %s10418_s14, %s10413_s21 }
  0xc9   : > { %p10416_p3 = pnand %p10414_p2, %p10689_p9  ;;  %p10422_p10 = scmp.lt.u32.totalorder %s10413_s21, %s10849_s28 }
  0xca   : > { %p10421_p11 = por %p10420_p5, %p10419_p12 }
  0xcb   : > { %p10417_p7 = pneg %p10416_p3 }
  0xcc   : > { %p10423_p1 = por %p10422_p10, %p10421_p11 }
  0xce   : > { %p10424_p8 = pnand %p10423_p1, %p10417_p7 }
  0xd0   : > { %10427 = shalt.err (!%p10424_p8)
}
  0xd1   : > { %s10428_s11 = scalar_lea.vmem %s10851_s22, 2048  ;;  %s10511_s0 = smov [#allocation14]  }
  0xd2   : > { %p10429_p0 = scmp.ne.s32.totalorder %s10851_s22, %s10428_s11  ;;  %s10433_s3 = sshll.u32 %s10511_s0, 4  ;;  %s10434_s3 = int_to_ptr.vmem [resolvable:$false] %s10433_s3 }
  0xd3   : > { %s10435_s17 = scalar_lea.vmem %s10434_s3, 4096  ;;  %p10436_p2 = scmp.lt.s32.totalorder %s10851_s22, %s10434_s3 }
  0xd4   : > { %p10431_p6 = pnand %p10429_p0, %p10689_p9  ;;  %p10437_p3 = scmp.lt.s32.totalorder %s10435_s17, %s10428_s11 }
  0xd6   : > { %p10432_p4 = pneg %p10431_p6  ;;  %p10438_p12 = por %p10437_p3, %p10436_p2 }
  0xd8   : > { %p10439_p5 = pnand %p10438_p12, %p10432_p4 }
  0xda   : > { %10442 = shalt.err (!%p10439_p5)
}
  0xdb   : > { %s10512_s15 = smov 1024   ;;  %p12931_p9 = scmp.ne.s32.totalorder %s12913_s20, 0 }
  0xdc   : > { %9564 = dma.hbm_to_vmem [thread:$0]  (!%p12928_p13), %s10849_s28, 2048, %s10851_s22, %s361_s29, %s10512_s15, %s10512_s15, %s10509_s9  }
  0xdd   : > { %383 = sbr.rel (%p12931_p9) target bundleno = 5288 (0x14a8), region = 48 }
  0xe4   : > { %s385_s6 = sand.u32 1, %s10489_s10   ;;  %p12932_p7 = scmp.ne.s32.totalorder %s12912_s19, 0 }
  0xe5   : > { %s8936_s30 = sshll.u32 %s385_s6, 4  ;;  %s386_s16 = scalar_lea.sflag [#allocation7], %s385_s6 }
  0xe6   : > { %s10881_s24 = scalar_lea.vmem [#allocation6], %s8936_s30 }
  0xe7   : > { %10460 = dma.done.wait (%p12932_p7), %s386_s16, 256  }
  0xe8   : > { %10462 = vsyncadd (%p12932_p7), %s386_s16, 4294967040  ;;  %s394_s26 = sand.u32 1, %s10600_s13   ;;  %s10888_s9 = scalar_lea.vmem [#allocation8], %s8936_s30 }
  0xe9   : > { %s395_s25 = scalar_lea.sflag [#allocation9], %s394_s26 }
  0xea   : > { %10464 = dma.done.wait (%p12932_p7), %s395_s25, 288  }
  0xeb   : > { %10466 = vsyncadd (%p12932_p7), %s395_s25, 4294967008  ;;  %s8938_s20 = sshll.u32 %s385_s6, 1  ;;  %s9503_s28 = smul.u32 2560, %s385_s6 }
  0xec   : > { %s10894_s18 = scalar_lea.vmem [#allocation10], %s8938_s20  ;;  %s413_s22 = scalar_lea.sflag [#allocation12], %s394_s26 }
  0xed   : > { %s10896_s29 = scalar_lea.vmem [#allocation11], %s9503_s28 }
  0xee   : > { %10468 = dma.done.wait (%p12932_p7), %s413_s22, 49152  }
  0xef   : > { %10470 = vsyncadd (%p12932_p7), %s413_s22, 4294918144  ;;  %s8939_s21 = sshll.u32 %s385_s6, 9  ;;  %s8940_s12 = sshll.u32 %s385_s6, 7 }
  0xf0   : > { %s10902_s23 = scalar_lea.vmem [#allocation13], %s8939_s21  ;;  %s431_s14 = scalar_lea.sflag [#allocation15], %s394_s26 }
  0xf1   : > { %s10904_s1 = scalar_lea.vmem [#allocation14], %s8940_s12 }
  0xf2   : > { %10472 = dma.done.wait (%p12932_p7), %s431_s14, 2048  }
  0xf3   : > { %10474 = vsyncadd (%p12932_p7), %s431_s14, 4294965248  ;;  %p12933_p13 = scmp.eq.s32.totalorder %s10600_s13, 0 }
  0xf5   : > { %10476 = dma.done.wait (%p12933_p13), [#allocation15], 512   ;;  %p12934_p11 = pmov %p12933_p13 }
  0xf7   : > { %10478 = vsyncadd (%p12934_p11), [#allocation15], 4294966784 }
  0xf8   : > { %p12935_p10 = pmov %p12934_p11  ;;  %s10513_s0 = smov [#allocation3]   ;;  %v12897_v2 = vmov 0  }
  0xf9   : > { %s507_s3 = sshll.u32 %s10513_s0, 4  ;;  %s10514_s19 = smov 1024   ;;  %816 = vmatprep.mubr.bf16.mxu0 %v12897_v2  ;;  %859 = vmatprep.mubr.bf16.mxu1 %v12897_v2  ;;  %s508_s3 = int_to_ptr.vmem [resolvable:$true] %s507_s3 }
  0xfa   : > { %s9521_s27 = scalar_select %p12935_p10, [#allocation0], [#allocation21] }
  0xfb   : > { %p12936_p1 = pmov %p12935_p10  ;;  %s10515_s17 = smov 8  }
  0xfc   : > { %s499_s11 = sld [smem:[%s9521_s27]]   ;;  %s10516_s15 = smov 64  }
  0xfd   : > { %9522 = sst [smem:[#allocation18]] (%p12936_p1), %s10514_s19  ;;  %p12937_p8 = pmov %p12936_p1 }
  0xfe   : > { %p12938_p0 = pmov %p12936_p1  ;;  %s10517_s6 = smov 128  }
  0xff   : > { %9523 = sst [smem:[#allocation18 + $0x1]] (%p12937_p8), %s10514_s19  ;;  %s10518_s16 = smov 2  }
 0x100   : > { %9524 = sst [smem:[#allocation18 + $0x2]] (%p12938_p0), %s10515_s17  ;;  %p12939_p6 = pmov %p12938_p0 }
 0x101   : > { %p12940_p4 = pmov %p12938_p0  ;;  %p12941_p2 = pmov %p12938_p0 }
 0x102   : > { %9525 = sst [smem:[#allocation18 + $0x3]] (%p12939_p6), %s10516_s15  ;;  %s8943_s30 = sshll.u32 %s499_s11, 26 }
 0x103   : > { %9526 = sst [smem:[#allocation18 + $0x4]] (%p12940_p4), %s10517_s6  ;;  %s8944_s26 = sadd.s32 134217728, %s8943_s30 }
 0x104   : > { %9527 = sst [smem:[#allocation18 + $0x5]] (%p12941_p2), %s10518_s16  ;;  %s10519_s25 = smov 512  }
 0x105   : > { %p12942_p3 = pmov %p12938_p0  ;;  %p12943_p12 = pmov %p12938_p0 }
 0x106   : > { %s10520_s20 = smov 4   ;;  %p12944_p5 = pmov %p12938_p0 }
 0x107   : > { %9528 = sst [smem:[#allocation18 + $0x6]] (%p12942_p3), %s10519_s25  ;;  %s10521_s28 = smov [#allocation5]  }
 0x108   : > { %9529 = sst [smem:[#allocation18 + $0x7]] (%p12943_p12), %s10516_s15  ;;  %s10522_s22 = smov [#allocation17]  }
 0x109   : > { %9530 = sst [smem:[#allocation18 + $0x8]] (%p12944_p5), %s10520_s20  ;;  %p12945_p9 = pmov %p12938_p0 }
 0x10a   : > { %p12946_p7 = pmov %p12938_p0  ;;  %p12947_p13 = pmov %p12938_p0 }
 0x10b   : > { %9531 = dma.general (%p12945_p9), %s12881_s7, 16384, %s508_s3, %s10521_s28, %s10522_s22, [#allocation18], %s8944_s26, 0  }
 0x10c   : > { %9532 = sst [smem:[#allocation20]] (%p12946_p7), %s10519_s25  ;;  %p12948_p11 = pmov %p12938_p0 }
 0x10d   : > { %9533 = sst [smem:[#allocation20 + $0x1]] (%p12947_p13), %s10519_s25  ;;  %s10523_s14 = smov [#allocation4]  }
 0x10e   : > { %9534 = sst [smem:[#allocation20 + $0x2]] (%p12948_p11), %s10520_s20  ;;  %s542_s27 = sshll.u32 %s10523_s14, 4  ;;  %s543_s27 = int_to_ptr.vmem [resolvable:$true] %s542_s27 }
 0x10f   : > { %p12949_p10 = pmov %p12938_p0  ;;  %p12950_p1 = pmov %p12938_p0 }
 0x110   : > { %p12951_p8 = pmov %p12938_p0  ;;  %s10524_s11 = smov 256  }
 0x111   : > { %9535 = sst [smem:[#allocation20 + $0x3]] (%p12949_p10), %s10516_s15  ;;  %p12952_p6 = pmov %p12938_p0 }
 0x112   : > { %9536 = sst [smem:[#allocation20 + $0x4]] (%p12950_p1), %s10517_s6  ;;  %p12953_p4 = pmov %p12938_p0 }
 0x113   : > { %9537 = sst [smem:[#allocation20 + $0x5]] (%p12951_p8), %s10518_s16  ;;  %s10525_s0 = smov [#allocation5 + $0x1]  }
 0x114   : > { %9538 = sst [smem:[#allocation20 + $0x6]] (%p12938_p0), %s10524_s11  ;;  %s10526_s3 = smov [#allocation19]  }
 0x115   : > { %9539 = sst [smem:[#allocation20 + $0x7]] (%p12952_p6), %s10516_s15  ;;  %p12954_p2 = pmov %p12938_p0 }
 0x116   : > { %9540 = sst [smem:[#allocation20 + $0x8]] (%p12953_p4), %s10520_s20  ;;  %p13001_p3 = scmp.ne.s32.totalorder %s10600_s13, 0 }
 0x117   : > { %9541 = dma.general (%p12954_p2), %s12882_s8, 32768, %s543_s27, %s10525_s0, %s10526_s3, [#allocation20], %s8944_s26, 0  }
 0x118   : > { %v9627_v0 = vld [vmem:[%s10896_s29 + $0x4] ss:$16 sps:$4 sm:$0xff]   ;;  %v9629_v1 = vld [vmem:[%s10896_s29] ss:$16 sps:$4 sm:$0xff]   ;;  %v9636_v6 = vld [vmem:[%s10896_s29 + $0xc] ss:$16 sps:$4 sm:$0xff]  }
 0x119   : > { %784 = vmatprep.subr.bf16.mxu0 %v9627_v0  ;;  %v9630_v3 = vld [vmem:[%s10896_s29 + $0x24] ss:$16 sps:$4 sm:$0xff]   ;;  %v9632_v4 = vld [vmem:[%s10896_s29 + $0x20] ss:$16 sps:$4 sm:$0xff]   ;;  %827 = vmatprep.subr.bf16.mxu1 %v9636_v6  ;;  %v9640_v8 = vld [vmem:[%s10896_s29 + $0x8] ss:$16 sps:$4 sm:$0xff]  }
 0x11a   : > { %785 = vmatpush1.bf16.msra.mxu0 %v9629_v1  ;;  %v9633_v5 = vld [vmem:[%s10896_s29 + $0x44] ss:$16 sps:$4 sm:$0xff]   ;;  %v9635_v7 = vld [vmem:[%s10896_s29 + $0x40] ss:$16 sps:$4 sm:$0xff]   ;;  %v9642_v9 = vld [vmem:[%s10896_s29 + $0x2c] ss:$16 sps:$4 sm:$0xff]   ;;  %828 = vmatpush1.bf16.msra.mxu1 %v9640_v8 }
 0x11b   : > { %786 = vmatprep.subr.bf16.mxu0 %v9630_v3  ;;  %v9638_v10 = vld [vmem:[%s10896_s29 + $0x64] ss:$16 sps:$4 sm:$0xff]   ;;  %v9646_v11 = vld [vmem:[%s10896_s29 + $0x28] ss:$16 sps:$4 sm:$0xff]   ;;  %829 = vmatprep.subr.bf16.mxu1 %v9642_v9  ;;  %v9648_v12 = vld [vmem:[%s10896_s29 + $0x4c] ss:$16 sps:$4 sm:$0xff]  }
 0x11c   : > { %v9641_v13 = vld [vmem:[%s10896_s29 + $0x60] ss:$16 sps:$4 sm:$0xff]   ;;  %v9644_v14 = vld [vmem:[%s10896_s29 + $0x84] ss:$16 sps:$4 sm:$0xff]   ;;  %v9652_v15 = vld [vmem:[%s10896_s29 + $0x48] ss:$16 sps:$4 sm:$0xff]  }
 0x11d   : > { %v9654_v16 = vld [vmem:[%s10896_s29 + $0x6c] ss:$16 sps:$4 sm:$0xff]   ;;  %v9647_v17 = vld [vmem:[%s10896_s29 + $0x80] ss:$16 sps:$4 sm:$0xff]   ;;  %v9650_v18 = vld [vmem:[%s10896_s29 + $0xa4] ss:$16 sps:$4 sm:$0xff]  }
 0x11e   : > { %787 = vmatpush1.bf16.msra.mxu0 %v9632_v4  ;;  %830 = vmatpush1.bf16.msra.mxu1 %v9646_v11  ;;  %v9658_v19 = vld [vmem:[%s10896_s29 + $0x68] ss:$16 sps:$4 sm:$0xff]   ;;  %v9660_v20 = vld [vmem:[%s10896_s29 + $0x8c] ss:$16 sps:$4 sm:$0xff]   ;;  %v9653_v21 = vld [vmem:[%s10896_s29 + $0xa0] ss:$16 sps:$4 sm:$0xff]  }
 0x11f   : > { %788 = vmatprep.subr.bf16.mxu0 %v9633_v5  ;;  %831 = vmatprep.subr.bf16.mxu1 %v9648_v12  ;;  %v9656_v22 = vld [vmem:[%s10896_s29 + $0xc4] ss:$16 sps:$4 sm:$0xff]   ;;  %v9664_v23 = vld [vmem:[%s10896_s29 + $0x88] ss:$16 sps:$4 sm:$0xff]   ;;  %v9659_v24 = vld [vmem:[%s10896_s29 + $0xc0] ss:$16 sps:$4 sm:$0xff]   ;;  %v604_v5 = vlaneseq }
 0x120   : > { %v9666_v25 = vld [vmem:[%s10896_s29 + $0xac] ss:$16 sps:$4 sm:$0xff]   ;;  %v9662_v26 = vld [vmem:[%s10896_s29 + $0xe4] ss:$16 sps:$4 sm:$0xff]   ;;  %v9668_v27 = vld [vmem:[%s10896_s29 + $0xa8] ss:$16 sps:$4 sm:$0xff]  }
 0x121   : > { %v9669_v28 = vld [vmem:[%s10896_s29 + $0xcc] ss:$16 sps:$4 sm:$0xff]   ;;  %v9665_v29 = vld [vmem:[%s10896_s29 + $0xe0] ss:$16 sps:$4 sm:$0xff]   ;;  %v566_v31 = vld [vmem:[%s10881_s24 + $0x8] sm:$0xff]  ;;  %v11033_v6 = vshrl.u32 %v604_v5, 7 }
 0x122   : > { %789 = vmatpush1.bf16.msra.mxu0 %v9635_v7  ;;  %832 = vmatpush1.bf16.msra.mxu1 %v9652_v15  ;;  %v565_v30 = vld [vmem:[%s10881_s24] sm:$0xff]  ;;  %v9671_v32 = vld [vmem:[%s10896_s29 + $0xc8] ss:$16 sps:$4 sm:$0xff]   ;;  %v9677_v36 = vld [vmem:[%s10896_s29 + $0x104] ss:$16 sps:$4 sm:$0xff]  }
 0x123   : > { %790 = vmatprep.subr.bf16.mxu0 %v9638_v10  ;;  %833 = vmatprep.subr.bf16.mxu1 %v9654_v16  ;;  %v9672_v33 = vld [vmem:[%s10896_s29 + $0xec] ss:$16 sps:$4 sm:$0xff]   ;;  %v569_v34 = vpack.c.bf16 %v566_v31, %v565_v30  ;;  %v9674_v35 = vld [vmem:[%s10896_s29 + $0xe8] ss:$16 sps:$4 sm:$0xff]   ;;  %v9675_v38 = vld [vmem:[%s10896_s29 + $0x100] ss:$16 sps:$4 sm:$0xff]  }
 0x124   : > { %v9680_v37 = vld [vmem:[%s10896_s29 + $0x10c] ss:$16 sps:$4 sm:$0xff]   ;;  %v9678_v39 = vld [vmem:[%s10896_s29 + $0x108] ss:$16 sps:$4 sm:$0xff]   ;;  %v9683_v40 = vld [vmem:[%s10896_s29 + $0x124] ss:$16 sps:$4 sm:$0xff]  }
 0x125   : > { %v9686_v41 = vld [vmem:[%s10896_s29 + $0x12c] ss:$16 sps:$4 sm:$0xff]   ;;  %v9681_v42 = vld [vmem:[%s10896_s29 + $0x120] ss:$16 sps:$4 sm:$0xff]   ;;  %v9684_v43 = vld [vmem:[%s10896_s29 + $0x128] ss:$16 sps:$4 sm:$0xff]  }
 0x126   : > { %791 = vmatpush1.bf16.msra.mxu0 %v9641_v13  ;;  %834 = vmatpush1.bf16.msra.mxu1 %v9658_v19  ;;  %v9689_v44 = vld [vmem:[%s10896_s29 + $0x144] ss:$16 sps:$4 sm:$0xff]   ;;  %v9692_v45 = vld [vmem:[%s10896_s29 + $0x14c] ss:$16 sps:$4 sm:$0xff]   ;;  %v9687_v46 = vld [vmem:[%s10896_s29 + $0x140] ss:$16 sps:$4 sm:$0xff]  }
 0x127   : > { %792 = vmatprep.subr.bf16.mxu0 %v9644_v14  ;;  %835 = vmatprep.subr.bf16.mxu1 %v9660_v20  ;;  %v9690_v47 = vld [vmem:[%s10896_s29 + $0x148] ss:$16 sps:$4 sm:$0xff]   ;;  %v9695_v48 = vld [vmem:[%s10896_s29 + $0x164] ss:$16 sps:$4 sm:$0xff]   ;;  %v9698_v49 = vld [vmem:[%s10896_s29 + $0x16c] ss:$16 sps:$4 sm:$0xff]  }
 0x128   : > { %v9693_v50 = vld [vmem:[%s10896_s29 + $0x160] ss:$16 sps:$4 sm:$0xff]   ;;  %v9696_v51 = vld [vmem:[%s10896_s29 + $0x168] ss:$16 sps:$4 sm:$0xff]   ;;  %v9701_v52 = vld [vmem:[%s10896_s29 + $0x184] ss:$16 sps:$4 sm:$0xff]  }
 0x129   : > { %v9704_v53 = vld [vmem:[%s10896_s29 + $0x18c] ss:$16 sps:$4 sm:$0xff]   ;;  %v9699_v54 = vld [vmem:[%s10896_s29 + $0x180] ss:$16 sps:$4 sm:$0xff]   ;;  %v9702_v55 = vld [vmem:[%s10896_s29 + $0x188] ss:$16 sps:$4 sm:$0xff]  }
 0x12a   : > { %793 = vmatpush1.bf16.msra.mxu0 %v9647_v17  ;;  %836 = vmatpush1.bf16.msra.mxu1 %v9664_v23  ;;  %v9707_v56 = vld [vmem:[%s10896_s29 + $0x1a4] ss:$16 sps:$4 sm:$0xff]   ;;  %v9705_v57 = vld [vmem:[%s10896_s29 + $0x1a0] ss:$16 sps:$4 sm:$0xff]   ;;  %v9708_v58 = vld [vmem:[%s10896_s29 + $0x1a8] ss:$16 sps:$4 sm:$0xff]  }
 0x12b   : > { %794 = vmatprep.subr.bf16.mxu0 %v9650_v18  ;;  %837 = vmatprep.subr.bf16.mxu1 %v9666_v25  ;;  %v9710_v59 = vld [vmem:[%s10896_s29 + $0x1ac] ss:$16 sps:$4 sm:$0xff]   ;;  %v9713_v60 = vld [vmem:[%s10896_s29 + $0x1c4] ss:$16 sps:$4 sm:$0xff]   ;;  %v9711_v62 = vld [vmem:[%s10896_s29 + $0x1c0] ss:$16 sps:$4 sm:$0xff]  }
 0x12c   : > { %v9716_v61 = vld [vmem:[%s10896_s29 + $0x1cc] ss:$16 sps:$4 sm:$0xff]   ;;  %v9714_v63 = vld [vmem:[%s10896_s29 + $0x1c8] ss:$16 sps:$4 sm:$0xff]   ;;  %v9719_v0 = vld [vmem:[%s10896_s29 + $0x1e4] ss:$16 sps:$4 sm:$0xff]  }
 0x12d   : > { %v9722_v1 = vld [vmem:[%s10896_s29 + $0x1ec] ss:$16 sps:$4 sm:$0xff]   ;;  %v9717_v3 = vld [vmem:[%s10896_s29 + $0x1e0] ss:$16 sps:$4 sm:$0xff]   ;;  %v9720_v4 = vld [vmem:[%s10896_s29 + $0x1e8] ss:$16 sps:$4 sm:$0xff]  }
 0x12e   : > { %795 = vmatpush1.bf16.msra.mxu0 %v9653_v21  ;;  %838 = vmatpush1.bf16.msra.mxu1 %v9668_v27  ;;  %12955 = vst [vmem:[#allocation32_spill] sm:$0xff] %v11033_v6  ;;  %v11036_v7 = vsub.s32 1, %v11033_v6  ;;  %v602_v8 = vld [vmem:[%s10904_s1] ss:$8 sm:$0xf]  ;;  %v11041_v10 = vsub.s32 2, %v11033_v6 }
 0x12f   : > { %796 = vmatprep.subr.bf16.mxu0 %v9656_v22  ;;  %839 = vmatprep.subr.bf16.mxu1 %v9669_v28  ;;  %v11044_v13 = vsub.s32 0, %v11033_v6 }
 0x130   : > { %v611_v9 = vrot.slane %v602_v8, %v11036_v7  ;;  %v615_v16 = vrot.slane %v602_v8, %v11041_v10 }
 0x131   : > { %v607_v21 = vrot.slane %v602_v8, %v11044_v13 }
 0x132   : > { %797 = vmatpush1.bf16.msra.mxu0 %v9659_v24  ;;  %840 = vmatpush1.bf16.msra.mxu1 %v9671_v32 }
 0x133   : > { %798 = vmatprep.subr.bf16.mxu0 %v9662_v26  ;;  %841 = vmatprep.subr.bf16.mxu1 %v9672_v33 }
 0x136   : > { %799 = vmatpush1.bf16.msra.mxu0 %v9665_v29  ;;  %842 = vmatpush1.bf16.msra.mxu1 %v9674_v35 }
 0x137   : > { %1135 = vmatprep.subr.bf16.mxu0 %v9677_v36  ;;  %1178 = vmatprep.subr.bf16.mxu1 %v9680_v37 }
 0x139   : > { %817 = vmatmul.mubr.bf16.vlgmr.msra.gmra.mrb[0].mxu0 %v569_v34  ;;  %860 = vmatmul.mubr.bf16.vlgmr.msra.gmra.mrb[0].mxu1 %v569_v34 }
 0x13a   : > { %1167 = vmatprep.mubr.bf16.mxu0 %v12897_v2  ;;  %1210 = vmatprep.mubr.bf16.mxu1 %v12897_v2 }
 0x13b   : > { %1136 = vmatpush1.bf16.msra.mxu0 %v9675_v38  ;;  %1179 = vmatpush1.bf16.msra.mxu1 %v9678_v39  ;;  %v11049_v39 = vsub.s32 3, %v11033_v6 }
 0x13c   : > { %1137 = vmatprep.subr.bf16.mxu0 %v9683_v40  ;;  %1180 = vmatprep.subr.bf16.mxu1 %v9686_v41 }
 0x13f   : > { %1138 = vmatpush1.bf16.msra.mxu0 %v9681_v42  ;;  %1181 = vmatpush1.bf16.msra.mxu1 %v9684_v43  ;;  %v619_v42 = vrot.slane %v602_v8, %v11049_v39  ;;  %v906_v43 = vld [vmem:[%s10904_s1 + $0x1] ss:$0 sm:$0xff] }
 0x140   : > { %1139 = vmatprep.subr.bf16.mxu0 %v9689_v44  ;;  %1182 = vmatprep.subr.bf16.mxu1 %v9692_v45 }
 0x143   : > { %1140 = vmatpush1.bf16.msra.mxu0 %v9687_v46  ;;  %1183 = vmatpush1.bf16.msra.mxu1 %v9690_v47 }
 0x144   : > { %1141 = vmatprep.subr.bf16.mxu0 %v9695_v48  ;;  %1184 = vmatprep.subr.bf16.mxu1 %v9698_v49 }
 0x147   : > { %1142 = vmatpush1.bf16.msra.mxu0 %v9693_v50  ;;  %1185 = vmatpush1.bf16.msra.mxu1 %v9696_v51 }
 0x148   : > { %1143 = vmatprep.subr.bf16.mxu0 %v9701_v52  ;;  %1186 = vmatprep.subr.bf16.mxu1 %v9704_v53 }
 0x14b   : > { %1144 = vmatpush1.bf16.msra.mxu0 %v9699_v54  ;;  %1187 = vmatpush1.bf16.msra.mxu1 %v9702_v55 }
 0x14c   : > { %1145 = vmatprep.subr.bf16.mxu0 %v9707_v56  ;;  %1188 = vmatprep.subr.bf16.mxu1 %v9710_v59 }
 0x14f   : > { %1146 = vmatpush1.bf16.msra.mxu0 %v9705_v57  ;;  %1189 = vmatpush1.bf16.msra.mxu1 %v9708_v58 }
 0x150   : > { %1147 = vmatprep.subr.bf16.mxu0 %v9713_v60  ;;  %1190 = vmatprep.subr.bf16.mxu1 %v9716_v61 }
 0x153   : > { %1148 = vmatpush1.bf16.msra.mxu0 %v9711_v62  ;;  %1191 = vmatpush1.bf16.msra.mxu1 %v9714_v63 }
 0x154   : > { %1149 = vmatprep.subr.bf16.mxu0 %v9719_v0  ;;  %1192 = vmatprep.subr.bf16.mxu1 %v9722_v1 }
 0x157   : > { %1150 = vmatpush1.bf16.msra.mxu0 %v9717_v3  ;;  %1193 = vmatpush1.bf16.msra.mxu1 %v9720_v4 }
 0x20c   : > { %v818_v11 = vpop.f32.mrb[0].mxu0  ;;  %v861_v20 = vpop.f32.mrb[0].mxu1 }
 0x20d   : > { %v820_v12 = vpop.f32.mrb[1].mxu0  ;;  %v862_v23 = vadd.f32 %v861_v20, %v615_v16  ;;  %v863_v24 = vpop.f32.mrb[1].mxu1  ;;  %v819_v29 = vadd.f32 %v818_v11, %v607_v21  ;;  %v12899_v11 = vmov 0.0  }
 0x20e   : > { %v821_v14 = vadd.f32 %v820_v12, %v611_v9  ;;  %v822_v15 = vpop.f32.mrb[2].mxu0  ;;  %v865_v25 = vpop.f32.mrb[2].mxu1  ;;  %v864_v48 = vadd.f32 %v863_v24, %v619_v42  ;;  %9457 = vmatprep.subr.bf16.mxu0 %v12899_v11  ;;  %9463 = vmatprep.subr.bf16.mxu1 %v12899_v11  ;;  %v10529_v12 = vmov 1966171168  }
 0x20f   : > { %v824_v17 = vpop.f32.mrb[3].mxu0  ;;  %v8983_v26 = vmul.f32 -1.442695, %v862_v23  ;;  %v866_v27 = vadd.f32 %v865_v25, %v615_v16  ;;  %v867_v28 = vpop.f32.mrb[3].mxu1  ;;  %v823_v31 = vadd.f32 %v822_v15, %v607_v21  ;;  %v8979_v32 = vmul.f32 -1.442695, %v819_v29 }
 0x210   : > { %v8981_v18 = vmul.f32 -1.442695, %v821_v14  ;;  %v825_v19 = vadd.f32 %v824_v17, %v611_v9  ;;  %v868_v53 = vadd.f32 %v867_v28, %v619_v42  ;;  %v1243_v14 = vunpack.c.l.s4 %v10529_v12  ;;  %v8985_v15 = vld [vmem:[%s10904_s1 + $0x2] ss:$8 sm:$0xf] }
 0x211   : > { %v8984_v30 = vmul.f32 -1.442695, %v866_v27  ;;  %v8980_v34 = vmul.f32 -1.442695, %v823_v31  ;;  %v966_v16 = vrot.slane %v8985_v15, %v11041_v10  ;;  %v962_v20 = vrot.slane %v8985_v15, %v11036_v7 }
 0x212   : > { %10171 = vpow2.f32 %v8981_v18  ;;  %v8982_v22 = vmul.f32 -1.442695, %v825_v19  ;;  %v1244_v17 = vunpack.c.0.s8 %v1243_v14  ;;  %v970_v18 = vrot.slane %v8985_v15, %v11049_v39 }
 0x213   : > { %v958_v19 = vrot.slane %v8985_v15, %v11044_v13 }
 0x214   : > { %10173 = vpow2.f32 %v8982_v22 }
 0x215   : > { %10175 = vpow2.f32 %v8983_v26  ;;  %v11061_v26 = vsub.s32 %v1244_v17, %v11033_v6 }
 0x216   : > { %10177 = vpow2.f32 %v8984_v30 }
 0x217   : > { %10179 = vpow2.f32 %v8979_v32 }
 0x21c   : > { %v10172_v33 = vpop.eup %10171 }
 0x21d   : > { %v888_v35 = vadd.f32 1.0, %v10172_v33 }
 0x21e   : > { %v10174_v36 = vpop.eup %10173 }
 0x21f   : > { %10181 = vrcp.f32 %v888_v35  ;;  %v889_v37 = vadd.f32 1.0, %v10174_v36  ;;  %v10176_v38 = vpop.eup %10175 }
 0x220   : > { %10183 = vpow2.f32 %v8980_v34  ;;  %v900_v40 = vadd.f32 1.0, %v10176_v38  ;;  %v10178_v41 = vpop.eup %10177 }
 0x221   : > { %10185 = vrcp.f32 %v889_v37  ;;  %v10180_v44 = vpop.eup %10179  ;;  %v901_v45 = vadd.f32 1.0, %v10178_v41 }
 0x222   : > { %10187 = vrcp.f32 %v900_v40  ;;  %v876_v51 = vadd.f32 1.0, %v10180_v44 }
 0x223   : > { %10189 = vrcp.f32 %v901_v45 }
 0x229   : > { %v10182_v46 = vpop.eup %10181 }
 0x22a   : > { %v10184_v47 = vpop.eup %10183  ;;  %v907_v49 = vmul.f32 %v10182_v46, %v906_v43 }
 0x22b   : > { %v10186_v50 = vpop.eup %10185  ;;  %v877_v55 = vadd.f32 1.0, %v10184_v47 }
 0x22c   : > { %v909_v52 = vadd.f32 %v907_v49, %v864_v48  ;;  %v908_v54 = vmul.f32 %v10186_v50, %v906_v43  ;;  %v10188_v57 = vpop.eup %10187  ;;  %v9018_v49 = vld [vmem:[%s10904_s1 + $0x3] ss:$8 sm:$0x3] }
 0x22d   : > { %v913_v58 = vsub.f32 1.0, %v10188_v57  ;;  %v10190_v59 = vpop.eup %10189 }
 0x22e   : > { %10191 = vtanh.f32 %v909_v52  ;;  %v910_v56 = vadd.f32 %v908_v54, %v868_v53  ;;  %v914_v62 = vsub.f32 1.0, %v10190_v59 }
 0x22f   : > { %10193 = vrcp.f32 %v876_v51 }
 0x230   : > { %10195 = vtanh.f32 %v910_v56  ;;  %v1227_v56 = vrot.slane %v9018_v49, %v11044_v13 }
 0x231   : > { %10197 = vrcp.f32 %v877_v55  ;;  %v1231_v55 = vrot.slane %v9018_v49, %v11036_v7 }
 0x238   : > { %v10192_v60 = vpop.eup %10191 }
 0x239   : > { %v10194_v61 = vpop.eup %10193  ;;  %v915_v63 = vmul.f32 %v10192_v60, %v913_v58 }
 0x23a   : > { %v10196_v0 = vpop.eup %10195 }
 0x23b   : > { %v916_v1 = vmul.f32 %v10196_v0, %v914_v62  ;;  %v917_v3 = vmul.f32 %v10194_v61, %v915_v63  ;;  %v10198_v4 = vpop.eup %10197  ;;  %v1235_v63 = vpack.c.bf16 %v1231_v55, %v1231_v55  ;;  %v1234_v0 = vpack.c.bf16 %v1227_v56, %v1227_v56 }
 0x23d   : > { %v918_v8 = vmul.f32 %v10198_v4, %v916_v1  ;;  %v1894_v14 = vpack.i.b16 %v1235_v63, %v1235_v63  ;;  %v1887_v15 = vpack.i.b16 %v1234_v0, %v1234_v0 }
 0x23f   : > { %v919_v9 = vpack.c.bf16 %v918_v8, %v917_v3 }
 0x241   : > { %1168 = vmatmul.mubr.bf16.vlgmr.msra.gmra.mrb[4].mxu0 %v919_v9  ;;  %1211 = vmatmul.mubr.bf16.vlgmr.msra.gmra.mrb[4].mxu1 %v919_v9 }
 0x314   : > { %v1169_v21 = vpop.f32.mrb[4].mxu0  ;;  %v1212_v22 = vpop.f32.mrb[4].mxu1 }
 0x315   : > { %v1213_v23 = vadd.f32 %v1212_v22, %v966_v16  ;;  %v1171_v24 = vpop.f32.mrb[5].mxu0  ;;  %v1214_v25 = vpop.f32.mrb[5].mxu1  ;;  %v1170_v30 = vadd.f32 %v1169_v21, %v958_v19 }
 0x316   : > { %v1215_v27 = vadd.f32 %v1214_v25, %v970_v18  ;;  %v1173_v28 = vpop.f32.mrb[6].mxu0  ;;  %v1216_v29 = vpop.f32.mrb[6].mxu1  ;;  %v1172_v31 = vadd.f32 %v1171_v24, %v962_v20  ;;  %v11111_v24 = vrot.slane %v1894_v14, %v11044_v13  ;;  %v11114_v25 = vrot.slane %v1887_v15, %v11044_v13 }
 0x317   : > { %v1174_v32 = vadd.f32 %v1173_v28, %v958_v19  ;;  %v1217_v33 = vadd.f32 %v1216_v29, %v966_v16  ;;  %v1175_v34 = vpop.f32.mrb[7].mxu0  ;;  %v1218_v35 = vpop.f32.mrb[7].mxu1 }
 0x318   : > { %v1240_v36 = vcombine.low %v1213_v23, %v1215_v27  ;;  %v1241_v37 = vcombine.high %v1213_v23, %v1215_v27  ;;  %v1176_v38 = vadd.f32 %v1175_v34, %v962_v20  ;;  %v1219_v40 = vadd.f32 %v1218_v35, %v970_v18 }
 0x319   : > { %v11063_v41 = vpack.c.bf16 %v1174_v32, %v1170_v30 }
 0x31a   : > { %v1248_v42 = vrot.slane %v1240_v36, %v11061_v26  ;;  %v11067_v43 = vrot.slane %v1241_v37, %v11061_v26  ;;  %v11069_v44 = vpack.c.bf16 %v1176_v38, %v1172_v31  ;;  %v1290_v45 = vcombine.low %v1217_v33, %v1219_v40 }
 0x31b   : > { %v1291_v46 = vcombine.high %v1217_v33, %v1219_v40  ;;  %9458 = vmatpush3.bf16.msra.mxu0 %v11063_v41 }
 0x31c   : > { %v1264_v47 = vrot.slane %v1248_v42, %v11061_v26  ;;  %v11075_v48 = vrot.slane %v11067_v43, %v11061_v26  ;;  %9464 = vmatpush3.bf16.msra.mxu1 %v11069_v44  ;;  %v11086_v54 = vrot.slane %v1290_v45, %v11061_v26  ;;  %v1256_v57 = vcombine.high %v1248_v42, %v1248_v42 }
 0x31d   : > { %v11106_v22 = vrot.slane %v1291_v46, %v11061_v26 }
 0x31e   : > { %v1343_v50 = vrot.slane %v1264_v47, %v11044_v13  ;;  %v1347_v51 = vrot.slane %v1264_v47, %v11036_v7  ;;  %v1375_v52 = vrot.slane %v11075_v48, %v11044_v13  ;;  %v1379_v53 = vrot.slane %v11075_v48, %v11036_v7 }
 0x31f   : > { %v11092_v62 = vrot.slane %v11086_v54, %v11061_v26  ;;  %v11095_v1 = vrot.slane %v1256_v57, %v11061_v26  ;;  %v1286_v31 = vcombine.high %v1264_v47, %v1264_v47  ;;  %v11132_v63 = vrot.slane %v11106_v22, %v11061_v26 }
 0x320   : > { %v1500_v58 = vpack.c.bf16 %v1343_v50, %v1343_v50  ;;  %v1501_v59 = vpack.c.bf16 %v1347_v51, %v1347_v51  ;;  %v1508_v60 = vpack.c.bf16 %v1375_v52, %v1375_v52  ;;  %v1509_v61 = vpack.c.bf16 %v1379_v53, %v1379_v53 }
 0x321   : > { %v1411_v3 = vrot.slane %v11092_v62, %v11036_v7  ;;  %v1355_v16 = vrot.slane %v11095_v1, %v11036_v7  ;;  %v1407_v23 = vrot.slane %v11092_v62, %v11044_v13  ;;  %v1351_v32 = vrot.slane %v11095_v1, %v11044_v13 }
 0x322   : > { %v1591_v4 = vpack.i.b16 %v1508_v60, %v1508_v60  ;;  %v1598_v8 = vpack.i.b16 %v1509_v61, %v1509_v61  ;;  %v1542_v9 = vpack.i.b16 %v1501_v59, %v1501_v59  ;;  %v1535_v12 = vpack.i.b16 %v1500_v58, %v1500_v58 }
 0x323   : > { %v1517_v17 = vpack.c.bf16 %v1411_v3, %v1411_v3  ;;  %v1503_v34 = vpack.c.bf16 %v1355_v16, %v1355_v16  ;;  %v1516_v37 = vpack.c.bf16 %v1407_v23, %v1407_v23  ;;  %v1502_v51 = vpack.c.bf16 %v1351_v32, %v1351_v32 }
 0x324   : > { %v1547_v18 = vrot.slane %v1542_v9, %v11044_v13  ;;  %v1540_v19 = vrot.slane %v1535_v12, %v11044_v13  ;;  %v1603_v20 = vrot.slane %v1598_v8, %v11044_v13  ;;  %v1596_v21 = vrot.slane %v1591_v4, %v11044_v13 }
 0x325   : > { %v1654_v33 = vpack.i.b16 %v1517_v17, %v1517_v17  ;;  %v1556_v46 = vpack.i.b16 %v1503_v34, %v1503_v34  ;;  %v1363_v52 = vrot.slane %v1286_v31, %v11036_v7  ;;  %v1359_v60 = vrot.slane %v1286_v31, %v11044_v13 }
 0x326   : > { %v1759_v27 = vadd.bf16 %v1547_v18, %v11069_v44  ;;  %v1758_v28 = vadd.bf16 %v1540_v19, %v11063_v41  ;;  %v1767_v29 = vadd.bf16 %v1603_v20, %v11069_v44  ;;  %v1766_v30 = vadd.bf16 %v1596_v21, %v11063_v41 }
 0x327   : > { %v1561_v53 = vrot.slane %v1556_v46, %v11044_v13  ;;  %v1659_v55 = vrot.slane %v1654_v33, %v11044_v13  ;;  %v1647_v0 = vpack.i.b16 %v1516_v37, %v1516_v37  ;;  %v1549_v3 = vpack.i.b16 %v1502_v51, %v1502_v51 }
 0x328   : > { %vm1791_vm0 = vcmp.gt.bf16.partialorder %v1759_v27, 0  ;;  %v1823_v35 = vmul.bf16 1045249613, %v1759_v27  ;;  %vm1790_vm1 = vcmp.gt.bf16.partialorder %v1758_v28, 0  ;;  %v1822_v36 = vmul.bf16 1045249613, %v1758_v28 }
 0x329   : > { %vm1799_vm2 = vcmp.gt.bf16.partialorder %v1767_v29, 0  ;;  %v1831_v38 = vmul.bf16 1045249613, %v1767_v29  ;;  %v1830_v40 = vmul.bf16 1045249613, %v1766_v30  ;;  %vm1798_vm3 = vcmp.gt.bf16.partialorder %v1766_v30, 0 }
 0x32a   : > { %v1855_v42 = vsel %vm1791_vm0, %v1759_v27, %v1823_v35  ;;  %v1854_v45 = vsel %vm1790_vm1, %v1758_v28, %v1822_v36  ;;  %v1761_v61 = vadd.bf16 %v1561_v53, %v11069_v44  ;;  %v1775_v9 = vadd.bf16 %v1659_v55, %v11069_v44 }
 0x32b   : > { %v1901_v49 = vmul.bf16 %v11111_v24, %v1855_v42  ;;  %v1900_v47 = vmul.bf16 %v11114_v25, %v1854_v45  ;;  %v1863_v50 = vsel %vm1799_vm2, %v1767_v29, %v1831_v38  ;;  %v1862_v59 = vsel %vm1798_vm3, %v1766_v30, %v1830_v40 }
 0x32c   : > { %v1909_v58 = vmul.bf16 %v11111_v24, %v1863_v50  ;;  %v1908_v4 = vmul.bf16 %v11114_v25, %v1862_v59  ;;  %vm1793_vm4 = vcmp.gt.bf16.partialorder %v1761_v61, 0  ;;  %v1825_v8 = vmul.bf16 1045249613, %v1761_v61 }
 0x32d   : > { %v2303_v56 = vunpack.c.l.bf16 %v1901_v49  ;;  %v1933_v57 = vunpack.c.h.bf16 %v1900_v47  ;;  %v2304_v12 = vunpack.c.h.bf16 %v1901_v49  ;;  %v1554_v15 = vrot.slane %v1549_v3, %v11044_v13 }
 0x32e   : > { %v2312_v14 = vunpack.c.h.bf16 %v1909_v58  ;;  %v1505_v16 = vpack.c.bf16 %v1363_v52, %v1363_v52  ;;  %v1857_v17 = vsel %vm1793_vm4, %v1761_v61, %v1825_v8  ;;  %v1257_v18 = vcombine.high %v11067_v43, %v11067_v43 }
 0x32f   : > { %2335 = vadd.xlane.f32.xlu0 %v2303_v56  ;;  %1966 = vadd.xlane.f32.xlu1 %v1933_v57  ;;  %v1443_v19 = vrot.slane %v11132_v63, %v11036_v7  ;;  %v1652_v20 = vrot.slane %v1647_v0, %v11044_v13  ;;  %v1941_v21 = vunpack.c.h.bf16 %v1908_v4  ;;  %v1932_v23 = vunpack.c.l.bf16 %v1900_v47 }
 0x330   : > { %vm1807_vm5 = vcmp.gt.bf16.partialorder %v1775_v9, 0  ;;  %v1839_v27 = vmul.bf16 1045249613, %v1775_v9  ;;  %v1903_v28 = vmul.bf16 %v11111_v24, %v1857_v17  ;;  %v1760_v29 = vadd.bf16 %v1554_v15, %v11063_v41 }
 0x331   : > { %v1570_v30 = vpack.i.b16 %v1505_v16, %v1505_v16  ;;  %v1504_v31 = vpack.c.bf16 %v1359_v60, %v1359_v60  ;;  %v11145_v32 = vrot.slane %v1257_v18, %v11061_v26  ;;  %v1439_v43 = vrot.slane %v11132_v63, %v11044_v13 }
 0x332   : > { %v1525_v33 = vpack.c.bf16 %v1443_v19, %v1443_v19  ;;  %v2311_v34 = vunpack.c.l.bf16 %v1909_v58  ;;  %v1871_v35 = vsel %vm1807_vm5, %v1775_v9, %v1839_v27  ;;  %v1774_v36 = vadd.bf16 %v1652_v20, %v11063_v41 }
 0x333   : > { %2337 = vadd.xlane.f32.xlu0 %v2304_v12  ;;  %2353 = vadd.xlane.f32.xlu1 %v2312_v14  ;;  %v2305_v37 = vunpack.c.l.bf16 %v1903_v28  ;;  %v1824_v38 = vmul.bf16 1045249613, %v1760_v29  ;;  %v1575_v40 = vrot.slane %v1570_v30, %v11044_v13  ;;  %v1563_v42 = vpack.i.b16 %v1504_v31, %v1504_v31 }
 0x334   : > { %vm1792_vm6 = vcmp.gt.bf16.partialorder %v1760_v29, 0  ;;  %v1387_v45 = vrot.slane %v11145_v32, %v11036_v7  ;;  %v1524_v46 = vpack.c.bf16 %v1439_v43, %v1439_v43  ;;  %v1710_v49 = vpack.i.b16 %v1525_v33, %v1525_v33 }
 0x335   : > { %v1940_v47 = vunpack.c.l.bf16 %v1908_v4  ;;  %v1917_v50 = vmul.bf16 %v11111_v24, %v1871_v35  ;;  %vm1806_vm7 = vcmp.gt.bf16.partialorder %v1774_v36, 0  ;;  %v1838_v51 = vmul.bf16 1045249613, %v1774_v36 }
 0x336   : > { %v2306_v52 = vunpack.c.h.bf16 %v1903_v28  ;;  %v1856_v53 = vsel %vm1792_vm6, %v1760_v29, %v1824_v38  ;;  %v1763_v55 = vadd.bf16 %v1575_v40, %v11069_v44  ;;  %v1568_v56 = vrot.slane %v1563_v42, %v11044_v13 }
 0x337   : > { %1982 = vadd.xlane.f32.xlu1 %v1941_v21  ;;  %1964 = vadd.xlane.f32.xlu0 %v1932_v23  ;;  %v1287_v57 = vcombine.high %v11075_v48, %v11075_v48  ;;  %v1383_v58 = vrot.slane %v11145_v32, %v11044_v13  ;;  %v1703_v59 = vpack.i.b16 %v1524_v46, %v1524_v46  ;;  %v2320_v60 = vunpack.c.h.bf16 %v1917_v50 }
 0x338   : > { %v1902_v61 = vmul.bf16 %v11114_v25, %v1856_v53  ;;  %v1870_v0 = vsel %vm1806_vm7, %v1774_v36, %v1838_v51  ;;  %v1715_v3 = vrot.slane %v1710_v49, %v11044_v13  ;;  %v2319_v4 = vunpack.c.l.bf16 %v1917_v50 }
 0x339   : > { %v1827_v8 = vmul.bf16 1045249613, %v1763_v55  ;;  %v1762_v9 = vadd.bf16 %v1568_v56, %v11063_v41  ;;  %v1511_v12 = vpack.c.bf16 %v1387_v45, %v1387_v45  ;;  %vm1795_vm8 = vcmp.gt.bf16.partialorder %v1763_v55, 0 }
 0x33a   : > { %v1395_v48 = vrot.slane %v1287_v57, %v11036_v7  ;;  %v1306_v14 = vcombine.high %v11086_v54, %v11086_v54  ;;  %v1708_v15 = vrot.slane %v1703_v59, %v11044_v13  ;;  %v1935_v16 = vunpack.c.h.bf16 %v1902_v61 }
 0x33b   : > { %2339 = vadd.xlane.f32.xlu1 %v2305_v37  ;;  %2351 = vadd.xlane.f32.xlu0 %v2311_v34  ;;  %v1916_v17 = vmul.bf16 %v11114_v25, %v1870_v0  ;;  %v1783_v18 = vadd.bf16 %v1715_v3, %v11069_v44  ;;  %v1510_v19 = vpack.c.bf16 %v1383_v58, %v1383_v58  ;;  %v1934_v20 = vunpack.c.l.bf16 %v1902_v61 }
 0x33c   : > { %v1859_v21 = vsel %vm1795_vm8, %v1763_v55, %v1827_v8  ;;  %v1826_v23 = vmul.bf16 1045249613, %v1762_v9  ;;  %v1612_v27 = vpack.i.b16 %v1511_v12, %v1511_v12  ;;  %vm1794_vm9 = vcmp.gt.bf16.partialorder %v1762_v9, 0 }
 0x33d   : > { %v11170_v28 = vrot.slane %v1306_v14, %v11061_v26  ;;  %v1782_v54 = vadd.bf16 %v1708_v15, %v11063_v41  ;;  %v1949_v29 = vunpack.c.h.bf16 %v1916_v17  ;;  %v1948_v30 = vunpack.c.l.bf16 %v1916_v17 }
 0x33e   : > { %v1905_v31 = vmul.bf16 %v11111_v24, %v1859_v21  ;;  %v1847_v43 = vmul.bf16 1045249613, %v1783_v18  ;;  %v1858_v33 = vsel %vm1794_vm9, %v1762_v9, %v1826_v23  ;;  %v1617_v34 = vrot.slane %v1612_v27, %v11044_v13 }
 0x33f   : > { %2341 = vadd.xlane.f32.xlu1 %v2306_v52  ;;  %1980 = vadd.xlane.f32.xlu0 %v1940_v47  ;;  %v1605_v35 = vpack.i.b16 %v1510_v19, %v1510_v19  ;;  %v1513_v36 = vpack.c.bf16 %v1395_v48, %v1395_v48  ;;  %v1391_v37 = vrot.slane %v1287_v57, %v11044_v13  ;;  %vm1815_vm10 = vcmp.gt.bf16.partialorder %v1783_v18, 0 }
 0x340   : > { %v1419_v38 = vrot.slane %v11170_v28, %v11036_v7  ;;  %vm1814_vm11 = vcmp.gt.bf16.partialorder %v1782_v54, 0  ;;  %v2308_v40 = vunpack.c.h.bf16 %v1905_v31  ;;  %v2307_v42 = vunpack.c.l.bf16 %v1905_v31 }
 0x341   : > { %v1904_v45 = vmul.bf16 %v11114_v25, %v1858_v33  ;;  %v1846_v46 = vmul.bf16 1045249613, %v1782_v54  ;;  %v1879_v49 = vsel %vm1815_vm10, %v1783_v18, %v1847_v43  ;;  %v1769_v47 = vadd.bf16 %v1617_v34, %v11069_v44 }
 0x342   : > { %v1610_v50 = vrot.slane %v1605_v35, %v11044_v13  ;;  %v1626_v51 = vpack.i.b16 %v1513_v36, %v1513_v36  ;;  %v1512_v52 = vpack.c.bf16 %v1391_v37, %v1391_v37  ;;  %v1336_v53 = vcombine.high %v11092_v62, %v11092_v62 }
 0x343   : > { %2369 = vadd.xlane.f32.xlu1 %v2320_v60  ;;  %2367 = vadd.xlane.f32.xlu0 %v2319_v4  ;;  %v1415_v55 = vrot.slane %v11170_v28, %v11044_v13  ;;  %v1937_v56 = vunpack.c.h.bf16 %v1904_v45  ;;  %v1936_v57 = vunpack.c.l.bf16 %v1904_v45  ;;  %v1925_v58 = vmul.bf16 %v11111_v24, %v1879_v49 }
 0x344   : > { %v1878_v59 = vsel %vm1814_vm11, %v1782_v54, %v1846_v46  ;;  %v1833_v60 = vmul.bf16 1045249613, %v1769_v47  ;;  %v1768_v61 = vadd.bf16 %v1610_v50, %v11063_v41  ;;  %v1631_v0 = vrot.slane %v1626_v51, %v11044_v13 }
 0x345   : > { %v1519_v3 = vpack.c.bf16 %v1419_v38, %v1419_v38  ;;  %vm1801_vm12 = vcmp.gt.bf16.partialorder %v1769_v47, 0  ;;  %v1619_v4 = vpack.i.b16 %v1512_v52, %v1512_v52  ;;  %v1427_v62 = vrot.slane %v1336_v53, %v11036_v7 }
 0x346   : > { %v2328_v8 = vunpack.c.h.bf16 %v1925_v58  ;;  %v2327_v9 = vunpack.c.l.bf16 %v1925_v58  ;;  %v1924_v12 = vmul.bf16 %v11114_v25, %v1878_v59  ;;  %v1518_v48 = vpack.c.bf16 %v1415_v55, %v1415_v55 }
 0x347   : > { %1970 = vadd.xlane.f32.xlu1 %v1935_v16  ;;  %1968 = vadd.xlane.f32.xlu0 %v1934_v20  ;;  %v1865_v14 = vsel %vm1801_vm12, %v1769_v47, %v1833_v60  ;;  %v1832_v15 = vmul.bf16 1045249613, %v1768_v61  ;;  %v1771_v16 = vadd.bf16 %v1631_v0, %v11069_v44  ;;  %v1668_v17 = vpack.i.b16 %v1519_v3, %v1519_v3 }
 0x348   : > { %vm1800_vm13 = vcmp.gt.bf16.partialorder %v1768_v61, 0  ;;  %v1624_v18 = vrot.slane %v1619_v4, %v11044_v13  ;;  %v1288_v19 = vcombine.high %v11095_v1, %v11095_v1  ;;  %v1957_v20 = vunpack.c.h.bf16 %v1924_v12 }
 0x349   : > { %v1911_v21 = vmul.bf16 %v11111_v24, %v1865_v14  ;;  %v1661_v23 = vpack.i.b16 %v1518_v48, %v1518_v48  ;;  %v1521_v27 = vpack.c.bf16 %v1427_v62, %v1427_v62  ;;  %v1956_v54 = vunpack.c.l.bf16 %v1924_v12 }
 0x34a   : > { %v1673_v31 = vrot.slane %v1668_v17, %v11044_v13  ;;  %v1423_v43 = vrot.slane %v1336_v53, %v11044_v13  ;;  %vm1803_vm14 = vcmp.gt.bf16.partialorder %v1771_v16, 0  ;;  %v1770_v33 = vadd.bf16 %v1624_v18, %v11063_v41 }
 0x34b   : > { %1998 = vadd.xlane.f32.xlu1 %v1949_v29  ;;  %1996 = vadd.xlane.f32.xlu0 %v1948_v30  ;;  %v1864_v29 = vsel %vm1800_vm13, %v1768_v61, %v1832_v15  ;;  %v1835_v30 = vmul.bf16 1045249613, %v1771_v16  ;;  %v1307_v1 = vcombine.high %v11106_v22, %v11106_v22  ;;  %v2314_v34 = vunpack.c.h.bf16 %v1911_v21 }
 0x34c   : > { %v1910_v35 = vmul.bf16 %v11114_v25, %v1864_v29  ;;  %v1666_v36 = vrot.slane %v1661_v23, %v11044_v13  ;;  %v1682_v37 = vpack.i.b16 %v1521_v27, %v1521_v27  ;;  %v2313_v38 = vunpack.c.l.bf16 %v1911_v21 }
 0x34d   : > { %v1371_v45 = vrot.slane %v1288_v19, %v11036_v7  ;;  %v1834_v46 = vmul.bf16 1045249613, %v1770_v33  ;;  %v1520_v49 = vpack.c.bf16 %v1423_v43, %v1423_v43  ;;  %v11206_v47 = vrot.slane %v1307_v1, %v11061_v26 }
 0x34e   : > { %vm1802_vm15 = vcmp.gt.bf16.partialorder %v1770_v33, 0  ;;  %v1776_v50 = vadd.bf16 %v1666_v36, %v11063_v41  ;;  %v1687_v51 = vrot.slane %v1682_v37, %v11044_v13  ;;  %v1943_v52 = vunpack.c.h.bf16 %v1910_v35 }
 0x34f   : > { %2345 = vadd.xlane.f32.xlu1 %v2308_v40  ;;  %2343 = vadd.xlane.f32.xlu0 %v2307_v42  ;;  %v1867_v40 = vsel %vm1803_vm14, %v1771_v16, %v1835_v30  ;;  %v1777_v42 = vadd.bf16 %v1673_v31, %v11069_v44  ;;  %v1942_v53 = vunpack.c.l.bf16 %v1910_v35  ;;  %v1675_v58 = vpack.i.b16 %v1520_v49, %v1520_v49 }
 0x350   : > { %v1913_v22 = vmul.bf16 %v11111_v24, %v1867_v40  ;;  %v1367_v59 = vrot.slane %v1288_v19, %v11044_v13  ;;  %v1451_v60 = vrot.slane %v11206_v47, %v11036_v7  ;;  %vm1808_vm1 = vcmp.gt.bf16.partialorder %v1776_v50, 0 }
 0x351   : > { %v1841_v55 = vmul.bf16 1045249613, %v1777_v42  ;;  %vm1809_vm0 = vcmp.gt.bf16.partialorder %v1777_v42, 0  ;;  %v1840_v0 = vmul.bf16 1045249613, %v1776_v50  ;;  %v1779_v3 = vadd.bf16 %v1687_v51, %v11069_v44 }
 0x352   : > { %v2316_v61 = vunpack.c.h.bf16 %v1913_v22  ;;  %v2315_v4 = vunpack.c.l.bf16 %v1913_v22  ;;  %v1680_v12 = vrot.slane %v1675_v58, %v11044_v13  ;;  %v1506_v48 = vpack.c.bf16 %v1367_v59, %v1367_v59 }
 0x353   : > { %1974 = vadd.xlane.f32.xlu1 %v1937_v56  ;;  %1972 = vadd.xlane.f32.xlu0 %v1936_v57  ;;  %v1507_v56 = vpack.c.bf16 %v1371_v45, %v1371_v45  ;;  %v1866_v57 = vsel %vm1802_vm15, %v1770_v33, %v1834_v46  ;;  %v1337_v14 = vcombine.high %v11132_v63, %v11132_v63  ;;  %v1843_v18 = vmul.bf16 1045249613, %v1779_v3 }
 0x354   : > { %v1912_v62 = vmul.bf16 %v11114_v25, %v1866_v57  ;;  %v1447_v15 = vrot.slane %v11206_v47, %v11044_v13  ;;  %v1872_v17 = vsel %vm1808_vm1, %v1776_v50, %v1840_v0  ;;  %v1527_v23 = vpack.c.bf16 %v1451_v60, %v1451_v60 }
 0x355   : > { %vm1811_vm2 = vcmp.gt.bf16.partialorder %v1779_v3, 0  ;;  %v1778_v27 = vadd.bf16 %v1680_v12, %v11063_v41  ;;  %v1459_v63 = vrot.slane %v1337_v14, %v11036_v7  ;;  %v1918_v30 = vmul.bf16 %v11114_v25, %v1872_v17 }
 0x356   : > { %v1945_v19 = vunpack.c.h.bf16 %v1912_v62  ;;  %v1526_v31 = vpack.c.bf16 %v1447_v15, %v1447_v15  ;;  %v1875_v33 = vsel %vm1811_vm2, %v1779_v3, %v1843_v18  ;;  %v1455_v37 = vrot.slane %v1337_v14, %v11044_v13 }
 0x357   : > { %2385 = vadd.xlane.f32.xlu1 %v2328_v8  ;;  %2383 = vadd.xlane.f32.xlu0 %v2327_v9  ;;  %v1873_v8 = vsel %vm1809_vm0, %v1777_v42, %v1841_v55  ;;  %v1584_v9 = vpack.i.b16 %v1507_v56, %v1507_v56  ;;  %v1842_v35 = vmul.bf16 1045249613, %v1778_v27  ;;  %vm1810_vm3 = vcmp.gt.bf16.partialorder %v1778_v27, 0 }
 0x358   : > { %v1919_v16 = vmul.bf16 %v11111_v24, %v1873_v8  ;;  %v1717_v40 = vpack.i.b16 %v1526_v31, %v1526_v31  ;;  %v1529_v42 = vpack.c.bf16 %v1459_v63, %v1459_v63  ;;  %v1951_v45 = vunpack.c.h.bf16 %v1918_v30 }
 0x359   : > { %v1589_v21 = vrot.slane %v1584_v9, %v11044_v13  ;;  %v1950_v46 = vunpack.c.l.bf16 %v1918_v30  ;;  %v1289_v50 = vcombine.high %v11145_v32, %v11145_v32  ;;  %v1874_v51 = vsel %vm1810_vm3, %v1778_v27, %v1842_v35 }
 0x35a   : > { %v2322_v29 = vunpack.c.h.bf16 %v1919_v16  ;;  %v2321_v43 = vunpack.c.l.bf16 %v1919_v16  ;;  %v1722_v55 = vrot.slane %v1717_v40, %v11044_v13  ;;  %v1738_v56 = vpack.i.b16 %v1529_v42, %v1529_v42 }
 0x35b   : > { %2014 = vadd.xlane.f32.xlu1 %v1957_v20  ;;  %2012 = vadd.xlane.f32.xlu0 %v1956_v54  ;;  %v1944_v20 = vunpack.c.l.bf16 %v1912_v62  ;;  %v1577_v54 = vpack.i.b16 %v1506_v48, %v1506_v48  ;;  %v1765_v1 = vadd.bf16 %v1589_v21, %v11069_v44  ;;  %v1528_v57 = vpack.c.bf16 %v1455_v37, %v1455_v37 }
 0x35c   : > { %v1920_v59 = vmul.bf16 %v11114_v25, %v1874_v51  ;;  %v1403_v32 = vrot.slane %v1289_v50, %v11036_v7  ;;  %v1743_v62 = vrot.slane %v1738_v56, %v11044_v13  ;;  %v1338_v9 = vcombine.high %v11170_v28, %v11170_v28 }
 0x35d   : > { %v1582_v36 = vrot.slane %v1577_v54, %v11044_v13  ;;  %v1829_v49 = vmul.bf16 1045249613, %v1765_v1  ;;  %vm1797_vm4 = vcmp.gt.bf16.partialorder %v1765_v1, 0  ;;  %v1731_v8 = vpack.i.b16 %v1528_v57, %v1528_v57 }
 0x35e   : > { %v1953_v12 = vunpack.c.h.bf16 %v1920_v59  ;;  %v1952_v48 = vunpack.c.l.bf16 %v1920_v59  ;;  %v1515_v16 = vpack.c.bf16 %v1403_v32, %v1403_v32  ;;  %v1399_v17 = vrot.slane %v1289_v50, %v11044_v13 }
 0x35f   : > { %2357 = vadd.xlane.f32.xlu1 %v2314_v34  ;;  %2355 = vadd.xlane.f32.xlu0 %v2313_v38  ;;  %v1724_v34 = vpack.i.b16 %v1527_v23, %v1527_v23  ;;  %v1921_v38 = vmul.bf16 %v11111_v24, %v1875_v33  ;;  %v1861_v60 = vsel %vm1797_vm4, %v1765_v1, %v1829_v49  ;;  %vm2073_vm0 = vcmask 130112  }
 0x360   : > { %v1907_v3 = vmul.bf16 %v11111_v24, %v1861_v60  ;;  %v1736_v21 = vrot.slane %v1731_v8, %v11044_v13  ;;  %v1640_v54 = vpack.i.b16 %v1515_v16, %v1515_v16  ;;  %v1514_v63 = vpack.c.bf16 %v1399_v17, %v1399_v17 }
 0x361   : > { %v1729_v22 = vrot.slane %v1724_v34, %v11044_v13  ;;  %v2323_v58 = vunpack.c.l.bf16 %v1921_v38  ;;  %v1339_v30 = vcombine.high %v11206_v47, %v11206_v47  ;;  %v1431_v40 = vrot.slane %v1338_v9, %v11044_v13 }
 0x362   : > { %v2310_v18 = vunpack.c.h.bf16 %v1907_v3  ;;  %v2309_v23 = vunpack.c.l.bf16 %v1907_v3  ;;  %v1786_v35 = vadd.bf16 %v1736_v21, %v11063_v41  ;;  %v1633_v37 = vpack.i.b16 %v1514_v63, %v1514_v63 }
 0x363   : > { %1986 = vadd.xlane.f32.xlu1 %v1943_v52  ;;  %1984 = vadd.xlane.f32.xlu0 %v1942_v53  ;;  %v1764_v52 = vadd.bf16 %v1582_v36, %v11063_v41  ;;  %v2324_v53 = vunpack.c.h.bf16 %v1921_v38  ;;  %v1645_v36 = vrot.slane %v1640_v54, %v11044_v13  ;;  %v1463_v60 = vrot.slane %v1339_v30, %v11044_v13 }
 0x364   : > { %vm1818_vm9 = vcmp.gt.bf16.partialorder %v1786_v35, 0  ;;  %v1850_v49 = vmul.bf16 1045249613, %v1786_v35  ;;  %v1638_v51 = vrot.slane %v1633_v37, %v11044_v13  ;;  %vm2210_vm1 = vcmask 1041409  }
 0x365   : > { %v1828_v0 = vmul.bf16 1045249613, %v1764_v52  ;;  %vm1796_vm5 = vcmp.gt.bf16.partialorder %v1764_v52, 0  ;;  %v1773_v50 = vadd.bf16 %v1645_v36, %v11069_v44  ;;  %vm2212_vm2 = vcmask 1042434  }
 0x366   : > { %vm2214_vm3 = vcmask 1043459   ;;  %vm2216_vm4 = vcmask 1044484  }
 0x367   : > { %2361 = vadd.xlane.f32.xlu1 %v2316_v61  ;;  %2359 = vadd.xlane.f32.xlu0 %v2315_v4  ;;  %v1785_v61 = vadd.bf16 %v1729_v22, %v11069_v44  ;;  %v1784_v4 = vadd.bf16 %v1722_v55, %v11063_v41  ;;  %v1860_v15 = vsel %vm1796_vm5, %v1764_v52, %v1828_v0  ;;  %vm1805_vm10 = vcmp.gt.bf16.partialorder %v1773_v50, 0 }
 0x368   : > { %v1906_v27 = vmul.bf16 %v11114_v25, %v1860_v15  ;;  %v1467_v22 = vrot.slane %v1339_v30, %v11036_v7  ;;  %v1772_v0 = vadd.bf16 %v1638_v51, %v11063_v41  ;;  %vm2218_vm5 = vcmask 1045509  }
 0x369   : > { %v1849_v14 = vmul.bf16 1045249613, %v1785_v61  ;;  %vm1817_vm6 = vcmp.gt.bf16.partialorder %v1785_v61, 0  ;;  %vm1816_vm7 = vcmp.gt.bf16.partialorder %v1784_v4, 0 }
 0x36a   : > { %v1939_v33 = vunpack.c.h.bf16 %v1906_v27  ;;  %v1938_v1 = vunpack.c.l.bf16 %v1906_v27  ;;  %v1531_v59 = vpack.c.bf16 %v1467_v22, %v1467_v22  ;;  %vm1804_vm11 = vcmp.gt.bf16.partialorder %v1772_v0, 0 }
 0x36b   : > { %1990 = vadd.xlane.f32.xlu1 %v1945_v19  ;;  %1988 = vadd.xlane.f32.xlu0 %v1944_v20  ;;  %v1848_v19 = vmul.bf16 1045249613, %v1784_v4  ;;  %v1787_v20 = vadd.bf16 %v1743_v62, %v11069_v44  ;;  %v1881_v28 = vsel %vm1817_vm6, %v1785_v61, %v1849_v14  ;;  %v1837_v61 = vmul.bf16 1045249613, %v1773_v50 }
 0x36c   : > { %v1927_v31 = vmul.bf16 %v11111_v24, %v1881_v28  ;;  %v1836_v14 = vmul.bf16 1045249613, %v1772_v0  ;;  %vm2220_vm6 = vcmask 1046534  }
 0x36d   : > { %vm1819_vm8 = vcmp.gt.bf16.partialorder %v1787_v20, 0  ;;  %v1851_v34 = vmul.bf16 1045249613, %v1787_v20 }
 0x36e   : > { %v2330_v42 = vunpack.c.h.bf16 %v1927_v31  ;;  %v1868_v21 = vsel %vm1804_vm11, %v1772_v0, %v1836_v14  ;;  %vm10530_vm11 = vmmov 0  }
 0x36f   : > { %2373 = vadd.xlane.f32.xlu1 %v2322_v29  ;;  %2371 = vadd.xlane.f32.xlu0 %v2321_v43  ;;  %v1435_v29 = vrot.slane %v1338_v9, %v11036_v7  ;;  %v1880_v43 = vsel %vm1816_vm7, %v1784_v4, %v1848_v19  ;;  %v1752_v9 = vpack.i.b16 %v1531_v59, %v1531_v59  ;;  %vm2222_vm7 = vcmask 1047559  }
 0x370   : > { %v1926_v47 = vmul.bf16 %v11114_v25, %v1880_v43  ;;  %9465 = vmatprep.mubr.msk.bf16.mxu1 %vm10530_vm11, %v12899_v11  ;;  %9459 = vmatprep.mubr.msk.bf16.mxu0 %vm10530_vm11, %v12899_v11 }
 0x371   : > { %v1523_v38 = vpack.c.bf16 %v1435_v29, %v1435_v29  ;;  %v1914_v29 = vmul.bf16 %v11114_v25, %v1868_v21 }
 0x372   : > { %v1959_v55 = vunpack.c.h.bf16 %v1926_v47  ;;  %v1958_v57 = vunpack.c.l.bf16 %v1926_v47 }
 0x373   : > { %2002 = vadd.xlane.f32.xlu1 %v1951_v45  ;;  %2000 = vadd.xlane.f32.xlu0 %v1950_v46  ;;  %v2329_v45 = vunpack.c.l.bf16 %v1927_v31  ;;  %v1883_v46 = vsel %vm1819_vm8, %v1787_v20, %v1851_v34  ;;  %v1696_v52 = vpack.i.b16 %v1523_v38, %v1523_v38  ;;  %v1757_v20 = vrot.slane %v1752_v9, %v11044_v13 }
 0x374   : > { %v1929_v56 = vmul.bf16 %v11111_v24, %v1883_v46  ;;  %v1946_v34 = vunpack.c.l.bf16 %v1914_v29 }
 0x375   : > { %v1701_v32 = vrot.slane %v1696_v52, %v11044_v13  ;;  %v1789_v43 = vadd.bf16 %v1757_v20, %v11069_v44 }
 0x376   : > { %v2332_v4 = vunpack.c.h.bf16 %v1929_v56  ;;  %v2331_v62 = vunpack.c.l.bf16 %v1929_v56 }
 0x377   : > { %2377 = vadd.xlane.f32.xlu1 %v2324_v53  ;;  %2375 = vadd.xlane.f32.xlu0 %v2323_v58  ;;  %v1522_v53 = vpack.c.bf16 %v1431_v40, %v1431_v40  ;;  %v1882_v58 = vsel %vm1818_vm9, %v1786_v35, %v1850_v49  ;;  %v1781_v15 = vadd.bf16 %v1701_v32, %v11069_v44  ;;  %v1853_v37 = vmul.bf16 1045249613, %v1789_v43 }
 0x378   : > { %v1928_v8 = vmul.bf16 %v11114_v25, %v1882_v58  ;;  %vm1821_vm14 = vcmp.gt.bf16.partialorder %v1789_v43, 0  ;;  %vm2235_vm9 = vcmask 130048  }
 0x379   : > { %v1689_v3 = vpack.i.b16 %v1522_v53, %v1522_v53  ;;  %vm1813_vm12 = vcmp.gt.bf16.partialorder %v1781_v15, 0 }
 0x37a   : > { %v1961_v17 = vunpack.c.h.bf16 %v1928_v8 }
 0x37b   : > { %2006 = vadd.xlane.f32.xlu1 %v1953_v12  ;;  %2004 = vadd.xlane.f32.xlu0 %v1952_v48  ;;  %v1530_v12 = vpack.c.bf16 %v1463_v60, %v1463_v60  ;;  %v1869_v48 = vsel %vm1805_vm10, %v1773_v50, %v1837_v61  ;;  %v1694_v16 = vrot.slane %v1689_v3, %v11044_v13 }
 0x37c   : > { %v1915_v19 = vmul.bf16 %v11111_v24, %v1869_v48 }
 0x37d   : > { %v1780_v27 = vadd.bf16 %v1694_v16, %v11063_v41  ;;  %v1745_v28 = vpack.i.b16 %v1530_v12, %v1530_v12 }
 0x37e   : > { %v2318_v54 = vunpack.c.h.bf16 %v1915_v19  ;;  %v2317_v63 = vunpack.c.l.bf16 %v1915_v19 }
 0x37f   : > { %2349 = vadd.xlane.f32.xlu1 %v2310_v18  ;;  %2347 = vadd.xlane.f32.xlu0 %v2309_v23  ;;  %v1960_v18 = vunpack.c.l.bf16 %v1928_v8  ;;  %v1845_v23 = vmul.bf16 1045249613, %v1781_v15  ;;  %v1844_v31 = vmul.bf16 1045249613, %v1780_v27  ;;  %vm1812_vm13 = vcmp.gt.bf16.partialorder %v1780_v27, 0 }
 0x381   : > { %v1877_v30 = vsel %vm1813_vm12, %v1781_v15, %v1845_v23  ;;  %v1876_v36 = vsel %vm1812_vm13, %v1780_v27, %v1844_v31 }
 0x382   : > { %v1923_v35 = vmul.bf16 %v11111_v24, %v1877_v30  ;;  %v1922_v44 = vmul.bf16 %v11114_v25, %v1876_v36 }
 0x383   : > { %1978 = vadd.xlane.f32.xlu1 %v1939_v33  ;;  %1976 = vadd.xlane.f32.xlu0 %v1938_v1  ;;  %v1750_v33 = vrot.slane %v1745_v28, %v11044_v13  ;;  %v1947_v1 = vunpack.c.h.bf16 %v1914_v29 }
 0x384   : > { %v2326_v40 = vunpack.c.h.bf16 %v1923_v35  ;;  %v1955_v46 = vunpack.c.h.bf16 %v1922_v44  ;;  %v1954_v49 = vunpack.c.l.bf16 %v1922_v44 }
 0x385   : > { %v1788_v38 = vadd.bf16 %v1750_v33, %v11063_v41 }
 0x387   : > { %2389 = vadd.xlane.f32.xlu1 %v2330_v42  ;;  %2387 = vadd.xlane.f32.xlu0 %v2329_v45  ;;  %v2325_v42 = vunpack.c.l.bf16 %v1923_v35  ;;  %v1885_v45 = vsel %vm1821_vm14, %v1789_v43, %v1853_v37  ;;  %v1852_v47 = vmul.bf16 1045249613, %v1788_v38  ;;  %vm1820_vm15 = vcmp.gt.bf16.partialorder %v1788_v38, 0 }
 0x388   : > { %v1931_v22 = vmul.bf16 %v11111_v24, %v1885_v45 }
 0x389   : > { %v1884_v50 = vsel %vm1820_vm15, %v1788_v38, %v1852_v47  ;;  %v2063_v38 = vand.u32 127, %v604_v5 }
 0x38a   : > { %v2334_v41 = vunpack.c.h.bf16 %v1931_v22  ;;  %v2333_v51 = vunpack.c.l.bf16 %v1931_v22  ;;  %v1930_v52 = vmul.bf16 %v11114_v25, %v1884_v50 }
 0x38b   : > { %2018 = vadd.xlane.f32.xlu1 %v1959_v55  ;;  %2016 = vadd.xlane.f32.xlu0 %v1958_v57  ;;  %v2068_v44 = vadd.s32 4294967288, %v2063_v38 }
 0x38c   : > { %v1963_v53 = vunpack.c.h.bf16 %v1930_v52  ;;  %v1962_v55 = vunpack.c.l.bf16 %v1930_v52 }
 0x38f   : > { %2393 = vadd.xlane.f32.xlu1 %v2332_v4  ;;  %2391 = vadd.xlane.f32.xlu0 %v2331_v62 }
 0x393   : > { %2022 = vadd.xlane.f32.xlu1 %v1961_v17  ;;  %2020 = vadd.xlane.f32.xlu0 %v1960_v18 }
 0x397   : > { %2365 = vadd.xlane.f32.xlu1 %v2318_v54  ;;  %2363 = vadd.xlane.f32.xlu0 %v2317_v63 }
 0x39b   : > { %1994 = vadd.xlane.f32.xlu1 %v1947_v1  ;;  %1992 = vadd.xlane.f32.xlu0 %v1946_v34 }
 0x39f   : > { %2381 = vadd.xlane.f32.xlu1 %v2326_v40  ;;  %2379 = vadd.xlane.f32.xlu0 %v2325_v42 }
 0x3a3   : > { %2010 = vadd.xlane.f32.xlu1 %v1955_v46  ;;  %2008 = vadd.xlane.f32.xlu0 %v1954_v49  ;;  %v11350_v46 = vsub.s32 %v2068_v44, %v11033_v6  ;;  %v11353_v49 = vsub.s32 %v2063_v38, %v11033_v6 }
 0x3a7   : > { %2397 = vadd.xlane.f32.xlu1 %v2334_v41  ;;  %2395 = vadd.xlane.f32.xlu0 %v2333_v51 }
 0x3ab   : > { %2026 = vadd.xlane.f32.xlu1 %v1963_v53  ;;  %2024 = vadd.xlane.f32.xlu0 %v1962_v55 }
 0x3bc   : > { %v11276_v56 = vpop.xlane.xlu0 %2335  ;;  %v11278_v57 = vpop.xlane.xlu1 %1966 }
 0x3bd   : > { %v2434_v44 = vrot.slane %v11276_v56, %v11353_v49 }
 0x3c0   : > { %v11280_v58 = vpop.xlane.xlu0 %2337  ;;  %v11282_v24 = vpop.xlane.xlu1 %2353 }
 0x3c1   : > { %v2438_v5 = vrot.slane %v11280_v58, %v11350_v46 }
 0x3c4   : > { %v11284_v59 = vpop.xlane.xlu1 %1982  ;;  %v11286_v60 = vpop.xlane.xlu0 %1964 }
 0x3c8   : > { %v2340_v61 = vpop.xlane.xlu1 %2339  ;;  %v11288_v25 = vpop.xlane.xlu0 %2351 }
 0x3c9   : > { %v2443_v53 = vrot.slane %v2340_v61, %v11353_v49 }
 0x3cc   : > { %v2342_v0 = vpop.xlane.xlu1 %2341  ;;  %v11290_v32 = vpop.xlane.xlu0 %1980 }
 0x3cd   : > { %v2447_v41 = vrot.slane %v2342_v0, %v11350_v46 }
 0x3cf   : > { %v2448_v58 = vsel %vm2073_vm0, %v2447_v41, %v2443_v53  ;;  %v2067_v41 = vrot.slane %v11286_v60, %v11353_v49  ;;  %v2072_v60 = vrot.slane %v11278_v57, %v11350_v46 }
 0x3d0   : > { %v11292_v3 = vpop.xlane.xlu1 %2369  ;;  %v11294_v4 = vpop.xlane.xlu0 %2367 }
 0x3d4   : > { %v11296_v62 = vpop.xlane.xlu1 %1970  ;;  %v11298_v8 = vpop.xlane.xlu0 %1968 }
 0x3d5   : > { %v2078_v61 = vrot.slane %v11298_v8, %v11353_v49 }
 0x3d8   : > { %v11300_v9 = vpop.xlane.xlu1 %1998  ;;  %v11302_v12 = vpop.xlane.xlu0 %1996 }
 0x3dc   : > { %v2346_v48 = vpop.xlane.xlu1 %2345  ;;  %v2344_v14 = vpop.xlane.xlu0 %2343 }
 0x3dd   : > { %v2456_v51 = vrot.slane %v2346_v48, %v11350_v46  ;;  %v2452_v52 = vrot.slane %v2344_v14, %v11353_v49  ;;  %v2082_v48 = vrot.slane %v11296_v62, %v11350_v46  ;;  %v2439_v14 = vsel %vm2073_vm0, %v2438_v5, %v2434_v44  ;;  %v11407_v44 = vld [vmem:[%s10888_s9] sm:$0xff] }
 0x3de   : > { %v2470_v5 = vrot.slane %v11288_v25, %v11353_v49  ;;  %v2105_v25 = vrot.slane %v11290_v32, %v11353_v49  ;;  %vm2028_vm8 = vcmp.gt.f32.partialorder %v11407_v44, 0.0 }
 0x3e0   : > { %v11304_v15 = vpop.xlane.xlu1 %1974  ;;  %v11306_v16 = vpop.xlane.xlu0 %1972 }
 0x3e1   : > { %v2091_v56 = vrot.slane %v11304_v15, %v11350_v46 }
 0x3e4   : > { %v11308_v17 = vpop.xlane.xlu1 %2385  ;;  %v11310_v18 = vpop.xlane.xlu0 %2383 }
 0x3e8   : > { %v11312_v19 = vpop.xlane.xlu1 %2014  ;;  %v11314_v20 = vpop.xlane.xlu0 %2012 }
 0x3ec   : > { %v11316_v21 = vpop.xlane.xlu1 %2357  ;;  %v11318_v23 = vpop.xlane.xlu0 %2355 }
 0x3ed   : > { %v2483_v57 = vrot.slane %v11316_v21, %v11350_v46 }
 0x3f0   : > { %v11320_v27 = vpop.xlane.xlu1 %1986  ;;  %v11322_v28 = vpop.xlane.xlu0 %1984 }
 0x3f4   : > { %v11324_v54 = vpop.xlane.xlu1 %2361  ;;  %v11326_v63 = vpop.xlane.xlu0 %2359 }
 0x3f8   : > { %v11328_v29 = vpop.xlane.xlu1 %1990  ;;  %v11330_v30 = vpop.xlane.xlu0 %1988 }
 0x3fc   : > { %v11332_v31 = vpop.xlane.xlu1 %2373  ;;  %v11334_v43 = vpop.xlane.xlu0 %2371 }
 0x400   : > { %v11336_v33 = vpop.xlane.xlu1 %2002  ;;  %v11338_v1 = vpop.xlane.xlu0 %2000 }
 0x404   : > { %v11340_v34 = vpop.xlane.xlu1 %2377  ;;  %v11342_v35 = vpop.xlane.xlu0 %2375 }
 0x408   : > { %v11344_v36 = vpop.xlane.xlu1 %2006  ;;  %v11346_v37 = vpop.xlane.xlu0 %2004 }
 0x40c   : > { %v2350_v40 = vpop.xlane.xlu1 %2349  ;;  %v2348_v42 = vpop.xlane.xlu0 %2347 }
 0x40d   : > { %v2465_v55 = vrot.slane %v2350_v40, %v11350_v46  ;;  %v2461_v38 = vrot.slane %v2348_v42, %v11353_v49  ;;  %v2457_v40 = vsel %vm2073_vm0, %v2456_v51, %v2452_v52  ;;  %v2087_v42 = vrot.slane %v11306_v16, %v11353_v49 }
 0x40e   : > { %v2575_v51 = vsel %vm2210_vm1, %v2448_v58, %v2439_v14  ;;  %v2083_v16 = vsel %vm2073_vm0, %v2082_v48, %v2078_v61  ;;  %v2074_v58 = vsel %vm2073_vm0, %v2072_v60, %v2067_v41  ;;  %v2479_v48 = vrot.slane %v11318_v23, %v11353_v49 }
 0x40f   : > { %v2466_v53 = vsel %vm2073_vm0, %v2465_v55, %v2461_v38  ;;  %v2092_v55 = vsel %vm2073_vm0, %v2091_v56, %v2087_v42  ;;  %v2211_v14 = vsel %vm2210_vm1, %v2083_v16, %v2074_v58  ;;  %v2488_v41 = vrot.slane %v11326_v63, %v11353_v49 }
 0x410   : > { %v1979_v45 = vpop.xlane.xlu1 %1978  ;;  %v1977_v47 = vpop.xlane.xlu0 %1976  ;;  %v2213_v42 = vsel %vm2212_vm2, %v2092_v55, %v2211_v14  ;;  %v2127_v60 = vrot.slane %v11328_v29, %v11350_v46  ;;  %v2519_v63 = vrot.slane %v11332_v31, %v11350_v46  ;;  %v2506_v29 = vrot.slane %v11294_v4, %v11353_v49 }
 0x411   : > { %v2100_v62 = vrot.slane %v1979_v45, %v11350_v46  ;;  %v2096_v8 = vrot.slane %v1977_v47, %v11353_v49  ;;  %v2576_v45 = vsel %vm2212_vm2, %v2457_v40, %v2575_v51  ;;  %v2474_v47 = vrot.slane %v11282_v24, %v11350_v46 }
 0x412   : > { %v2577_v38 = vsel %vm2214_vm3, %v2466_v53, %v2576_v45  ;;  %v2109_v24 = vrot.slane %v11284_v59, %v11350_v46  ;;  %v2492_v59 = vrot.slane %v11324_v54, %v11350_v46  ;;  %v2114_v51 = vrot.slane %v11322_v28, %v11353_v49 }
 0x413   : > { %v2101_v61 = vsel %vm2073_vm0, %v2100_v62, %v2096_v8  ;;  %v2475_v32 = vsel %vm2073_vm0, %v2474_v47, %v2470_v5  ;;  %v2510_v62 = vrot.slane %v11292_v3, %v11350_v46  ;;  %v2484_v8 = vsel %vm2073_vm0, %v2483_v57, %v2479_v48 }
 0x414   : > { %v11355_v22 = vpop.xlane.xlu1 %2389  ;;  %v11357_v50 = vpop.xlane.xlu0 %2387  ;;  %v2578_v21 = vsel %vm2216_vm4, %v2475_v32, %v2577_v38  ;;  %v2110_v23 = vsel %vm2073_vm0, %v2109_v24, %v2105_v25  ;;  %v2215_v53 = vsel %vm2214_vm3, %v2101_v61, %v2213_v42  ;;  %v2118_v5 = vrot.slane %v11320_v27, %v11350_v46 }
 0x415   : > { %v2123_v54 = vrot.slane %v11330_v30, %v11353_v49  ;;  %v2579_v3 = vsel %vm2218_vm5, %v2484_v8, %v2578_v21  ;;  %v2515_v47 = vrot.slane %v11334_v43, %v11353_v49  ;;  %v2217_v25 = vsel %vm2216_vm4, %v2110_v23, %v2215_v53 }
 0x416   : > { %v2493_v30 = vsel %vm2073_vm0, %v2492_v59, %v2488_v41  ;;  %v2528_v31 = vrot.slane %v11340_v34, %v11350_v46  ;;  %v2524_v55 = vrot.slane %v11342_v35, %v11353_v49  ;;  %v2145_v43 = vrot.slane %v11300_v9, %v11350_v46 }
 0x417   : > { %v2119_v38 = vsel %vm2073_vm0, %v2118_v5, %v2114_v51  ;;  %v2580_v57 = vsel %vm2220_vm6, %v2493_v30, %v2579_v3  ;;  %v2141_v4 = vrot.slane %v11302_v12, %v11353_v49  ;;  %v2128_v48 = vsel %vm2073_vm0, %v2127_v60, %v2123_v54 }
 0x418   : > { %v11369_v0 = vpop.xlane.xlu1 %2018  ;;  %v11371_v2 = vpop.xlane.xlu0 %2016  ;;  %v2219_v35 = vsel %vm2218_vm5, %v2119_v38, %v2217_v25  ;;  %v2520_v32 = vsel %vm2073_vm0, %v2519_v63, %v2515_v47  ;;  %v2154_v12 = vrot.slane %v11336_v33, %v11350_v46  ;;  %v2150_v21 = vrot.slane %v11338_v1, %v11353_v49 }
 0x419   : > { %v2529_v23 = vsel %vm2073_vm0, %v2528_v31, %v2524_v55  ;;  %v2163_v41 = vrot.slane %v11344_v36, %v11350_v46  ;;  %v2159_v53 = vrot.slane %v11346_v37, %v11353_v49  ;;  %v2221_v5 = vsel %vm2220_vm6, %v2128_v48, %v2219_v35  ;;  %v11534_v35 = vld [vmem:[%s10888_s9 + $0x8] sm:$0xff] }
 0x41a   : > { %v2511_v33 = vsel %vm2073_vm0, %v2510_v62, %v2506_v29  ;;  %v2546_v1 = vrot.slane %v11308_v17, %v11350_v46  ;;  %v2542_v51 = vrot.slane %v11310_v18, %v11353_v49  ;;  %v2146_v62 = vsel %vm2073_vm0, %v2145_v43, %v2141_v4 }
 0x41b   : > { %v2582_v63 = vsel %vm2210_vm1, %v2520_v32, %v2511_v33  ;;  %v2155_v17 = vsel %vm2073_vm0, %v2154_v12, %v2150_v21  ;;  %v2164_v47 = vsel %vm2073_vm0, %v2163_v41, %v2159_v53  ;;  %v2181_v30 = vrot.slane %v11312_v19, %v11350_v46 }
 0x41c   : > { %v11392_v52 = vpop.xlane.xlu1 %2393  ;;  %v11394_v15 = vpop.xlane.xlu0 %2391  ;;  %v2583_v18 = vsel %vm2212_vm2, %v2529_v23, %v2582_v63  ;;  %v2547_v29 = vsel %vm2073_vm0, %v2546_v1, %v2542_v51  ;;  %v2177_v31 = vrot.slane %v11314_v20, %v11353_v49  ;;  %vm12900_vm10 = vcmp.gt.f32.partialorder %v11534_v35, 0.0 }
 0x41d   : > { %v2564_v19 = vrot.slane %v11392_v52, %v11350_v46  ;;  %v2560_v20 = vrot.slane %v11394_v15, %v11353_v49 }
 0x41e   : > { %v2182_v32 = vsel %vm2073_vm0, %v2181_v30, %v2177_v31 }
 0x420   : > { %v11419_v40 = vpop.xlane.xlu1 %2022  ;;  %v11421_v56 = vpop.xlane.xlu0 %2020 }
 0x421   : > { %v2199_v23 = vrot.slane %v11419_v40, %v11350_v46 }
 0x424   : > { %v2366_v16 = vpop.xlane.xlu1 %2365  ;;  %v2364_v45 = vpop.xlane.xlu0 %2363 }
 0x425   : > { %v2501_v27 = vrot.slane %v2366_v16, %v11350_v46  ;;  %v2497_v28 = vrot.slane %v2364_v45, %v11353_v49 }
 0x427   : > { %v2502_v58 = vsel %vm2073_vm0, %v2501_v27, %v2497_v28  ;;  %v2555_v27 = vrot.slane %v11355_v22, %v11350_v46  ;;  %v2551_v28 = vrot.slane %v11357_v50, %v11353_v49  ;;  %v2224_v22 = vsel %vm2210_vm1, %v2155_v17, %v2146_v62 }
 0x428   : > { %v1995_v61 = vpop.xlane.xlu1 %1994  ;;  %v1993_v24 = vpop.xlane.xlu0 %1992  ;;  %v2581_v34 = vsel %vm2222_vm7, %v2502_v58, %v2580_v57  ;;  %v2225_v4 = vsel %vm2212_vm2, %v2164_v47, %v2224_v22 }
 0x429   : > { %v2136_v9 = vrot.slane %v1995_v61, %v11350_v46  ;;  %v2132_v14 = vrot.slane %v1993_v24, %v11353_v49  ;;  %v11473_v42 = vsel %vm2028_vm8, %v2581_v34, -1e+30  ;;  %v2556_v48 = vsel %vm2073_vm0, %v2555_v27, %v2551_v28 }
 0x42a   : > { %v2593_v59 = vsel %vm2235_vm9, %v11473_v42, -inf  ;;  %v2190_v61 = vrot.slane %v11369_v0, %v11350_v46  ;;  %v2186_v24 = vrot.slane %v11371_v2, %v11353_v49  ;;  %v2565_v2 = vsel %vm2073_vm0, %v2564_v19, %v2560_v20  ;;  %v9725_v20 = vld [vmem:[%s10896_s29 + $0x204] ss:$16 sps:$4 sm:$0xff]  }
 0x42b   : > { %2594 = vmax.xlane.f32.xlu0 %v2593_v59  ;;  %v2137_v8 = vsel %vm2073_vm0, %v2136_v9, %v2132_v14  ;;  %v2195_v59 = vrot.slane %v11421_v56, %v11353_v49  ;;  %3090 = vmatprep.subr.bf16.mxu0 %v9725_v20  ;;  %v9788_v20 = vld [vmem:[%s10896_s29 + $0x34c] ss:$16 sps:$4 sm:$0xff]  }
 0x42c   : > { %v2382_v60 = vpop.xlane.xlu1 %2381  ;;  %v2380_v54 = vpop.xlane.xlu0 %2379  ;;  %v2223_v36 = vsel %vm2222_vm7, %v2137_v8, %v2221_v5  ;;  %v2191_v41 = vsel %vm2073_vm0, %v2190_v61, %v2186_v24 }
 0x42d   : > { %v2537_v37 = vrot.slane %v2382_v60, %v11350_v46  ;;  %v2533_v16 = vrot.slane %v2380_v54, %v11353_v49  ;;  %v11499_v45 = vsel %vm2028_vm8, %v2223_v36, -1e+30  ;;  %v2200_v54 = vsel %vm2073_vm0, %v2199_v23, %v2195_v59 }
 0x42e   : > { %v2236_v3 = vsel %vm2235_vm9, %v11499_v45, -inf }
 0x42f   : > { %v2538_v25 = vsel %vm2073_vm0, %v2537_v37, %v2533_v16  ;;  %2237 = vmax.xlane.f32.xlu0 %v2236_v3 }
 0x430   : > { %v2584_v55 = vsel %vm2214_vm3, %v2538_v25, %v2583_v18  ;;  %v2011_v43 = vpop.xlane.xlu1 %2010  ;;  %v2009_v38 = vpop.xlane.xlu0 %2008 }
 0x431   : > { %v2172_v50 = vrot.slane %v2011_v43, %v11350_v46  ;;  %v2168_v58 = vrot.slane %v2009_v38, %v11353_v49  ;;  %v2585_v57 = vsel %vm2216_vm4, %v2547_v29, %v2584_v55 }
 0x432   : > { %v2586_v15 = vsel %vm2218_vm5, %v2556_v48, %v2585_v57  ;;  %v9728_v48 = vld [vmem:[%s10896_s29 + $0x20c] ss:$16 sps:$4 sm:$0xff]  }
 0x433   : > { %v2173_v34 = vsel %vm2073_vm0, %v2172_v50, %v2168_v58  ;;  %v2587_v8 = vsel %vm2220_vm6, %v2565_v2, %v2586_v15  ;;  %3133 = vmatprep.subr.bf16.mxu1 %v9728_v48  ;;  %v9734_v2 = vld [vmem:[%s10896_s29 + $0x22c] ss:$16 sps:$4 sm:$0xff]   ;;  %v9777_v48 = vld [vmem:[%s10896_s29 + $0x320] ss:$16 sps:$4 sm:$0xff]  }
 0x434   : > { %v2226_v9 = vsel %vm2214_vm3, %v2173_v34, %v2225_v4  ;;  %v2398_v52 = vpop.xlane.xlu1 %2397  ;;  %v2396_v14 = vpop.xlane.xlu0 %2395 }
 0x435   : > { %v2573_v12 = vrot.slane %v2398_v52, %v11350_v46  ;;  %v2569_v21 = vrot.slane %v2396_v14, %v11353_v49  ;;  %v2227_v0 = vsel %vm2216_vm4, %v2182_v32, %v2226_v9 }
 0x436   : > { %v2228_v51 = vsel %vm2218_vm5, %v2191_v41, %v2227_v0 }
 0x437   : > { %v2574_v53 = vsel %vm2073_vm0, %v2573_v12, %v2569_v21  ;;  %v2229_v37 = vsel %vm2220_vm6, %v2200_v54, %v2228_v51  ;;  %v9726_v21 = vld [vmem:[%s10896_s29 + $0x208] ss:$16 sps:$4 sm:$0xff]   ;;  %v9729_v51 = vld [vmem:[%s10896_s29 + $0x220] ss:$16 sps:$4 sm:$0xff]  }
 0x438   : > { %v2027_v5 = vpop.xlane.xlu1 %2026  ;;  %v2025_v33 = vpop.xlane.xlu0 %2024  ;;  %v2588_v1 = vsel %vm2222_vm7, %v2574_v53, %v2587_v8  ;;  %v9723_v53 = vld [vmem:[%s10896_s29 + $0x200] ss:$16 sps:$4 sm:$0xff]   ;;  %v9732_v8 = vld [vmem:[%s10896_s29 + $0x228] ss:$16 sps:$4 sm:$0xff]  }
 0x439   : > { %v2208_v60 = vrot.slane %v2027_v5, %v11350_v46  ;;  %v2204_v40 = vrot.slane %v2025_v33, %v11353_v49  ;;  %v2592_v56 = vsel %vm12900_vm10, %v2588_v1, -1e+30  ;;  %v9731_v33 = vld [vmem:[%s10896_s29 + $0x224] ss:$16 sps:$4 sm:$0xff]   ;;  %v9740_v1 = vld [vmem:[%s10896_s29 + $0x24c] ss:$16 sps:$4 sm:$0xff]  }
 0x43a   : > { %v2596_v36 = vsel %vm2235_vm9, %v2592_v56, -inf  ;;  %v9735_v54 = vld [vmem:[%s10896_s29 + $0x240] ss:$16 sps:$4 sm:$0xff]  }
 0x43b   : > { %2597 = vmax.xlane.f32.xlu1 %v2596_v36  ;;  %v2209_v63 = vsel %vm2073_vm0, %v2208_v60, %v2204_v40  ;;  %v9738_v60 = vld [vmem:[%s10896_s29 + $0x248] ss:$16 sps:$4 sm:$0xff]   ;;  %v9737_v40 = vld [vmem:[%s10896_s29 + $0x244] ss:$16 sps:$4 sm:$0xff]  }
 0x43c   : > { %v2230_v16 = vsel %vm2222_vm7, %v2209_v63, %v2229_v37  ;;  %v9744_v36 = vld [vmem:[%s10896_s29 + $0x268] ss:$16 sps:$4 sm:$0xff]   ;;  %v9743_v63 = vld [vmem:[%s10896_s29 + $0x264] ss:$16 sps:$4 sm:$0xff]   ;;  %v9752_v37 = vld [vmem:[%s10896_s29 + $0x28c] ss:$16 sps:$4 sm:$0xff]  }
 0x43d   : > { %v2234_v62 = vsel %vm12900_vm10, %v2230_v16, -1e+30  ;;  %v9741_v16 = vld [vmem:[%s10896_s29 + $0x260] ss:$16 sps:$4 sm:$0xff]  }
 0x43e   : > { %v2239_v17 = vsel %vm2235_vm9, %v2234_v62, -inf }
 0x43f   : > { %2240 = vmax.xlane.f32.xlu1 %v2239_v17  ;;  %v9749_v17 = vld [vmem:[%s10896_s29 + $0x284] ss:$16 sps:$4 sm:$0xff]  }
 0x4b8   : > { %v2595_v18 = vpop.xlane.xlu0 %2594 }
 0x4b9   : > { %v2599_v3 = vsub.f32 %v11473_v42, %v2595_v18  ;;  %v9758_v18 = vld [vmem:[%s10896_s29 + $0x2ac] ss:$16 sps:$4 sm:$0xff]  }
 0x4bb   : > { %v2601_v47 = vmul.f32 1.442695, %v2599_v3  ;;  %v9747_v3 = vld [vmem:[%s10896_s29 + $0x280] ss:$16 sps:$4 sm:$0xff]  }
 0x4bc   : > { %v2238_v27 = vpop.xlane.xlu0 %2237 }
 0x4bd   : > { %10199 = vpow2.f32 %v2601_v47  ;;  %v2242_v28 = vsub.f32 %v11499_v45, %v2238_v27  ;;  %v9756_v47 = vld [vmem:[%s10896_s29 + $0x2a8] ss:$16 sps:$4 sm:$0xff]   ;;  %v9755_v27 = vld [vmem:[%s10896_s29 + $0x2a4] ss:$16 sps:$4 sm:$0xff]  }
 0x4bf   : > { %v2244_v25 = vmul.f32 1.442695, %v2242_v28  ;;  %v9764_v28 = vld [vmem:[%s10896_s29 + $0x2cc] ss:$16 sps:$4 sm:$0xff]  }
 0x4c1   : > { %10201 = vpow2.f32 %v2244_v25  ;;  %v9753_v25 = vld [vmem:[%s10896_s29 + $0x2a0] ss:$16 sps:$4 sm:$0xff]  }
 0x4c7   : > { %v10200_v29 = vpop.eup %10199 }
 0x4c8   : > { %v2598_v30 = vpop.xlane.xlu1 %2597  ;;  %v2605_v31 = vsel %vm2235_vm9, %v10200_v29, 0.0 }
 0x4c9   : > { %v2600_v55 = vsub.f32 %v2592_v56, %v2598_v30  ;;  %2606 = vadd.xlane.f32.xlu0 %v2605_v31  ;;  %v9746_v56 = vld [vmem:[%s10896_s29 + $0x26c] ss:$16 sps:$4 sm:$0xff]   ;;  %v9761_v30 = vld [vmem:[%s10896_s29 + $0x2c4] ss:$16 sps:$4 sm:$0xff]  }
 0x4ca   : > { %v9770_v31 = vld [vmem:[%s10896_s29 + $0x2ec] ss:$16 sps:$4 sm:$0xff]  }
 0x4cb   : > { %v10202_v43 = vpop.eup %10201  ;;  %v2603_v38 = vmul.f32 1.442695, %v2600_v55  ;;  %v9759_v55 = vld [vmem:[%s10896_s29 + $0x2c0] ss:$16 sps:$4 sm:$0xff]  }
 0x4cc   : > { %v2241_v22 = vpop.xlane.xlu1 %2240  ;;  %v2248_v50 = vsel %vm2235_vm9, %v10202_v43, 0.0 }
 0x4cd   : > { %10203 = vpow2.f32 %v2603_v38  ;;  %v2243_v42 = vsub.f32 %v2234_v62, %v2241_v22  ;;  %2249 = vadd.xlane.f32.xlu0 %v2248_v50  ;;  %v9750_v62 = vld [vmem:[%s10896_s29 + $0x288] ss:$16 sps:$4 sm:$0xff]   ;;  %v9767_v38 = vld [vmem:[%s10896_s29 + $0x2e4] ss:$16 sps:$4 sm:$0xff]   ;;  %v9776_v22 = vld [vmem:[%s10896_s29 + $0x30c] ss:$16 sps:$4 sm:$0xff]  }
 0x4ce   : > { %v9765_v50 = vld [vmem:[%s10896_s29 + $0x2e0] ss:$16 sps:$4 sm:$0xff]  }
 0x4cf   : > { %v2246_v58 = vmul.f32 1.442695, %v2243_v42  ;;  %v9774_v42 = vld [vmem:[%s10896_s29 + $0x308] ss:$16 sps:$4 sm:$0xff]  }
 0x4d1   : > { %10205 = vpow2.f32 %v2246_v58  ;;  %v9773_v58 = vld [vmem:[%s10896_s29 + $0x304] ss:$16 sps:$4 sm:$0xff]  }
 0x4d7   : > { %v10204_v45 = vpop.eup %10203 }
 0x4d8   : > { %v2608_v57 = vsel %vm2235_vm9, %v10204_v45, 0.0 }
 0x4d9   : > { %2609 = vadd.xlane.f32.xlu1 %v2608_v57  ;;  %v9771_v57 = vld [vmem:[%s10896_s29 + $0x300] ss:$16 sps:$4 sm:$0xff]  }
 0x4db   : > { %v10206_v4 = vpop.eup %10205 }
 0x4dc   : > { %v2251_v19 = vsel %vm2235_vm9, %v10206_v4, 0.0 }
 0x4dd   : > { %2252 = vadd.xlane.f32.xlu1 %v2251_v19  ;;  %v9779_v19 = vld [vmem:[%s10896_s29 + $0x324] ss:$16 sps:$4 sm:$0xff]  }
 0x556   : > { %v2607_v61 = vpop.xlane.xlu0 %2606 }
 0x557   : > { %10207 = vrcp.f32 %v2607_v61  ;;  %v9786_v61 = vld [vmem:[%s10896_s29 + $0x348] ss:$16 sps:$4 sm:$0xff]  }
 0x55a   : > { %v2250_v24 = vpop.xlane.xlu0 %2249 }
 0x561   : > { %v10208_v9 = vpop.eup %10207 }
 0x562   : > { %v2613_v14 = vmul.f32 %v10208_v9, %v10200_v29  ;;  %v9762_v29 = vld [vmem:[%s10896_s29 + $0x2c8] ss:$16 sps:$4 sm:$0xff]  }
 0x563   : > { %v9792_v9 = vld [vmem:[%s10896_s29 + $0x368] ss:$16 sps:$4 sm:$0xff]  }
 0x566   : > { %v2610_v34 = vpop.xlane.xlu1 %2609 }
 0x567   : > { %10209 = vrcp.f32 %v2610_v34  ;;  %v9794_v34 = vld [vmem:[%s10896_s29 + $0x36c] ss:$16 sps:$4 sm:$0xff]  }
 0x568   : > { %10211 = vrcp.f32 %v2250_v24  ;;  %v9785_v24 = vld [vmem:[%s10896_s29 + $0x344] ss:$16 sps:$4 sm:$0xff]  }
 0x56a   : > { %v2253_v32 = vpop.xlane.xlu1 %2252 }
 0x56b   : > { %10213 = vrcp.f32 %v2253_v32  ;;  %v9783_v32 = vld [vmem:[%s10896_s29 + $0x340] ss:$16 sps:$4 sm:$0xff]  }
 0x571   : > { %v10210_v52 = vpop.eup %10209 }
 0x572   : > { %v2614_v15 = vmul.f32 %v10210_v52, %v10204_v45  ;;  %v10212_v12 = vpop.eup %10211  ;;  %v9782_v45 = vld [vmem:[%s10896_s29 + $0x32c] ss:$16 sps:$4 sm:$0xff]   ;;  %v9791_v52 = vld [vmem:[%s10896_s29 + $0x364] ss:$16 sps:$4 sm:$0xff]  }
 0x573   : > { %v2256_v59 = vmul.f32 %v10212_v12, %v10202_v43  ;;  %v9768_v43 = vld [vmem:[%s10896_s29 + $0x2e8] ss:$16 sps:$4 sm:$0xff]  }
 0x574   : > { %v2615_v0 = vpack.c.bf16 %v2614_v15, %v2613_v14  ;;  %v9800_v14 = vld [vmem:[%s10896_s29 + $0x38c] ss:$16 sps:$4 sm:$0xff]   ;;  %v9789_v15 = vld [vmem:[%s10896_s29 + $0x360] ss:$16 sps:$4 sm:$0xff]   ;;  %v9798_v12 = vld [vmem:[%s10896_s29 + $0x388] ss:$16 sps:$4 sm:$0xff]  }
 0x575   : > { %v10214_v23 = vpop.eup %10213 }
 0x576   : > { %v2257_v41 = vmul.f32 %v10214_v23, %v10206_v4  ;;  %9466 = vmatmul.mubr.msk.bf16.vlgmr.msra.gmra.mrb[8].mxu1 %vm2235_vm9, %v2615_v0  ;;  %v9780_v4 = vld [vmem:[%s10896_s29 + $0x328] ss:$16 sps:$4 sm:$0xff]   ;;  %v9795_v0 = vld [vmem:[%s10896_s29 + $0x380] ss:$16 sps:$4 sm:$0xff]   ;;  %v9803_v23 = vld [vmem:[%s10896_s29 + $0x3a4] ss:$16 sps:$4 sm:$0xff]  }
 0x577   : > { %3134 = vmatpush1.bf16.msra.mxu1 %v9726_v21  ;;  %v9797_v21 = vld [vmem:[%s10896_s29 + $0x384] ss:$16 sps:$4 sm:$0xff]  }
 0x578   : > { %v2258_v5 = vpack.c.bf16 %v2257_v41, %v2256_v59  ;;  %3135 = vmatprep.subr.bf16.mxu1 %v9734_v2  ;;  %v9801_v2 = vld [vmem:[%s10896_s29 + $0x3a0] ss:$16 sps:$4 sm:$0xff]   ;;  %v9804_v59 = vld [vmem:[%s10896_s29 + $0x3a8] ss:$16 sps:$4 sm:$0xff]   ;;  %v9806_v41 = vld [vmem:[%s10896_s29 + $0x3ac] ss:$16 sps:$4 sm:$0xff]  }
 0x57a   : > { %9460 = vmatmul.mubr.msk.bf16.vlgmr.msra.gmra.mrb[8].mxu0 %vm2235_vm9, %v2258_v5  ;;  %v9810_v5 = vld [vmem:[%s10896_s29 + $0x3c8] ss:$16 sps:$4 sm:$0xff]  }
 0x57b   : > { %3091 = vmatpush1.bf16.msra.mxu0 %v9723_v53  ;;  %3136 = vmatpush1.bf16.msra.mxu1 %v9732_v8  ;;  %v9807_v53 = vld [vmem:[%s10896_s29 + $0x3c0] ss:$16 sps:$4 sm:$0xff]   ;;  %v9809_v8 = vld [vmem:[%s10896_s29 + $0x3c4] ss:$16 sps:$4 sm:$0xff]  }
 0x57c   : > { %3092 = vmatprep.subr.bf16.mxu0 %v9731_v33  ;;  %3137 = vmatprep.subr.bf16.mxu1 %v9740_v1  ;;  %v9812_v33 = vld [vmem:[%s10896_s29 + $0x3cc] ss:$16 sps:$4 sm:$0xff]   ;;  %v9813_v1 = vld [vmem:[%s10896_s29 + $0x3e0] ss:$16 sps:$4 sm:$0xff]  }
 0x57f   : > { %3093 = vmatpush1.bf16.msra.mxu0 %v9729_v51  ;;  %3138 = vmatpush1.bf16.msra.mxu1 %v9738_v60  ;;  %v9815_v51 = vld [vmem:[%s10896_s29 + $0x3e4] ss:$16 sps:$4 sm:$0xff]   ;;  %v9816_v60 = vld [vmem:[%s10896_s29 + $0x3e8] ss:$16 sps:$4 sm:$0xff]  }
 0x580   : > { %3094 = vmatprep.subr.bf16.mxu0 %v9737_v40  ;;  %3139 = vmatprep.subr.bf16.mxu1 %v9746_v56  ;;  %v9818_v40 = vld [vmem:[%s10896_s29 + $0x3ec] ss:$16 sps:$4 sm:$0xff]  }
 0x581   : > { %v9021_v56 = vld [vmem:[%s10904_s1 + $0x4] ss:$8 sm:$0x3] }
 0x583   : > { %3095 = vmatpush1.bf16.msra.mxu0 %v9735_v54  ;;  %3140 = vmatpush1.bf16.msra.mxu1 %v9744_v36  ;;  %v2670_v54 = vrot.slane %v9021_v56, %v11036_v7 }
 0x584   : > { %3096 = vmatprep.subr.bf16.mxu0 %v9743_v63  ;;  %3141 = vmatprep.subr.bf16.mxu1 %v9752_v37 }
 0x587   : > { %3097 = vmatpush1.bf16.msra.mxu0 %v9741_v16  ;;  %3142 = vmatpush1.bf16.msra.mxu1 %v9750_v62  ;;  %v2666_v16 = vrot.slane %v9021_v56, %v11044_v13 }
 0x588   : > { %3098 = vmatprep.subr.bf16.mxu0 %v9749_v17  ;;  %3143 = vmatprep.subr.bf16.mxu1 %v9758_v18 }
 0x58b   : > { %3099 = vmatpush1.bf16.msra.mxu0 %v9747_v3  ;;  %3144 = vmatpush1.bf16.msra.mxu1 %v9756_v47 }
 0x58c   : > { %3100 = vmatprep.subr.bf16.mxu0 %v9755_v27  ;;  %3145 = vmatprep.subr.bf16.mxu1 %v9764_v28 }
 0x58f   : > { %3101 = vmatpush1.bf16.msra.mxu0 %v9753_v25  ;;  %3146 = vmatpush1.bf16.msra.mxu1 %v9762_v29 }
 0x590   : > { %3102 = vmatprep.subr.bf16.mxu0 %v9761_v30  ;;  %3147 = vmatprep.subr.bf16.mxu1 %v9770_v31 }
 0x593   : > { %3103 = vmatpush1.bf16.msra.mxu0 %v9759_v55  ;;  %3148 = vmatpush1.bf16.msra.mxu1 %v9768_v43 }
 0x594   : > { %3104 = vmatprep.subr.bf16.mxu0 %v9767_v38  ;;  %3149 = vmatprep.subr.bf16.mxu1 %v9776_v22 }
 0x597   : > { %3105 = vmatpush1.bf16.msra.mxu0 %v9765_v50  ;;  %3150 = vmatpush1.bf16.msra.mxu1 %v9774_v42  ;;  %v12956_v50 = vmov 0   ;;  %v9022_v42 = vld [vmem:[%s10904_s1 + $0x5] ss:$8 sm:$0xf] }
 0x598   : > { %3106 = vmatprep.subr.bf16.mxu0 %v9773_v58  ;;  %3151 = vmatprep.subr.bf16.mxu1 %v9782_v45  ;;  %v9087_v58 = vld [vmem:[%s10904_s1 + $0x6] ss:$8 sm:$0x3]  ;;  %v2761_v45 = vrot.slane %v9022_v42, %v11041_v10 }
 0x59b   : > { %3107 = vmatpush1.bf16.msra.mxu0 %v9771_v57  ;;  %3152 = vmatpush1.bf16.msra.mxu1 %v9780_v4  ;;  %v3182_v57 = vrot.slane %v9087_v58, %v11044_v13  ;;  %v3186_v4 = vrot.slane %v9087_v58, %v11036_v7 }
 0x59c   : > { %3108 = vmatprep.subr.bf16.mxu0 %v9779_v19  ;;  %3153 = vmatprep.subr.bf16.mxu1 %v9788_v20  ;;  %v2765_v19 = vrot.slane %v9022_v42, %v11049_v39  ;;  %v2753_v20 = vrot.slane %v9022_v42, %v11044_v13 }
 0x59f   : > { %3109 = vmatpush1.bf16.msra.mxu0 %v9777_v48  ;;  %3154 = vmatpush1.bf16.msra.mxu1 %v9786_v61  ;;  %v2757_v48 = vrot.slane %v9022_v42, %v11036_v7 }
 0x5a0   : > { %3110 = vmatprep.subr.bf16.mxu0 %v9785_v24  ;;  %3155 = vmatprep.subr.bf16.mxu1 %v9794_v34 }
 0x5a3   : > { %3111 = vmatpush1.bf16.msra.mxu0 %v9783_v32  ;;  %3156 = vmatpush1.bf16.msra.mxu1 %v9792_v9 }
 0x5a4   : > { %3112 = vmatprep.subr.bf16.mxu0 %v9791_v52  ;;  %3157 = vmatprep.subr.bf16.mxu1 %v9800_v14  ;;  %v3189_v52 = vpack.c.bf16 %v3182_v57, %v3182_v57  ;;  %v3190_v14 = vpack.c.bf16 %v3186_v4, %v3186_v4 }
 0x5a7   : > { %3113 = vmatpush1.bf16.msra.mxu0 %v9789_v15  ;;  %3158 = vmatpush1.bf16.msra.mxu1 %v9798_v12 }
 0x5a8   : > { %3114 = vmatprep.subr.bf16.mxu0 %v9797_v21  ;;  %3159 = vmatprep.subr.bf16.mxu1 %v9806_v41 }
 0x5ab   : > { %3115 = vmatpush1.bf16.msra.mxu0 %v9795_v0  ;;  %3160 = vmatpush1.bf16.msra.mxu1 %v9804_v59 }
 0x5ac   : > { %3116 = vmatprep.subr.bf16.mxu0 %v9803_v23  ;;  %3161 = vmatprep.subr.bf16.mxu1 %v9812_v33 }
 0x5af   : > { %3117 = vmatpush1.bf16.msra.mxu0 %v9801_v2  ;;  %3162 = vmatpush1.bf16.msra.mxu1 %v9810_v5 }
 0x5b0   : > { %3118 = vmatprep.subr.bf16.mxu0 %v9809_v8  ;;  %3163 = vmatprep.subr.bf16.mxu1 %v9818_v40  ;;  %v3849_v40 = vpack.i.b16 %v3190_v14, %v3190_v14 }
 0x5b3   : > { %3119 = vmatpush1.bf16.msra.mxu0 %v9807_v53  ;;  %3164 = vmatpush1.bf16.msra.mxu1 %v9816_v60  ;;  %v3842_v60 = vpack.i.b16 %v3189_v52, %v3189_v52 }
 0x5b4   : > { %3120 = vmatprep.subr.bf16.mxu0 %v9815_v51 }
 0x5b7   : > { %3121 = vmatpush1.bf16.msra.mxu0 %v9813_v1 }
 0x649   : > { %v2653_v36 = vpop.f32.mrb[8].mxu1 }
 0x64a   : > { %v2674_v63 = vadd.f32 %v2670_v54, %v2653_v36  ;;  %v9467_v37 = vpop.f32.mrb[9].mxu1 }
 0x64b   : > { %v2656_v62 = vpop.f32.mrb[10].mxu1 }
 0x64c   : > { %v2676_v17 = vadd.f32 %v2670_v54, %v2656_v62  ;;  %v9468_v18 = vpop.f32.mrb[11].mxu1  ;;  %v2678_v47 = vmax.f32 %v2674_v63, 0.0 }
 0x64d   : > { %v2296_v3 = vpop.f32.mrb[8].mxu0 }
 0x64e   : > { %v2680_v27 = vmax.f32 %v2676_v17, 0.0  ;;  %v2673_v28 = vadd.f32 %v2666_v16, %v2296_v3  ;;  %v9461_v25 = vpop.f32.mrb[9].mxu0 }
 0x64f   : > { %v2299_v29 = vpop.f32.mrb[10].mxu0 }
 0x650   : > { %v2682_v30 = vpack.c.bf16 %v2680_v27, %v2678_v47  ;;  %v2675_v31 = vadd.f32 %v2666_v16, %v2299_v29  ;;  %v9462_v55 = vpop.f32.mrb[11].mxu0  ;;  %v2677_v43 = vmax.f32 %v2673_v28, 0.0  ;;  %v11664_v27 = vrot.slane %v3842_v60, %v11044_v13 }
 0x651   : > { %v11667_v28 = vrot.slane %v3849_v40, %v11044_v13 }
 0x652   : > { %v2679_v38 = vmax.f32 %v2675_v31, 0.0  ;;  %3122 = vmatprep.mubr.bf16.mxu0 %v2682_v30  ;;  %3165 = vmatprep.mubr.bf16.mxu1 %v2682_v30 }
 0x654   : > { %v2681_v22 = vpack.c.bf16 %v2679_v38, %v2677_v43 }
 0x656   : > { %3123 = vmatmul.mubr.bf16.vlgmr.msra.gmra.mrb[12].mxu0 %v2681_v22  ;;  %3166 = vmatmul.mubr.bf16.vlgmr.msra.gmra.mrb[12].mxu1 %v2681_v22 }
 0x657   : > { %4312 = vmatprep.mubr.bf16.mxu0 %v12956_v50 }
 0x729   : > { %v3124_v61 = vpop.f32.mrb[12].mxu0  ;;  %v3167_v24 = vpop.f32.mrb[12].mxu1 }
 0x72a   : > { %v3168_v34 = vadd.f32 %v3167_v24, %v2761_v45  ;;  %v3126_v32 = vpop.f32.mrb[13].mxu0  ;;  %v3169_v9 = vpop.f32.mrb[13].mxu1  ;;  %v3125_v0 = vadd.f32 %v3124_v61, %v2753_v20 }
 0x72b   : > { %v3170_v15 = vadd.f32 %v3169_v9, %v2765_v19  ;;  %v3128_v12 = vpop.f32.mrb[14].mxu0  ;;  %v3171_v21 = vpop.f32.mrb[14].mxu1  ;;  %v3127_v2 = vadd.f32 %v3126_v32, %v2757_v48 }
 0x72c   : > { %v3129_v23 = vadd.f32 %v3128_v12, %v2753_v20  ;;  %v3172_v59 = vadd.f32 %v3171_v21, %v2761_v45  ;;  %v3130_v41 = vpop.f32.mrb[15].mxu0  ;;  %v3173_v53 = vpop.f32.mrb[15].mxu1 }
 0x72d   : > { %v3195_v8 = vcombine.low %v3168_v34, %v3170_v15  ;;  %v3196_v5 = vcombine.high %v3168_v34, %v3170_v15  ;;  %v3131_v33 = vadd.f32 %v3130_v41, %v2757_v48  ;;  %v3174_v1 = vadd.f32 %v3173_v53, %v2765_v19 }
 0x72e   : > { %v11651_v51 = vpack.c.bf16 %v3129_v23, %v3125_v0 }
 0x72f   : > { %v3203_v56 = vrot.slane %v3195_v8, %v11061_v26  ;;  %v3210_v54 = vrot.slane %v3196_v5, %v11061_v26  ;;  %v11655_v36 = vpack.c.bf16 %v3131_v33, %v3127_v2  ;;  %v3245_v63 = vcombine.low %v3172_v59, %v3174_v1 }
 0x730   : > { %v3246_v37 = vcombine.high %v3172_v59, %v3174_v1 }
 0x731   : > { %v3211_v16 = vcombine.high %v3203_v56, %v3203_v56  ;;  %v3212_v62 = vcombine.high %v3210_v54, %v3210_v54  ;;  %v3219_v17 = vrot.slane %v3203_v56, %v11061_v26  ;;  %v3226_v18 = vrot.slane %v3210_v54, %v11061_v26  ;;  %4280 = vmatprep.subr.bf16.mxu0 %v11655_v36 }
 0x732   : > { %v3253_v3 = vrot.slane %v3245_v63, %v11061_v26  ;;  %v3260_v47 = vrot.slane %v3246_v37, %v11061_v26  ;;  %4281 = vmatpush1.bf16.msra.mxu0 %v11651_v51 }
 0x733   : > { %v3233_v25 = vrot.slane %v3211_v16, %v11061_v26  ;;  %v3240_v29 = vrot.slane %v3212_v62, %v11061_v26  ;;  %v3241_v30 = vcombine.high %v3219_v17, %v3219_v17  ;;  %v3242_v31 = vcombine.high %v3226_v18, %v3226_v18 }
 0x734   : > { %v3298_v55 = vrot.slane %v3219_v17, %v11044_v13  ;;  %v3302_v43 = vrot.slane %v3219_v17, %v11036_v7  ;;  %v3330_v38 = vrot.slane %v3226_v18, %v11044_v13  ;;  %v3334_v22 = vrot.slane %v3226_v18, %v11036_v7 }
 0x735   : > { %v3243_v42 = vcombine.high %v3233_v25, %v3233_v25  ;;  %v3244_v58 = vcombine.high %v3240_v29, %v3240_v29  ;;  %v3306_v45 = vrot.slane %v3233_v25, %v11044_v13  ;;  %v3310_v57 = vrot.slane %v3233_v25, %v11036_v7 }
 0x736   : > { %v3314_v4 = vrot.slane %v3241_v30, %v11044_v13  ;;  %v3318_v19 = vrot.slane %v3241_v30, %v11036_v7  ;;  %v3338_v20 = vrot.slane %v3240_v29, %v11044_v13  ;;  %v3342_v48 = vrot.slane %v3240_v29, %v11036_v7 }
 0x737   : > { %v11682_v61 = vrot.slane %v3243_v42, %v11044_v13  ;;  %v11685_v24 = vrot.slane %v3243_v42, %v11036_v7  ;;  %v3346_v34 = vrot.slane %v3242_v31, %v11044_v13  ;;  %v3350_v32 = vrot.slane %v3242_v31, %v11036_v7 }
 0x738   : > { %v3354_v9 = vrot.slane %v3244_v58, %v11044_v13  ;;  %v3358_v52 = vrot.slane %v3244_v58, %v11036_v7  ;;  %v3455_v14 = vpack.c.bf16 %v3298_v55, %v3298_v55  ;;  %v3456_v15 = vpack.c.bf16 %v3302_v43, %v3302_v43 }
 0x739   : > { %v11691_v12 = vpack.c.bf16 %v3306_v45, %v3306_v45  ;;  %v11693_v21 = vpack.c.bf16 %v3310_v57, %v3310_v57  ;;  %v11695_v0 = vpack.c.bf16 %v3314_v4, %v3314_v4  ;;  %v11697_v2 = vpack.c.bf16 %v3318_v19, %v3318_v19 }
 0x73a   : > { %v3463_v23 = vpack.c.bf16 %v3330_v38, %v3330_v38  ;;  %v3464_v59 = vpack.c.bf16 %v3334_v22, %v3334_v22  ;;  %v11699_v41 = vpack.c.bf16 %v3338_v20, %v3338_v20  ;;  %v11701_v53 = vpack.c.bf16 %v3342_v48, %v3342_v48 }
 0x73b   : > { %v11703_v8 = vpack.c.bf16 %v3346_v34, %v3346_v34  ;;  %v11705_v5 = vpack.c.bf16 %v3350_v32, %v3350_v32  ;;  %v11707_v33 = vpack.c.bf16 %v3354_v9, %v3354_v9  ;;  %v11709_v1 = vpack.c.bf16 %v3358_v52, %v3358_v52 }
 0x73c   : > { %v3490_v60 = vpack.i.b16 %v3455_v14, %v3455_v14  ;;  %v3497_v40 = vpack.i.b16 %v3456_v15, %v3456_v15  ;;  %v3504_v56 = vpack.i.b16 %v11691_v12, %v11691_v12  ;;  %v3511_v54 = vpack.i.b16 %v11693_v21, %v11693_v21 }
 0x73d   : > { %v3546_v16 = vpack.i.b16 %v3463_v23, %v3463_v23  ;;  %v3553_v62 = vpack.i.b16 %v3464_v59, %v3464_v59  ;;  %v3261_v55 = vcombine.high %v3253_v3, %v3253_v3  ;;  %v3262_v43 = vcombine.high %v3260_v47, %v3260_v47 }
 0x73e   : > { %v3269_v38 = vrot.slane %v3253_v3, %v11061_v26  ;;  %v3276_v22 = vrot.slane %v3260_v47, %v11061_v26  ;;  %v3495_v42 = vrot.slane %v3490_v60, %v11044_v13  ;;  %v3502_v58 = vrot.slane %v3497_v40, %v11044_v13 }
 0x73f   : > { %v3283_v45 = vrot.slane %v3261_v55, %v11061_v26  ;;  %v3290_v57 = vrot.slane %v3262_v43, %v11061_v26  ;;  %v3551_v4 = vrot.slane %v3546_v16, %v11044_v13  ;;  %v3558_v19 = vrot.slane %v3553_v62, %v11044_v13 }
 0x740   : > { %v3291_v20 = vcombine.high %v3269_v38, %v3269_v38  ;;  %v3292_v48 = vcombine.high %v3276_v22, %v3276_v22  ;;  %v3362_v34 = vrot.slane %v3269_v38, %v11044_v13  ;;  %v3366_v3 = vrot.slane %v3269_v38, %v11036_v7 }
 0x741   : > { %v3293_v32 = vcombine.high %v3283_v45, %v3283_v45  ;;  %v3294_v47 = vcombine.high %v3290_v57, %v3290_v57  ;;  %v3370_v9 = vrot.slane %v3283_v45, %v11044_v13  ;;  %v3374_v52 = vrot.slane %v3283_v45, %v11036_v7 }
 0x742   : > { %v3378_v14 = vrot.slane %v3291_v20, %v11044_v13  ;;  %v3382_v15 = vrot.slane %v3291_v20, %v11036_v7  ;;  %v3394_v23 = vrot.slane %v3276_v22, %v11044_v13  ;;  %v3398_v59 = vrot.slane %v3276_v22, %v11036_v7 }
 0x743   : > { %v3386_v60 = vrot.slane %v3293_v32, %v11044_v13  ;;  %v3390_v40 = vrot.slane %v3293_v32, %v11036_v7  ;;  %v3402_v16 = vrot.slane %v3290_v57, %v11044_v13  ;;  %v3406_v62 = vrot.slane %v3290_v57, %v11036_v7 }
 0x744   : > { %v3410_v55 = vrot.slane %v3292_v48, %v11044_v13  ;;  %v3414_v43 = vrot.slane %v3292_v48, %v11036_v7  ;;  %v3418_v38 = vrot.slane %v3294_v47, %v11044_v13  ;;  %v3422_v45 = vrot.slane %v3294_v47, %v11036_v7 }
 0x745   : > { %v3471_v20 = vpack.c.bf16 %v3362_v34, %v3362_v34  ;;  %v3472_v11 = vpack.c.bf16 %v3366_v3, %v3366_v3  ;;  %v11755_v31 = vpack.c.bf16 %v3370_v9, %v3370_v9  ;;  %v11757_v22 = vpack.c.bf16 %v3374_v52, %v3374_v52 }
 0x746   : > { %v11759_v30 = vpack.c.bf16 %v3378_v14, %v3378_v14  ;;  %v11761_v32 = vpack.c.bf16 %v3382_v15, %v3382_v15  ;;  %v11763_v29 = vpack.c.bf16 %v3386_v60, %v3386_v60  ;;  %v11765_v57 = vpack.c.bf16 %v3390_v40, %v3390_v40 }
 0x747   : > { %v11767_v25 = vpack.c.bf16 %v3394_v23, %v3394_v23  ;;  %v11769_v48 = vpack.c.bf16 %v3398_v59, %v3398_v59  ;;  %v11771_v18 = vpack.c.bf16 %v3402_v16, %v3402_v16  ;;  %v11773_v34 = vpack.c.bf16 %v3406_v62, %v3406_v62 }
 0x748   : > { %v11775_v3 = vpack.c.bf16 %v3410_v55, %v3410_v55  ;;  %v11777_v47 = vpack.c.bf16 %v3414_v43, %v3414_v43  ;;  %v11779_v9 = vpack.c.bf16 %v3418_v38, %v3418_v38  ;;  %v11781_v52 = vpack.c.bf16 %v3422_v45, %v3422_v45 }
 0x749   : > { %v3602_v14 = vpack.i.b16 %v3471_v20, %v3471_v20  ;;  %v3609_v15 = vpack.i.b16 %v3472_v11, %v3472_v11  ;;  %v3713_v40 = vadd.bf16 %v3495_v42, %v11651_v51  ;;  %v3714_v60 = vadd.bf16 %v3502_v58, %v11655_v36 }
 0x74a   : > { %v3721_v43 = vadd.bf16 %v3551_v4, %v11651_v51  ;;  %v3722_v38 = vadd.bf16 %v3558_v19, %v11655_v36  ;;  %v3509_v45 = vrot.slane %v3504_v56, %v11044_v13  ;;  %v3516_v62 = vrot.slane %v3511_v54, %v11044_v13 }
 0x74b   : > { %v3607_v16 = vrot.slane %v3602_v14, %v11044_v13  ;;  %v3614_v42 = vrot.slane %v3609_v15, %v11044_v13  ;;  %vm3745_vm12 = vcmp.gt.bf16.partialorder %v3713_v40, 0  ;;  %vm3746_vm13 = vcmp.gt.bf16.partialorder %v3714_v60, 0 }
 0x74c   : > { %v3777_v58 = vmul.bf16 1045249613, %v3713_v40  ;;  %v3778_v4 = vmul.bf16 1045249613, %v3714_v60  ;;  %vm3753_vm14 = vcmp.gt.bf16.partialorder %v3721_v43, 0  ;;  %vm3754_vm15 = vcmp.gt.bf16.partialorder %v3722_v38, 0 }
 0x74d   : > { %v3785_v19 = vmul.bf16 1045249613, %v3721_v43  ;;  %v3786_v20 = vmul.bf16 1045249613, %v3722_v38  ;;  %v3715_v56 = vadd.bf16 %v3509_v45, %v11651_v51  ;;  %v3716_v23 = vadd.bf16 %v3516_v62, %v11655_v36 }
 0x74e   : > { %v3809_v59 = vsel %vm3745_vm12, %v3713_v40, %v3777_v58  ;;  %v3810_v12 = vsel %vm3746_vm13, %v3714_v60, %v3778_v4 }
 0x74f   : > { %v3855_v21 = vmul.bf16 %v11664_v27, %v3809_v59  ;;  %v3856_v54 = vmul.bf16 %v11667_v28, %v3810_v12  ;;  %v3817_v14 = vsel %vm3753_vm14, %v3721_v43, %v3785_v19  ;;  %v3818_v15 = vsel %vm3754_vm15, %v3722_v38, %v3786_v20 }
 0x750   : > { %v3863_v17 = vmul.bf16 %v11664_v27, %v3817_v14  ;;  %v3864_v55 = vmul.bf16 %v11667_v28, %v3818_v15  ;;  %vm3747_vm11 = vcmp.gt.bf16.partialorder %v3715_v56, 0  ;;  %vm3748_vm10 = vcmp.gt.bf16.partialorder %v3716_v23, 0 }
 0x751   : > { %v3889_v11 = vunpack.c.h.bf16 %v3855_v21  ;;  %v3890_v37 = vunpack.c.h.bf16 %v3856_v54  ;;  %v3887_v40 = vunpack.c.l.bf16 %v3855_v21  ;;  %v3888_v60 = vunpack.c.l.bf16 %v3856_v54 }
 0x752   : > { %v3905_v58 = vunpack.c.h.bf16 %v3863_v17  ;;  %v3906_v45 = vunpack.c.h.bf16 %v3864_v55  ;;  %v3903_v4 = vunpack.c.l.bf16 %v3863_v17  ;;  %v3904_v62 = vunpack.c.l.bf16 %v3864_v55 }
 0x753   : > { %v3954_v63 = vadd.f32 %v3890_v37, %v3889_v11  ;;  %v3951_v59 = vadd.f32 %v3888_v60, %v3887_v40  ;;  %v3779_v6 = vmul.bf16 1045249613, %v3715_v56  ;;  %v3780_v12 = vmul.bf16 1045249613, %v3716_v23 }
 0x754   : > { %v3978_v43 = vadd.f32 %v3906_v45, %v3905_v58  ;;  %v3975_v38 = vadd.f32 %v3904_v62, %v3903_v4  ;;  %v3729_v20 = vadd.bf16 %v3607_v16, %v11651_v51  ;;  %v3730_v19 = vadd.bf16 %v3614_v42, %v11655_v36 }
 0x755   : > { %3955 = vadd.xlane.f32.xlu1 %v3954_v63  ;;  %3952 = vadd.xlane.f32.xlu0 %v3951_v59  ;;  %v3811_v14 = vsel %vm3747_vm11, %v3715_v56, %v3779_v6  ;;  %v3812_v21 = vsel %vm3748_vm10, %v3716_v23, %v3780_v12  ;;  %v12957_v17 = vpack.i.b16 %v11695_v0, %v11695_v0 }
 0x756   : > { %v3857_v11 = vmul.bf16 %v11664_v27, %v3811_v14  ;;  %v3858_v55 = vmul.bf16 %v11667_v28, %v3812_v21  ;;  %vm3761_vm12 = vcmp.gt.bf16.partialorder %v3729_v20, 0  ;;  %vm3762_vm13 = vcmp.gt.bf16.partialorder %v3730_v19, 0 }
 0x757   : > { %v3523_v37 = vrot.slane %v12957_v17, %v11044_v13  ;;  %v3793_v16 = vmul.bf16 1045249613, %v3729_v20  ;;  %v3794_v54 = vmul.bf16 1045249613, %v3730_v19  ;;  %v12958_v63 = vpack.i.b16 %v11697_v2, %v11697_v2 }
 0x758   : > { %v3893_v42 = vunpack.c.h.bf16 %v3857_v11  ;;  %v3894_v56 = vunpack.c.h.bf16 %v3858_v55  ;;  %v3891_v15 = vunpack.c.l.bf16 %v3857_v11  ;;  %v3892_v0 = vunpack.c.l.bf16 %v3858_v55 }
 0x759   : > { %v3530_v6 = vrot.slane %v12958_v63, %v11044_v13  ;;  %v3717_v23 = vadd.bf16 %v3523_v37, %v11651_v51  ;;  %3979 = vadd.xlane.f32.xlu1 %v3978_v43  ;;  %3976 = vadd.xlane.f32.xlu0 %v3975_v38  ;;  %v3825_v40 = vsel %vm3761_vm12, %v3729_v20, %v3793_v16 }
 0x75a   : > { %v3826_v60 = vsel %vm3762_vm13, %v3730_v19, %v3794_v54  ;;  %v3960_v45 = vadd.f32 %v3894_v56, %v3893_v42  ;;  %v3957_v4 = vadd.f32 %v3892_v0, %v3891_v15  ;;  %v3871_v62 = vmul.bf16 %v11664_v27, %v3825_v40 }
 0x75b   : > { %v3718_v58 = vadd.bf16 %v3530_v6, %v11655_v36  ;;  %vm3749_vm10 = vcmp.gt.bf16.partialorder %v3717_v23, 0  ;;  %v3872_v2 = vmul.bf16 %v11667_v28, %v3826_v60  ;;  %v3781_v59 = vmul.bf16 1045249613, %v3717_v23 }
 0x75c   : > { %v12959_v14 = vpack.i.b16 %v11767_v25, %v11767_v25  ;;  %v3921_v38 = vunpack.c.h.bf16 %v3871_v62  ;;  %v3919_v19 = vunpack.c.l.bf16 %v3871_v62  ;;  %v12960_v11 = vpack.i.b16 %v11769_v48, %v11769_v48 }
 0x75d   : > { %vm3750_vm14 = vcmp.gt.bf16.partialorder %v3718_v58, 0  ;;  %v3782_v12 = vmul.bf16 1045249613, %v3718_v58  ;;  %v3922_v20 = vunpack.c.h.bf16 %v3872_v2  ;;  %v3920_v21 = vunpack.c.l.bf16 %v3872_v2  ;;  %3961 = vadd.xlane.f32.xlu1 %v3960_v45  ;;  %3958 = vadd.xlane.f32.xlu0 %v3957_v4 }
 0x75e   : > { %v3663_v43 = vrot.slane %v12959_v14, %v11044_v13  ;;  %v3813_v17 = vsel %vm3749_vm10, %v3717_v23, %v3781_v59  ;;  %v3670_v55 = vrot.slane %v12960_v11, %v11044_v13  ;;  %v12961_v23 = vpack.i.b16 %v11699_v41, %v11699_v41 }
 0x75f   : > { %v3814_v37 = vsel %vm3750_vm14, %v3718_v58, %v3782_v12  ;;  %v4002_v16 = vadd.f32 %v3922_v20, %v3921_v38  ;;  %v3999_v54 = vadd.f32 %v3920_v21, %v3919_v19  ;;  %v3859_v63 = vmul.bf16 %v11664_v27, %v3813_v17 }
 0x760   : > { %v3860_v25 = vmul.bf16 %v11667_v28, %v3814_v37  ;;  %v3737_v6 = vadd.bf16 %v3663_v43, %v11651_v51  ;;  %v3738_v42 = vadd.bf16 %v3670_v55, %v11655_v36  ;;  %v3565_v56 = vrot.slane %v12961_v23, %v11044_v13 }
 0x761   : > { %v12962_v48 = vpack.i.b16 %v11701_v53, %v11701_v53  ;;  %v3897_v0 = vunpack.c.h.bf16 %v3859_v63  ;;  %v3895_v60 = vunpack.c.l.bf16 %v3859_v63  ;;  %4003 = vadd.xlane.f32.xlu1 %v4002_v16  ;;  %4000 = vadd.xlane.f32.xlu0 %v3999_v54  ;;  %v12963_v53 = vpack.i.b16 %v11703_v8, %v11703_v8 }
 0x762   : > { %v3898_v40 = vunpack.c.h.bf16 %v3860_v25  ;;  %v3896_v58 = vunpack.c.l.bf16 %v3860_v25  ;;  %vm3769_vm15 = vcmp.gt.bf16.partialorder %v3737_v6, 0  ;;  %vm3770_vm11 = vcmp.gt.bf16.partialorder %v3738_v42, 0 }
 0x763   : > { %v3572_v15 = vrot.slane %v12962_v48, %v11044_v13  ;;  %v3801_v45 = vmul.bf16 1045249613, %v3737_v6  ;;  %v3802_v4 = vmul.bf16 1045249613, %v3738_v42  ;;  %v3723_v41 = vadd.bf16 %v3565_v56, %v11651_v51 }
 0x764   : > { %v3966_v62 = vadd.f32 %v3898_v40, %v3897_v0  ;;  %v3963_v2 = vadd.f32 %v3896_v58, %v3895_v60  ;;  %v3579_v43 = vrot.slane %v12963_v53, %v11044_v13  ;;  %v12964_v38 = vpack.i.b16 %v11705_v5, %v11705_v5 }
 0x765   : > { %v3724_v59 = vadd.bf16 %v3572_v15, %v11655_v36  ;;  %v3833_v12 = vsel %vm3769_vm15, %v3737_v6, %v3801_v45  ;;  %v3834_v14 = vsel %vm3770_vm11, %v3738_v42, %v3802_v4  ;;  %vm3755_vm12 = vcmp.gt.bf16.partialorder %v3723_v41, 0 }
 0x766   : > { %v3586_v20 = vrot.slane %v12964_v38, %v11044_v13  ;;  %v3879_v19 = vmul.bf16 %v11664_v27, %v3833_v12  ;;  %v3880_v21 = vmul.bf16 %v11667_v28, %v3834_v14  ;;  %3967 = vadd.xlane.f32.xlu1 %v3966_v62  ;;  %3964 = vadd.xlane.f32.xlu0 %v3963_v2  ;;  %v3787_v17 = vmul.bf16 1045249613, %v3723_v41 }
 0x767   : > { %vm3756_vm13 = vcmp.gt.bf16.partialorder %v3724_v59, 0  ;;  %v3788_v37 = vmul.bf16 1045249613, %v3724_v59  ;;  %v3725_v11 = vadd.bf16 %v3579_v43, %v11651_v51  ;;  %v12965_v0 = vpack.i.b16 %v11755_v31, %v11755_v31 }
 0x768   : > { %v3726_v8 = vadd.bf16 %v3586_v20, %v11655_v36  ;;  %v3937_v55 = vunpack.c.h.bf16 %v3879_v19  ;;  %v3938_v16 = vunpack.c.h.bf16 %v3880_v21  ;;  %v3935_v54 = vunpack.c.l.bf16 %v3879_v19 }
 0x769   : > { %v3936_v63 = vunpack.c.l.bf16 %v3880_v21  ;;  %v3819_v5 = vsel %vm3755_vm12, %v3723_v41, %v3787_v17  ;;  %v3820_v25 = vsel %vm3756_vm13, %v3724_v59, %v3788_v37  ;;  %vm3757_vm10 = vcmp.gt.bf16.partialorder %v3725_v11, 0 }
 0x76a   : > { %vm3758_vm14 = vcmp.gt.bf16.partialorder %v3726_v8, 0  ;;  %v4026_v6 = vadd.f32 %v3938_v16, %v3937_v55  ;;  %v3865_v23 = vmul.bf16 %v11664_v27, %v3819_v5  ;;  %v3866_v56 = vmul.bf16 %v11667_v28, %v3820_v25 }
 0x76b   : > { %v4023_v42 = vadd.f32 %v3936_v63, %v3935_v54  ;;  %v3789_v48 = vmul.bf16 1045249613, %v3725_v11  ;;  %v3790_v15 = vmul.bf16 1045249613, %v3726_v8  ;;  %v3621_v40 = vrot.slane %v12965_v0, %v11044_v13 }
 0x76c   : > { %v12966_v60 = vpack.i.b16 %v11757_v22, %v11757_v22  ;;  %4027 = vadd.xlane.f32.xlu1 %v4026_v6  ;;  %v3909_v45 = vunpack.c.h.bf16 %v3865_v23  ;;  %v3910_v4 = vunpack.c.h.bf16 %v3866_v56  ;;  %v3907_v62 = vunpack.c.l.bf16 %v3865_v23 }
 0x76d   : > { %4024 = vadd.xlane.f32.xlu0 %v4023_v42  ;;  %v3908_v2 = vunpack.c.l.bf16 %v3866_v56  ;;  %v3821_v41 = vsel %vm3757_vm10, %v3725_v11, %v3789_v48  ;;  %v3822_v59 = vsel %vm3758_vm14, %v3726_v8, %v3790_v15  ;;  %v3731_v12 = vadd.bf16 %v3621_v40, %v11651_v51 }
 0x76e   : > { %v3628_v58 = vrot.slane %v12966_v60, %v11044_v13  ;;  %v3984_v14 = vadd.f32 %v3910_v4, %v3909_v45  ;;  %v3867_v43 = vmul.bf16 %v11664_v27, %v3821_v41  ;;  %v3868_v22 = vmul.bf16 %v11667_v28, %v3822_v59 }
 0x76f   : > { %v3981_v53 = vadd.f32 %v3908_v2, %v3907_v62  ;;  %vm3763_vm15 = vcmp.gt.bf16.partialorder %v3731_v12, 0  ;;  %v3795_v38 = vmul.bf16 1045249613, %v3731_v12  ;;  %v12967_v55 = vpack.i.b16 %v11759_v30, %v11759_v30 }
 0x770   : > { %v3732_v31 = vadd.bf16 %v3628_v58, %v11655_v36  ;;  %3985 = vadd.xlane.f32.xlu1 %v3984_v14  ;;  %v3913_v19 = vunpack.c.h.bf16 %v3867_v43  ;;  %v3914_v21 = vunpack.c.h.bf16 %v3868_v22  ;;  %v3911_v17 = vunpack.c.l.bf16 %v3867_v43 }
 0x771   : > { %3982 = vadd.xlane.f32.xlu0 %v3981_v53  ;;  %v3912_v37 = vunpack.c.l.bf16 %v3868_v22  ;;  %v3827_v11 = vsel %vm3763_vm15, %v3731_v12, %v3795_v38  ;;  %v3635_v16 = vrot.slane %v12967_v55, %v11044_v13  ;;  %v12968_v54 = vpack.i.b16 %v11761_v32, %v11761_v32 }
 0x772   : > { %vm3764_vm11 = vcmp.gt.bf16.partialorder %v3732_v31, 0  ;;  %v3796_v20 = vmul.bf16 1045249613, %v3732_v31  ;;  %v3990_v5 = vadd.f32 %v3914_v21, %v3913_v19  ;;  %v3873_v6 = vmul.bf16 %v11664_v27, %v3827_v11 }
 0x773   : > { %v3642_v63 = vrot.slane %v12968_v54, %v11044_v13  ;;  %v3987_v25 = vadd.f32 %v3912_v37, %v3911_v17  ;;  %v3733_v23 = vadd.bf16 %v3635_v16, %v11651_v51  ;;  %v3461_v48 = vpack.c.bf16 %v11682_v61, %v11682_v61 }
 0x774   : > { %v3828_v8 = vsel %vm3764_vm11, %v3732_v31, %v3796_v20  ;;  %v3462_v30 = vpack.c.bf16 %v11685_v24, %v11685_v24  ;;  %3991 = vadd.xlane.f32.xlu1 %v3990_v5  ;;  %v3925_v32 = vunpack.c.h.bf16 %v3873_v6  ;;  %v3923_v0 = vunpack.c.l.bf16 %v3873_v6 }
 0x775   : > { %v3874_v42 = vmul.bf16 %v11667_v28, %v3828_v8  ;;  %v3734_v56 = vadd.bf16 %v3642_v63, %v11655_v36  ;;  %3988 = vadd.xlane.f32.xlu0 %v3987_v25  ;;  %vm3765_vm12 = vcmp.gt.bf16.partialorder %v3733_v23, 0  ;;  %v3797_v60 = vmul.bf16 1045249613, %v3733_v23 }
 0x776   : > { %v3532_v62 = vpack.i.b16 %v3461_v48, %v3461_v48  ;;  %v3539_v2 = vpack.i.b16 %v3462_v30, %v3462_v30  ;;  %v12969_v61 = vpack.i.b16 %v11771_v18, %v11771_v18  ;;  %v12970_v12 = vpack.i.b16 %v11773_v34, %v11773_v34 }
 0x777   : > { %v3926_v15 = vunpack.c.h.bf16 %v3874_v42  ;;  %v3924_v40 = vunpack.c.l.bf16 %v3874_v42  ;;  %vm3766_vm13 = vcmp.gt.bf16.partialorder %v3734_v56, 0  ;;  %v3798_v58 = vmul.bf16 1045249613, %v3734_v56 }
 0x778   : > { %v3829_v41 = vsel %vm3765_vm12, %v3733_v23, %v3797_v60  ;;  %v3677_v24 = vrot.slane %v12969_v61, %v11044_v13  ;;  %v3684_v31 = vrot.slane %v12970_v12, %v11044_v13  ;;  %v3537_v43 = vrot.slane %v3532_v62, %v11044_v13 }
 0x779   : > { %v4008_v45 = vadd.f32 %v3926_v15, %v3925_v32  ;;  %v4005_v4 = vadd.f32 %v3924_v40, %v3923_v0  ;;  %v3830_v59 = vsel %vm3766_vm13, %v3734_v56, %v3798_v58  ;;  %v3875_v14 = vmul.bf16 %v11664_v27, %v3829_v41 }
 0x77a   : > { %v3876_v53 = vmul.bf16 %v11667_v28, %v3830_v59  ;;  %v3544_v22 = vrot.slane %v3539_v2, %v11044_v13  ;;  %v3739_v38 = vadd.bf16 %v3677_v24, %v11651_v51  ;;  %v3740_v18 = vadd.bf16 %v3684_v31, %v11655_v36 }
 0x77b   : > { %4009 = vadd.xlane.f32.xlu1 %v4008_v45  ;;  %4006 = vadd.xlane.f32.xlu0 %v4005_v4  ;;  %v12971_v20 = vpack.i.b16 %v11775_v3, %v11775_v3  ;;  %v3929_v19 = vunpack.c.h.bf16 %v3875_v14  ;;  %v3927_v17 = vunpack.c.l.bf16 %v3875_v14  ;;  %v3719_v11 = vadd.bf16 %v3537_v43, %v11651_v51 }
 0x77c   : > { %v3930_v21 = vunpack.c.h.bf16 %v3876_v53  ;;  %v3928_v37 = vunpack.c.l.bf16 %v3876_v53  ;;  %v3720_v8 = vadd.bf16 %v3544_v22, %v11655_v36  ;;  %vm3771_vm10 = vcmp.gt.bf16.partialorder %v3739_v38, 0 }
 0x77d   : > { %v3691_v34 = vrot.slane %v12971_v20, %v11044_v13  ;;  %vm3772_vm14 = vcmp.gt.bf16.partialorder %v3740_v18, 0  ;;  %v3803_v54 = vmul.bf16 1045249613, %v3739_v38  ;;  %v3804_v63 = vmul.bf16 1045249613, %v3740_v18 }
 0x77e   : > { %v4014_v55 = vadd.f32 %v3930_v21, %v3929_v19  ;;  %v4011_v16 = vadd.f32 %v3928_v37, %v3927_v17  ;;  %vm3751_vm15 = vcmp.gt.bf16.partialorder %v3719_v11, 0  ;;  %vm3752_vm11 = vcmp.gt.bf16.partialorder %v3720_v8, 0 }
 0x77f   : > { %v3783_v5 = vmul.bf16 1045249613, %v3719_v11  ;;  %v3784_v25 = vmul.bf16 1045249613, %v3720_v8  ;;  %v3835_v3 = vsel %vm3771_vm10, %v3739_v38, %v3803_v54  ;;  %v3836_v6 = vsel %vm3772_vm14, %v3740_v18, %v3804_v63 }
 0x780   : > { %4015 = vadd.xlane.f32.xlu1 %v4014_v55  ;;  %4012 = vadd.xlane.f32.xlu0 %v4011_v16  ;;  %v12972_v42 = vpack.i.b16 %v11777_v47, %v11777_v47  ;;  %v3881_v30 = vmul.bf16 %v11664_v27, %v3835_v3  ;;  %v3882_v32 = vmul.bf16 %v11667_v28, %v3836_v6 }
 0x781   : > { %v3815_v56 = vsel %vm3751_vm15, %v3719_v11, %v3783_v5  ;;  %v3816_v48 = vsel %vm3752_vm11, %v3720_v8, %v3784_v25  ;;  %v3741_v40 = vadd.bf16 %v3691_v34, %v11651_v51  ;;  %v12973_v43 = vpack.i.b16 %v11707_v33, %v11707_v33 }
 0x782   : > { %v3698_v23 = vrot.slane %v12972_v42, %v11044_v13  ;;  %v3861_v15 = vmul.bf16 %v11664_v27, %v3815_v56  ;;  %v3862_v0 = vmul.bf16 %v11667_v28, %v3816_v48  ;;  %v3941_v58 = vunpack.c.h.bf16 %v3881_v30 }
 0x783   : > { %v3942_v45 = vunpack.c.h.bf16 %v3882_v32  ;;  %v3939_v4 = vunpack.c.l.bf16 %v3881_v30  ;;  %v3940_v62 = vunpack.c.l.bf16 %v3882_v32  ;;  %vm3773_vm12 = vcmp.gt.bf16.partialorder %v3741_v40, 0 }
 0x784   : > { %v3742_v60 = vadd.bf16 %v3698_v23, %v11655_v36  ;;  %v3901_v47 = vunpack.c.h.bf16 %v3861_v15  ;;  %v3902_v2 = vunpack.c.h.bf16 %v3862_v0  ;;  %v3899_v41 = vunpack.c.l.bf16 %v3861_v15 }
 0x785   : > { %v3900_v59 = vunpack.c.l.bf16 %v3862_v0  ;;  %v4032_v61 = vadd.f32 %v3942_v45, %v3941_v58  ;;  %v4029_v24 = vadd.f32 %v3940_v62, %v3939_v4  ;;  %v3805_v14 = vmul.bf16 1045249613, %v3741_v40 }
 0x786   : > { %vm3774_vm13 = vcmp.gt.bf16.partialorder %v3742_v60, 0  ;;  %v3972_v12 = vadd.f32 %v3902_v2, %v3901_v47  ;;  %v3806_v53 = vmul.bf16 1045249613, %v3742_v60  ;;  %v3593_v22 = vrot.slane %v12973_v43, %v11044_v13 }
 0x787   : > { %v3969_v31 = vadd.f32 %v3900_v59, %v3899_v41  ;;  %v12974_v38 = vpack.i.b16 %v11709_v1, %v11709_v1  ;;  %v12975_v20 = vpack.i.b16 %v11763_v29, %v11763_v29  ;;  %v12976_v19 = vpack.i.b16 %v11765_v57, %v11765_v57 }
 0x788   : > { %3973 = vadd.xlane.f32.xlu1 %v3972_v12  ;;  %v3837_v17 = vsel %vm3773_vm12, %v3741_v40, %v3805_v14  ;;  %v3838_v33 = vsel %vm3774_vm13, %v3742_v60, %v3806_v53  ;;  %v12977_v37 = vpack.i.b16 %v11779_v9, %v11779_v9  ;;  %v3727_v29 = vadd.bf16 %v3593_v22, %v11651_v51 }
 0x789   : > { %v3600_v18 = vrot.slane %v12974_v38, %v11044_v13  ;;  %v3649_v34 = vrot.slane %v12975_v20, %v11044_v13  ;;  %v3656_v21 = vrot.slane %v12976_v19, %v11044_v13  ;;  %3970 = vadd.xlane.f32.xlu0 %v3969_v31  ;;  %v3883_v11 = vmul.bf16 %v11664_v27, %v3837_v17 }
 0x78a   : > { %v3705_v1 = vrot.slane %v12977_v37, %v11044_v13  ;;  %v3884_v8 = vmul.bf16 %v11667_v28, %v3838_v33  ;;  %v12978_v54 = vpack.i.b16 %v11781_v52, %v11781_v52  ;;  %vm3759_vm10 = vcmp.gt.bf16.partialorder %v3727_v29, 0 }
 0x78b   : > { %v3728_v55 = vadd.bf16 %v3600_v18, %v11655_v36  ;;  %v3735_v57 = vadd.bf16 %v3649_v34, %v11651_v51  ;;  %v3736_v16 = vadd.bf16 %v3656_v21, %v11655_v36  ;;  %v3945_v5 = vunpack.c.h.bf16 %v3883_v11 }
 0x78c   : > { %v3712_v63 = vrot.slane %v12978_v54, %v11044_v13  ;;  %v3743_v9 = vadd.bf16 %v3705_v1, %v11651_v51  ;;  %v3946_v25 = vunpack.c.h.bf16 %v3884_v8  ;;  %v3943_v3 = vunpack.c.l.bf16 %v3883_v11  ;;  %4033 = vadd.xlane.f32.xlu1 %v4032_v61 }
 0x78d   : > { %v3944_v6 = vunpack.c.l.bf16 %v3884_v8  ;;  %4030 = vadd.xlane.f32.xlu0 %v4029_v24  ;;  %vm3760_vm14 = vcmp.gt.bf16.partialorder %v3728_v55, 0  ;;  %v3791_v42 = vmul.bf16 1045249613, %v3727_v29  ;;  %v3792_v23 = vmul.bf16 1045249613, %v3728_v55 }
 0x78e   : > { %v4038_v56 = vadd.f32 %v3946_v25, %v3945_v5  ;;  %vm3767_vm15 = vcmp.gt.bf16.partialorder %v3735_v57, 0  ;;  %vm3768_vm11 = vcmp.gt.bf16.partialorder %v3736_v16, 0  ;;  %v3799_v52 = vmul.bf16 1045249613, %v3735_v57 }
 0x78f   : > { %v4035_v48 = vadd.f32 %v3944_v6, %v3943_v3  ;;  %v3823_v30 = vsel %vm3759_vm10, %v3727_v29, %v3791_v42  ;;  %v3824_v32 = vsel %vm3760_vm14, %v3728_v55, %v3792_v23  ;;  %v3800_v15 = vmul.bf16 1045249613, %v3736_v16 }
 0x790   : > { %v3869_v51 = vmul.bf16 %v11664_v27, %v3823_v30  ;;  %v3870_v0 = vmul.bf16 %v11667_v28, %v3824_v32  ;;  %v3744_v40 = vadd.bf16 %v3712_v63, %v11655_v36  ;;  %4039 = vadd.xlane.f32.xlu1 %v4038_v56  ;;  %v3831_v60 = vsel %vm3767_vm15, %v3735_v57, %v3799_v52 }
 0x791   : > { %4036 = vadd.xlane.f32.xlu0 %v4035_v48  ;;  %v3832_v58 = vsel %vm3768_vm11, %v3736_v16, %v3800_v15  ;;  %vm3775_vm12 = vcmp.gt.bf16.partialorder %v3743_v9, 0  ;;  %v3807_v45 = vmul.bf16 1045249613, %v3743_v9  ;;  %v3877_v41 = vmul.bf16 %v11664_v27, %v3831_v60 }
 0x792   : > { %v3917_v4 = vunpack.c.h.bf16 %v3869_v51  ;;  %v3918_v62 = vunpack.c.h.bf16 %v3870_v0  ;;  %v3915_v47 = vunpack.c.l.bf16 %v3869_v51  ;;  %v3916_v2 = vunpack.c.l.bf16 %v3870_v0 }
 0x793   : > { %v3878_v59 = vmul.bf16 %v11667_v28, %v3832_v58  ;;  %vm3776_vm13 = vcmp.gt.bf16.partialorder %v3744_v40, 0  ;;  %v3808_v61 = vmul.bf16 1045249613, %v3744_v40  ;;  %v3839_v31 = vsel %vm3775_vm12, %v3743_v9, %v3807_v45 }
 0x794   : > { %v3996_v24 = vadd.f32 %v3918_v62, %v3917_v4  ;;  %v3993_v12 = vadd.f32 %v3916_v2, %v3915_v47  ;;  %v3933_v36 = vunpack.c.h.bf16 %v3877_v41  ;;  %v3931_v53 = vunpack.c.l.bf16 %v3877_v41 }
 0x795   : > { %v3934_v14 = vunpack.c.h.bf16 %v3878_v59  ;;  %v3932_v43 = vunpack.c.l.bf16 %v3878_v59  ;;  %v3840_v22 = vsel %vm3776_vm13, %v3744_v40, %v3808_v61  ;;  %v3885_v38 = vmul.bf16 %v11664_v27, %v3839_v31 }
 0x796   : > { %3997 = vadd.xlane.f32.xlu1 %v3996_v24  ;;  %3994 = vadd.xlane.f32.xlu0 %v3993_v12  ;;  %v3886_v18 = vmul.bf16 %v11667_v28, %v3840_v22  ;;  %vm12979_vm10 = vcmp.gt.f32.partialorder %v11534_v35, 0.0 }
 0x797   : > { %v4020_v20 = vadd.f32 %v3934_v14, %v3933_v36  ;;  %v4017_v34 = vadd.f32 %v3932_v43, %v3931_v53  ;;  %v3949_v19 = vunpack.c.h.bf16 %v3885_v38  ;;  %v3947_v21 = vunpack.c.l.bf16 %v3885_v38 }
 0x798   : > { %v3950_v17 = vunpack.c.h.bf16 %v3886_v18  ;;  %v3948_v33 = vunpack.c.l.bf16 %v3886_v18 }
 0x79a   : > { %4021 = vadd.xlane.f32.xlu1 %v4020_v20  ;;  %4018 = vadd.xlane.f32.xlu0 %v4017_v34  ;;  %v4044_v37 = vadd.f32 %v3950_v17, %v3949_v19  ;;  %v4041_v1 = vadd.f32 %v3948_v33, %v3947_v21 }
 0x79e   : > { %4045 = vadd.xlane.f32.xlu1 %v4044_v37  ;;  %4042 = vadd.xlane.f32.xlu0 %v4041_v1 }
 0x7e2   : > { %v3956_v11 = vpop.xlane.xlu1 %3955  ;;  %v3953_v8 = vpop.xlane.xlu0 %3952 }
 0x7e3   : > { %v4086_v0 = vrot.slane %v3956_v11, %v11350_v46  ;;  %v4082_v40 = vrot.slane %v3953_v8, %v11353_v49 }
 0x7e5   : > { %v4087_v2 = vsel %vm2073_vm0, %v4086_v0, %v4082_v40 }
 0x7e6   : > { %v3980_v29 = vpop.xlane.xlu1 %3979  ;;  %v3977_v55 = vpop.xlane.xlu0 %3976 }
 0x7e7   : > { %v4122_v24 = vrot.slane %v3980_v29, %v11350_v46  ;;  %v4118_v12 = vrot.slane %v3977_v55, %v11353_v49 }
 0x7e9   : > { %v4123_v18 = vsel %vm2073_vm0, %v4122_v24, %v4118_v12 }
 0x7ea   : > { %v3962_v57 = vpop.xlane.xlu1 %3961  ;;  %v3959_v27 = vpop.xlane.xlu0 %3958 }
 0x7eb   : > { %v4095_v32 = vrot.slane %v3962_v57, %v11350_v46  ;;  %v4091_v52 = vrot.slane %v3959_v27, %v11353_v49 }
 0x7ed   : > { %v4096_v62 = vsel %vm2073_vm0, %v4095_v32, %v4091_v52 }
 0x7ee   : > { %v4004_v16 = vpop.xlane.xlu1 %4003  ;;  %v4001_v28 = vpop.xlane.xlu0 %4000  ;;  %v4223_v31 = vsel %vm2210_vm1, %v4096_v62, %v4087_v2 }
 0x7ef   : > { %v4158_v34 = vrot.slane %v4004_v16, %v11350_v46  ;;  %v4154_v19 = vrot.slane %v4001_v28, %v11353_v49 }
 0x7f1   : > { %v4159_v28 = vsel %vm2073_vm0, %v4158_v34, %v4154_v19 }
 0x7f3   : > { %v3968_v54 = vpop.xlane.xlu1 %3967  ;;  %v3965_v63 = vpop.xlane.xlu0 %3964 }
 0x7f4   : > { %v4104_v15 = vrot.slane %v3968_v54, %v11350_v46  ;;  %v4100_v51 = vrot.slane %v3965_v63, %v11353_v49 }
 0x7f6   : > { %v4105_v47 = vsel %vm2073_vm0, %v4104_v15, %v4100_v51 }
 0x7f7   : > { %v4224_v36 = vsel %vm2212_vm2, %v4105_v47, %v4223_v31 }
 0x7f9   : > { %v11983_v9 = vpop.xlane.xlu1 %4027 }
 0x7fa   : > { %v11985_v5 = vpop.xlane.xlu0 %4024  ;;  %v4194_v63 = vrot.slane %v11983_v9, %v11350_v46 }
 0x7fd   : > { %v3986_v25 = vpop.xlane.xlu1 %3985 }
 0x7fe   : > { %v3983_v3 = vpop.xlane.xlu0 %3982  ;;  %v4131_v53 = vrot.slane %v3986_v25, %v11350_v46 }
 0x7ff   : > { %v4127_v43 = vrot.slane %v3983_v3, %v11353_v49 }
 0x801   : > { %v3992_v6 = vpop.xlane.xlu1 %3991  ;;  %v4132_v33 = vsel %vm2073_vm0, %v4131_v53, %v4127_v43 }
 0x802   : > { %v3989_v42 = vpop.xlane.xlu0 %3988  ;;  %v4140_v21 = vrot.slane %v3992_v6, %v11350_v46 }
 0x803   : > { %v4136_v17 = vrot.slane %v3989_v42, %v11353_v49  ;;  %v4190_v42 = vrot.slane %v11985_v5, %v11353_v49 }
 0x805   : > { %v4141_v54 = vsel %vm2073_vm0, %v4140_v21, %v4136_v17 }
 0x808   : > { %v4010_v23 = vpop.xlane.xlu1 %4009  ;;  %v4007_v56 = vpop.xlane.xlu0 %4006 }
 0x809   : > { %v4167_v37 = vrot.slane %v4010_v23, %v11350_v46  ;;  %v4163_v1 = vrot.slane %v4007_v56, %v11353_v49 }
 0x80b   : > { %v4168_v25 = vsel %vm2073_vm0, %v4167_v37, %v4163_v1 }
 0x80c   : > { %v4230_v0 = vsel %vm2210_vm1, %v4168_v25, %v4159_v28  ;;  %v9839_v28 = vld [vmem:[%s10896_s29 + $0x464] ss:$16 sps:$4 sm:$0xff]   ;;  %v9843_v25 = vld [vmem:[%s10896_s29 + $0x480] ss:$16 sps:$4 sm:$0xff]  }
 0x80d   : > { %v4016_v48 = vpop.xlane.xlu1 %4015  ;;  %v4013_v30 = vpop.xlane.xlu0 %4012 }
 0x80e   : > { %v4176_v11 = vrot.slane %v4016_v48, %v11350_v46  ;;  %v4172_v8 = vrot.slane %v4013_v30, %v11353_v49 }
 0x810   : > { %v4177_v23 = vsel %vm2073_vm0, %v4176_v11, %v4172_v8  ;;  %v9819_v11 = vld [vmem:[%s10896_s29 + $0x400] ss:$16 sps:$4 sm:$0xff]   ;;  %v9821_v8 = vld [vmem:[%s10896_s29 + $0x404] ss:$16 sps:$4 sm:$0xff]  }
 0x811   : > { %4736 = vmatprep.subr.bf16.mxu1 %v9821_v8  ;;  %v9884_v8 = vld [vmem:[%s10896_s29 + $0x54c] ss:$16 sps:$4 sm:$0xff]  }
 0x812   : > { %4737 = vmatpush1.bf16.msra.mxu1 %v9819_v11  ;;  %v9876_v11 = vld [vmem:[%s10896_s29 + $0x528] ss:$16 sps:$4 sm:$0xff]  }
 0x815   : > { %v3974_v60 = vpop.xlane.xlu1 %3973 }
 0x816   : > { %v3971_v58 = vpop.xlane.xlu0 %3970  ;;  %v4113_v45 = vrot.slane %v3974_v60, %v11350_v46 }
 0x817   : > { %v4109_v4 = vrot.slane %v3971_v58, %v11353_v49  ;;  %v4231_v58 = vsel %vm2212_vm2, %v4177_v23, %v4230_v0  ;;  %v9855_v23 = vld [vmem:[%s10896_s29 + $0x4c0] ss:$16 sps:$4 sm:$0xff]   ;;  %v9887_v0 = vld [vmem:[%s10896_s29 + $0x564] ss:$16 sps:$4 sm:$0xff]  }
 0x819   : > { %v4114_v41 = vsel %vm2073_vm0, %v4113_v45, %v4109_v4  ;;  %v4034_v59 = vpop.xlane.xlu1 %4033  ;;  %v4195_v4 = vsel %vm2073_vm0, %v4194_v63, %v4190_v42  ;;  %v9845_v63 = vld [vmem:[%s10896_s29 + $0x484] ss:$16 sps:$4 sm:$0xff]  }
 0x81a   : > { %v4031_v61 = vpop.xlane.xlu0 %4030  ;;  %v4225_v14 = vsel %vm2214_vm3, %v4114_v41, %v4224_v36  ;;  %v4203_v56 = vrot.slane %v4034_v59, %v11350_v46  ;;  %v9857_v42 = vld [vmem:[%s10896_s29 + $0x4c4] ss:$16 sps:$4 sm:$0xff]  }
 0x81b   : > { %v4226_v20 = vsel %vm2216_vm4, %v4123_v18, %v4225_v14  ;;  %v4199_v52 = vrot.slane %v4031_v61, %v11353_v49 }
 0x81c   : > { %v4227_v57 = vsel %vm2218_vm5, %v4132_v33, %v4226_v20 }
 0x81d   : > { %v4040_v22 = vpop.xlane.xlu1 %4039  ;;  %v4228_v6 = vsel %vm2220_vm6, %v4141_v54, %v4227_v57  ;;  %v4204_v41 = vsel %vm2073_vm0, %v4203_v56, %v4199_v52  ;;  %v9825_v57 = vld [vmem:[%s10896_s29 + $0x420] ss:$16 sps:$4 sm:$0xff]   ;;  %v9863_v56 = vld [vmem:[%s10896_s29 + $0x4e4] ss:$16 sps:$4 sm:$0xff]  }
 0x81e   : > { %v4037_v38 = vpop.xlane.xlu0 %4036  ;;  %v4212_v5 = vrot.slane %v4040_v22, %v11350_v46  ;;  %v9837_v54 = vld [vmem:[%s10896_s29 + $0x460] ss:$16 sps:$4 sm:$0xff]   ;;  %v9875_v52 = vld [vmem:[%s10896_s29 + $0x524] ss:$16 sps:$4 sm:$0xff]  }
 0x81f   : > { %v4208_v40 = vrot.slane %v4037_v38, %v11353_v49 }
 0x821   : > { %v4213_v12 = vsel %vm2073_vm0, %v4212_v5, %v4208_v40  ;;  %v9885_v5 = vld [vmem:[%s10896_s29 + $0x560] ss:$16 sps:$4 sm:$0xff]   ;;  %v9893_v40 = vld [vmem:[%s10896_s29 + $0x584] ss:$16 sps:$4 sm:$0xff]  }
 0x823   : > { %v3998_v29 = vpop.xlane.xlu1 %3997  ;;  %v3995_v55 = vpop.xlane.xlu0 %3994 }
 0x824   : > { %v4149_v27 = vrot.slane %v3998_v29, %v11350_v46  ;;  %v4145_v16 = vrot.slane %v3995_v55, %v11353_v49  ;;  %v9824_v29 = vld [vmem:[%s10896_s29 + $0x40c] ss:$16 sps:$4 sm:$0xff]   ;;  %v9827_v55 = vld [vmem:[%s10896_s29 + $0x424] ss:$16 sps:$4 sm:$0xff]  }
 0x825   : > { %4779 = vmatprep.subr.bf16.mxu0 %v9824_v29  ;;  %4738 = vmatprep.subr.bf16.mxu1 %v9827_v55  ;;  %v9882_v29 = vld [vmem:[%s10896_s29 + $0x548] ss:$16 sps:$4 sm:$0xff]   ;;  %v9890_v55 = vld [vmem:[%s10896_s29 + $0x56c] ss:$16 sps:$4 sm:$0xff]  }
 0x826   : > { %v4150_v3 = vsel %vm2073_vm0, %v4149_v27, %v4145_v16  ;;  %v9833_v27 = vld [vmem:[%s10896_s29 + $0x444] ss:$16 sps:$4 sm:$0xff]   ;;  %4739 = vmatpush1.bf16.msra.mxu1 %v9825_v57  ;;  %v9831_v16 = vld [vmem:[%s10896_s29 + $0x440] ss:$16 sps:$4 sm:$0xff]   ;;  %v9888_v57 = vld [vmem:[%s10896_s29 + $0x568] ss:$16 sps:$4 sm:$0xff]  }
 0x827   : > { %v4022_v48 = vpop.xlane.xlu1 %4021  ;;  %v4019_v30 = vpop.xlane.xlu0 %4018  ;;  %v4229_v32 = vsel %vm2222_vm7, %v4150_v3, %v4228_v6  ;;  %4740 = vmatprep.subr.bf16.mxu1 %v9833_v27  ;;  %v9851_v3 = vld [vmem:[%s10896_s29 + $0x4a4] ss:$16 sps:$4 sm:$0xff]   ;;  %v9849_v6 = vld [vmem:[%s10896_s29 + $0x4a0] ss:$16 sps:$4 sm:$0xff]   ;;  %v9896_v27 = vld [vmem:[%s10896_s29 + $0x58c] ss:$16 sps:$4 sm:$0xff]  }
 0x828   : > { %v4185_v9 = vrot.slane %v4022_v48, %v11350_v46  ;;  %v4181_v15 = vrot.slane %v4019_v30, %v11353_v49  ;;  %v4239_v51 = vsel %vm2028_vm8, %v4229_v32, -1e+30  ;;  %v9861_v48 = vld [vmem:[%s10896_s29 + $0x4e0] ss:$16 sps:$4 sm:$0xff]   ;;  %v9869_v30 = vld [vmem:[%s10896_s29 + $0x504] ss:$16 sps:$4 sm:$0xff]  }
 0x829   : > { %v4241_v60 = vsel %vm2235_vm9, %v4239_v51, -inf  ;;  %v9867_v32 = vld [vmem:[%s10896_s29 + $0x500] ss:$16 sps:$4 sm:$0xff]  }
 0x82a   : > { %v4186_v45 = vsel %vm2073_vm0, %v4185_v9, %v4181_v15  ;;  %4242 = vmax.xlane.f32.xlu0 %v4241_v60  ;;  %4741 = vmatpush1.bf16.msra.mxu1 %v9831_v16  ;;  %v9873_v9 = vld [vmem:[%s10896_s29 + $0x520] ss:$16 sps:$4 sm:$0xff]   ;;  %v9881_v15 = vld [vmem:[%s10896_s29 + $0x544] ss:$16 sps:$4 sm:$0xff]   ;;  %v9894_v16 = vld [vmem:[%s10896_s29 + $0x588] ss:$16 sps:$4 sm:$0xff]  }
 0x82b   : > { %v4232_v62 = vsel %vm2214_vm3, %v4186_v45, %v4231_v58  ;;  %v4046_v47 = vpop.xlane.xlu1 %4045  ;;  %v4043_v2 = vpop.xlane.xlu0 %4042  ;;  %4742 = vmatprep.subr.bf16.mxu1 %v9839_v28  ;;  %v9891_v60 = vld [vmem:[%s10896_s29 + $0x580] ss:$16 sps:$4 sm:$0xff]   ;;  %v9899_v58 = vld [vmem:[%s10896_s29 + $0x5a4] ss:$16 sps:$4 sm:$0xff]   ;;  %v9902_v28 = vld [vmem:[%s10896_s29 + $0x5ac] ss:$16 sps:$4 sm:$0xff]  }
 0x82c   : > { %v4233_v59 = vsel %vm2216_vm4, %v4195_v4, %v4232_v62  ;;  %v4221_v61 = vrot.slane %v4046_v47, %v11350_v46  ;;  %v4217_v24 = vrot.slane %v4043_v2, %v11353_v49  ;;  %v9897_v45 = vld [vmem:[%s10896_s29 + $0x5a0] ss:$16 sps:$4 sm:$0xff]  }
 0x82d   : > { %v4234_v31 = vsel %vm2218_vm5, %v4204_v41, %v4233_v59 }
 0x82e   : > { %v4222_v36 = vsel %vm2073_vm0, %v4221_v61, %v4217_v24  ;;  %v4235_v14 = vsel %vm2220_vm6, %v4213_v12, %v4234_v31  ;;  %4743 = vmatpush1.bf16.msra.mxu1 %v9837_v54  ;;  %v9822_v61 = vld [vmem:[%s10896_s29 + $0x408] ss:$16 sps:$4 sm:$0xff]   ;;  %v9830_v12 = vld [vmem:[%s10896_s29 + $0x42c] ss:$16 sps:$4 sm:$0xff]  }
 0x82f   : > { %v4236_v53 = vsel %vm2222_vm7, %v4222_v36, %v4235_v14  ;;  %4744 = vmatprep.subr.bf16.mxu1 %v9845_v63  ;;  %v9828_v31 = vld [vmem:[%s10896_s29 + $0x428] ss:$16 sps:$4 sm:$0xff]   ;;  %v9836_v36 = vld [vmem:[%s10896_s29 + $0x44c] ss:$16 sps:$4 sm:$0xff]   ;;  %v9903_v63 = vld [vmem:[%s10896_s29 + $0x5c0] ss:$16 sps:$4 sm:$0xff]  }
 0x830   : > { %v4240_v43 = vsel %vm12979_vm10, %v4236_v53, -1e+30  ;;  %v9834_v14 = vld [vmem:[%s10896_s29 + $0x448] ss:$16 sps:$4 sm:$0xff]   ;;  %v9842_v53 = vld [vmem:[%s10896_s29 + $0x46c] ss:$16 sps:$4 sm:$0xff]  }
 0x831   : > { %v4244_v22 = vsel %vm2235_vm9, %v4240_v43, -inf  ;;  %v9900_v54 = vld [vmem:[%s10896_s29 + $0x5a8] ss:$16 sps:$4 sm:$0xff]  }
 0x832   : > { %4245 = vmax.xlane.f32.xlu1 %v4244_v22  ;;  %4745 = vmatpush1.bf16.msra.mxu1 %v9843_v25  ;;  %v9848_v22 = vld [vmem:[%s10896_s29 + $0x48c] ss:$16 sps:$4 sm:$0xff]   ;;  %v9905_v25 = vld [vmem:[%s10896_s29 + $0x5c4] ss:$16 sps:$4 sm:$0xff]  }
 0x833   : > { %4746 = vmatprep.subr.bf16.mxu1 %v9851_v3  ;;  %v9906_v3 = vld [vmem:[%s10896_s29 + $0x5c8] ss:$16 sps:$4 sm:$0xff]  }
 0x836   : > { %4747 = vmatpush1.bf16.msra.mxu1 %v9849_v6  ;;  %v9908_v6 = vld [vmem:[%s10896_s29 + $0x5cc] ss:$16 sps:$4 sm:$0xff]  }
 0x837   : > { %4748 = vmatprep.subr.bf16.mxu1 %v9857_v42  ;;  %v9911_v42 = vld [vmem:[%s10896_s29 + $0x5e4] ss:$16 sps:$4 sm:$0xff]  }
 0x83a   : > { %4749 = vmatpush1.bf16.msra.mxu1 %v9855_v23  ;;  %v9914_v23 = vld [vmem:[%s10896_s29 + $0x5ec] ss:$16 sps:$4 sm:$0xff]  }
 0x83b   : > { %4750 = vmatprep.subr.bf16.mxu1 %v9863_v56  ;;  %v9909_v56 = vld [vmem:[%s10896_s29 + $0x5e0] ss:$16 sps:$4 sm:$0xff]  }
 0x83e   : > { %4751 = vmatpush1.bf16.msra.mxu1 %v9861_v48  ;;  %v9912_v48 = vld [vmem:[%s10896_s29 + $0x5e8] ss:$16 sps:$4 sm:$0xff]  }
 0x83f   : > { %4752 = vmatprep.subr.bf16.mxu1 %v9869_v30  ;;  %v9088_v30 = vld [vmem:[%s10904_s1 + $0x7] ss:$8 sm:$0x3] }
 0x842   : > { %4753 = vmatpush1.bf16.msra.mxu1 %v9867_v32  ;;  %v4270_v32 = vrot.slane %v9088_v30, %v11044_v13 }
 0x843   : > { %4754 = vmatprep.subr.bf16.mxu1 %v9875_v52  ;;  %v4274_v52 = vrot.slane %v9088_v30, %v11036_v7 }
 0x846   : > { %4755 = vmatpush1.bf16.msra.mxu1 %v9873_v9 }
 0x847   : > { %4756 = vmatprep.subr.bf16.mxu1 %v9881_v15 }
 0x8b7   : > { %v4243_v38 = vpop.xlane.xlu0 %4242 }
 0x8b8   : > { %v4247_v18 = vsub.f32 %v4239_v51, %v4243_v38  ;;  %v9879_v51 = vld [vmem:[%s10896_s29 + $0x540] ss:$16 sps:$4 sm:$0xff]   ;;  %v9846_v38 = vld [vmem:[%s10896_s29 + $0x488] ss:$16 sps:$4 sm:$0xff]  }
 0x8b9   : > { %4757 = vmatpush1.bf16.msra.mxu1 %v9879_v51 }
 0x8ba   : > { %v4249_v20 = vmul.f32 1.442695, %v4247_v18  ;;  %4758 = vmatprep.subr.bf16.mxu1 %v9887_v0  ;;  %v9854_v18 = vld [vmem:[%s10896_s29 + $0x4ac] ss:$16 sps:$4 sm:$0xff]  }
 0x8bc   : > { %10215 = vpow2.f32 %v4249_v20  ;;  %v9852_v20 = vld [vmem:[%s10896_s29 + $0x4a8] ss:$16 sps:$4 sm:$0xff]  }
 0x8bd   : > { %4759 = vmatpush1.bf16.msra.mxu1 %v9885_v5 }
 0x8be   : > { %4760 = vmatprep.subr.bf16.mxu1 %v9893_v40 }
 0x8bf   : > { %v4246_v34 = vpop.xlane.xlu1 %4245 }
 0x8c0   : > { %v4248_v19 = vsub.f32 %v4240_v43, %v4246_v34  ;;  %v9840_v43 = vld [vmem:[%s10896_s29 + $0x468] ss:$16 sps:$4 sm:$0xff]   ;;  %v9860_v34 = vld [vmem:[%s10896_s29 + $0x4cc] ss:$16 sps:$4 sm:$0xff]  }
 0x8c1   : > { %4761 = vmatpush1.bf16.msra.mxu1 %v9891_v60 }
 0x8c2   : > { %v4251_v21 = vmul.f32 1.442695, %v4248_v19  ;;  %4762 = vmatprep.subr.bf16.mxu1 %v9899_v58  ;;  %v9858_v19 = vld [vmem:[%s10896_s29 + $0x4c8] ss:$16 sps:$4 sm:$0xff]  }
 0x8c4   : > { %10217 = vpow2.f32 %v4251_v21  ;;  %v9866_v21 = vld [vmem:[%s10896_s29 + $0x4ec] ss:$16 sps:$4 sm:$0xff]  }
 0x8c5   : > { %4763 = vmatpush1.bf16.msra.mxu1 %v9897_v45 }
 0x8c6   : > { %v12057_v17 = vpop.eup %10215  ;;  %4764 = vmatprep.subr.bf16.mxu1 %v9905_v25 }
 0x8c7   : > { %v4253_v33 = vsel %vm2235_vm9, %v12057_v17, 0.0 }
 0x8c8   : > { %4254 = vadd.xlane.f32.xlu0 %v4253_v33  ;;  %v9872_v33 = vld [vmem:[%s10896_s29 + $0x50c] ss:$16 sps:$4 sm:$0xff]  }
 0x8c9   : > { %4765 = vmatpush1.bf16.msra.mxu1 %v9903_v63 }
 0x8ca   : > { %4766 = vmatprep.subr.bf16.mxu1 %v9911_v42 }
 0x8cd   : > { %4767 = vmatpush1.bf16.msra.mxu1 %v9909_v56 }
 0x8ce   : > { %v12061_v37 = vpop.eup %10217 }
 0x8cf   : > { %v4256_v1 = vsel %vm2235_vm9, %v12061_v37, 0.0 }
 0x8d0   : > { %4257 = vadd.xlane.f32.xlu1 %v4256_v1  ;;  %v9878_v1 = vld [vmem:[%s10896_s29 + $0x52c] ss:$16 sps:$4 sm:$0xff]  }
 0x955   : > { %v4255_v4 = vpop.xlane.xlu0 %4254 }
 0x956   : > { %10219 = vrcp.f32 %v4255_v4 }
 0x95d   : > { %v4258_v62 = vpop.xlane.xlu1 %4257 }
 0x95e   : > { %10221 = vrcp.f32 %v4258_v62 }
 0x960   : > { %v10220_v47 = vpop.eup %10219 }
 0x961   : > { %v4261_v41 = vmul.f32 %v10220_v47, %v12057_v17  ;;  %v9864_v17 = vld [vmem:[%s10896_s29 + $0x4e8] ss:$16 sps:$4 sm:$0xff]  }
 0x968   : > { %v10222_v2 = vpop.eup %10221 }
 0x969   : > { %v4262_v59 = vmul.f32 %v10222_v2, %v12061_v37  ;;  %v9870_v37 = vld [vmem:[%s10896_s29 + $0x508] ss:$16 sps:$4 sm:$0xff]  }
 0x96b   : > { %v4263_v24 = vpack.c.bf16 %v4262_v59, %v4261_v41  ;;  %v12980_v59 = vmov 0.0  }
 0x96d   : > { %9089 = vmatmul.mubr.msk.bf16.vlgmr.msra.gmra.mrb[16].mxu0 %vm2235_vm9, %v4263_v24  ;;  %v9155_v24 = vld [vmem:[%s10904_s1 + $0x41] ss:$8 sm:$0x3] }
 0x96e   : > { %4780 = vmatpush1.bf16.msra.mxu0 %v9822_v61  ;;  %v9090_v61 = vld [vmem:[%s10904_s1 + $0x40] ss:$8 sm:$0xf] }
 0x96f   : > { %4781 = vmatprep.subr.bf16.mxu0 %v9830_v12  ;;  %v4407_v12 = vrot.slane %v9090_v61, %v11041_v10 }
 0x972   : > { %4782 = vmatpush1.bf16.msra.mxu0 %v9828_v31  ;;  %v4828_v31 = vrot.slane %v9155_v24, %v11044_v13 }
 0x973   : > { %4783 = vmatprep.subr.bf16.mxu0 %v9836_v36  ;;  %v4832_v36 = vrot.slane %v9155_v24, %v11036_v7 }
 0x976   : > { %4784 = vmatpush1.bf16.msra.mxu0 %v9834_v14  ;;  %v4411_v14 = vrot.slane %v9090_v61, %v11049_v39 }
 0x977   : > { %4785 = vmatprep.subr.bf16.mxu0 %v9842_v53  ;;  %v4399_v53 = vrot.slane %v9090_v61, %v11044_v13 }
 0x97a   : > { %4786 = vmatpush1.bf16.msra.mxu0 %v9840_v43  ;;  %v4403_v43 = vrot.slane %v9090_v61, %v11036_v7 }
 0x97b   : > { %4787 = vmatprep.subr.bf16.mxu0 %v9848_v22 }
 0x97e   : > { %4788 = vmatpush1.bf16.msra.mxu0 %v9846_v38 }
 0x97f   : > { %4789 = vmatprep.subr.bf16.mxu0 %v9854_v18 }
 0x982   : > { %4790 = vmatpush1.bf16.msra.mxu0 %v9852_v20 }
 0x983   : > { %4791 = vmatprep.subr.bf16.mxu0 %v9860_v34  ;;  %v4835_v34 = vpack.c.bf16 %v4828_v31, %v4828_v31 }
 0x985   : > { %v5488_v63 = vpack.i.b16 %v4835_v34, %v4835_v34 }
 0x986   : > { %4792 = vmatpush1.bf16.msra.mxu0 %v9858_v19  ;;  %v4836_v19 = vpack.c.bf16 %v4832_v36, %v4832_v36 }
 0x987   : > { %4793 = vmatprep.subr.bf16.mxu0 %v9866_v21 }
 0x988   : > { %v5495_v25 = vpack.i.b16 %v4836_v19, %v4836_v19 }
 0x98a   : > { %4794 = vmatpush1.bf16.msra.mxu0 %v9864_v17 }
 0x98b   : > { %4795 = vmatprep.subr.bf16.mxu0 %v9872_v33 }
 0x98e   : > { %4796 = vmatpush1.bf16.msra.mxu0 %v9870_v37 }
 0x98f   : > { %4797 = vmatprep.subr.bf16.mxu0 %v9878_v1 }
 0x992   : > { %4798 = vmatpush1.bf16.msra.mxu0 %v9876_v11 }
 0x993   : > { %4799 = vmatprep.subr.bf16.mxu0 %v9884_v8 }
 0x996   : > { %4800 = vmatpush1.bf16.msra.mxu0 %v9882_v29 }
 0x997   : > { %4801 = vmatprep.subr.bf16.mxu0 %v9890_v55 }
 0x99a   : > { %4802 = vmatpush1.bf16.msra.mxu0 %v9888_v57 }
 0x99b   : > { %4803 = vmatprep.subr.bf16.mxu0 %v9896_v27 }
 0x99e   : > { %4804 = vmatpush1.bf16.msra.mxu0 %v9894_v16 }
 0x99f   : > { %4805 = vmatprep.subr.bf16.mxu0 %v9902_v28 }
 0x9a2   : > { %4806 = vmatpush1.bf16.msra.mxu0 %v9900_v54 }
 0x9a3   : > { %4807 = vmatprep.subr.bf16.mxu0 %v9908_v6 }
 0x9a6   : > { %4808 = vmatpush1.bf16.msra.mxu0 %v9906_v3 }
 0x9a7   : > { %4809 = vmatprep.subr.bf16.mxu0 %v9914_v23 }
 0x9aa   : > { %4810 = vmatpush1.bf16.msra.mxu0 %v9912_v48 }
 0xa40   : > { %v4314_v9 = vpop.f32.mrb[16].mxu0 }
 0xa41   : > { %v4315_v15 = vadd.f32 %v4314_v9, %v4270_v32  ;;  %v4316_v51 = vpop.f32.mrb[17].mxu0 }
 0xa42   : > { %v4317_v0 = vadd.f32 %v4316_v51, %v4274_v52  ;;  %v4318_v5 = vpop.f32.mrb[18].mxu0  ;;  %v12162_v51 = vrot.slane %v5488_v63, %v11044_v13 }
 0xa43   : > { %v4319_v40 = vadd.f32 %v4318_v5, %v4270_v32  ;;  %v4320_v60 = vpop.f32.mrb[19].mxu0  ;;  %v4323_v45 = vmax.f32 %v4315_v15, 0.0 }
 0xa44   : > { %v4321_v58 = vadd.f32 %v4320_v60, %v4274_v52  ;;  %v4324_v62 = vmax.f32 %v4317_v0, 0.0  ;;  %v12165_v0 = vrot.slane %v5495_v25, %v11044_v13 }
 0xa45   : > { %v4325_v4 = vmax.f32 %v4319_v40, 0.0 }
 0xa46   : > { %v4326_v47 = vmax.f32 %v4321_v58, 0.0 }
 0xa47   : > { %v4327_v2 = vpack.c.bf16 %v4325_v4, %v4323_v45 }
 0xa48   : > { %v4328_v41 = vpack.c.bf16 %v4326_v47, %v4324_v62 }
 0xa4a   : > { %4768 = vmatprep.mubr.bf16.mxu1 %v4328_v41  ;;  %4811 = vmatprep.mubr.bf16.mxu0 %v4328_v41 }
 0xa4b   : > { %4769 = vmatmul.mubr.bf16.vlgmr.msra.gmra.mrb[16].mxu1 %v4327_v2  ;;  %4812 = vmatmul.mubr.bf16.vlgmr.msra.gmra.mrb[20].mxu0 %v4327_v2 }
 0xa4c   : > { %5958 = vmatprep.mubr.bf16.mxu1 %v12956_v50  ;;  %6037 = vmatprep.mubr.f32.mxu0 %v12980_v59 }
 0xb1e   : > { %v4770_v22 = vpop.f32.mrb[16].mxu1  ;;  %v4813_v38 = vpop.f32.mrb[20].mxu0 }
 0xb1f   : > { %v4814_v18 = vadd.f32 %v4813_v38, %v4407_v12  ;;  %v4772_v50 = vpop.f32.mrb[17].mxu1  ;;  %v4815_v20 = vpop.f32.mrb[21].mxu0  ;;  %v4771_v37 = vadd.f32 %v4770_v22, %v4399_v53 }
 0xb20   : > { %v4816_v21 = vadd.f32 %v4815_v20, %v4411_v14  ;;  %v4774_v17 = vpop.f32.mrb[18].mxu1  ;;  %v4817_v33 = vpop.f32.mrb[22].mxu0  ;;  %v4773_v1 = vadd.f32 %v4772_v50, %v4403_v43 }
 0xb21   : > { %v4775_v11 = vadd.f32 %v4774_v17, %v4399_v53  ;;  %v4818_v8 = vadd.f32 %v4817_v33, %v4407_v12  ;;  %v4776_v29 = vpop.f32.mrb[19].mxu1  ;;  %v4819_v55 = vpop.f32.mrb[23].mxu0 }
 0xb22   : > { %v4841_v57 = vcombine.low %v4814_v18, %v4816_v21  ;;  %v4842_v27 = vcombine.high %v4814_v18, %v4816_v21  ;;  %v4777_v16 = vadd.f32 %v4776_v29, %v4403_v43  ;;  %v4820_v28 = vadd.f32 %v4819_v55, %v4411_v14 }
 0xb23   : > { %v12145_v54 = vpack.c.bf16 %v4775_v11, %v4771_v37 }
 0xb24   : > { %v4849_v3 = vrot.slane %v4841_v57, %v11061_v26  ;;  %v4856_v6 = vrot.slane %v4842_v27, %v11061_v26  ;;  %v12149_v42 = vpack.c.bf16 %v4777_v16, %v4773_v1  ;;  %v4891_v23 = vcombine.low %v4818_v8, %v4820_v28 }
 0xb25   : > { %v4892_v56 = vcombine.high %v4818_v8, %v4820_v28 }
 0xb26   : > { %v4857_v48 = vcombine.high %v4849_v3, %v4849_v3  ;;  %v4858_v30 = vcombine.high %v4856_v6, %v4856_v6  ;;  %v4865_v32 = vrot.slane %v4849_v3, %v11061_v26  ;;  %v4872_v52 = vrot.slane %v4856_v6, %v11061_v26  ;;  %5926 = vmatprep.subr.bf16.mxu1 %v12149_v42 }
 0xb27   : > { %v12155_v9 = vrot.slane %v4891_v23, %v11061_v26  ;;  %v12158_v15 = vrot.slane %v4892_v56, %v11061_v26  ;;  %5927 = vmatpush1.bf16.msra.mxu1 %v12145_v54 }
 0xb28   : > { %v4879_v5 = vrot.slane %v4857_v48, %v11061_v26  ;;  %v4886_v40 = vrot.slane %v4858_v30, %v11061_v26  ;;  %v4887_v60 = vcombine.high %v4865_v32, %v4865_v32  ;;  %v4888_v58 = vcombine.high %v4872_v52, %v4872_v52 }
 0xb29   : > { %v4944_v45 = vrot.slane %v4865_v32, %v11044_v13  ;;  %v4948_v4 = vrot.slane %v4865_v32, %v11036_v7  ;;  %v4976_v62 = vrot.slane %v4872_v52, %v11044_v13  ;;  %v4980_v47 = vrot.slane %v4872_v52, %v11036_v7 }
 0xb2a   : > { %v4889_v2 = vcombine.high %v4879_v5, %v4879_v5  ;;  %v4890_v41 = vcombine.high %v4886_v40, %v4886_v40  ;;  %v4952_v59 = vrot.slane %v4879_v5, %v11044_v13  ;;  %v4956_v61 = vrot.slane %v4879_v5, %v11036_v7 }
 0xb2b   : > { %v4960_v24 = vrot.slane %v4887_v60, %v11044_v13  ;;  %v4964_v12 = vrot.slane %v4887_v60, %v11036_v7  ;;  %v4984_v31 = vrot.slane %v4886_v40, %v11044_v13  ;;  %v4988_v36 = vrot.slane %v4886_v40, %v11036_v7 }
 0xb2c   : > { %v4968_v14 = vrot.slane %v4889_v2, %v11044_v13  ;;  %v4972_v53 = vrot.slane %v4889_v2, %v11036_v7  ;;  %v4992_v43 = vrot.slane %v4888_v58, %v11044_v13  ;;  %v4996_v22 = vrot.slane %v4888_v58, %v11036_v7 }
 0xb2d   : > { %v5000_v38 = vrot.slane %v4890_v41, %v11044_v13  ;;  %v5004_v18 = vrot.slane %v4890_v41, %v11036_v7  ;;  %v5101_v50 = vpack.c.bf16 %v4944_v45, %v4944_v45  ;;  %v5102_v20 = vpack.c.bf16 %v4948_v4, %v4948_v4 }
 0xb2e   : > { %v12185_v34 = vpack.c.bf16 %v4952_v59, %v4952_v59  ;;  %v12187_v19 = vpack.c.bf16 %v4956_v61, %v4956_v61  ;;  %v12189_v21 = vpack.c.bf16 %v4960_v24, %v4960_v24  ;;  %v12191_v17 = vpack.c.bf16 %v4964_v12, %v4964_v12 }
 0xb2f   : > { %v12193_v33 = vpack.c.bf16 %v4968_v14, %v4968_v14  ;;  %v12195_v37 = vpack.c.bf16 %v4972_v53, %v4972_v53  ;;  %v5109_v1 = vpack.c.bf16 %v4976_v62, %v4976_v62  ;;  %v5110_v11 = vpack.c.bf16 %v4980_v47, %v4980_v47 }
 0xb30   : > { %v12197_v8 = vpack.c.bf16 %v4984_v31, %v4984_v31  ;;  %v12199_v29 = vpack.c.bf16 %v4988_v36, %v4988_v36  ;;  %v12201_v55 = vpack.c.bf16 %v4992_v43, %v4992_v43  ;;  %v12203_v57 = vpack.c.bf16 %v4996_v22, %v4996_v22 }
 0xb31   : > { %v12205_v27 = vpack.c.bf16 %v5000_v38, %v5000_v38  ;;  %v12207_v16 = vpack.c.bf16 %v5004_v18, %v5004_v18  ;;  %v5136_v28 = vpack.i.b16 %v5101_v50, %v5101_v50  ;;  %v5143_v63 = vpack.i.b16 %v5102_v20, %v5102_v20 }
 0xb32   : > { %v5150_v25 = vpack.i.b16 %v12185_v34, %v12185_v34  ;;  %v5157_v3 = vpack.i.b16 %v12187_v19, %v12187_v19  ;;  %v5164_v6 = vpack.i.b16 %v12189_v21, %v12189_v21  ;;  %v5171_v23 = vpack.i.b16 %v12191_v17, %v12191_v17 }
 0xb33   : > { %v5141_v56 = vrot.slane %v5136_v28, %v11044_v13  ;;  %v5148_v48 = vrot.slane %v5143_v63, %v11044_v13  ;;  %v5192_v52 = vpack.i.b16 %v5109_v1, %v5109_v1  ;;  %v5199_v5 = vpack.i.b16 %v5110_v11, %v5110_v11 }
 0xb34   : > { %v5206_v40 = vpack.i.b16 %v12197_v8, %v12197_v8  ;;  %v4907_v41 = vcombine.high %v12155_v9, %v12155_v9  ;;  %v4908_v59 = vcombine.high %v12158_v15, %v12158_v15  ;;  %v4915_v61 = vrot.slane %v12155_v9, %v11061_v26 }
 0xb35   : > { %v5197_v47 = vrot.slane %v5192_v52, %v11044_v13  ;;  %v5204_v2 = vrot.slane %v5199_v5, %v11044_v13  ;;  %v4922_v24 = vrot.slane %v12158_v15, %v11061_v26  ;;  %v12246_v12 = vadd.bf16 %v5141_v56, %v12145_v54 }
 0xb36   : > { %v12249_v31 = vadd.bf16 %v5148_v48, %v12149_v42  ;;  %v4929_v36 = vrot.slane %v4907_v41, %v11061_v26  ;;  %v4936_v14 = vrot.slane %v4908_v59, %v11061_v26  ;;  %v4937_v9 = vcombine.high %v4915_v61, %v4915_v61 }
 0xb37   : > { %v12254_v53 = vadd.bf16 %v5197_v47, %v12145_v54  ;;  %v12257_v43 = vadd.bf16 %v5204_v2, %v12149_v42  ;;  %v4938_v22 = vcombine.high %v4922_v24, %v4922_v24  ;;  %v5008_v15 = vrot.slane %v4915_v61, %v11044_v13 }
 0xb38   : > { %v5012_v38 = vrot.slane %v4915_v61, %v11036_v7  ;;  %v4939_v18 = vcombine.high %v4929_v36, %v4929_v36  ;;  %v4940_v50 = vcombine.high %v4936_v14, %v4936_v14  ;;  %v5016_v20 = vrot.slane %v4929_v36, %v11044_v13 }
 0xb39   : > { %v5020_v1 = vrot.slane %v4929_v36, %v11036_v7  ;;  %v5024_v26 = vrot.slane %v4937_v9, %v11044_v13  ;;  %v5028_v11 = vrot.slane %v4937_v9, %v11036_v7  ;;  %v5040_v28 = vrot.slane %v4922_v24, %v11044_v13 }
 0xb3a   : > { %v5044_v63 = vrot.slane %v4922_v24, %v11036_v7  ;;  %v5032_v56 = vrot.slane %v4939_v18, %v11044_v13  ;;  %v5036_v48 = vrot.slane %v4939_v18, %v11036_v7  ;;  %v5048_v52 = vrot.slane %v4936_v14, %v11044_v13 }
 0xb3b   : > { %v5052_v5 = vrot.slane %v4936_v14, %v11036_v7  ;;  %v5056_v47 = vrot.slane %v4938_v22, %v11044_v13  ;;  %v5060_v2 = vrot.slane %v4938_v22, %v11036_v7  ;;  %v5064_v41 = vrot.slane %v4940_v50, %v11044_v13 }
 0xb3c   : > { %v5068_v59 = vrot.slane %v4940_v50, %v11036_v7  ;;  %v5117_v61 = vpack.c.bf16 %v5008_v15, %v5008_v15  ;;  %v5118_v36 = vpack.c.bf16 %v5012_v38, %v5012_v38  ;;  %v12275_v9 = vpack.c.bf16 %v5016_v20, %v5016_v20 }
 0xb3d   : > { %v12277_v24 = vpack.c.bf16 %v5020_v1, %v5020_v1  ;;  %v12279_v62 = vpack.c.bf16 %v5024_v26, %v5024_v26  ;;  %v12281_v18 = vpack.c.bf16 %v5028_v11, %v5028_v11  ;;  %v12283_v4 = vpack.c.bf16 %v5032_v56, %v5032_v56 }
 0xb3e   : > { %v12285_v14 = vpack.c.bf16 %v5036_v48, %v5036_v48  ;;  %v5125_v32 = vpack.c.bf16 %v5040_v28, %v5040_v28  ;;  %v5126_v22 = vpack.c.bf16 %v5044_v63, %v5044_v63  ;;  %v12287_v30 = vpack.c.bf16 %v5048_v52, %v5048_v52 }
 0xb3f   : > { %v12289_v45 = vpack.c.bf16 %v5052_v5, %v5052_v5  ;;  %v12291_v15 = vpack.c.bf16 %v5056_v47, %v5056_v47  ;;  %v12293_v38 = vpack.c.bf16 %v5060_v2, %v5060_v2  ;;  %v12295_v50 = vpack.c.bf16 %v5064_v41, %v5064_v41 }
 0xb40   : > { %v12297_v20 = vpack.c.bf16 %v5068_v59, %v5068_v59  ;;  %v5248_v1 = vpack.i.b16 %v5117_v61, %v5117_v61  ;;  %v5255_v26 = vpack.i.b16 %v5118_v36, %v5118_v36  ;;  %v5304_v2 = vpack.i.b16 %v5125_v32, %v5125_v32 }
 0xb41   : > { %v5311_v41 = vpack.i.b16 %v5126_v22, %v5126_v22  ;;  %vm5391_vm14 = vcmp.gt.bf16.partialorder %v12246_v12, 0  ;;  %vm5392_vm15 = vcmp.gt.bf16.partialorder %v12249_v31, 0  ;;  %v5424_v36 = vmul.bf16 1045249613, %v12249_v31 }
 0xb42   : > { %v5253_v5 = vrot.slane %v5248_v1, %v11044_v13  ;;  %v5260_v47 = vrot.slane %v5255_v26, %v11044_v13  ;;  %v5309_v52 = vrot.slane %v5304_v2, %v11044_v13  ;;  %v5423_v26 = vmul.bf16 1045249613, %v12246_v12 }
 0xb43   : > { %v12323_v1 = vrot.slane %v5311_v41, %v11044_v13  ;;  %vm5399_vm11 = vcmp.gt.bf16.partialorder %v12254_v53, 0  ;;  %vm5400_vm12 = vcmp.gt.bf16.partialorder %v12257_v43, 0  ;;  %v5431_v2 = vmul.bf16 1045249613, %v12254_v53 }
 0xb44   : > { %v5432_v41 = vmul.bf16 1045249613, %v12257_v43  ;;  %v5455_v32 = vsel %vm5391_vm14, %v12246_v12, %v5423_v26  ;;  %v5456_v22 = vsel %vm5392_vm15, %v12249_v31, %v5424_v36  ;;  %v5155_v48 = vrot.slane %v5150_v25, %v11044_v13 }
 0xb45   : > { %v5162_v61 = vrot.slane %v5157_v3, %v11044_v13  ;;  %v5501_v59 = vmul.bf16 %v12162_v51, %v5455_v32  ;;  %v5502_v56 = vmul.bf16 %v12165_v0, %v5456_v22  ;;  %v5463_v63 = vsel %vm5399_vm11, %v12254_v53, %v5431_v2 }
 0xb46   : > { %v5464_v12 = vsel %vm5400_vm12, %v12257_v43, %v5432_v41  ;;  %v5509_v31 = vmul.bf16 %v12162_v51, %v5463_v63  ;;  %v5361_v34 = vadd.bf16 %v5155_v48, %v12145_v54  ;;  %v5375_v48 = vadd.bf16 %v5253_v5, %v12145_v54 }
 0xb47   : > { %v5510_v36 = vmul.bf16 %v12165_v0, %v5464_v12  ;;  %v5362_v25 = vadd.bf16 %v5162_v61, %v12149_v42  ;;  %v5535_v26 = vunpack.c.h.bf16 %v5501_v59  ;;  %v5536_v28 = vunpack.c.h.bf16 %v5502_v56 }
 0xb48   : > { %v5533_v19 = vunpack.c.l.bf16 %v5501_v59  ;;  %v5534_v3 = vunpack.c.l.bf16 %v5502_v56  ;;  %v5551_v11 = vunpack.c.h.bf16 %v5509_v31  ;;  %v5549_v58 = vunpack.c.l.bf16 %v5509_v31 }
 0xb49   : > { %v5552_v32 = vunpack.c.h.bf16 %v5510_v36  ;;  %v5550_v22 = vunpack.c.l.bf16 %v5510_v36  ;;  %v5600_v60 = vadd.f32 %v5536_v28, %v5535_v26  ;;  %vm5393_vm13 = vcmp.gt.bf16.partialorder %v5361_v34, 0 }
 0xb4a   : > { %v5597_v53 = vadd.f32 %v5534_v3, %v5533_v19  ;;  %vm5394_vm10 = vcmp.gt.bf16.partialorder %v5362_v25, 0  ;;  %v5425_v2 = vmul.bf16 1045249613, %v5361_v34  ;;  %v5426_v41 = vmul.bf16 1045249613, %v5362_v25 }
 0xb4b   : > { %v5624_v43 = vadd.f32 %v5552_v32, %v5551_v11  ;;  %v5621_v63 = vadd.f32 %v5550_v22, %v5549_v58  ;;  %5601 = vadd.xlane.f32.xlu1 %v5600_v60  ;;  %v5376_v61 = vadd.bf16 %v5260_v47, %v12149_v42  ;;  %v5169_v56 = vrot.slane %v5164_v6, %v11044_v13 }
 0xb4c   : > { %5598 = vadd.xlane.f32.xlu0 %v5597_v53  ;;  %v5457_v59 = vsel %vm5393_vm13, %v5361_v34, %v5425_v2  ;;  %v5458_v28 = vsel %vm5394_vm10, %v5362_v25, %v5426_v41  ;;  %v5176_v58 = vrot.slane %v5171_v23, %v11044_v13  ;;  %v5383_v11 = vadd.bf16 %v5309_v52, %v12145_v54 }
 0xb4d   : > { %v5503_v60 = vmul.bf16 %v12162_v51, %v5457_v59  ;;  %v5504_v5 = vmul.bf16 %v12165_v0, %v5458_v28  ;;  %vm5407_vm14 = vcmp.gt.bf16.partialorder %v5375_v48, 0  ;;  %vm5408_vm15 = vcmp.gt.bf16.partialorder %v5376_v61, 0 }
 0xb4e   : > { %v5439_v47 = vmul.bf16 1045249613, %v5375_v48  ;;  %v5440_v12 = vmul.bf16 1045249613, %v5376_v61  ;;  %v5363_v21 = vadd.bf16 %v5169_v56, %v12145_v54  ;;  %v5364_v6 = vadd.bf16 %v5176_v58, %v12149_v42 }
 0xb4f   : > { %5625 = vadd.xlane.f32.xlu1 %v5624_v43  ;;  %v5539_v31 = vunpack.c.h.bf16 %v5503_v60  ;;  %v5540_v36 = vunpack.c.h.bf16 %v5504_v5  ;;  %v5537_v17 = vunpack.c.l.bf16 %v5503_v60  ;;  %v5538_v23 = vunpack.c.l.bf16 %v5504_v5 }
 0xb50   : > { %5622 = vadd.xlane.f32.xlu0 %v5621_v63  ;;  %v5471_v34 = vsel %vm5407_vm14, %v5375_v48, %v5439_v47  ;;  %v5472_v52 = vsel %vm5408_vm15, %v5376_v61, %v5440_v12  ;;  %vm5395_vm11 = vcmp.gt.bf16.partialorder %v5363_v21, 0  ;;  %vm5396_vm12 = vcmp.gt.bf16.partialorder %v5364_v6, 0 }
 0xb51   : > { %v5606_v25 = vadd.f32 %v5540_v36, %v5539_v31  ;;  %v5603_v26 = vadd.f32 %v5538_v23, %v5537_v17  ;;  %v5517_v19 = vmul.bf16 %v12162_v51, %v5471_v34  ;;  %v5518_v3 = vmul.bf16 %v12165_v0, %v5472_v52 }
 0xb52   : > { %v5427_v32 = vmul.bf16 1045249613, %v5363_v21  ;;  %v5428_v22 = vmul.bf16 1045249613, %v5364_v6  ;;  %v5384_v53 = vadd.bf16 %v12323_v1, %v12149_v42  ;;  %vm5415_vm13 = vcmp.gt.bf16.partialorder %v5383_v11, 0 }
 0xb53   : > { %5607 = vadd.xlane.f32.xlu1 %v5606_v25  ;;  %v5567_v43 = vunpack.c.h.bf16 %v5517_v19  ;;  %v5568_v63 = vunpack.c.h.bf16 %v5518_v3  ;;  %v5565_v2 = vunpack.c.l.bf16 %v5517_v19  ;;  %v5566_v41 = vunpack.c.l.bf16 %v5518_v3 }
 0xb54   : > { %5604 = vadd.xlane.f32.xlu0 %v5603_v26  ;;  %v5459_v48 = vsel %vm5395_vm11, %v5363_v21, %v5427_v32  ;;  %v5460_v61 = vsel %vm5396_vm12, %v5364_v6, %v5428_v22  ;;  %vm5416_vm10 = vcmp.gt.bf16.partialorder %v5384_v53, 0  ;;  %v5447_v56 = vmul.bf16 1045249613, %v5383_v11 }
 0xb55   : > { %v5648_v59 = vadd.f32 %v5568_v63, %v5567_v43  ;;  %v5645_v28 = vadd.f32 %v5566_v41, %v5565_v2  ;;  %v5505_v58 = vmul.bf16 %v12162_v51, %v5459_v48  ;;  %v5506_v60 = vmul.bf16 %v12165_v0, %v5460_v61 }
 0xb56   : > { %v5448_v1 = vmul.bf16 1045249613, %v5384_v53  ;;  %v5479_v5 = vsel %vm5415_vm13, %v5383_v11, %v5447_v56  ;;  %v5211_v47 = vrot.slane %v5206_v40, %v11044_v13  ;;  %v12981_v12 = vpack.i.b16 %v12199_v29, %v12199_v29 }
 0xb57   : > { %5649 = vadd.xlane.f32.xlu1 %v5648_v59  ;;  %v5543_v6 = vunpack.c.h.bf16 %v5505_v58  ;;  %v5544_v31 = vunpack.c.h.bf16 %v5506_v60  ;;  %v5541_v36 = vunpack.c.l.bf16 %v5505_v58  ;;  %v5542_v17 = vunpack.c.l.bf16 %v5506_v60 }
 0xb58   : > { %v5218_v21 = vrot.slane %v12981_v12, %v11044_v13  ;;  %5646 = vadd.xlane.f32.xlu0 %v5645_v28  ;;  %v5480_v23 = vsel %vm5416_vm10, %v5384_v53, %v5448_v1  ;;  %v5525_v11 = vmul.bf16 %v12162_v51, %v5479_v5  ;;  %v5369_v34 = vadd.bf16 %v5211_v47, %v12145_v54 }
 0xb59   : > { %v5612_v40 = vadd.f32 %v5544_v31, %v5543_v6  ;;  %v5609_v52 = vadd.f32 %v5542_v17, %v5541_v36  ;;  %v5526_v25 = vmul.bf16 %v12165_v0, %v5480_v23  ;;  %v12982_v29 = vpack.i.b16 %v12201_v55, %v12201_v55 }
 0xb5a   : > { %v5370_v8 = vadd.bf16 %v5218_v21, %v12149_v42  ;;  %v5583_v19 = vunpack.c.h.bf16 %v5525_v11  ;;  %v5581_v3 = vunpack.c.l.bf16 %v5525_v11  ;;  %vm5401_vm14 = vcmp.gt.bf16.partialorder %v5369_v34, 0 }
 0xb5b   : > { %v5225_v26 = vrot.slane %v12982_v29, %v11044_v13  ;;  %5613 = vadd.xlane.f32.xlu1 %v5612_v40  ;;  %v5584_v32 = vunpack.c.h.bf16 %v5526_v25  ;;  %v5582_v22 = vunpack.c.l.bf16 %v5526_v25  ;;  %v5433_v53 = vmul.bf16 1045249613, %v5369_v34 }
 0xb5c   : > { %vm5402_vm15 = vcmp.gt.bf16.partialorder %v5370_v8, 0  ;;  %5610 = vadd.xlane.f32.xlu0 %v5609_v52  ;;  %v5434_v43 = vmul.bf16 1045249613, %v5370_v8  ;;  %v12983_v63 = vpack.i.b16 %v12203_v57, %v12203_v57  ;;  %v12984_v55 = vpack.i.b16 %v12275_v9, %v12275_v9 }
 0xb5d   : > { %v5371_v41 = vadd.bf16 %v5225_v26, %v12145_v54  ;;  %v12985_v61 = vpack.i.b16 %v12277_v24, %v12277_v24  ;;  %v5672_v59 = vadd.f32 %v5584_v32, %v5583_v19  ;;  %v5669_v28 = vadd.f32 %v5582_v22, %v5581_v3 }
 0xb5e   : > { %v5232_v2 = vrot.slane %v12983_v63, %v11044_v13  ;;  %v5267_v48 = vrot.slane %v12984_v55, %v11044_v13  ;;  %v5465_v58 = vsel %vm5401_vm14, %v5369_v34, %v5433_v53  ;;  %v5466_v60 = vsel %vm5402_vm15, %v5370_v8, %v5434_v43 }
 0xb5f   : > { %v5274_v56 = vrot.slane %v12985_v61, %v11044_v13  ;;  %v5511_v1 = vmul.bf16 %v12162_v51, %v5465_v58  ;;  %v5512_v57 = vmul.bf16 %v12165_v0, %v5466_v60  ;;  %vm5403_vm11 = vcmp.gt.bf16.partialorder %v5371_v41, 0  ;;  %5673 = vadd.xlane.f32.xlu1 %v5672_v59 }
 0xb60   : > { %v5372_v5 = vadd.bf16 %v5232_v2, %v12149_v42  ;;  %5670 = vadd.xlane.f32.xlu0 %v5669_v28  ;;  %v5435_v9 = vmul.bf16 1045249613, %v5371_v41  ;;  %v5377_v47 = vadd.bf16 %v5267_v48, %v12145_v54  ;;  %v12986_v24 = vpack.i.b16 %v12279_v62, %v12279_v62 }
 0xb61   : > { %v5378_v12 = vadd.bf16 %v5274_v56, %v12149_v42  ;;  %v5555_v6 = vunpack.c.h.bf16 %v5511_v1  ;;  %v5556_v31 = vunpack.c.h.bf16 %v5512_v57  ;;  %v5553_v36 = vunpack.c.l.bf16 %v5511_v1 }
 0xb62   : > { %v5281_v21 = vrot.slane %v12986_v24, %v11044_v13  ;;  %v5554_v17 = vunpack.c.l.bf16 %v5512_v57  ;;  %vm5404_vm12 = vcmp.gt.bf16.partialorder %v5372_v5, 0  ;;  %v5436_v23 = vmul.bf16 1045249613, %v5372_v5 }
 0xb63   : > { %v5467_v11 = vsel %vm5403_vm11, %v5371_v41, %v5435_v9  ;;  %vm5409_vm13 = vcmp.gt.bf16.partialorder %v5377_v47, 0  ;;  %v5630_v34 = vadd.f32 %v5556_v31, %v5555_v6  ;;  %vm5410_vm10 = vcmp.gt.bf16.partialorder %v5378_v12, 0 }
 0xb64   : > { %v5627_v8 = vadd.f32 %v5554_v17, %v5553_v36  ;;  %v5513_v40 = vmul.bf16 %v12162_v51, %v5467_v11  ;;  %v5468_v52 = vsel %vm5404_vm12, %v5372_v5, %v5436_v23  ;;  %v5441_v25 = vmul.bf16 1045249613, %v5377_v47 }
 0xb65   : > { %v5442_v29 = vmul.bf16 1045249613, %v5378_v12  ;;  %v12987_v62 = vpack.i.b16 %v12281_v18, %v12281_v18  ;;  %5631 = vadd.xlane.f32.xlu1 %v5630_v34  ;;  %v5514_v19 = vmul.bf16 %v12165_v0, %v5468_v52  ;;  %v5379_v22 = vadd.bf16 %v5281_v21, %v12145_v54 }
 0xb66   : > { %5628 = vadd.xlane.f32.xlu0 %v5627_v8  ;;  %v5559_v3 = vunpack.c.h.bf16 %v5513_v40  ;;  %v5557_v32 = vunpack.c.l.bf16 %v5513_v40  ;;  %v5473_v53 = vsel %vm5409_vm13, %v5377_v47, %v5441_v25  ;;  %v12988_v2 = vpack.i.b16 %v12193_v33, %v12193_v33 }
 0xb67   : > { %v5288_v26 = vrot.slane %v12987_v62, %v11044_v13  ;;  %v5474_v43 = vsel %vm5410_vm10, %v5378_v12, %v5442_v29  ;;  %v5560_v55 = vunpack.c.h.bf16 %v5514_v19  ;;  %v5558_v18 = vunpack.c.l.bf16 %v5514_v19 }
 0xb68   : > { %v5183_v41 = vrot.slane %v12988_v2, %v11044_v13  ;;  %v5519_v48 = vmul.bf16 %v12162_v51, %v5473_v53  ;;  %v5520_v61 = vmul.bf16 %v12165_v0, %v5474_v43  ;;  %vm5411_vm14 = vcmp.gt.bf16.partialorder %v5379_v22, 0 }
 0xb69   : > { %v5380_v63 = vadd.bf16 %v5288_v26, %v12149_v42  ;;  %v5443_v56 = vmul.bf16 1045249613, %v5379_v22  ;;  %v5636_v28 = vadd.f32 %v5560_v55, %v5559_v3  ;;  %v5633_v58 = vadd.f32 %v5558_v18, %v5557_v32 }
 0xb6a   : > { %v5571_v60 = vunpack.c.h.bf16 %v5519_v48  ;;  %v5572_v1 = vunpack.c.h.bf16 %v5520_v61  ;;  %v5569_v57 = vunpack.c.l.bf16 %v5519_v48  ;;  %v5570_v5 = vunpack.c.l.bf16 %v5520_v61 }
 0xb6b   : > { %vm5412_vm15 = vcmp.gt.bf16.partialorder %v5380_v63, 0  ;;  %v5444_v59 = vmul.bf16 1045249613, %v5380_v63  ;;  %v5475_v9 = vsel %vm5411_vm14, %v5379_v22, %v5443_v56  ;;  %5637 = vadd.xlane.f32.xlu1 %v5636_v28  ;;  %5634 = vadd.xlane.f32.xlu0 %v5633_v58  ;;  %v12989_v6 = vpack.i.b16 %v12195_v37, %v12195_v37 }
 0xb6c   : > { %v5654_v33 = vadd.f32 %v5572_v1, %v5571_v60  ;;  %v5521_v12 = vmul.bf16 %v12162_v51, %v5475_v9  ;;  %v5651_v21 = vadd.f32 %v5570_v5, %v5569_v57  ;;  %v5365_v36 = vadd.bf16 %v5183_v41, %v12145_v54 }
 0xb6d   : > { %v5476_v47 = vsel %vm5412_vm15, %v5380_v63, %v5444_v59  ;;  %v5190_v31 = vrot.slane %v12989_v6, %v11044_v13  ;;  %v12990_v17 = vpack.i.b16 %v12287_v30, %v12287_v30  ;;  %v12991_v37 = vpack.i.b16 %v12289_v45, %v12289_v45 }
 0xb6e   : > { %v5522_v24 = vmul.bf16 %v12165_v0, %v5476_v47  ;;  %v5575_v11 = vunpack.c.h.bf16 %v5521_v12  ;;  %v5573_v8 = vunpack.c.l.bf16 %v5521_v12  ;;  %vm5397_vm11 = vcmp.gt.bf16.partialorder %v5365_v36, 0 }
 0xb6f   : > { %v5323_v23 = vrot.slane %v12990_v17, %v11044_v13  ;;  %v5366_v52 = vadd.bf16 %v5190_v31, %v12149_v42  ;;  %v5429_v25 = vmul.bf16 1045249613, %v5365_v36  ;;  %v5330_v29 = vrot.slane %v12991_v37, %v11044_v13  ;;  %5655 = vadd.xlane.f32.xlu1 %v5654_v33  ;;  %5652 = vadd.xlane.f32.xlu0 %v5651_v21 }
 0xb70   : > { %v5576_v34 = vunpack.c.h.bf16 %v5522_v24  ;;  %v5574_v40 = vunpack.c.l.bf16 %v5522_v24  ;;  %v12992_v45 = vpack.i.b16 %v12291_v15, %v12291_v15  ;;  %v12993_v41 = vpack.i.b16 %v12293_v38, %v12293_v38 }
 0xb71   : > { %v5385_v30 = vadd.bf16 %v5323_v23, %v12145_v54  ;;  %vm5398_vm12 = vcmp.gt.bf16.partialorder %v5366_v52, 0  ;;  %v5430_v19 = vmul.bf16 1045249613, %v5366_v52  ;;  %v5461_v3 = vsel %vm5397_vm11, %v5365_v36, %v5429_v25 }
 0xb72   : > { %v5660_v62 = vadd.f32 %v5576_v34, %v5575_v11  ;;  %v5657_v26 = vadd.f32 %v5574_v40, %v5573_v8  ;;  %v5386_v32 = vadd.bf16 %v5330_v29, %v12149_v42  ;;  %v5507_v22 = vmul.bf16 %v12162_v51, %v5461_v3 }
 0xb73   : > { %vm5417_vm13 = vcmp.gt.bf16.partialorder %v5385_v30, 0  ;;  %v5449_v53 = vmul.bf16 1045249613, %v5385_v30  ;;  %v5337_v43 = vrot.slane %v12992_v45, %v11044_v13  ;;  %v5462_v63 = vsel %vm5398_vm12, %v5366_v52, %v5430_v19 }
 0xb74   : > { %vm5418_vm10 = vcmp.gt.bf16.partialorder %v5386_v32, 0  ;;  %v5450_v2 = vmul.bf16 1045249613, %v5386_v32  ;;  %v5344_v55 = vrot.slane %v12993_v41, %v11044_v13  ;;  %5661 = vadd.xlane.f32.xlu1 %v5660_v62  ;;  %5658 = vadd.xlane.f32.xlu0 %v5657_v26  ;;  %v5508_v18 = vmul.bf16 %v12165_v0, %v5462_v63 }
 0xb75   : > { %v5547_v48 = vunpack.c.h.bf16 %v5507_v22  ;;  %v5545_v61 = vunpack.c.l.bf16 %v5507_v22  ;;  %v5481_v56 = vsel %vm5417_vm13, %v5385_v30, %v5449_v53  ;;  %v5387_v15 = vadd.bf16 %v5337_v43, %v12145_v54 }
 0xb76   : > { %v5482_v59 = vsel %vm5418_vm10, %v5386_v32, %v5450_v2  ;;  %v5527_v28 = vmul.bf16 %v12162_v51, %v5481_v56  ;;  %v5388_v58 = vadd.bf16 %v5344_v55, %v12149_v42  ;;  %v5548_v60 = vunpack.c.h.bf16 %v5508_v18 }
 0xb77   : > { %v5546_v1 = vunpack.c.l.bf16 %v5508_v18  ;;  %v5528_v57 = vmul.bf16 %v12165_v0, %v5482_v59  ;;  %v12994_v38 = vpack.i.b16 %v12205_v27, %v12205_v27  ;;  %vm5419_vm14 = vcmp.gt.bf16.partialorder %v5387_v15, 0 }
 0xb78   : > { %v5587_v9 = vunpack.c.h.bf16 %v5527_v28  ;;  %v5585_v47 = vunpack.c.l.bf16 %v5527_v28  ;;  %vm5420_vm15 = vcmp.gt.bf16.partialorder %v5388_v58, 0  ;;  %v5618_v33 = vadd.f32 %v5548_v60, %v5547_v48 }
 0xb79   : > { %v5239_v5 = vrot.slane %v12994_v38, %v11044_v13  ;;  %v5615_v12 = vadd.f32 %v5546_v1, %v5545_v61  ;;  %v5588_v24 = vunpack.c.h.bf16 %v5528_v57  ;;  %v5586_v21 = vunpack.c.l.bf16 %v5528_v57 }
 0xb7a   : > { %v5451_v6 = vmul.bf16 1045249613, %v5387_v15  ;;  %v5452_v31 = vmul.bf16 1045249613, %v5388_v58  ;;  %v12995_v36 = vpack.i.b16 %v12207_v16, %v12207_v16  ;;  %5619 = vadd.xlane.f32.xlu1 %v5618_v33  ;;  %v12996_v34 = vpack.i.b16 %v12283_v4, %v12283_v4 }
 0xb7b   : > { %v5373_v23 = vadd.bf16 %v5239_v5, %v12145_v54  ;;  %5616 = vadd.xlane.f32.xlu0 %v5615_v12  ;;  %v5678_v27 = vadd.f32 %v5588_v24, %v5587_v9  ;;  %v5675_v11 = vadd.f32 %v5586_v21, %v5585_v47  ;;  %v12997_v62 = vpack.i.b16 %v12285_v14, %v12285_v14 }
 0xb7c   : > { %v5246_v17 = vrot.slane %v12995_v36, %v11044_v13  ;;  %v5295_v8 = vrot.slane %v12996_v34, %v11044_v13  ;;  %v5483_v40 = vsel %vm5419_vm14, %v5387_v15, %v5451_v6  ;;  %v5484_v52 = vsel %vm5420_vm15, %v5388_v58, %v5452_v31 }
 0xb7d   : > { %vm5405_vm11 = vcmp.gt.bf16.partialorder %v5373_v23, 0  ;;  %v5529_v37 = vmul.bf16 %v12162_v51, %v5483_v40  ;;  %v5530_v16 = vmul.bf16 %v12165_v0, %v5484_v52  ;;  %v5437_v29 = vmul.bf16 1045249613, %v5373_v23 }
 0xb7e   : > { %v5374_v25 = vadd.bf16 %v5246_v17, %v12149_v42  ;;  %v5302_v26 = vrot.slane %v12997_v62, %v11044_v13  ;;  %v5381_v4 = vadd.bf16 %v5295_v8, %v12145_v54  ;;  %v12998_v19 = vpack.i.b16 %v12295_v50, %v12295_v50  ;;  %5679 = vadd.xlane.f32.xlu1 %v5678_v27 }
 0xb7f   : > { %5676 = vadd.xlane.f32.xlu0 %v5675_v11  ;;  %v5591_v32 = vunpack.c.h.bf16 %v5529_v37  ;;  %v5592_v22 = vunpack.c.h.bf16 %v5530_v16  ;;  %v5589_v53 = vunpack.c.l.bf16 %v5529_v37  ;;  %v5590_v45 = vunpack.c.l.bf16 %v5530_v16 }
 0xb80   : > { %vm5406_vm12 = vcmp.gt.bf16.partialorder %v5374_v25, 0  ;;  %v5438_v30 = vmul.bf16 1045249613, %v5374_v25  ;;  %v5351_v3 = vrot.slane %v12998_v19, %v11044_v13  ;;  %v5469_v43 = vsel %vm5405_vm11, %v5373_v23, %v5437_v29 }
 0xb81   : > { %v5382_v14 = vadd.bf16 %v5302_v26, %v12149_v42  ;;  %vm5413_vm13 = vcmp.gt.bf16.partialorder %v5381_v4, 0  ;;  %v5684_v2 = vadd.f32 %v5592_v22, %v5591_v32  ;;  %v5681_v41 = vadd.f32 %v5590_v45, %v5589_v53 }
 0xb82   : > { %v5470_v63 = vsel %vm5406_vm12, %v5374_v25, %v5438_v30  ;;  %v5515_v55 = vmul.bf16 %v12162_v51, %v5469_v43  ;;  %v5445_v50 = vmul.bf16 1045249613, %v5381_v4  ;;  %v12999_v61 = vpack.i.b16 %v12297_v20, %v12297_v20 }
 0xb83   : > { %v5516_v18 = vmul.bf16 %v12165_v0, %v5470_v63  ;;  %vm5414_vm10 = vcmp.gt.bf16.partialorder %v5382_v14, 0  ;;  %v5446_v48 = vmul.bf16 1045249613, %v5382_v14  ;;  %5685 = vadd.xlane.f32.xlu1 %v5684_v2  ;;  %5682 = vadd.xlane.f32.xlu0 %v5681_v41  ;;  %v5389_v57 = vadd.bf16 %v5351_v3, %v12145_v54 }
 0xb84   : > { %v5358_v56 = vrot.slane %v12999_v61, %v11044_v13  ;;  %v5563_v59 = vunpack.c.h.bf16 %v5515_v55  ;;  %v5561_v15 = vunpack.c.l.bf16 %v5515_v55  ;;  %v5477_v60 = vsel %vm5413_vm13, %v5381_v4, %v5445_v50 }
 0xb85   : > { %v5564_v28 = vunpack.c.h.bf16 %v5516_v18  ;;  %v5562_v58 = vunpack.c.l.bf16 %v5516_v18  ;;  %v5478_v1 = vsel %vm5414_vm10, %v5382_v14, %v5446_v48  ;;  %v5523_v47 = vmul.bf16 %v12162_v51, %v5477_v60 }
 0xb86   : > { %v5390_v38 = vadd.bf16 %v5358_v56, %v12149_v42  ;;  %v5524_v33 = vmul.bf16 %v12165_v0, %v5478_v1  ;;  %vm5421_vm14 = vcmp.gt.bf16.partialorder %v5389_v57, 0  ;;  %v5453_v20 = vmul.bf16 1045249613, %v5389_v57 }
 0xb87   : > { %v5642_v5 = vadd.f32 %v5564_v28, %v5563_v59  ;;  %v5639_v9 = vadd.f32 %v5562_v58, %v5561_v15  ;;  %v5579_v24 = vunpack.c.h.bf16 %v5523_v47  ;;  %v5577_v6 = vunpack.c.l.bf16 %v5523_v47 }
 0xb88   : > { %vm5422_vm15 = vcmp.gt.bf16.partialorder %v5390_v38, 0  ;;  %v5454_v12 = vmul.bf16 1045249613, %v5390_v38  ;;  %v5580_v21 = vunpack.c.h.bf16 %v5524_v33  ;;  %v5578_v31 = vunpack.c.l.bf16 %v5524_v33 }
 0xb89   : > { %5643 = vadd.xlane.f32.xlu1 %v5642_v5  ;;  %5640 = vadd.xlane.f32.xlu0 %v5639_v9  ;;  %v5485_v36 = vsel %vm5421_vm14, %v5389_v57, %v5453_v20 }
 0xb8a   : > { %v5486_v54 = vsel %vm5422_vm15, %v5390_v38, %v5454_v12  ;;  %v5666_v17 = vadd.f32 %v5580_v21, %v5579_v24  ;;  %v5663_v42 = vadd.f32 %v5578_v31, %v5577_v6  ;;  %v5531_v23 = vmul.bf16 %v12162_v51, %v5485_v36 }
 0xb8b   : > { %v5532_v27 = vmul.bf16 %v12165_v0, %v5486_v54 }
 0xb8c   : > { %v5595_v11 = vunpack.c.h.bf16 %v5531_v23  ;;  %v5593_v8 = vunpack.c.l.bf16 %v5531_v23 }
 0xb8d   : > { %5667 = vadd.xlane.f32.xlu1 %v5666_v17  ;;  %5664 = vadd.xlane.f32.xlu0 %v5663_v42  ;;  %v5596_v34 = vunpack.c.h.bf16 %v5532_v27  ;;  %v5594_v40 = vunpack.c.l.bf16 %v5532_v27 }
 0xb8f   : > { %v5690_v52 = vadd.f32 %v5596_v34, %v5595_v11  ;;  %v5687_v25 = vadd.f32 %v5594_v40, %v5593_v8 }
 0xb91   : > { %5691 = vadd.xlane.f32.xlu1 %v5690_v52  ;;  %5688 = vadd.xlane.f32.xlu0 %v5687_v25 }
 0xbd8   : > { %v5602_v37 = vpop.xlane.xlu1 %5601 }
 0xbd9   : > { %v5599_v16 = vpop.xlane.xlu0 %5598  ;;  %v5732_v61 = vrot.slane %v5602_v37, %v11350_v46 }
 0xbda   : > { %v5728_v56 = vrot.slane %v5599_v16, %v11353_v49 }
 0xbdc   : > { %v5626_v29 = vpop.xlane.xlu1 %5625  ;;  %v5733_v57 = vsel %vm2073_vm0, %v5732_v61, %v5728_v56 }
 0xbdd   : > { %v5623_v62 = vpop.xlane.xlu0 %5622  ;;  %v5768_v5 = vrot.slane %v5626_v29, %v11350_v46 }
 0xbde   : > { %v5764_v9 = vrot.slane %v5623_v62, %v11353_v49 }
 0xbe0   : > { %v5608_v26 = vpop.xlane.xlu1 %5607  ;;  %v5769_v31 = vsel %vm2073_vm0, %v5768_v5, %v5764_v9 }
 0xbe1   : > { %v5605_v30 = vpop.xlane.xlu0 %5604  ;;  %v5741_v55 = vrot.slane %v5608_v26, %v11350_v46 }
 0xbe2   : > { %v5737_v18 = vrot.slane %v5605_v30, %v11353_v49 }
 0xbe4   : > { %v5650_v4 = vpop.xlane.xlu1 %5649  ;;  %v5742_v15 = vsel %vm2073_vm0, %v5741_v55, %v5737_v18 }
 0xbe5   : > { %v5647_v51 = vpop.xlane.xlu0 %5646  ;;  %v5869_v47 = vsel %vm2210_vm1, %v5742_v15, %v5733_v57  ;;  %v5804_v42 = vrot.slane %v5650_v4, %v11350_v46 }
 0xbe6   : > { %v5800_v23 = vrot.slane %v5647_v51, %v11353_v49 }
 0xbe8   : > { %v5614_v19 = vpop.xlane.xlu1 %5613  ;;  %v5805_v30 = vsel %vm2073_vm0, %v5804_v42, %v5800_v23 }
 0xbe9   : > { %v5611_v0 = vpop.xlane.xlu0 %5610  ;;  %v5750_v50 = vrot.slane %v5614_v19, %v11350_v46 }
 0xbea   : > { %v5746_v48 = vrot.slane %v5611_v0, %v11353_v49 }
 0xbec   : > { %v12502_v3 = vpop.xlane.xlu1 %5673  ;;  %v5751_v1 = vsel %vm2073_vm0, %v5750_v50, %v5746_v48 }
 0xbed   : > { %v12504_v32 = vpop.xlane.xlu0 %5670  ;;  %v5870_v12 = vsel %vm2212_vm2, %v5751_v1, %v5869_v47  ;;  %v5840_v51 = vrot.slane %v12502_v3, %v11350_v46 }
 0xbf2   : > { %v5632_v22 = vpop.xlane.xlu1 %5631 }
 0xbf3   : > { %v5629_v53 = vpop.xlane.xlu0 %5628  ;;  %v5777_v21 = vrot.slane %v5632_v22, %v11350_v46 }
 0xbf4   : > { %v5773_v6 = vrot.slane %v5629_v53, %v11353_v49  ;;  %v5836_v53 = vrot.slane %v12504_v32, %v11353_v49 }
 0xbf6   : > { %v5778_v34 = vsel %vm2073_vm0, %v5777_v21, %v5773_v6 }
 0xbf8   : > { %v5638_v45 = vpop.xlane.xlu1 %5637  ;;  %v5635_v43 = vpop.xlane.xlu0 %5634 }
 0xbf9   : > { %v5786_v27 = vrot.slane %v5638_v45, %v11350_v46  ;;  %v5782_v11 = vrot.slane %v5635_v43, %v11353_v49 }
 0xbfb   : > { %v5787_v4 = vsel %vm2073_vm0, %v5786_v27, %v5782_v11 }
 0xbfc   : > { %v5656_v63 = vpop.xlane.xlu1 %5655  ;;  %v5653_v14 = vpop.xlane.xlu0 %5652 }
 0xbfd   : > { %v5813_v8 = vrot.slane %v5656_v63, %v11350_v46  ;;  %v5809_v40 = vrot.slane %v5653_v14, %v11353_v49 }
 0xbff   : > { %v5814_v19 = vsel %vm2073_vm0, %v5813_v8, %v5809_v40 }
 0xc00   : > { %v5876_v50 = vsel %vm2210_vm1, %v5814_v19, %v5805_v30  ;;  %vm13000_vm1 = vcmp.gt.f32.partialorder %v11534_v35, 0.0  ;;  %v9935_v30 = vld [vmem:[%s10896_s29 + $0x664] ss:$16 sps:$4 sm:$0xff]   ;;  %v9939_v19 = vld [vmem:[%s10896_s29 + $0x680] ss:$16 sps:$4 sm:$0xff]  }
 0xc01   : > { %v5662_v2 = vpop.xlane.xlu1 %5661  ;;  %v5659_v41 = vpop.xlane.xlu0 %5658 }
 0xc02   : > { %v5822_v52 = vrot.slane %v5662_v2, %v11350_v46  ;;  %v5818_v25 = vrot.slane %v5659_v41, %v11353_v49 }
 0xc04   : > { %v5823_v45 = vsel %vm2073_vm0, %v5822_v52, %v5818_v25  ;;  %v9915_v25 = vld [vmem:[%s10896_s29 + $0x600] ss:$16 sps:$4 sm:$0xff]  }
 0xc05   : > { %v5877_v56 = vsel %vm2212_vm2, %v5823_v45, %v5876_v50  ;;  %v9951_v45 = vld [vmem:[%s10896_s29 + $0x6c0] ss:$16 sps:$4 sm:$0xff]   ;;  %v9983_v50 = vld [vmem:[%s10896_s29 + $0x764] ss:$16 sps:$4 sm:$0xff]  }
 0xc07   : > { %v5620_v59 = vpop.xlane.xlu1 %5619 }
 0xc08   : > { %v5617_v28 = vpop.xlane.xlu0 %5616  ;;  %v5759_v58 = vrot.slane %v5620_v59, %v11350_v46 }
 0xc09   : > { %v5755_v60 = vrot.slane %v5617_v28, %v11353_v49  ;;  %v5841_v28 = vsel %vm2073_vm0, %v5840_v51, %v5836_v53  ;;  %v9941_v51 = vld [vmem:[%s10896_s29 + $0x684] ss:$16 sps:$4 sm:$0xff]  }
 0xc0a   : > { %v9953_v53 = vld [vmem:[%s10896_s29 + $0x6c4] ss:$16 sps:$4 sm:$0xff]  }
 0xc0b   : > { %v5760_v38 = vsel %vm2073_vm0, %v5759_v58, %v5755_v60  ;;  %v5680_v33 = vpop.xlane.xlu1 %5679 }
 0xc0c   : > { %v5677_v20 = vpop.xlane.xlu0 %5676  ;;  %v5871_v24 = vsel %vm2214_vm3, %v5760_v38, %v5870_v12  ;;  %v5849_v43 = vrot.slane %v5680_v33, %v11350_v46 }
 0xc0d   : > { %v5872_v17 = vsel %vm2216_vm4, %v5769_v31, %v5871_v24  ;;  %v5845_v41 = vrot.slane %v5677_v20, %v11353_v49 }
 0xc0e   : > { %v5873_v29 = vsel %vm2218_vm5, %v5778_v34, %v5872_v17 }
 0xc0f   : > { %v5874_v22 = vsel %vm2220_vm6, %v5787_v4, %v5873_v29  ;;  %v5850_v60 = vsel %vm2073_vm0, %v5849_v43, %v5845_v41  ;;  %v9921_v29 = vld [vmem:[%s10896_s29 + $0x620] ss:$16 sps:$4 sm:$0xff]   ;;  %v9959_v43 = vld [vmem:[%s10896_s29 + $0x6e4] ss:$16 sps:$4 sm:$0xff]  }
 0xc10   : > { %v5686_v36 = vpop.xlane.xlu1 %5685  ;;  %v5683_v54 = vpop.xlane.xlu0 %5682  ;;  %v9933_v4 = vld [vmem:[%s10896_s29 + $0x660] ss:$16 sps:$4 sm:$0xff]   ;;  %v9971_v41 = vld [vmem:[%s10896_s29 + $0x724] ss:$16 sps:$4 sm:$0xff]  }
 0xc11   : > { %v5858_v32 = vrot.slane %v5686_v36, %v11350_v46  ;;  %v5854_v48 = vrot.slane %v5683_v54, %v11353_v49 }
 0xc13   : > { %v5859_v5 = vsel %vm2073_vm0, %v5858_v32, %v5854_v48  ;;  %v9981_v32 = vld [vmem:[%s10896_s29 + $0x760] ss:$16 sps:$4 sm:$0xff]   ;;  %v9989_v48 = vld [vmem:[%s10896_s29 + $0x784] ss:$16 sps:$4 sm:$0xff]  }
 0xc16   : > { %v5644_v37 = vpop.xlane.xlu1 %5643  ;;  %v5641_v16 = vpop.xlane.xlu0 %5640 }
 0xc17   : > { %v5795_v62 = vrot.slane %v5644_v37, %v11350_v46  ;;  %v5791_v26 = vrot.slane %v5641_v16, %v11353_v49  ;;  %v9917_v37 = vld [vmem:[%s10896_s29 + $0x604] ss:$16 sps:$4 sm:$0xff]  }
 0xc18   : > { %v9923_v16 = vld [vmem:[%s10896_s29 + $0x624] ss:$16 sps:$4 sm:$0xff]   ;;  %6453 = vmatprep.subr.bf16.mxu1 %v9917_v37  ;;  %v9966_v37 = vld [vmem:[%s10896_s29 + $0x708] ss:$16 sps:$4 sm:$0xff]  }
 0xc19   : > { %v5796_v0 = vsel %vm2073_vm0, %v5795_v62, %v5791_v26  ;;  %v9929_v62 = vld [vmem:[%s10896_s29 + $0x644] ss:$16 sps:$4 sm:$0xff]   ;;  %v9927_v26 = vld [vmem:[%s10896_s29 + $0x640] ss:$16 sps:$4 sm:$0xff]  }
 0xc1a   : > { %v5668_v63 = vpop.xlane.xlu1 %5667  ;;  %v5665_v14 = vpop.xlane.xlu0 %5664  ;;  %v5875_v2 = vsel %vm2222_vm7, %v5796_v0, %v5874_v22  ;;  %v9947_v0 = vld [vmem:[%s10896_s29 + $0x6a4] ss:$16 sps:$4 sm:$0xff]   ;;  %v9945_v22 = vld [vmem:[%s10896_s29 + $0x6a0] ss:$16 sps:$4 sm:$0xff]  }
 0xc1b   : > { %v5831_v3 = vrot.slane %v5668_v63, %v11350_v46  ;;  %v5827_v55 = vrot.slane %v5665_v14, %v11353_v49  ;;  %v5885_v18 = vsel %vm2028_vm8, %v5875_v2, -1e+30  ;;  %v9957_v63 = vld [vmem:[%s10896_s29 + $0x6e0] ss:$16 sps:$4 sm:$0xff]   ;;  %v9965_v14 = vld [vmem:[%s10896_s29 + $0x704] ss:$16 sps:$4 sm:$0xff]  }
 0xc1c   : > { %v5887_v61 = vsel %vm2235_vm9, %v5885_v18, -inf  ;;  %v9963_v2 = vld [vmem:[%s10896_s29 + $0x700] ss:$16 sps:$4 sm:$0xff]  }
 0xc1d   : > { %v5832_v59 = vsel %vm2073_vm0, %v5831_v3, %v5827_v55  ;;  %5888 = vmax.xlane.f32.xlu0 %v5887_v61  ;;  %v9969_v3 = vld [vmem:[%s10896_s29 + $0x720] ss:$16 sps:$4 sm:$0xff]   ;;  %v9977_v55 = vld [vmem:[%s10896_s29 + $0x744] ss:$16 sps:$4 sm:$0xff]  }
 0xc1e   : > { %v5878_v15 = vsel %vm2214_vm3, %v5832_v59, %v5877_v56  ;;  %v5692_v58 = vpop.xlane.xlu1 %5691  ;;  %v5689_v44 = vpop.xlane.xlu0 %5688  ;;  %v9987_v61 = vld [vmem:[%s10896_s29 + $0x780] ss:$16 sps:$4 sm:$0xff]   ;;  %v9995_v56 = vld [vmem:[%s10896_s29 + $0x7a4] ss:$16 sps:$4 sm:$0xff]  }
 0xc1f   : > { %v5879_v1 = vsel %vm2216_vm4, %v5841_v28, %v5878_v15  ;;  %v5867_v57 = vrot.slane %v5692_v58, %v11350_v46  ;;  %v5863_v38 = vrot.slane %v5689_v44, %v11353_v49  ;;  %v9993_v59 = vld [vmem:[%s10896_s29 + $0x7a0] ss:$16 sps:$4 sm:$0xff]   ;;  %v10001_v28 = vld [vmem:[%s10896_s29 + $0x7c4] ss:$16 sps:$4 sm:$0xff]  }
 0xc20   : > { %v5880_v9 = vsel %vm2218_vm5, %v5850_v60, %v5879_v1  ;;  %v9999_v15 = vld [vmem:[%s10896_s29 + $0x7c0] ss:$16 sps:$4 sm:$0xff]  }
 0xc21   : > { %v5868_v47 = vsel %vm2073_vm0, %v5867_v57, %v5863_v38  ;;  %v5881_v33 = vsel %vm2220_vm6, %v5859_v5, %v5880_v9  ;;  %v9156_v58 = vld [vmem:[%s10904_s1 + $0x42] ss:$8 sm:$0x3] }
 0xc22   : > { %v5882_v20 = vsel %vm2222_vm7, %v5868_v47, %v5881_v33  ;;  %v5916_v44 = vrot.slane %v9156_v58, %v11044_v13  ;;  %v5920_v1 = vrot.slane %v9156_v58, %v11036_v7  ;;  %v10025_v58 = vld [vmem:[%s10896_s29 + $0x844] ss:$16 sps:$4 sm:$0xff]  }
 0xc23   : > { %v5886_v12 = vsel %vm13000_vm1, %v5882_v20, -1e+30 }
 0xc24   : > { %v5890_v24 = vsel %vm2235_vm9, %v5886_v12, -inf }
 0xc25   : > { %5891 = vmax.xlane.f32.xlu1 %v5890_v24 }
 0xcaa   : > { %v5889_v21 = vpop.xlane.xlu0 %5888 }
 0xcab   : > { %v5893_v46 = vsub.f32 %v5885_v18, %v5889_v21  ;;  %v9975_v18 = vld [vmem:[%s10896_s29 + $0x740] ss:$16 sps:$4 sm:$0xff]   ;;  %v9920_v21 = vld [vmem:[%s10896_s29 + $0x60c] ss:$16 sps:$4 sm:$0xff]  }
 0xcad   : > { %v5895_v6 = vmul.f32 1.442695, %v5893_v46  ;;  %v5969_v46 = vld [vmem:[%s10894_s18] sm:$0x3] }
 0xcaf   : > { %10223 = vpow2.f32 %v5895_v6  ;;  %v9918_v6 = vld [vmem:[%s10896_s29 + $0x608] ss:$16 sps:$4 sm:$0xff]  }
 0xcb2   : > { %v5892_v49 = vpop.xlane.xlu1 %5891 }
 0xcb3   : > { %v5894_v31 = vsub.f32 %v5886_v12, %v5892_v49  ;;  %v9926_v49 = vld [vmem:[%s10896_s29 + $0x62c] ss:$16 sps:$4 sm:$0xff]  }
 0xcb5   : > { %v5897_v36 = vmul.f32 1.442695, %v5894_v31  ;;  %v9924_v31 = vld [vmem:[%s10896_s29 + $0x628] ss:$16 sps:$4 sm:$0xff]  }
 0xcb7   : > { %10225 = vpow2.f32 %v5897_v36  ;;  %v9932_v36 = vld [vmem:[%s10896_s29 + $0x64c] ss:$16 sps:$4 sm:$0xff]  }
 0xcb9   : > { %v10224_v54 = vpop.eup %10223 }
 0xcba   : > { %v5899_v17 = vsel %vm2235_vm9, %v10224_v54, 0.0 }
 0xcbb   : > { %5900 = vadd.xlane.f32.xlu0 %v5899_v17  ;;  %v9938_v17 = vld [vmem:[%s10896_s29 + $0x66c] ss:$16 sps:$4 sm:$0xff]  }
 0xcc1   : > { %v10226_v35 = vpop.eup %10225 }
 0xcc2   : > { %v5902_v42 = vsel %vm2235_vm9, %v10226_v35, 0.0 }
 0xcc3   : > { %5903 = vadd.xlane.f32.xlu1 %v5902_v42  ;;  %v9944_v42 = vld [vmem:[%s10896_s29 + $0x68c] ss:$16 sps:$4 sm:$0xff]  }
 0xd48   : > { %v5901_v23 = vpop.xlane.xlu0 %5900 }
 0xd49   : > { %10227 = vrcp.f32 %v5901_v23  ;;  %v9942_v23 = vld [vmem:[%s10896_s29 + $0x688] ss:$16 sps:$4 sm:$0xff]  }
 0xd50   : > { %v5904_v27 = vpop.xlane.xlu1 %5903 }
 0xd51   : > { %10229 = vrcp.f32 %v5904_v27  ;;  %v9950_v27 = vld [vmem:[%s10896_s29 + $0x6ac] ss:$16 sps:$4 sm:$0xff]  }
 0xd53   : > { %v10228_v11 = vpop.eup %10227 }
 0xd54   : > { %v5907_v8 = vmul.f32 %v10228_v11, %v10224_v54  ;;  %v9930_v54 = vld [vmem:[%s10896_s29 + $0x648] ss:$16 sps:$4 sm:$0xff]  }
 0xd55   : > { %v9948_v11 = vld [vmem:[%s10896_s29 + $0x6a8] ss:$16 sps:$4 sm:$0xff]  }
 0xd5b   : > { %v10230_v34 = vpop.eup %10229 }
 0xd5c   : > { %v5908_v40 = vmul.f32 %v10230_v34, %v10226_v35  ;;  %v9936_v35 = vld [vmem:[%s10896_s29 + $0x668] ss:$16 sps:$4 sm:$0xff]   ;;  %v9956_v34 = vld [vmem:[%s10896_s29 + $0x6cc] ss:$16 sps:$4 sm:$0xff]  }
 0xd5e   : > { %v5909_v52 = vpack.c.bf16 %v5908_v40, %v5907_v8  ;;  %v9954_v8 = vld [vmem:[%s10896_s29 + $0x6c8] ss:$16 sps:$4 sm:$0xff]   ;;  %v9962_v40 = vld [vmem:[%s10896_s29 + $0x6ec] ss:$16 sps:$4 sm:$0xff]  }
 0xd60   : > { %9157 = vmatmul.mubr.msk.bf16.vlgmr.msra.gmra.mrb[20].mxu1 %vm2235_vm9, %v5909_v52  ;;  %v9960_v52 = vld [vmem:[%s10896_s29 + $0x6e8] ss:$16 sps:$4 sm:$0xff]  }
 0xd61   : > { %6454 = vmatpush1.bf16.msra.mxu1 %v9915_v25  ;;  %v9968_v25 = vld [vmem:[%s10896_s29 + $0x70c] ss:$16 sps:$4 sm:$0xff]  }
 0xd62   : > { %6455 = vmatprep.subr.bf16.mxu1 %v9923_v16  ;;  %v9974_v16 = vld [vmem:[%s10896_s29 + $0x72c] ss:$16 sps:$4 sm:$0xff]  }
 0xd65   : > { %6456 = vmatpush1.bf16.msra.mxu1 %v9921_v29  ;;  %v9972_v29 = vld [vmem:[%s10896_s29 + $0x728] ss:$16 sps:$4 sm:$0xff]  }
 0xd66   : > { %6457 = vmatprep.subr.bf16.mxu1 %v9929_v62  ;;  %v9980_v62 = vld [vmem:[%s10896_s29 + $0x74c] ss:$16 sps:$4 sm:$0xff]  }
 0xd69   : > { %6458 = vmatpush1.bf16.msra.mxu1 %v9927_v26  ;;  %v9978_v26 = vld [vmem:[%s10896_s29 + $0x748] ss:$16 sps:$4 sm:$0xff]  }
 0xd6a   : > { %6459 = vmatprep.subr.bf16.mxu1 %v9935_v30  ;;  %v9986_v30 = vld [vmem:[%s10896_s29 + $0x76c] ss:$16 sps:$4 sm:$0xff]  }
 0xd6d   : > { %6460 = vmatpush1.bf16.msra.mxu1 %v9933_v4  ;;  %v9984_v4 = vld [vmem:[%s10896_s29 + $0x768] ss:$16 sps:$4 sm:$0xff]  }
 0xd6e   : > { %6461 = vmatprep.subr.bf16.mxu1 %v9941_v51  ;;  %v9992_v51 = vld [vmem:[%s10896_s29 + $0x78c] ss:$16 sps:$4 sm:$0xff]  }
 0xd71   : > { %6462 = vmatpush1.bf16.msra.mxu1 %v9939_v19  ;;  %v9990_v19 = vld [vmem:[%s10896_s29 + $0x788] ss:$16 sps:$4 sm:$0xff]  }
 0xd72   : > { %6463 = vmatprep.subr.bf16.mxu1 %v9947_v0  ;;  %v9998_v0 = vld [vmem:[%s10896_s29 + $0x7ac] ss:$16 sps:$4 sm:$0xff]  }
 0xd75   : > { %6464 = vmatpush1.bf16.msra.mxu1 %v9945_v22  ;;  %v9996_v22 = vld [vmem:[%s10896_s29 + $0x7a8] ss:$16 sps:$4 sm:$0xff]  }
 0xd76   : > { %6465 = vmatprep.subr.bf16.mxu1 %v9953_v53  ;;  %v10004_v53 = vld [vmem:[%s10896_s29 + $0x7cc] ss:$16 sps:$4 sm:$0xff]  }
 0xd79   : > { %6466 = vmatpush1.bf16.msra.mxu1 %v9951_v45  ;;  %v10002_v45 = vld [vmem:[%s10896_s29 + $0x7c8] ss:$16 sps:$4 sm:$0xff]  }
 0xd7a   : > { %6467 = vmatprep.subr.bf16.mxu1 %v9959_v43  ;;  %v10005_v43 = vld [vmem:[%s10896_s29 + $0x7e0] ss:$16 sps:$4 sm:$0xff]  }
 0xd7d   : > { %6468 = vmatpush1.bf16.msra.mxu1 %v9957_v63  ;;  %v10007_v63 = vld [vmem:[%s10896_s29 + $0x7e4] ss:$16 sps:$4 sm:$0xff]  }
 0xd7e   : > { %6469 = vmatprep.subr.bf16.mxu1 %v9965_v14  ;;  %v10008_v14 = vld [vmem:[%s10896_s29 + $0x7e8] ss:$16 sps:$4 sm:$0xff]  }
 0xd81   : > { %6470 = vmatpush1.bf16.msra.mxu1 %v9963_v2  ;;  %v10010_v2 = vld [vmem:[%s10896_s29 + $0x7ec] ss:$16 sps:$4 sm:$0xff]  }
 0xd82   : > { %6471 = vmatprep.subr.bf16.mxu1 %v9971_v41  ;;  %v10013_v41 = vld [vmem:[%s10896_s29 + $0x804] ss:$16 sps:$4 sm:$0xff]  }
 0xd85   : > { %6472 = vmatpush1.bf16.msra.mxu1 %v9969_v3  ;;  %v10016_v3 = vld [vmem:[%s10896_s29 + $0x80c] ss:$16 sps:$4 sm:$0xff]  }
 0xd86   : > { %6473 = vmatprep.subr.bf16.mxu1 %v9977_v55 }
 0xd89   : > { %6474 = vmatpush1.bf16.msra.mxu1 %v9975_v18 }
 0xd8a   : > { %6475 = vmatprep.subr.bf16.mxu1 %v9983_v50 }
 0xd8d   : > { %6476 = vmatpush1.bf16.msra.mxu1 %v9981_v32  ;;  %v10011_v32 = vld [vmem:[%s10896_s29 + $0x800] ss:$16 sps:$4 sm:$0xff]  }
 0xd8e   : > { %6477 = vmatprep.subr.bf16.mxu1 %v9989_v48  ;;  %v10014_v48 = vld [vmem:[%s10896_s29 + $0x808] ss:$16 sps:$4 sm:$0xff]  }
 0xd91   : > { %6478 = vmatpush1.bf16.msra.mxu1 %v9987_v61 }
 0xd92   : > { %6479 = vmatprep.subr.bf16.mxu1 %v9995_v56  ;;  %v10019_v56 = vld [vmem:[%s10896_s29 + $0x824] ss:$16 sps:$4 sm:$0xff]  }
 0xd95   : > { %6480 = vmatpush1.bf16.msra.mxu1 %v9993_v59  ;;  %v10022_v59 = vld [vmem:[%s10896_s29 + $0x82c] ss:$16 sps:$4 sm:$0xff]  }
 0xd96   : > { %6481 = vmatprep.subr.bf16.mxu1 %v10001_v28  ;;  %v10017_v28 = vld [vmem:[%s10896_s29 + $0x820] ss:$16 sps:$4 sm:$0xff]  }
 0xd99   : > { %6482 = vmatpush1.bf16.msra.mxu1 %v9999_v15  ;;  %v10020_v15 = vld [vmem:[%s10896_s29 + $0x828] ss:$16 sps:$4 sm:$0xff]  }
 0xd9a   : > { %6483 = vmatprep.subr.bf16.mxu1 %v10007_v63  ;;  %v10094_v63 = vld [vmem:[%s10896_s29 + $0x9ac] ss:$16 sps:$4 sm:$0xff]  }
 0xd9d   : > { %6484 = vmatpush1.bf16.msra.mxu1 %v10005_v43  ;;  %v10091_v43 = vld [vmem:[%s10896_s29 + $0x9a4] ss:$16 sps:$4 sm:$0xff]  }
 0xd9e   : > { %6946 = vmatprep.subr.bf16.mxu1 %v10013_v41  ;;  %v10097_v41 = vld [vmem:[%s10896_s29 + $0x9c4] ss:$16 sps:$4 sm:$0xff]  }
 0xe33   : > { %v5960_v60 = vpop.f32.mrb[20].mxu1 }
 0xe34   : > { %v5962_v57 = vpop.f32.mrb[21].mxu1  ;;  %v5961_v5 = vadd.f32 %v5960_v60, %v5916_v44  ;;  %v10023_v60 = vld [vmem:[%s10896_s29 + $0x840] ss:$16 sps:$4 sm:$0xff]  }
 0xe35   : > { %v5964_v38 = vpop.f32.mrb[22].mxu1  ;;  %v5963_v33 = vadd.f32 %v5962_v57, %v5920_v1  ;;  %v10031_v57 = vld [vmem:[%s10896_s29 + $0x864] ss:$16 sps:$4 sm:$0xff]  }
 0xe36   : > { %v5965_v9 = vadd.f32 %v5964_v38, %v5916_v44  ;;  %v5966_v47 = vpop.f32.mrb[23].mxu1  ;;  %v10028_v44 = vld [vmem:[%s10896_s29 + $0x84c] ss:$16 sps:$4 sm:$0xff]  }
 0xe37   : > { %v5967_v20 = vadd.f32 %v5966_v47, %v5920_v1  ;;  %v10026_v1 = vld [vmem:[%s10896_s29 + $0x848] ss:$16 sps:$4 sm:$0xff]   ;;  %v10034_v38 = vld [vmem:[%s10896_s29 + $0x86c] ss:$16 sps:$4 sm:$0xff]   ;;  %v10037_v47 = vld [vmem:[%s10896_s29 + $0x884] ss:$16 sps:$4 sm:$0xff]  }
 0xe38   : > { %v9471_v12 = vpack.c.bf16 %v5965_v9, %v5961_v5  ;;  %v10029_v5 = vld [vmem:[%s10896_s29 + $0x860] ss:$16 sps:$4 sm:$0xff]   ;;  %v10032_v9 = vld [vmem:[%s10896_s29 + $0x868] ss:$16 sps:$4 sm:$0xff]  }
 0xe39   : > { %v9469_v24 = vpack.c.bf16 %v5967_v20, %v5963_v33  ;;  %v10040_v33 = vld [vmem:[%s10896_s29 + $0x88c] ss:$16 sps:$4 sm:$0xff]   ;;  %v10035_v20 = vld [vmem:[%s10896_s29 + $0x880] ss:$16 sps:$4 sm:$0xff]  }
 0xe3b   : > { %9470 = vmatprep.subr.bf16.mxu0 %v9469_v24  ;;  %v10043_v24 = vld [vmem:[%s10896_s29 + $0x8a4] ss:$16 sps:$4 sm:$0xff]  }
 0xe3c   : > { %9472 = vmatpush1.bf16.msra.mxu0 %v9471_v12  ;;  %v10038_v12 = vld [vmem:[%s10896_s29 + $0x888] ss:$16 sps:$4 sm:$0xff]  }
 0xe3d   : > { %6494 = vmatprep.subr.bf16.mxu0 %v9920_v21  ;;  %v10046_v21 = vld [vmem:[%s10896_s29 + $0x8ac] ss:$16 sps:$4 sm:$0xff]  }
 0xe3f   : > { %9158 = vmatmul.mubr.msk.f32.vlgmr.msra.gmra.mrb[24].mxu0 %vm2235_vm9, %v5969_v46  ;;  %v10041_v46 = vld [vmem:[%s10896_s29 + $0x8a0] ss:$16 sps:$4 sm:$0xff]  }
 0xe40   : > { %6495 = vmatpush1.bf16.msra.mxu0 %v9918_v6  ;;  %v10044_v6 = vld [vmem:[%s10896_s29 + $0x8a8] ss:$16 sps:$4 sm:$0xff]  }
 0xe41   : > { %6496 = vmatprep.subr.bf16.mxu0 %v9926_v49  ;;  %v10049_v49 = vld [vmem:[%s10896_s29 + $0x8c4] ss:$16 sps:$4 sm:$0xff]  }
 0xe44   : > { %6497 = vmatpush1.bf16.msra.mxu0 %v9924_v31  ;;  %v10052_v31 = vld [vmem:[%s10896_s29 + $0x8cc] ss:$16 sps:$4 sm:$0xff]  }
 0xe45   : > { %6498 = vmatprep.subr.bf16.mxu0 %v9932_v36  ;;  %v10047_v36 = vld [vmem:[%s10896_s29 + $0x8c0] ss:$16 sps:$4 sm:$0xff]  }
 0xe48   : > { %6499 = vmatpush1.bf16.msra.mxu0 %v9930_v54  ;;  %v10050_v54 = vld [vmem:[%s10896_s29 + $0x8c8] ss:$16 sps:$4 sm:$0xff]  }
 0xe49   : > { %6500 = vmatprep.subr.bf16.mxu0 %v9938_v17  ;;  %v10055_v17 = vld [vmem:[%s10896_s29 + $0x8e4] ss:$16 sps:$4 sm:$0xff]  }
 0xe4c   : > { %6501 = vmatpush1.bf16.msra.mxu0 %v9936_v35  ;;  %v10058_v35 = vld [vmem:[%s10896_s29 + $0x8ec] ss:$16 sps:$4 sm:$0xff]  }
 0xe4d   : > { %6502 = vmatprep.subr.bf16.mxu0 %v9944_v42  ;;  %v10053_v42 = vld [vmem:[%s10896_s29 + $0x8e0] ss:$16 sps:$4 sm:$0xff]  }
 0xe50   : > { %6503 = vmatpush1.bf16.msra.mxu0 %v9942_v23  ;;  %v10056_v23 = vld [vmem:[%s10896_s29 + $0x8e8] ss:$16 sps:$4 sm:$0xff]  }
 0xe51   : > { %6504 = vmatprep.subr.bf16.mxu0 %v9950_v27  ;;  %v10061_v27 = vld [vmem:[%s10896_s29 + $0x904] ss:$16 sps:$4 sm:$0xff]  }
 0xe54   : > { %6505 = vmatpush1.bf16.msra.mxu0 %v9948_v11  ;;  %v10064_v11 = vld [vmem:[%s10896_s29 + $0x90c] ss:$16 sps:$4 sm:$0xff]  }
 0xe55   : > { %6506 = vmatprep.subr.bf16.mxu0 %v9956_v34  ;;  %v10059_v34 = vld [vmem:[%s10896_s29 + $0x900] ss:$16 sps:$4 sm:$0xff]  }
 0xe58   : > { %6507 = vmatpush1.bf16.msra.mxu0 %v9954_v8  ;;  %v10062_v8 = vld [vmem:[%s10896_s29 + $0x908] ss:$16 sps:$4 sm:$0xff]  }
 0xe59   : > { %6508 = vmatprep.subr.bf16.mxu0 %v9962_v40  ;;  %v10067_v40 = vld [vmem:[%s10896_s29 + $0x924] ss:$16 sps:$4 sm:$0xff]  }
 0xe5c   : > { %6509 = vmatpush1.bf16.msra.mxu0 %v9960_v52  ;;  %v10070_v52 = vld [vmem:[%s10896_s29 + $0x92c] ss:$16 sps:$4 sm:$0xff]  }
 0xe5d   : > { %6510 = vmatprep.subr.bf16.mxu0 %v9968_v25  ;;  %v10065_v25 = vld [vmem:[%s10896_s29 + $0x920] ss:$16 sps:$4 sm:$0xff]  }
 0xe60   : > { %6511 = vmatpush1.bf16.msra.mxu0 %v9966_v37  ;;  %v10068_v37 = vld [vmem:[%s10896_s29 + $0x928] ss:$16 sps:$4 sm:$0xff]  }
 0xe61   : > { %6512 = vmatprep.subr.bf16.mxu0 %v9974_v16  ;;  %v10073_v16 = vld [vmem:[%s10896_s29 + $0x944] ss:$16 sps:$4 sm:$0xff]  }
 0xe64   : > { %6513 = vmatpush1.bf16.msra.mxu0 %v9972_v29  ;;  %v10076_v29 = vld [vmem:[%s10896_s29 + $0x94c] ss:$16 sps:$4 sm:$0xff]  }
 0xe65   : > { %6514 = vmatprep.subr.bf16.mxu0 %v9980_v62  ;;  %v10071_v62 = vld [vmem:[%s10896_s29 + $0x940] ss:$16 sps:$4 sm:$0xff]  }
 0xe68   : > { %6515 = vmatpush1.bf16.msra.mxu0 %v9978_v26  ;;  %v10074_v26 = vld [vmem:[%s10896_s29 + $0x948] ss:$16 sps:$4 sm:$0xff]  }
 0xe69   : > { %6516 = vmatprep.subr.bf16.mxu0 %v9986_v30  ;;  %v10079_v30 = vld [vmem:[%s10896_s29 + $0x964] ss:$16 sps:$4 sm:$0xff]  }
 0xe6c   : > { %6517 = vmatpush1.bf16.msra.mxu0 %v9984_v4  ;;  %v10082_v4 = vld [vmem:[%s10896_s29 + $0x96c] ss:$16 sps:$4 sm:$0xff]  }
 0xe6d   : > { %6518 = vmatprep.subr.bf16.mxu0 %v9992_v51  ;;  %v10077_v51 = vld [vmem:[%s10896_s29 + $0x960] ss:$16 sps:$4 sm:$0xff]  }
 0xe70   : > { %6519 = vmatpush1.bf16.msra.mxu0 %v9990_v19  ;;  %v10080_v19 = vld [vmem:[%s10896_s29 + $0x968] ss:$16 sps:$4 sm:$0xff]  }
 0xe71   : > { %6520 = vmatprep.subr.bf16.mxu0 %v9998_v0  ;;  %v10085_v0 = vld [vmem:[%s10896_s29 + $0x984] ss:$16 sps:$4 sm:$0xff]  }
 0xe74   : > { %6521 = vmatpush1.bf16.msra.mxu0 %v9996_v22  ;;  %v10088_v22 = vld [vmem:[%s10896_s29 + $0x98c] ss:$16 sps:$4 sm:$0xff]  }
 0xe75   : > { %6522 = vmatprep.subr.bf16.mxu0 %v10004_v53  ;;  %v10083_v53 = vld [vmem:[%s10896_s29 + $0x980] ss:$16 sps:$4 sm:$0xff]  }
 0xe78   : > { %6523 = vmatpush1.bf16.msra.mxu0 %v10002_v45  ;;  %v10086_v45 = vld [vmem:[%s10896_s29 + $0x988] ss:$16 sps:$4 sm:$0xff]  }
 0xe79   : > { %6524 = vmatprep.subr.bf16.mxu0 %v10010_v2  ;;  %v10092_v2 = vld [vmem:[%s10896_s29 + $0x9a8] ss:$16 sps:$4 sm:$0xff]  }
 0xe7c   : > { %6525 = vmatpush1.bf16.msra.mxu0 %v10008_v14  ;;  %v10089_v14 = vld [vmem:[%s10896_s29 + $0x9a0] ss:$16 sps:$4 sm:$0xff]  }
 0xe7d   : > { %6987 = vmatprep.subr.bf16.mxu0 %v10016_v3  ;;  %v10100_v3 = vld [vmem:[%s10896_s29 + $0x9cc] ss:$16 sps:$4 sm:$0xff]  }
 0xf12   : > { %v6039_v55 = vpop.f32.mrb[24].mxu0 }
 0xf13   : > { %v6041_v18 = vpop.f32.mrb[25].mxu0  ;;  %v12652_v61 = vpack.c.bf16 %v6039_v55, %v6039_v55  ;;  %v10095_v55 = vld [vmem:[%s10896_s29 + $0x9c0] ss:$16 sps:$4 sm:$0xff]  }
 0xf14   : > { %v6045_v50 = vpack.c.bf16 %v6041_v18, %v6041_v18  ;;  %v10098_v18 = vld [vmem:[%s10896_s29 + $0x9c8] ss:$16 sps:$4 sm:$0xff]  }
 0xf16   : > { %6485 = vmatprep.mubr.bf16.mxu1 %v6045_v50  ;;  %6526 = vmatprep.mubr.bf16.mxu0 %v6045_v50 }
 0xf17   : > { %6486 = vmatmul.mubr.bf16.vlgmr.msra.gmra.mrb[24].mxu1 %v12652_v61  ;;  %6527 = vmatmul.mubr.bf16.vlgmr.msra.gmra.mrb[28].mxu0 %v12652_v61 }
 0xf18   : > { %6947 = vmatpush1.bf16.msra.mxu1 %v10011_v32  ;;  %6988 = vmatpush1.bf16.msra.mxu0 %v10014_v48  ;;  %v10106_v32 = vld [vmem:[%s10896_s29 + $0x9ec] ss:$16 sps:$4 sm:$0xff]   ;;  %v10101_v48 = vld [vmem:[%s10896_s29 + $0x9e0] ss:$16 sps:$4 sm:$0xff]  }
 0xf19   : > { %6948 = vmatprep.subr.bf16.mxu1 %v10019_v56  ;;  %6978 = vmatprep.mubr.bf16.mxu1 %v6045_v50  ;;  %v10104_v56 = vld [vmem:[%s10896_s29 + $0x9e8] ss:$16 sps:$4 sm:$0xff]  }
 0xf1a   : > { %6989 = vmatprep.subr.bf16.mxu0 %v10022_v59  ;;  %7019 = vmatprep.mubr.bf16.mxu0 %v6045_v50  ;;  %v10103_v50 = vld [vmem:[%s10896_s29 + $0x9e4] ss:$16 sps:$4 sm:$0xff]  }
 0xf1b   : > { %v10107_v59 = vld [vmem:[%s10902_s23 + $0x140] sm:$0xff]  }
 0xf1c   : > { %6949 = vmatpush1.bf16.msra.mxu1 %v10017_v28  ;;  %6990 = vmatpush1.bf16.msra.mxu0 %v10020_v15  ;;  %v10108_v28 = vld [vmem:[%s10902_s23 + $0x1c0] sm:$0xff]  }
 0xf1d   : > { %6950 = vmatprep.subr.bf16.mxu1 %v10025_v58  ;;  %6991 = vmatprep.subr.bf16.mxu0 %v10028_v44  ;;  %v10109_v15 = vld [vmem:[%s10902_s23 + $0x100] sm:$0xff]   ;;  %v10111_v44 = vld [vmem:[%s10902_s23 + $0x148] sm:$0xff]  }
 0xf1e   : > { %v10110_v58 = vld [vmem:[%s10902_s23 + $0x180] sm:$0xff]  }
 0xf20   : > { %6951 = vmatpush1.bf16.msra.mxu1 %v10023_v60  ;;  %6992 = vmatpush1.bf16.msra.mxu0 %v10026_v1  ;;  %v10112_v60 = vld [vmem:[%s10902_s23 + $0x1c8] sm:$0xff]  }
 0xf21   : > { %6952 = vmatprep.subr.bf16.mxu1 %v10031_v57  ;;  %6993 = vmatprep.subr.bf16.mxu0 %v10034_v38  ;;  %v10113_v1 = vld [vmem:[%s10902_s23 + $0x108] sm:$0xff]   ;;  %v10116_v38 = vld [vmem:[%s10902_s23 + $0x1d0] sm:$0xff]  }
 0xf22   : > { %v10114_v57 = vld [vmem:[%s10902_s23 + $0x188] sm:$0xff]  }
 0xf24   : > { %6953 = vmatpush1.bf16.msra.mxu1 %v10029_v5  ;;  %6994 = vmatpush1.bf16.msra.mxu0 %v10032_v9  ;;  %v10117_v5 = vld [vmem:[%s10902_s23 + $0x110] sm:$0xff]  }
 0xf25   : > { %6954 = vmatprep.subr.bf16.mxu1 %v10037_v47  ;;  %6995 = vmatprep.subr.bf16.mxu0 %v10040_v33  ;;  %v10118_v9 = vld [vmem:[%s10902_s23 + $0x190] sm:$0xff]   ;;  %v10119_v47 = vld [vmem:[%s10902_s23 + $0x158] sm:$0xff]  }
 0xf26   : > { %v10120_v33 = vld [vmem:[%s10902_s23 + $0x1d8] sm:$0xff]  }
 0xf28   : > { %6955 = vmatpush1.bf16.msra.mxu1 %v10035_v20  ;;  %6996 = vmatpush1.bf16.msra.mxu0 %v10038_v12  ;;  %v10121_v20 = vld [vmem:[%s10902_s23 + $0x118] sm:$0xff]  }
 0xf29   : > { %6956 = vmatprep.subr.bf16.mxu1 %v10043_v24  ;;  %6997 = vmatprep.subr.bf16.mxu0 %v10046_v21  ;;  %v10122_v12 = vld [vmem:[%s10902_s23 + $0x198] sm:$0xff]   ;;  %v10123_v24 = vld [vmem:[%s10902_s23 + $0x160] sm:$0xff]  }
 0xf2a   : > { %v10124_v21 = vld [vmem:[%s10902_s23 + $0x1e0] sm:$0xff]  }
 0xf2c   : > { %6957 = vmatpush1.bf16.msra.mxu1 %v10041_v46  ;;  %6998 = vmatpush1.bf16.msra.mxu0 %v10044_v6  ;;  %v10125_v46 = vld [vmem:[%s10902_s23 + $0x120] sm:$0xff]  }
 0xf2d   : > { %6958 = vmatprep.subr.bf16.mxu1 %v10049_v49  ;;  %6999 = vmatprep.subr.bf16.mxu0 %v10052_v31  ;;  %v10126_v6 = vld [vmem:[%s10902_s23 + $0x1a0] sm:$0xff]   ;;  %v10127_v49 = vld [vmem:[%s10902_s23 + $0x168] sm:$0xff]  }
 0xf2e   : > { %v10128_v31 = vld [vmem:[%s10902_s23 + $0x1e8] sm:$0xff]  }
 0xf30   : > { %6959 = vmatpush1.bf16.msra.mxu1 %v10047_v36  ;;  %7000 = vmatpush1.bf16.msra.mxu0 %v10050_v54  ;;  %v10129_v36 = vld [vmem:[%s10902_s23 + $0x128] sm:$0xff]  }
 0xf31   : > { %6960 = vmatprep.subr.bf16.mxu1 %v10055_v17  ;;  %7001 = vmatprep.subr.bf16.mxu0 %v10058_v35  ;;  %v10130_v54 = vld [vmem:[%s10902_s23 + $0x1a8] sm:$0xff]   ;;  %v10131_v17 = vld [vmem:[%s10902_s23 + $0x170] sm:$0xff]  }
 0xf32   : > { %v10132_v35 = vld [vmem:[%s10902_s23 + $0x1f0] sm:$0xff]  }
 0xf34   : > { %6961 = vmatpush1.bf16.msra.mxu1 %v10053_v42  ;;  %7002 = vmatpush1.bf16.msra.mxu0 %v10056_v23  ;;  %v10133_v42 = vld [vmem:[%s10902_s23 + $0x130] sm:$0xff]  }
 0xf35   : > { %6962 = vmatprep.subr.bf16.mxu1 %v10061_v27  ;;  %7003 = vmatprep.subr.bf16.mxu0 %v10064_v11  ;;  %v10134_v23 = vld [vmem:[%s10902_s23 + $0x1b0] sm:$0xff]   ;;  %v10135_v27 = vld [vmem:[%s10902_s23 + $0x178] sm:$0xff]  }
 0xf36   : > { %v10136_v11 = vld [vmem:[%s10902_s23 + $0x1f8] sm:$0xff]  }
 0xf38   : > { %6963 = vmatpush1.bf16.msra.mxu1 %v10059_v34  ;;  %7004 = vmatpush1.bf16.msra.mxu0 %v10062_v8  ;;  %v10137_v34 = vld [vmem:[%s10902_s23 + $0x138] sm:$0xff]  }
 0xf39   : > { %6964 = vmatprep.subr.bf16.mxu1 %v10067_v40  ;;  %7005 = vmatprep.subr.bf16.mxu0 %v10070_v52  ;;  %v10138_v8 = vld [vmem:[%s10902_s23 + $0x1b8] sm:$0xff]   ;;  %v10139_v40 = vld [vmem:[%s10902_s23 + $0x40] sm:$0xff]  }
 0xf3a   : > { %v10140_v52 = vld [vmem:[%s10902_s23 + $0xc0] sm:$0xff]  }
 0xf3c   : > { %6965 = vmatpush1.bf16.msra.mxu1 %v10065_v25  ;;  %7006 = vmatpush1.bf16.msra.mxu0 %v10068_v37 }
 0xf3d   : > { %6966 = vmatprep.subr.bf16.mxu1 %v10073_v16  ;;  %7007 = vmatprep.subr.bf16.mxu0 %v10076_v29 }
 0xf40   : > { %6967 = vmatpush1.bf16.msra.mxu1 %v10071_v62  ;;  %7008 = vmatpush1.bf16.msra.mxu0 %v10074_v26 }
 0xf41   : > { %6968 = vmatprep.subr.bf16.mxu1 %v10079_v30  ;;  %7009 = vmatprep.subr.bf16.mxu0 %v10082_v4 }
 0xf44   : > { %6969 = vmatpush1.bf16.msra.mxu1 %v10077_v51  ;;  %7010 = vmatpush1.bf16.msra.mxu0 %v10080_v19  ;;  %v12757_v51 = vld [vmem:[%s10904_s1 + $0x43] ss:$8 sm:$0xf] }
 0xf45   : > { %6970 = vmatprep.subr.bf16.mxu1 %v10085_v0  ;;  %7011 = vmatprep.subr.bf16.mxu0 %v10088_v22  ;;  %v9224_v19 = vld [vmem:[%s10904_s1 + $0x63] ss:$8 sm:$0xf]  ;;  %v6120_v0 = vrot.slane %v12757_v51, %v11036_v7  ;;  %v6128_v22 = vrot.slane %v12757_v51, %v11049_v39 }
 0xf48   : > { %6971 = vmatpush1.bf16.msra.mxu1 %v10083_v53  ;;  %7012 = vmatpush1.bf16.msra.mxu0 %v10086_v45  ;;  %v6609_v53 = vrot.slane %v9224_v19, %v11044_v13  ;;  %v6617_v45 = vrot.slane %v9224_v19, %v11041_v10 }
 0xf49   : > { %6972 = vmatprep.subr.bf16.mxu1 %v10091_v43  ;;  %7013 = vmatprep.subr.bf16.mxu0 %v10094_v63  ;;  %v6613_v43 = vrot.slane %v9224_v19, %v11036_v7  ;;  %v6621_v63 = vrot.slane %v9224_v19, %v11049_v39  ;;  %v10163_v19 = vld [vmem:[%s10902_s23 + $0x70] sm:$0xff]  }
 0xf4c   : > { %6973 = vmatpush1.bf16.msra.mxu1 %v10089_v14  ;;  %7014 = vmatpush1.bf16.msra.mxu0 %v10092_v2 }
 0xf4d   : > { %6974 = vmatprep.subr.bf16.mxu1 %v10097_v41  ;;  %7015 = vmatprep.subr.bf16.mxu0 %v10100_v3 }
 0xf50   : > { %6975 = vmatpush1.bf16.msra.mxu1 %v10095_v55  ;;  %7016 = vmatpush1.bf16.msra.mxu0 %v10098_v18 }
 0xf51   : > { %6976 = vmatprep.subr.bf16.mxu1 %v10103_v50  ;;  %7017 = vmatprep.subr.bf16.mxu0 %v10106_v32 }
 0xf54   : > { %6977 = vmatpush1.bf16.msra.mxu1 %v10101_v48  ;;  %7018 = vmatpush1.bf16.msra.mxu0 %v10104_v56 }
 0xf55   : > { %9369 = vmatprep.subr.bf16.mxu1 %v10107_v59  ;;  %9391 = vmatprep.subr.bf16.mxu0 %v10108_v28 }
 0xf57   : > { %6979 = vmatmul.mubr.bf16.vlgmr.msra.gmra.mrb[28].mxu1 %v12652_v61  ;;  %7020 = vmatmul.mubr.bf16.vlgmr.msra.gmra.mrb[32].mxu0 %v12652_v61  ;;  %v10115_v61 = vld [vmem:[%s10902_s23 + $0x150] sm:$0xff]  }
 0xf58   : > { %9370 = vmatpush3.bf16.msra.mxu1 %v10109_v15  ;;  %9392 = vmatpush3.bf16.msra.mxu0 %v10110_v58 }
 0xf59   : > { %9371 = vmatprep.subr.bf16.mxu1 %v10111_v44  ;;  %9393 = vmatprep.subr.bf16.mxu0 %v10112_v60 }
 0xf5c   : > { %9372 = vmatpush3.bf16.msra.mxu1 %v10113_v1  ;;  %9394 = vmatpush3.bf16.msra.mxu0 %v10114_v57 }
 0xf5d   : > { %9373 = vmatprep.subr.bf16.mxu1 %v10115_v61  ;;  %9395 = vmatprep.subr.bf16.mxu0 %v10116_v38 }
 0xf60   : > { %9374 = vmatpush3.bf16.msra.mxu1 %v10117_v5  ;;  %9396 = vmatpush3.bf16.msra.mxu0 %v10118_v9 }
 0xf61   : > { %9375 = vmatprep.subr.bf16.mxu1 %v10119_v47  ;;  %9397 = vmatprep.subr.bf16.mxu0 %v10120_v33  ;;  %v10141_v47 = vld [vmem:[%s10902_s23] sm:$0xff]  }
 0xf62   : > { %v10142_v33 = vld [vmem:[%s10902_s23 + $0x80] sm:$0xff]  }
 0xf64   : > { %9376 = vmatpush3.bf16.msra.mxu1 %v10121_v20  ;;  %9398 = vmatpush3.bf16.msra.mxu0 %v10122_v12 }
 0xf65   : > { %9377 = vmatprep.subr.bf16.mxu1 %v10123_v24  ;;  %9399 = vmatprep.subr.bf16.mxu0 %v10124_v21  ;;  %v10143_v24 = vld [vmem:[%s10902_s23 + $0x48] sm:$0xff]  }
 0xf66   : > { %v10144_v21 = vld [vmem:[%s10902_s23 + $0xc8] sm:$0xff]  }
 0xf68   : > { %9378 = vmatpush3.bf16.msra.mxu1 %v10125_v46  ;;  %9400 = vmatpush3.bf16.msra.mxu0 %v10126_v6 }
 0xf69   : > { %9379 = vmatprep.subr.bf16.mxu1 %v10127_v49  ;;  %9401 = vmatprep.subr.bf16.mxu0 %v10128_v31  ;;  %v10145_v49 = vld [vmem:[%s10902_s23 + $0x8] sm:$0xff]  }
 0xf6a   : > { %v10146_v31 = vld [vmem:[%s10902_s23 + $0x88] sm:$0xff]  }
 0xf6c   : > { %9380 = vmatpush3.bf16.msra.mxu1 %v10129_v36  ;;  %9402 = vmatpush3.bf16.msra.mxu0 %v10130_v54  ;;  %v10147_v36 = vld [vmem:[%s10902_s23 + $0x50] sm:$0xff]  }
 0xf6d   : > { %9381 = vmatprep.subr.bf16.mxu1 %v10131_v17  ;;  %9403 = vmatprep.subr.bf16.mxu0 %v10132_v35  ;;  %v10148_v54 = vld [vmem:[%s10902_s23 + $0xd0] sm:$0xff]  }
 0xf6e   : > { %v10149_v17 = vld [vmem:[%s10902_s23 + $0x10] sm:$0xff]  }
 0xf6f   : > { %v10150_v35 = vld [vmem:[%s10902_s23 + $0x90] sm:$0xff]  }
 0xf70   : > { %9382 = vmatpush3.bf16.msra.mxu1 %v10133_v42  ;;  %9404 = vmatpush3.bf16.msra.mxu0 %v10134_v23  ;;  %v10151_v42 = vld [vmem:[%s10902_s23 + $0x58] sm:$0xff]  }
 0xf71   : > { %9383 = vmatprep.subr.bf16.mxu1 %v10135_v27  ;;  %9405 = vmatprep.subr.bf16.mxu0 %v10136_v11  ;;  %v10152_v23 = vld [vmem:[%s10902_s23 + $0xd8] sm:$0xff]  }
 0xf72   : > { %v10153_v27 = vld [vmem:[%s10902_s23 + $0x18] sm:$0xff]  }
 0xf73   : > { %v10154_v11 = vld [vmem:[%s10902_s23 + $0x98] sm:$0xff]  }
 0xf74   : > { %9384 = vmatpush3.bf16.msra.mxu1 %v10137_v34  ;;  %9406 = vmatpush3.bf16.msra.mxu0 %v10138_v8  ;;  %v10155_v34 = vld [vmem:[%s10902_s23 + $0x60] sm:$0xff]  }
 0xf75   : > { %9413 = vmatprep.subr.bf16.mxu1 %v10139_v40  ;;  %9435 = vmatprep.subr.bf16.mxu0 %v10140_v52  ;;  %v10156_v8 = vld [vmem:[%s10902_s23 + $0xe0] sm:$0xff]  }
 0xf76   : > { %v10157_v40 = vld [vmem:[%s10902_s23 + $0x20] sm:$0xff]  }
 0xf77   : > { %v10158_v52 = vld [vmem:[%s10902_s23 + $0xa0] sm:$0xff]  }
 0xfea   : > { %v12752_v25 = vpop.f32.mrb[24].mxu1  ;;  %v12754_v37 = vpop.f32.mrb[28].mxu0 }
 0xfeb   : > { %v6489_v16 = vpop.f32.mrb[25].mxu1  ;;  %v6530_v29 = vpop.f32.mrb[29].mxu0 }
 0xfec   : > { %v6491_v62 = vpop.f32.mrb[26].mxu1  ;;  %v6532_v26 = vpop.f32.mrb[30].mxu0  ;;  %v6490_v41 = vadd.f32 %v6489_v16, %v6120_v0  ;;  %v6531_v3 = vadd.f32 %v6530_v29, %v6128_v22  ;;  %v10159_v16 = vld [vmem:[%s10902_s23 + $0x68] sm:$0xff]   ;;  %v10164_v0 = vld [vmem:[%s10902_s23 + $0xf0] sm:$0xff]  }
 0xfed   : > { %v6492_v30 = vpop.f32.mrb[27].mxu1  ;;  %v6533_v4 = vpop.f32.mrb[31].mxu0  ;;  %v10160_v29 = vld [vmem:[%s10902_s23 + $0xe8] sm:$0xff]   ;;  %v10165_v22 = vld [vmem:[%s10902_s23 + $0x30] sm:$0xff]  }
 0xfee   : > { %v6536_v61 = vmax.f32 %v6490_v41, 0.0  ;;  %v6538_v38 = vmax.f32 %v6531_v3, 0.0  ;;  %v10161_v62 = vld [vmem:[%s10902_s23 + $0x28] sm:$0xff]   ;;  %v6116_v30 = vrot.slane %v12757_v51, %v11044_v13  ;;  %v6124_v4 = vrot.slane %v12757_v51, %v11041_v10  ;;  %v10169_v51 = vld [vmem:[%s10902_s23 + $0x38] sm:$0xff]  }
 0xfef   : > { %v10162_v26 = vld [vmem:[%s10902_s23 + $0xa8] sm:$0xff]  }
 0xff0   : > { %v7033_v46 = vpack.c.bf16 %v6536_v61, %v6536_v61  ;;  %v7035_v6 = vpack.c.bf16 %v6538_v38, %v6538_v38 }
0x102a   : > { %v6980_v14 = vpop.f32.mrb[28].mxu1  ;;  %v7021_v2 = vpop.f32.mrb[32].mxu0 }
0x102b   : > { %v6981_v55 = vadd.f32 %v6980_v14, %v6609_v53  ;;  %v7022_v18 = vadd.f32 %v7021_v2, %v6617_v45  ;;  %v6982_v50 = vpop.f32.mrb[29].mxu1  ;;  %v7023_v32 = vpop.f32.mrb[33].mxu0  ;;  %v10166_v53 = vld [vmem:[%s10902_s23 + $0xb0] sm:$0xff]   ;;  %v6488_v45 = vadd.f32 %v12752_v25, %v6116_v30  ;;  %v10168_v14 = vld [vmem:[%s10902_s23 + $0xf8] sm:$0xff]  }
0x102c   : > { %v6983_v48 = vadd.f32 %v6982_v50, %v6613_v43  ;;  %v7024_v56 = vadd.f32 %v7023_v32, %v6621_v63  ;;  %v6984_v59 = vpop.f32.mrb[30].mxu1  ;;  %v7025_v28 = vpop.f32.mrb[34].mxu0  ;;  %v6529_v43 = vadd.f32 %v12754_v37, %v6124_v4  ;;  %v10167_v63 = vld [vmem:[%s10902_s23 + $0x78] sm:$0xff]  }
0x102d   : > { %v7028_v15 = vmax.f32 %v6981_v55, 0.0  ;;  %v7030_v58 = vmax.f32 %v7022_v18, 0.0  ;;  %v6985_v44 = vpop.f32.mrb[31].mxu1  ;;  %v7026_v60 = vpop.f32.mrb[35].mxu0  ;;  %v10170_v2 = vld [vmem:[%s10902_s23 + $0xb8] sm:$0xff]   ;;  %v6535_v41 = vmax.f32 %v6488_v45, 0.0 }
0x102e   : > { %v7029_v1 = vmax.f32 %v6983_v48, 0.0  ;;  %v7031_v57 = vmax.f32 %v7024_v56, 0.0  ;;  %v6537_v3 = vmax.f32 %v6529_v43, 0.0 }
0x102f   : > { %v7100_v20 = vpack.c.bf16 %v7028_v15, %v7028_v15  ;;  %v7102_v12 = vpack.c.bf16 %v7030_v58, %v7030_v58  ;;  %v7032_v55 = vpack.c.bf16 %v6535_v41, %v6535_v41 }
0x1030   : > { %v7101_v5 = vpack.c.bf16 %v7029_v1, %v7029_v1  ;;  %v7103_v9 = vpack.c.bf16 %v7031_v57, %v7031_v57  ;;  %v7034_v18 = vpack.c.bf16 %v6537_v3, %v6537_v3 }
0x1032   : > { %7392 = vmatprep.mubr.bf16.mxu1 %v7101_v5  ;;  %7432 = vmatprep.mubr.bf16.mxu0 %v7103_v9 }
0x1033   : > { %7393 = vmatmul.mubr.bf16.vlgmr.msra.gmra.mrb[32].mxu1 %v7100_v20  ;;  %7433 = vmatmul.mubr.bf16.vlgmr.msra.gmra.mrb[36].mxu0 %v7102_v12 }
0x1034   : > { %9414 = vmatpush3.bf16.msra.mxu1 %v10141_v47  ;;  %9436 = vmatpush3.bf16.msra.mxu0 %v10142_v33 }
0x1035   : > { %7664 = vmatprep.mubr.bf16.mxu1 %v7033_v46  ;;  %7704 = vmatprep.mubr.bf16.mxu0 %v7035_v6 }
0x1036   : > { %9415 = vmatprep.subr.bf16.mxu1 %v10143_v24  ;;  %9437 = vmatprep.subr.bf16.mxu0 %v10144_v21  ;;  %v7712_v24 = vld [vmem:[%s10904_s1 + $0x44] ss:$0 sm:$0xff] }
0x1038   : > { %9416 = vmatpush3.bf16.msra.mxu1 %v10145_v49  ;;  %9438 = vmatpush3.bf16.msra.mxu0 %v10146_v31 }
0x1039   : > { %9417 = vmatprep.subr.bf16.mxu1 %v10147_v36  ;;  %9439 = vmatprep.subr.bf16.mxu0 %v10148_v54 }
0x103c   : > { %9418 = vmatpush3.bf16.msra.mxu1 %v10149_v17  ;;  %9440 = vmatpush3.bf16.msra.mxu0 %v10150_v35 }
0x103d   : > { %9419 = vmatprep.subr.bf16.mxu1 %v10151_v42  ;;  %9441 = vmatprep.subr.bf16.mxu0 %v10152_v23 }
0x1040   : > { %9420 = vmatpush3.bf16.msra.mxu1 %v10153_v27  ;;  %9442 = vmatpush3.bf16.msra.mxu0 %v10154_v11 }
0x1041   : > { %9421 = vmatprep.subr.bf16.mxu1 %v10155_v34  ;;  %9443 = vmatprep.subr.bf16.mxu0 %v10156_v8 }
0x1044   : > { %9422 = vmatpush3.bf16.msra.mxu1 %v10157_v40  ;;  %9444 = vmatpush3.bf16.msra.mxu0 %v10158_v52 }
0x1045   : > { %9423 = vmatprep.subr.bf16.mxu1 %v10159_v16  ;;  %9445 = vmatprep.subr.bf16.mxu0 %v10160_v29 }
0x1048   : > { %9424 = vmatpush3.bf16.msra.mxu1 %v10161_v62  ;;  %9446 = vmatpush3.bf16.msra.mxu0 %v10162_v26 }
0x1049   : > { %9425 = vmatprep.subr.bf16.mxu1 %v10163_v19  ;;  %9447 = vmatprep.subr.bf16.mxu0 %v10164_v0 }
0x104c   : > { %9426 = vmatpush3.bf16.msra.mxu1 %v10165_v22  ;;  %9448 = vmatpush3.bf16.msra.mxu0 %v10166_v53 }
0x104d   : > { %9427 = vmatprep.subr.bf16.mxu1 %v10167_v63  ;;  %9449 = vmatprep.subr.bf16.mxu0 %v10168_v14 }
0x1050   : > { %9428 = vmatpush3.bf16.msra.mxu1 %v10169_v51  ;;  %9450 = vmatpush3.bf16.msra.mxu0 %v10170_v2 }
0x1053   : > { %7665 = vmatmul.mubr.bf16.vlgmr.msra.gmra.mrb[36].mxu1 %v7032_v55  ;;  %7705 = vmatmul.mubr.bf16.vlgmr.msra.gmra.mrb[40].mxu0 %v7034_v18 }
0x1106   : > { %v9385_v25 = vpop.f32.mrb[32].mxu1  ;;  %v9407_v37 = vpop.f32.mrb[36].mxu0 }
0x1107   : > { %v9386_v50 = vpop.f32.mrb[33].mxu1  ;;  %v9408_v32 = vpop.f32.mrb[37].mxu0 }
0x1108   : > { %v9387_v48 = vadd.f32 %v9386_v50, %v9385_v25  ;;  %v9409_v56 = vadd.f32 %v9408_v32, %v9407_v37  ;;  %v9388_v59 = vpop.f32.mrb[34].mxu1  ;;  %v9410_v28 = vpop.f32.mrb[38].mxu0 }
0x1109   : > { %v9389_v15 = vpop.f32.mrb[35].mxu1  ;;  %v9411_v58 = vpop.f32.mrb[39].mxu0 }
0x110a   : > { %v7435_v44 = vadd.f32 %v9409_v56, %v9387_v48 }
0x1126   : > { %v9429_v60 = vpop.f32.mrb[36].mxu1  ;;  %v9451_v1 = vpop.f32.mrb[40].mxu0 }
0x1127   : > { %v9430_v57 = vpop.f32.mrb[37].mxu1  ;;  %v9452_v61 = vpop.f32.mrb[41].mxu0 }
0x1128   : > { %v9431_v38 = vadd.f32 %v9430_v57, %v9429_v60  ;;  %v9453_v5 = vadd.f32 %v9452_v61, %v9451_v1  ;;  %v9432_v9 = vpop.f32.mrb[38].mxu1  ;;  %v9454_v47 = vpop.f32.mrb[42].mxu0  ;;  %7716 = sbr.rel (%p13001_p3) target bundleno = 4401 (0x1131), region = 84 }
0x1129   : > { %v9433_v33 = vpop.f32.mrb[39].mxu1  ;;  %v9455_v20 = vpop.f32.mrb[43].mxu0 }
0x112a   : > { %v7667_v12 = vadd.f32 %v9431_v38, %v7435_v44 }
0x112c   : > { %v7707_v21 = vadd.f32 %v9453_v5, %v7667_v12 }
0x112e   : > { %v7713_v46 = vadd.f32 %v7712_v24, %v7707_v21 }
0x1130   : > { %7717 = vst [vmem:[#allocation2] sm:$0x3] %v7713_v46 }
0x1131 PF: > { %p9354_p12 = scmp.ne.s32.totalorder %s10600_s13, 1 }
0x1133   : > { %7721 = sbr.rel (%p9354_p12) target bundleno = 5288 (0x14a8), region = 88 }
0x113a   : > { %10479 = dma.done.wait [#allocation5], 16384 }
0x113b   : > { %10480 = vsyncadd [#allocation5], 4294950912 }
0x113c   : > { %10481 = dma.done.wait [#allocation5 + $0x1], 32768 }
0x113d   : > { %10482 = vsyncadd [#allocation5 + $0x1], 4294934528  ;;  %v12808_v6 = vpack.c.bf16 %v7713_v46, %v7713_v46  ;;  %v7735_v49 = vld [vmem:[#allocation3 + $0x8] sm:$0xff]  ;;  %v7734_v31 = vld [vmem:[#allocation3] sm:$0xff]  ;;  %vm8722_vm0 = vcmask 1041408   ;;  %vm8744_vm2 = vcmask 1024  }
0x113e   : > { %v7743_v36 = vld [vmem:[#allocation3 + $0x48] sm:$0xff]  ;;  %7904 = vmatprep.subr.bf16.mxu0 %v7735_v49  ;;  %v7742_v54 = vld [vmem:[#allocation3 + $0x40] sm:$0xff]  ;;  %v7737_v23 = vld [vmem:[#allocation3 + $0x18] sm:$0xff]  ;;  %s13003_s9 = sld [smem:[#allocation37_spill]] }
0x113f   : > { %7936 = vmatprep.mubr.bf16.mxu0 %v12808_v6  ;;  %7977 = vmatprep.mubr.bf16.mxu1 %v12808_v6  ;;  %v7751_v17 = vld [vmem:[#allocation3 + $0x88] sm:$0xff]  ;;  %v7750_v35 = vld [vmem:[#allocation3 + $0x80] sm:$0xff]  ;;  %v7736_v11 = vld [vmem:[#allocation3 + $0x10] sm:$0xff] }
0x1140   : > { %7905 = vmatpush1.bf16.msra.mxu0 %v7734_v31  ;;  %v7759_v42 = vld [vmem:[#allocation3 + $0xc8] sm:$0xff]  ;;  %v7758_v27 = vld [vmem:[#allocation3 + $0xc0] sm:$0xff]  ;;  %7945 = vmatprep.subr.bf16.mxu1 %v7737_v23  ;;  %v7745_v34 = vld [vmem:[#allocation3 + $0x58] sm:$0xff] }
0x1141   : > { %7906 = vmatprep.subr.bf16.mxu0 %v7743_v36  ;;  %v7767_v8 = vld [vmem:[#allocation3 + $0x108] sm:$0xff]  ;;  %7946 = vmatpush1.bf16.msra.mxu1 %v7736_v11  ;;  %v7744_v40 = vld [vmem:[#allocation3 + $0x50] sm:$0xff]  ;;  %v7753_v52 = vld [vmem:[#allocation3 + $0x98] sm:$0xff] }
0x1142   : > { %7947 = vmatprep.subr.bf16.mxu1 %v7745_v34  ;;  %v7766_v16 = vld [vmem:[#allocation3 + $0x100] sm:$0xff]  ;;  %v7775_v29 = vld [vmem:[#allocation3 + $0x148] sm:$0xff]  ;;  %v7752_v62 = vld [vmem:[#allocation3 + $0x90] sm:$0xff] }
0x1143   : > { %v7761_v26 = vld [vmem:[#allocation3 + $0xd8] sm:$0xff]  ;;  %v7774_v30 = vld [vmem:[#allocation3 + $0x140] sm:$0xff]  ;;  %v7783_v4 = vld [vmem:[#allocation3 + $0x188] sm:$0xff] }
0x1144   : > { %7907 = vmatpush1.bf16.msra.mxu0 %v7742_v54  ;;  %v7760_v19 = vld [vmem:[#allocation3 + $0xd0] sm:$0xff]  ;;  %v7769_v0 = vld [vmem:[#allocation3 + $0x118] sm:$0xff]  ;;  %v7782_v22 = vld [vmem:[#allocation3 + $0x180] sm:$0xff] }
0x1145   : > { %7908 = vmatprep.subr.bf16.mxu0 %v7751_v17  ;;  %7948 = vmatpush1.bf16.msra.mxu1 %v7744_v40  ;;  %v7791_v53 = vld [vmem:[#allocation3 + $0x1c8] sm:$0xff]  ;;  %v7768_v45 = vld [vmem:[#allocation3 + $0x110] sm:$0xff]  ;;  %v7777_v43 = vld [vmem:[#allocation3 + $0x158] sm:$0xff] }
0x1146   : > { %7949 = vmatprep.subr.bf16.mxu1 %v7753_v52  ;;  %v7790_v63 = vld [vmem:[#allocation3 + $0x1c0] sm:$0xff]  ;;  %v7799_v14 = vld [vmem:[#allocation3 + $0x208] sm:$0xff]  ;;  %v7776_v51 = vld [vmem:[#allocation3 + $0x150] sm:$0xff] }
0x1147   : > { %v7785_v2 = vld [vmem:[#allocation3 + $0x198] sm:$0xff]  ;;  %v7798_v41 = vld [vmem:[#allocation3 + $0x200] sm:$0xff]  ;;  %v7807_v3 = vld [vmem:[#allocation3 + $0x248] sm:$0xff] }
0x1148   : > { %7909 = vmatpush1.bf16.msra.mxu0 %v7750_v35  ;;  %v7784_v55 = vld [vmem:[#allocation3 + $0x190] sm:$0xff]  ;;  %v7793_v18 = vld [vmem:[#allocation3 + $0x1d8] sm:$0xff]  ;;  %v7806_v25 = vld [vmem:[#allocation3 + $0x240] sm:$0xff] }
0x1149   : > { %7910 = vmatprep.subr.bf16.mxu0 %v7759_v42  ;;  %7950 = vmatpush1.bf16.msra.mxu1 %v7752_v62  ;;  %v7815_v37 = vld [vmem:[#allocation3 + $0x288] sm:$0xff]  ;;  %v7792_v50 = vld [vmem:[#allocation3 + $0x1d0] sm:$0xff]  ;;  %v7801_v32 = vld [vmem:[#allocation3 + $0x218] sm:$0xff] }
0x114a   : > { %7951 = vmatprep.subr.bf16.mxu1 %v7761_v26  ;;  %v7814_v48 = vld [vmem:[#allocation3 + $0x280] sm:$0xff]  ;;  %v7823_v56 = vld [vmem:[#allocation3 + $0x2c8] sm:$0xff]  ;;  %v7800_v59 = vld [vmem:[#allocation3 + $0x210] sm:$0xff] }
0x114b   : > { %v7809_v28 = vld [vmem:[#allocation3 + $0x258] sm:$0xff]  ;;  %v7822_v15 = vld [vmem:[#allocation3 + $0x2c0] sm:$0xff]  ;;  %v7831_v58 = vld [vmem:[#allocation3 + $0x308] sm:$0xff] }
0x114c   : > { %7911 = vmatpush1.bf16.msra.mxu0 %v7758_v27  ;;  %v7808_v44 = vld [vmem:[#allocation3 + $0x250] sm:$0xff]  ;;  %v7817_v60 = vld [vmem:[#allocation3 + $0x298] sm:$0xff]  ;;  %v7830_v1 = vld [vmem:[#allocation3 + $0x300] sm:$0xff] }
0x114d   : > { %7912 = vmatprep.subr.bf16.mxu0 %v7767_v8  ;;  %7952 = vmatpush1.bf16.msra.mxu1 %v7760_v19  ;;  %v7839_v57 = vld [vmem:[#allocation3 + $0x348] sm:$0xff]  ;;  %v7816_v61 = vld [vmem:[#allocation3 + $0x290] sm:$0xff]  ;;  %v7825_v38 = vld [vmem:[#allocation3 + $0x2d8] sm:$0xff] }
0x114e   : > { %7953 = vmatprep.subr.bf16.mxu1 %v7769_v0  ;;  %v7838_v5 = vld [vmem:[#allocation3 + $0x340] sm:$0xff]  ;;  %v7847_v9 = vld [vmem:[#allocation3 + $0x388] sm:$0xff]  ;;  %v7824_v47 = vld [vmem:[#allocation3 + $0x2d0] sm:$0xff] }
0x114f   : > { %v7833_v33 = vld [vmem:[#allocation3 + $0x318] sm:$0xff]  ;;  %v7846_v20 = vld [vmem:[#allocation3 + $0x380] sm:$0xff]  ;;  %v7855_v12 = vld [vmem:[#allocation3 + $0x3c8] sm:$0xff] }
0x1150   : > { %7913 = vmatpush1.bf16.msra.mxu0 %v7766_v16  ;;  %v7832_v24 = vld [vmem:[#allocation3 + $0x310] sm:$0xff]  ;;  %v7731_v21 = vld [vmem:[#allocation2] sm:$0x3]  ;;  %v7854_v49 = vld [vmem:[#allocation3 + $0x3c0] sm:$0xff] }
0x1151   : > { %7914 = vmatprep.subr.bf16.mxu0 %v7775_v29  ;;  %7954 = vmatpush1.bf16.msra.mxu1 %v7768_v45  ;;  %v7841_v46 = vld [vmem:[#allocation3 + $0x358] sm:$0xff]  ;;  %v7739_v31 = vld [vmem:[#allocation3 + $0x28] sm:$0xff]  ;;  %v12812_v36 = vpack.c.bf16 %v7731_v21, %v7731_v21  ;;  %v7840_v54 = vld [vmem:[#allocation3 + $0x350] sm:$0xff] }
0x1152   : > { %7955 = vmatprep.subr.bf16.mxu1 %v7777_v43  ;;  %v7849_v17 = vld [vmem:[#allocation3 + $0x398] sm:$0xff]  ;;  %v7738_v35 = vld [vmem:[#allocation3 + $0x20] sm:$0xff]  ;;  %v7747_v42 = vld [vmem:[#allocation3 + $0x68] sm:$0xff] }
0x1153   : > { %v7848_v23 = vld [vmem:[#allocation3 + $0x390] sm:$0xff]  ;;  %v7857_v27 = vld [vmem:[#allocation3 + $0x3d8] sm:$0xff]  ;;  %v7746_v11 = vld [vmem:[#allocation3 + $0x60] sm:$0xff] }
0x1154   : > { %7915 = vmatpush1.bf16.msra.mxu0 %v7774_v30  ;;  %v7755_v34 = vld [vmem:[#allocation3 + $0xa8] sm:$0xff]  ;;  %v7856_v8 = vld [vmem:[#allocation3 + $0x3d0] sm:$0xff]  ;;  %v7741_v40 = vld [vmem:[#allocation3 + $0x38] sm:$0xff] }
0x1155   : > { %7916 = vmatprep.subr.bf16.mxu0 %v7783_v4  ;;  %7956 = vmatpush1.bf16.msra.mxu1 %v7776_v51  ;;  %v7754_v52 = vld [vmem:[#allocation3 + $0xa0] sm:$0xff]  ;;  %v7763_v16 = vld [vmem:[#allocation3 + $0xe8] sm:$0xff]  ;;  %v7740_v29 = vld [vmem:[#allocation3 + $0x30] sm:$0xff] }
0x1156   : > { %7957 = vmatprep.subr.bf16.mxu1 %v7785_v2  ;;  %v7749_v62 = vld [vmem:[#allocation3 + $0x78] sm:$0xff]  ;;  %v7762_v26 = vld [vmem:[#allocation3 + $0xe0] sm:$0xff]  ;;  %v7771_v30 = vld [vmem:[#allocation3 + $0x128] sm:$0xff] }
0x1157   : > { %v7748_v4 = vld [vmem:[#allocation3 + $0x70] sm:$0xff]  ;;  %v7757_v19 = vld [vmem:[#allocation3 + $0xb8] sm:$0xff]  ;;  %v7770_v0 = vld [vmem:[#allocation3 + $0x120] sm:$0xff] }
0x1158   : > { %7917 = vmatpush1.bf16.msra.mxu0 %v7782_v22  ;;  %v7779_v22 = vld [vmem:[#allocation3 + $0x168] sm:$0xff]  ;;  %v7765_v45 = vld [vmem:[#allocation3 + $0xf8] sm:$0xff]  ;;  %v7778_v43 = vld [vmem:[#allocation3 + $0x160] sm:$0xff] }
0x1159   : > { %7918 = vmatprep.subr.bf16.mxu0 %v7791_v53  ;;  %7958 = vmatpush1.bf16.msra.mxu1 %v7784_v55  ;;  %v7756_v53 = vld [vmem:[#allocation3 + $0xb0] sm:$0xff]  ;;  %v7786_v51 = vld [vmem:[#allocation3 + $0x1a0] sm:$0xff]  ;;  %v7795_v2 = vld [vmem:[#allocation3 + $0x1e8] sm:$0xff] }
0x115a   : > { %7959 = vmatprep.subr.bf16.mxu1 %v7793_v18  ;;  %v7794_v55 = vld [vmem:[#allocation3 + $0x1e0] sm:$0xff]  ;;  %v7803_v18 = vld [vmem:[#allocation3 + $0x228] sm:$0xff] }
0x115b   : > { %v7851_v21 = vld [vmem:[#allocation3 + $0x3a8] sm:$0xff] }
0x115c   : > { %7919 = vmatpush1.bf16.msra.mxu0 %v7790_v63  ;;  %v7787_v63 = vld [vmem:[#allocation3 + $0x1a8] sm:$0xff] }
0x115d   : > { %7920 = vmatprep.subr.bf16.mxu0 %v7799_v14  ;;  %7960 = vmatpush1.bf16.msra.mxu1 %v7792_v50  ;;  %v7764_v14 = vld [vmem:[#allocation3 + $0xf0] sm:$0xff]  ;;  %v7802_v50 = vld [vmem:[#allocation3 + $0x220] sm:$0xff] }
0x115e   : > { %7961 = vmatprep.subr.bf16.mxu1 %v7801_v32  ;;  %v7811_v32 = vld [vmem:[#allocation3 + $0x268] sm:$0xff] }
0x1160   : > { %7921 = vmatpush1.bf16.msra.mxu0 %v7798_v41  ;;  %v7772_v41 = vld [vmem:[#allocation3 + $0x130] sm:$0xff] }
0x1161   : > { %7922 = vmatprep.subr.bf16.mxu0 %v7807_v3  ;;  %7962 = vmatpush1.bf16.msra.mxu1 %v7800_v59  ;;  %v7781_v3 = vld [vmem:[#allocation3 + $0x178] sm:$0xff]  ;;  %v7810_v59 = vld [vmem:[#allocation3 + $0x260] sm:$0xff] }
0x1162   : > { %7963 = vmatprep.subr.bf16.mxu1 %v7809_v28  ;;  %v7819_v28 = vld [vmem:[#allocation3 + $0x2a8] sm:$0xff] }
0x1164   : > { %7923 = vmatpush1.bf16.msra.mxu0 %v7806_v25  ;;  %v7780_v25 = vld [vmem:[#allocation3 + $0x170] sm:$0xff] }
0x1165   : > { %7924 = vmatprep.subr.bf16.mxu0 %v7815_v37  ;;  %7964 = vmatpush1.bf16.msra.mxu1 %v7808_v44  ;;  %v7789_v37 = vld [vmem:[#allocation3 + $0x1b8] sm:$0xff]  ;;  %v7818_v44 = vld [vmem:[#allocation3 + $0x2a0] sm:$0xff] }
0x1166   : > { %7965 = vmatprep.subr.bf16.mxu1 %v7817_v60  ;;  %v7827_v60 = vld [vmem:[#allocation3 + $0x2e8] sm:$0xff] }
0x1168   : > { %7925 = vmatpush1.bf16.msra.mxu0 %v7814_v48  ;;  %v7788_v48 = vld [vmem:[#allocation3 + $0x1b0] sm:$0xff] }
0x1169   : > { %7926 = vmatprep.subr.bf16.mxu0 %v7823_v56  ;;  %7966 = vmatpush1.bf16.msra.mxu1 %v7816_v61  ;;  %v7797_v56 = vld [vmem:[#allocation3 + $0x1f8] sm:$0xff]  ;;  %v7826_v61 = vld [vmem:[#allocation3 + $0x2e0] sm:$0xff] }
0x116a   : > { %7967 = vmatprep.subr.bf16.mxu1 %v7825_v38  ;;  %v7835_v38 = vld [vmem:[#allocation3 + $0x328] sm:$0xff] }
0x116c   : > { %7927 = vmatpush1.bf16.msra.mxu0 %v7822_v15  ;;  %v7796_v15 = vld [vmem:[#allocation3 + $0x1f0] sm:$0xff] }
0x116d   : > { %7928 = vmatprep.subr.bf16.mxu0 %v7831_v58  ;;  %7968 = vmatpush1.bf16.msra.mxu1 %v7824_v47  ;;  %v7805_v58 = vld [vmem:[#allocation3 + $0x238] sm:$0xff]  ;;  %v7834_v47 = vld [vmem:[#allocation3 + $0x320] sm:$0xff] }
0x116e   : > { %7969 = vmatprep.subr.bf16.mxu1 %v7833_v33  ;;  %v7843_v33 = vld [vmem:[#allocation3 + $0x368] sm:$0xff] }
0x1170   : > { %7929 = vmatpush1.bf16.msra.mxu0 %v7830_v1  ;;  %v7804_v1 = vld [vmem:[#allocation3 + $0x230] sm:$0xff] }
0x1171   : > { %7930 = vmatprep.subr.bf16.mxu0 %v7839_v57  ;;  %7970 = vmatpush1.bf16.msra.mxu1 %v7832_v24  ;;  %v7813_v57 = vld [vmem:[#allocation3 + $0x278] sm:$0xff]  ;;  %v7842_v24 = vld [vmem:[#allocation3 + $0x360] sm:$0xff] }
0x1172   : > { %7971 = vmatprep.subr.bf16.mxu1 %v7841_v46  ;;  %v7828_v46 = vld [vmem:[#allocation3 + $0x2f0] sm:$0xff] }
0x1174   : > { %7931 = vmatpush1.bf16.msra.mxu0 %v7838_v5  ;;  %v7812_v5 = vld [vmem:[#allocation3 + $0x270] sm:$0xff] }
0x1175   : > { %7932 = vmatprep.subr.bf16.mxu0 %v7847_v9  ;;  %7972 = vmatpush1.bf16.msra.mxu1 %v7840_v54  ;;  %v7821_v9 = vld [vmem:[#allocation3 + $0x2b8] sm:$0xff]  ;;  %v7859_v54 = vld [vmem:[#allocation3 + $0x3e8] sm:$0xff] }
0x1176   : > { %7973 = vmatprep.subr.bf16.mxu1 %v7849_v17  ;;  %v7836_v17 = vld [vmem:[#allocation3 + $0x330] sm:$0xff] }
0x1178   : > { %7933 = vmatpush1.bf16.msra.mxu0 %v7846_v20  ;;  %v7820_v20 = vld [vmem:[#allocation3 + $0x2b0] sm:$0xff] }
0x1179   : > { %7934 = vmatprep.subr.bf16.mxu0 %v7855_v12  ;;  %7974 = vmatpush1.bf16.msra.mxu1 %v7848_v23  ;;  %v7829_v12 = vld [vmem:[#allocation3 + $0x2f8] sm:$0xff]  ;;  %v8085_v23 = vld [vmem:[#allocation4 + $0x8] sm:$0xff] }
0x117a   : > { %7975 = vmatprep.subr.bf16.mxu1 %v7857_v27  ;;  %v7844_v27 = vld [vmem:[#allocation3 + $0x370] sm:$0xff] }
0x117c   : > { %7935 = vmatpush1.bf16.msra.mxu0 %v7854_v49  ;;  %v7837_v49 = vld [vmem:[#allocation3 + $0x338] sm:$0xff] }
0x117d   : > { %7986 = vmatprep.subr.bf16.mxu0 %v7739_v31  ;;  %7976 = vmatpush1.bf16.msra.mxu1 %v7856_v8  ;;  %v7850_v31 = vld [vmem:[#allocation3 + $0x3a0] sm:$0xff]  ;;  %v8089_v8 = vld [vmem:[#allocation4 + $0x28] sm:$0xff] }
0x117e   : > { %8027 = vmatprep.subr.bf16.mxu1 %v7741_v40  ;;  %v7852_v40 = vld [vmem:[#allocation3 + $0x3b0] sm:$0xff] }
0x117f   : > { %7937 = vmatmul.mubr.bf16.vlgmr.msra.gmra.mrb[0].mxu0 %v12812_v36 }
0x1180   : > { %7987 = vmatpush1.bf16.msra.mxu0 %v7738_v35  ;;  %8018 = vmatprep.mubr.bf16.mxu0 %v12808_v6  ;;  %v7845_v35 = vld [vmem:[#allocation3 + $0x378] sm:$0xff] }
0x1181   : > { %7988 = vmatprep.subr.bf16.mxu0 %v7747_v42  ;;  %7978 = vmatmul.mubr.bf16.vlgmr.msra.gmra.mrb[0].mxu1 %v12812_v36  ;;  %v7858_v42 = vld [vmem:[#allocation3 + $0x3e0] sm:$0xff] }
0x1182   : > { %8028 = vmatpush1.bf16.msra.mxu1 %v7740_v29  ;;  %8059 = vmatprep.mubr.bf16.mxu1 %v12808_v6  ;;  %v7773_v6 = vld [vmem:[#allocation3 + $0x138] sm:$0xff]  ;;  %v8093_v29 = vld [vmem:[#allocation4 + $0x48] sm:$0xff] }
0x1183   : > { %8029 = vmatprep.subr.bf16.mxu1 %v7749_v62  ;;  %v7860_v62 = vld [vmem:[#allocation3 + $0x3f0] sm:$0xff] }
0x1184   : > { %7989 = vmatpush1.bf16.msra.mxu0 %v7746_v11  ;;  %v7853_v11 = vld [vmem:[#allocation3 + $0x3b8] sm:$0xff] }
0x1185   : > { %7990 = vmatprep.subr.bf16.mxu0 %v7755_v34  ;;  %v8084_v34 = vld [vmem:[#allocation4] sm:$0xff] }
0x1186   : > { %8030 = vmatpush1.bf16.msra.mxu1 %v7748_v4  ;;  %v8097_v4 = vld [vmem:[#allocation4 + $0x68] sm:$0xff] }
0x1187   : > { %8031 = vmatprep.subr.bf16.mxu1 %v7757_v19  ;;  %v8086_v19 = vld [vmem:[#allocation4 + $0x10] sm:$0xff] }
0x1188   : > { %7991 = vmatpush1.bf16.msra.mxu0 %v7754_v52  ;;  %v7861_v52 = vld [vmem:[#allocation3 + $0x3f8] sm:$0xff] }
0x1189   : > { %7992 = vmatprep.subr.bf16.mxu0 %v7763_v16  ;;  %v8088_v16 = vld [vmem:[#allocation4 + $0x20] sm:$0xff] }
0x118a   : > { %8032 = vmatpush1.bf16.msra.mxu1 %v7756_v53  ;;  %v8101_v53 = vld [vmem:[#allocation4 + $0x88] sm:$0xff] }
0x118b   : > { %8033 = vmatprep.subr.bf16.mxu1 %v7765_v45  ;;  %v8090_v45 = vld [vmem:[#allocation4 + $0x30] sm:$0xff] }
0x118c   : > { %7993 = vmatpush1.bf16.msra.mxu0 %v7762_v26  ;;  %v8087_v26 = vld [vmem:[#allocation4 + $0x18] sm:$0xff] }
0x118d   : > { %7994 = vmatprep.subr.bf16.mxu0 %v7771_v30  ;;  %v8092_v30 = vld [vmem:[#allocation4 + $0x40] sm:$0xff] }
0x118e   : > { %8034 = vmatpush1.bf16.msra.mxu1 %v7764_v14  ;;  %v8105_v14 = vld [vmem:[#allocation4 + $0xa8] sm:$0xff] }
0x118f   : > { %8035 = vmatprep.subr.bf16.mxu1 %v7773_v6  ;;  %v8094_v6 = vld [vmem:[#allocation4 + $0x50] sm:$0xff] }
0x1190   : > { %7995 = vmatpush1.bf16.msra.mxu0 %v7770_v0  ;;  %v8091_v0 = vld [vmem:[#allocation4 + $0x38] sm:$0xff] }
0x1191   : > { %7996 = vmatprep.subr.bf16.mxu0 %v7779_v22  ;;  %v8096_v22 = vld [vmem:[#allocation4 + $0x60] sm:$0xff] }
0x1192   : > { %8036 = vmatpush1.bf16.msra.mxu1 %v7772_v41  ;;  %v8098_v41 = vld [vmem:[#allocation4 + $0x70] sm:$0xff] }
0x1193   : > { %8037 = vmatprep.subr.bf16.mxu1 %v7781_v3  ;;  %v8103_v3 = vld [vmem:[#allocation4 + $0x98] sm:$0xff] }
0x1194   : > { %7997 = vmatpush1.bf16.msra.mxu0 %v7778_v43  ;;  %v8095_v43 = vld [vmem:[#allocation4 + $0x58] sm:$0xff] }
0x1195   : > { %7998 = vmatprep.subr.bf16.mxu0 %v7787_v63  ;;  %v8100_v63 = vld [vmem:[#allocation4 + $0x80] sm:$0xff] }
0x1196   : > { %8038 = vmatpush1.bf16.msra.mxu1 %v7780_v25  ;;  %v8102_v25 = vld [vmem:[#allocation4 + $0x90] sm:$0xff] }
0x1197   : > { %8039 = vmatprep.subr.bf16.mxu1 %v7789_v37  ;;  %v8107_v37 = vld [vmem:[#allocation4 + $0xb8] sm:$0xff] }
0x1198   : > { %7999 = vmatpush1.bf16.msra.mxu0 %v7786_v51  ;;  %v8099_v51 = vld [vmem:[#allocation4 + $0x78] sm:$0xff] }
0x1199   : > { %8000 = vmatprep.subr.bf16.mxu0 %v7795_v2  ;;  %v8104_v2 = vld [vmem:[#allocation4 + $0xa0] sm:$0xff] }
0x119a   : > { %8040 = vmatpush1.bf16.msra.mxu1 %v7788_v48  ;;  %v8106_v48 = vld [vmem:[#allocation4 + $0xb0] sm:$0xff] }
0x119b   : > { %8041 = vmatprep.subr.bf16.mxu1 %v7797_v56  ;;  %v8111_v56 = vld [vmem:[#allocation4 + $0xd8] sm:$0xff] }
0x119c   : > { %8001 = vmatpush1.bf16.msra.mxu0 %v7794_v55  ;;  %v8108_v55 = vld [vmem:[#allocation4 + $0xc0] sm:$0xff] }
0x119d   : > { %8002 = vmatprep.subr.bf16.mxu0 %v7803_v18  ;;  %v8113_v18 = vld [vmem:[#allocation4 + $0xe8] sm:$0xff] }
0x119e   : > { %8042 = vmatpush1.bf16.msra.mxu1 %v7796_v15  ;;  %v8110_v15 = vld [vmem:[#allocation4 + $0xd0] sm:$0xff] }
0x119f   : > { %8043 = vmatprep.subr.bf16.mxu1 %v7805_v58  ;;  %v8115_v58 = vld [vmem:[#allocation4 + $0xf8] sm:$0xff] }
0x11a0   : > { %8003 = vmatpush1.bf16.msra.mxu0 %v7802_v50  ;;  %v8112_v50 = vld [vmem:[#allocation4 + $0xe0] sm:$0xff] }
0x11a1   : > { %8004 = vmatprep.subr.bf16.mxu0 %v7811_v32  ;;  %v8117_v32 = vld [vmem:[#allocation4 + $0x108] sm:$0xff] }
0x11a2   : > { %8044 = vmatpush1.bf16.msra.mxu1 %v7804_v1  ;;  %v8114_v1 = vld [vmem:[#allocation4 + $0xf0] sm:$0xff] }
0x11a3   : > { %8045 = vmatprep.subr.bf16.mxu1 %v7813_v57  ;;  %v8119_v57 = vld [vmem:[#allocation4 + $0x118] sm:$0xff] }
0x11a4   : > { %8005 = vmatpush1.bf16.msra.mxu0 %v7810_v59  ;;  %v8116_v59 = vld [vmem:[#allocation4 + $0x100] sm:$0xff] }
0x11a5   : > { %8006 = vmatprep.subr.bf16.mxu0 %v7819_v28  ;;  %v8121_v28 = vld [vmem:[#allocation4 + $0x128] sm:$0xff] }
0x11a6   : > { %8046 = vmatpush1.bf16.msra.mxu1 %v7812_v5  ;;  %v8118_v5 = vld [vmem:[#allocation4 + $0x110] sm:$0xff] }
0x11a7   : > { %8047 = vmatprep.subr.bf16.mxu1 %v7821_v9  ;;  %v8123_v9 = vld [vmem:[#allocation4 + $0x138] sm:$0xff] }
0x11a8   : > { %8007 = vmatpush1.bf16.msra.mxu0 %v7818_v44  ;;  %v8120_v44 = vld [vmem:[#allocation4 + $0x120] sm:$0xff] }
0x11a9   : > { %8008 = vmatprep.subr.bf16.mxu0 %v7827_v60  ;;  %v8125_v60 = vld [vmem:[#allocation4 + $0x148] sm:$0xff] }
0x11aa   : > { %8048 = vmatpush1.bf16.msra.mxu1 %v7820_v20  ;;  %v8122_v20 = vld [vmem:[#allocation4 + $0x130] sm:$0xff] }
0x11ab   : > { %8049 = vmatprep.subr.bf16.mxu1 %v7829_v12  ;;  %v8127_v12 = vld [vmem:[#allocation4 + $0x158] sm:$0xff] }
0x11ac   : > { %8009 = vmatpush1.bf16.msra.mxu0 %v7826_v61  ;;  %v8124_v61 = vld [vmem:[#allocation4 + $0x140] sm:$0xff] }
0x11ad   : > { %8010 = vmatprep.subr.bf16.mxu0 %v7835_v38  ;;  %v8129_v38 = vld [vmem:[#allocation4 + $0x168] sm:$0xff] }
0x11ae   : > { %8050 = vmatpush1.bf16.msra.mxu1 %v7828_v46  ;;  %v8126_v46 = vld [vmem:[#allocation4 + $0x150] sm:$0xff] }
0x11af   : > { %8051 = vmatprep.subr.bf16.mxu1 %v7837_v49  ;;  %v8131_v49 = vld [vmem:[#allocation4 + $0x178] sm:$0xff] }
0x11b0   : > { %8011 = vmatpush1.bf16.msra.mxu0 %v7834_v47  ;;  %v8128_v47 = vld [vmem:[#allocation4 + $0x160] sm:$0xff] }
0x11b1   : > { %8012 = vmatprep.subr.bf16.mxu0 %v7843_v33  ;;  %v8133_v33 = vld [vmem:[#allocation4 + $0x188] sm:$0xff] }
0x11b2   : > { %8052 = vmatpush1.bf16.msra.mxu1 %v7836_v17  ;;  %v8130_v17 = vld [vmem:[#allocation4 + $0x170] sm:$0xff] }
0x11b3   : > { %8053 = vmatprep.subr.bf16.mxu1 %v7845_v35  ;;  %v8135_v35 = vld [vmem:[#allocation4 + $0x198] sm:$0xff] }
0x11b4   : > { %8013 = vmatpush1.bf16.msra.mxu0 %v7842_v24  ;;  %v8132_v24 = vld [vmem:[#allocation4 + $0x180] sm:$0xff] }
0x11b5   : > { %8014 = vmatprep.subr.bf16.mxu0 %v7851_v21  ;;  %v8137_v21 = vld [vmem:[#allocation4 + $0x1a8] sm:$0xff] }
0x11b6   : > { %8054 = vmatpush1.bf16.msra.mxu1 %v7844_v27  ;;  %v8134_v27 = vld [vmem:[#allocation4 + $0x190] sm:$0xff] }
0x11b7   : > { %8055 = vmatprep.subr.bf16.mxu1 %v7853_v11  ;;  %v8139_v11 = vld [vmem:[#allocation4 + $0x1b8] sm:$0xff] }
0x11b8   : > { %8015 = vmatpush1.bf16.msra.mxu0 %v7850_v31  ;;  %v8136_v31 = vld [vmem:[#allocation4 + $0x1a0] sm:$0xff] }
0x11b9   : > { %8016 = vmatprep.subr.bf16.mxu0 %v7859_v54  ;;  %v8141_v54 = vld [vmem:[#allocation4 + $0x1c8] sm:$0xff] }
0x11ba   : > { %8056 = vmatpush1.bf16.msra.mxu1 %v7852_v40  ;;  %v8138_v40 = vld [vmem:[#allocation4 + $0x1b0] sm:$0xff] }
0x11bb   : > { %8057 = vmatprep.subr.bf16.mxu1 %v7861_v52  ;;  %v8143_v52 = vld [vmem:[#allocation4 + $0x1d8] sm:$0xff] }
0x11bc   : > { %8017 = vmatpush1.bf16.msra.mxu0 %v7858_v42  ;;  %v8140_v42 = vld [vmem:[#allocation4 + $0x1c0] sm:$0xff] }
0x11bd   : > { %8363 = vmatprep.subr.bf16.mxu0 %v8085_v23  ;;  %v8145_v23 = vld [vmem:[#allocation4 + $0x1e8] sm:$0xff] }
0x11be   : > { %8058 = vmatpush1.bf16.msra.mxu1 %v7860_v62  ;;  %v8146_v62 = vld [vmem:[#allocation4 + $0x1f0] sm:$0xff] }
0x11bf   : > { %8019 = vmatmul.mubr.bf16.vlgmr.msra.gmra.mrb[4].mxu0 %v12812_v36  ;;  %8527 = vmatprep.subr.bf16.mxu1 %v8087_v26  ;;  %v8151_v26 = vld [vmem:[#allocation4 + $0x218] sm:$0xff] }
0x11c0   : > { %8364 = vmatpush1.bf16.msra.mxu0 %v8084_v34  ;;  %v8144_v34 = vld [vmem:[#allocation4 + $0x1e0] sm:$0xff] }
0x11c1   : > { %8365 = vmatprep.subr.bf16.mxu0 %v8089_v8  ;;  %8060 = vmatmul.mubr.bf16.vlgmr.msra.gmra.mrb[4].mxu1 %v12812_v36  ;;  %v8109_v36 = vld [vmem:[#allocation4 + $0xc8] sm:$0xff] }
0x11c2   : > { %8528 = vmatpush1.bf16.msra.mxu1 %v8086_v19  ;;  %v8149_v8 = vld [vmem:[#allocation4 + $0x208] sm:$0xff] }
0x11c3   : > { %8529 = vmatprep.subr.bf16.mxu1 %v8091_v0 }
0x11c4   : > { %8366 = vmatpush1.bf16.msra.mxu0 %v8088_v16  ;;  %v8142_v16 = vld [vmem:[#allocation4 + $0x1d0] sm:$0xff] }
0x11c5   : > { %8367 = vmatprep.subr.bf16.mxu0 %v8093_v29  ;;  %v8147_v29 = vld [vmem:[#allocation4 + $0x1f8] sm:$0xff] }
0x11c6   : > { %8530 = vmatpush1.bf16.msra.mxu1 %v8090_v45 }
0x11c7   : > { %8531 = vmatprep.subr.bf16.mxu1 %v8095_v43 }
0x11c8   : > { %8368 = vmatpush1.bf16.msra.mxu0 %v8092_v30  ;;  %v12820_v30 = vld [vmem:[#allocation16] ss:$4 sm:$0xff] }
0x11c9   : > { %8369 = vmatprep.subr.bf16.mxu0 %v8097_v4  ;;  %v7867_v4 = vrot.slane %v12820_v30, %v11044_v13  ;;  %v7871_v19 = vrot.slane %v12820_v30, %v11036_v7 }
0x11ca   : > { %8532 = vmatpush1.bf16.msra.mxu1 %v8094_v6 }
0x11cb   : > { %8533 = vmatprep.subr.bf16.mxu1 %v8099_v51 }
0x11cc   : > { %8370 = vmatpush1.bf16.msra.mxu0 %v8096_v22 }
0x11cd   : > { %8371 = vmatprep.subr.bf16.mxu0 %v8101_v53 }
0x11ce   : > { %8534 = vmatpush1.bf16.msra.mxu1 %v8098_v41  ;;  %v8150_v41 = vld [vmem:[#allocation4 + $0x210] sm:$0xff] }
0x11cf   : > { %8535 = vmatprep.subr.bf16.mxu1 %v8103_v3  ;;  %v8153_v3 = vld [vmem:[#allocation4 + $0x228] sm:$0xff] }
0x11d0   : > { %8372 = vmatpush1.bf16.msra.mxu0 %v8100_v63 }
0x11d1   : > { %8373 = vmatprep.subr.bf16.mxu0 %v8105_v14 }
0x11d2   : > { %8536 = vmatpush1.bf16.msra.mxu1 %v8102_v25 }
0x11d3   : > { %8537 = vmatprep.subr.bf16.mxu1 %v8107_v37  ;;  %v8152_v37 = vld [vmem:[#allocation4 + $0x220] sm:$0xff] }
0x11d4   : > { %8374 = vmatpush1.bf16.msra.mxu0 %v8104_v2 }
0x11d5   : > { %8375 = vmatprep.subr.bf16.mxu0 %v8109_v36  ;;  %v8148_v36 = vld [vmem:[#allocation4 + $0x200] sm:$0xff] }
0x11d6   : > { %8538 = vmatpush1.bf16.msra.mxu1 %v8106_v48  ;;  %v8157_v48 = vld [vmem:[#allocation4 + $0x248] sm:$0xff] }
0x11d7   : > { %8539 = vmatprep.subr.bf16.mxu1 %v8111_v56  ;;  %v8159_v56 = vld [vmem:[#allocation4 + $0x258] sm:$0xff] }
0x11d8   : > { %8376 = vmatpush1.bf16.msra.mxu0 %v8108_v55  ;;  %v8155_v55 = vld [vmem:[#allocation4 + $0x238] sm:$0xff] }
0x11d9   : > { %8377 = vmatprep.subr.bf16.mxu0 %v8113_v18  ;;  %v7879_v18 = vrot.slane %v12820_v30, %v11049_v39 }
0x11da   : > { %8540 = vmatpush1.bf16.msra.mxu1 %v8110_v15 }
0x11db   : > { %8541 = vmatprep.subr.bf16.mxu1 %v8115_v58 }
0x11dc   : > { %8378 = vmatpush1.bf16.msra.mxu0 %v8112_v50  ;;  %v8154_v50 = vld [vmem:[#allocation4 + $0x230] sm:$0xff] }
0x11dd   : > { %8379 = vmatprep.subr.bf16.mxu0 %v8117_v32 }
0x11de   : > { %8542 = vmatpush1.bf16.msra.mxu1 %v8114_v1  ;;  %v8161_v1 = vld [vmem:[#allocation4 + $0x268] sm:$0xff] }
0x11df   : > { %8543 = vmatprep.subr.bf16.mxu1 %v8119_v57  ;;  %v8163_v57 = vld [vmem:[#allocation4 + $0x278] sm:$0xff] }
0x11e0   : > { %8380 = vmatpush1.bf16.msra.mxu0 %v8116_v59 }
0x11e1   : > { %8381 = vmatprep.subr.bf16.mxu0 %v8121_v28 }
0x11e2   : > { %8544 = vmatpush1.bf16.msra.mxu1 %v8118_v5  ;;  %v8162_v5 = vld [vmem:[#allocation4 + $0x270] sm:$0xff] }
0x11e3   : > { %8545 = vmatprep.subr.bf16.mxu1 %v8123_v9  ;;  %v8165_v9 = vld [vmem:[#allocation4 + $0x288] sm:$0xff] }
0x11e4   : > { %8382 = vmatpush1.bf16.msra.mxu0 %v8120_v44  ;;  %v8156_v44 = vld [vmem:[#allocation4 + $0x240] sm:$0xff] }
0x11e5   : > { %8383 = vmatprep.subr.bf16.mxu0 %v8125_v60  ;;  %v8158_v60 = vld [vmem:[#allocation4 + $0x250] sm:$0xff] }
0x11e6   : > { %8546 = vmatpush1.bf16.msra.mxu1 %v8122_v20  ;;  %v8166_v20 = vld [vmem:[#allocation4 + $0x290] sm:$0xff] }
0x11e7   : > { %8547 = vmatprep.subr.bf16.mxu1 %v8127_v12  ;;  %v8169_v12 = vld [vmem:[#allocation4 + $0x2a8] sm:$0xff] }
0x11e8   : > { %8384 = vmatpush1.bf16.msra.mxu0 %v8124_v61 }
0x11e9   : > { %8385 = vmatprep.subr.bf16.mxu0 %v8129_v38  ;;  %v8160_v38 = vld [vmem:[#allocation4 + $0x260] sm:$0xff] }
0x11ea   : > { %8548 = vmatpush1.bf16.msra.mxu1 %v8126_v46  ;;  %v8170_v46 = vld [vmem:[#allocation4 + $0x2b0] sm:$0xff] }
0x11eb   : > { %8549 = vmatprep.subr.bf16.mxu1 %v8131_v49  ;;  %v8173_v49 = vld [vmem:[#allocation4 + $0x2c8] sm:$0xff] }
0x11ec   : > { %8386 = vmatpush1.bf16.msra.mxu0 %v8128_v47  ;;  %v8167_v47 = vld [vmem:[#allocation4 + $0x298] sm:$0xff] }
0x11ed   : > { %8387 = vmatprep.subr.bf16.mxu0 %v8133_v33  ;;  %v8164_v33 = vld [vmem:[#allocation4 + $0x280] sm:$0xff] }
0x11ee   : > { %8550 = vmatpush1.bf16.msra.mxu1 %v8130_v17  ;;  %v8174_v17 = vld [vmem:[#allocation4 + $0x2d0] sm:$0xff] }
0x11ef   : > { %8551 = vmatprep.subr.bf16.mxu1 %v8135_v35  ;;  %v8177_v35 = vld [vmem:[#allocation4 + $0x2e8] sm:$0xff] }
0x11f0   : > { %8388 = vmatpush1.bf16.msra.mxu0 %v8132_v24  ;;  %v8171_v24 = vld [vmem:[#allocation4 + $0x2b8] sm:$0xff] }
0x11f1   : > { %8389 = vmatprep.subr.bf16.mxu0 %v8137_v21  ;;  %v8168_v21 = vld [vmem:[#allocation4 + $0x2a0] sm:$0xff] }
0x11f2   : > { %8552 = vmatpush1.bf16.msra.mxu1 %v8134_v27  ;;  %v8178_v27 = vld [vmem:[#allocation4 + $0x2f0] sm:$0xff] }
0x11f3   : > { %8553 = vmatprep.subr.bf16.mxu1 %v8139_v11  ;;  %v8181_v11 = vld [vmem:[#allocation4 + $0x308] sm:$0xff] }
0x11f4   : > { %8390 = vmatpush1.bf16.msra.mxu0 %v8136_v31  ;;  %v8175_v31 = vld [vmem:[#allocation4 + $0x2d8] sm:$0xff] }
0x11f5   : > { %8391 = vmatprep.subr.bf16.mxu0 %v8141_v54  ;;  %v8172_v54 = vld [vmem:[#allocation4 + $0x2c0] sm:$0xff] }
0x11f6   : > { %8554 = vmatpush1.bf16.msra.mxu1 %v8138_v40  ;;  %v8182_v40 = vld [vmem:[#allocation4 + $0x310] sm:$0xff] }
0x11f7   : > { %8555 = vmatprep.subr.bf16.mxu1 %v8143_v52  ;;  %v8185_v52 = vld [vmem:[#allocation4 + $0x328] sm:$0xff] }
0x11f8   : > { %8392 = vmatpush1.bf16.msra.mxu0 %v8140_v42  ;;  %v8179_v42 = vld [vmem:[#allocation4 + $0x2f8] sm:$0xff] }
0x11f9   : > { %8393 = vmatprep.subr.bf16.mxu0 %v8145_v23  ;;  %v8176_v23 = vld [vmem:[#allocation4 + $0x2e0] sm:$0xff] }
0x11fa   : > { %8556 = vmatpush1.bf16.msra.mxu1 %v8142_v16  ;;  %v8187_v16 = vld [vmem:[#allocation4 + $0x338] sm:$0xff] }
0x11fb   : > { %8557 = vmatprep.subr.bf16.mxu1 %v8147_v29  ;;  %v8184_v29 = vld [vmem:[#allocation4 + $0x320] sm:$0xff] }
0x11fc   : > { %8394 = vmatpush1.bf16.msra.mxu0 %v8144_v34  ;;  %v8183_v34 = vld [vmem:[#allocation4 + $0x318] sm:$0xff] }
0x11fd   : > { %8404 = vmatprep.subr.bf16.mxu0 %v8149_v8  ;;  %v8180_v8 = vld [vmem:[#allocation4 + $0x300] sm:$0xff] }
0x11fe   : > { %8558 = vmatpush1.bf16.msra.mxu1 %v8146_v62  ;;  %v8186_v62 = vld [vmem:[#allocation4 + $0x330] sm:$0xff] }
0x11ff   : > { %8568 = vmatprep.subr.bf16.mxu1 %v8151_v26  ;;  %v8189_v26 = vld [vmem:[#allocation4 + $0x348] sm:$0xff] }
0x1252   : > { %v7938_v0 = vpop.f32.mrb[0].mxu0 }
0x1253   : > { %v7939_v22 = vadd.f32 %v7938_v0, %v7867_v4  ;;  %v7940_v53 = vpop.f32.mrb[1].mxu0  ;;  %v8191_v4 = vld [vmem:[#allocation4 + $0x358] sm:$0xff]  ;;  %v8190_v0 = vld [vmem:[#allocation4 + $0x350] sm:$0xff] }
0x1254   : > { %v7941_v45 = vadd.f32 %v7940_v53, %v7871_v19  ;;  %v7942_v43 = vpop.f32.mrb[2].mxu0  ;;  %v12828_v25 = vpop.f32.mrb[0].mxu1  ;;  %v8188_v19 = vld [vmem:[#allocation4 + $0x340] sm:$0xff]  ;;  %v8195_v53 = vld [vmem:[#allocation4 + $0x378] sm:$0xff] }
0x1255   : > { %v8068_v63 = vmax.f32 %v7939_v22, 0.0  ;;  %v7943_v14 = vpop.f32.mrb[3].mxu0  ;;  %v7981_v32 = vpop.f32.mrb[1].mxu1  ;;  %v8193_v22 = vld [vmem:[#allocation4 + $0x368] sm:$0xff]  ;;  %v8194_v43 = vld [vmem:[#allocation4 + $0x370] sm:$0xff] }
0x1256   : > { %v8069_v6 = vmax.f32 %v7941_v45, 0.0  ;;  %v7982_v59 = vadd.f32 %v7981_v32, %v7879_v18  ;;  %v7983_v28 = vpop.f32.mrb[2].mxu1  ;;  %v8192_v45 = vld [vmem:[#allocation4 + $0x360] sm:$0xff]  ;;  %v8199_v14 = vld [vmem:[#allocation4 + $0x398] sm:$0xff] }
0x1257   : > { %v8076_v2 = vpack.c.bf16 %v8068_v63, %v8068_v63  ;;  %v7984_v15 = vpop.f32.mrb[3].mxu1  ;;  %v8197_v63 = vld [vmem:[#allocation4 + $0x388] sm:$0xff]  ;;  %v8200_v18 = vld [vmem:[#allocation4 + $0x3a0] sm:$0xff]  ;;  %v8207_v32 = vld [vmem:[#allocation4 + $0x3d8] sm:$0xff] }
0x1258   : > { %v8077_v51 = vpack.c.bf16 %v8069_v6, %v8069_v6  ;;  %v8071_v58 = vmax.f32 %v7982_v59, 0.0  ;;  %v8196_v6 = vld [vmem:[#allocation4 + $0x380] sm:$0xff]  ;;  %v8206_v28 = vld [vmem:[#allocation4 + $0x3d0] sm:$0xff]  ;;  %v8209_v15 = vld [vmem:[#allocation4 + $0x3e8] sm:$0xff] }
0x1259   : > { %v8204_v59 = vld [vmem:[#allocation4 + $0x3c0] sm:$0xff] }
0x125a   : > { %8395 = vmatprep.mubr.bf16.mxu0 %v8077_v51  ;;  %8559 = vmatprep.mubr.bf16.mxu1 %v8077_v51  ;;  %v8079_v61 = vpack.c.bf16 %v8071_v58, %v8071_v58  ;;  %v8198_v51 = vld [vmem:[#allocation4 + $0x390] sm:$0xff]  ;;  %v8211_v58 = vld [vmem:[#allocation4 + $0x3f8] sm:$0xff] }
0x125b   : > { %8396 = vmatmul.mubr.bf16.vlgmr.msra.gmra.mrb[8].mxu0 %v8076_v2  ;;  %8560 = vmatmul.mubr.bf16.vlgmr.msra.gmra.mrb[8].mxu1 %v8076_v2  ;;  %v8201_v2 = vld [vmem:[#allocation4 + $0x3a8] sm:$0xff] }
0x125c   : > { %8405 = vmatpush1.bf16.msra.mxu0 %v8148_v36  ;;  %8569 = vmatpush1.bf16.msra.mxu1 %v8150_v41  ;;  %v8203_v36 = vld [vmem:[#allocation4 + $0x3b8] sm:$0xff]  ;;  %v7875_v41 = vrot.slane %v12820_v30, %v11041_v10 }
0x125d   : > { %8406 = vmatprep.subr.bf16.mxu0 %v8153_v3  ;;  %8570 = vmatprep.subr.bf16.mxu1 %v8155_v55  ;;  %v13002_v3 = vld [vmem:[#allocation32_spill] sm:$0xff] }
0x125e   : > { %8436 = vmatprep.mubr.bf16.mxu0 %v8079_v61  ;;  %8600 = vmatprep.mubr.bf16.mxu1 %v8079_v61  ;;  %v7886_v55 = vsub.s32 5, %v13002_v3 }
0x1260   : > { %8407 = vmatpush1.bf16.msra.mxu0 %v8152_v37  ;;  %8571 = vmatpush1.bf16.msra.mxu1 %v8154_v50  ;;  %v8202_v37 = vld [vmem:[#allocation4 + $0x3b0] sm:$0xff]  ;;  %v8205_v50 = vld [vmem:[#allocation4 + $0x3c8] sm:$0xff] }
0x1261   : > { %8408 = vmatprep.subr.bf16.mxu0 %v8157_v48  ;;  %8572 = vmatprep.subr.bf16.mxu1 %v8159_v56  ;;  %v7980_v48 = vadd.f32 %v12828_v25, %v7875_v41  ;;  %v7887_v56 = vrot.slane %v12820_v30, %v7886_v55  ;;  %v8208_v25 = vld [vmem:[#allocation4 + $0x3e0] sm:$0xff]  ;;  %v8242_v41 = vld [vmem:[#allocation4 + $0x4f0] sm:$0xff]  ;;  %v8245_v55 = vld [vmem:[#allocation4 + $0x508] sm:$0xff] }
0x1264   : > { %8409 = vmatpush1.bf16.msra.mxu0 %v8156_v44  ;;  %8573 = vmatpush1.bf16.msra.mxu1 %v8158_v60  ;;  %v8070_v60 = vmax.f32 %v7980_v48, 0.0  ;;  %v8251_v48 = vld [vmem:[#allocation4 + $0x538] sm:$0xff] }
0x1265   : > { %8410 = vmatprep.subr.bf16.mxu0 %v8161_v1  ;;  %8574 = vmatprep.subr.bf16.mxu1 %v8163_v57 }
0x1268   : > { %8411 = vmatpush1.bf16.msra.mxu0 %v8160_v38  ;;  %8575 = vmatpush1.bf16.msra.mxu1 %v8162_v5  ;;  %v8210_v38 = vld [vmem:[#allocation4 + $0x3f0] sm:$0xff] }
0x1269   : > { %8412 = vmatprep.subr.bf16.mxu0 %v8165_v9  ;;  %8576 = vmatprep.subr.bf16.mxu1 %v8167_v47  ;;  %v8213_v9 = vld [vmem:[#allocation4 + $0x408] sm:$0xff]  ;;  %v8215_v47 = vld [vmem:[#allocation4 + $0x418] sm:$0xff] }
0x126c   : > { %8413 = vmatpush1.bf16.msra.mxu0 %v8164_v33  ;;  %8577 = vmatpush1.bf16.msra.mxu1 %v8166_v20  ;;  %v8078_v20 = vpack.c.bf16 %v8070_v60, %v8070_v60  ;;  %v8254_v60 = vld [vmem:[#allocation4 + $0x550] sm:$0xff] }
0x126d   : > { %8414 = vmatprep.subr.bf16.mxu0 %v8169_v12  ;;  %8578 = vmatprep.subr.bf16.mxu1 %v8171_v24  ;;  %v8212_v12 = vld [vmem:[#allocation4 + $0x400] sm:$0xff]  ;;  %v8214_v24 = vld [vmem:[#allocation4 + $0x410] sm:$0xff] }
0x1270   : > { %8415 = vmatpush1.bf16.msra.mxu0 %v8168_v21  ;;  %8579 = vmatpush1.bf16.msra.mxu1 %v8170_v46  ;;  %v8217_v21 = vld [vmem:[#allocation4 + $0x428] sm:$0xff]  ;;  %v8219_v46 = vld [vmem:[#allocation4 + $0x438] sm:$0xff] }
0x1271   : > { %8416 = vmatprep.subr.bf16.mxu0 %v8173_v49  ;;  %8580 = vmatprep.subr.bf16.mxu1 %v8175_v31 }
0x1274   : > { %8417 = vmatpush1.bf16.msra.mxu0 %v8172_v54  ;;  %8581 = vmatpush1.bf16.msra.mxu1 %v8174_v17  ;;  %v8216_v54 = vld [vmem:[#allocation4 + $0x420] sm:$0xff]  ;;  %v8218_v17 = vld [vmem:[#allocation4 + $0x430] sm:$0xff] }
0x1275   : > { %8418 = vmatprep.subr.bf16.mxu0 %v8177_v35  ;;  %8582 = vmatprep.subr.bf16.mxu1 %v8179_v42  ;;  %v8221_v42 = vld [vmem:[#allocation4 + $0x448] sm:$0xff] }
0x1278   : > { %8419 = vmatpush1.bf16.msra.mxu0 %v8176_v23  ;;  %8583 = vmatpush1.bf16.msra.mxu1 %v8178_v27  ;;  %v8223_v23 = vld [vmem:[#allocation4 + $0x458] sm:$0xff] }
0x1279   : > { %8420 = vmatprep.subr.bf16.mxu0 %v8181_v11  ;;  %8584 = vmatprep.subr.bf16.mxu1 %v8183_v34  ;;  %v8220_v34 = vld [vmem:[#allocation4 + $0x440] sm:$0xff] }
0x127c   : > { %8421 = vmatpush1.bf16.msra.mxu0 %v8180_v8  ;;  %8585 = vmatpush1.bf16.msra.mxu1 %v8182_v40  ;;  %v8222_v8 = vld [vmem:[#allocation4 + $0x450] sm:$0xff]  ;;  %v8225_v40 = vld [vmem:[#allocation4 + $0x468] sm:$0xff] }
0x127d   : > { %8422 = vmatprep.subr.bf16.mxu0 %v8185_v52  ;;  %8586 = vmatprep.subr.bf16.mxu1 %v8187_v16  ;;  %v8227_v52 = vld [vmem:[#allocation4 + $0x478] sm:$0xff]  ;;  %v8224_v16 = vld [vmem:[#allocation4 + $0x460] sm:$0xff] }
0x1280   : > { %8423 = vmatpush1.bf16.msra.mxu0 %v8184_v29  ;;  %8587 = vmatpush1.bf16.msra.mxu1 %v8186_v62  ;;  %v8226_v29 = vld [vmem:[#allocation4 + $0x470] sm:$0xff]  ;;  %v8229_v62 = vld [vmem:[#allocation4 + $0x488] sm:$0xff] }
0x1281   : > { %8424 = vmatprep.subr.bf16.mxu0 %v8189_v26  ;;  %8588 = vmatprep.subr.bf16.mxu1 %v8191_v4  ;;  %v8231_v26 = vld [vmem:[#allocation4 + $0x498] sm:$0xff]  ;;  %v8228_v4 = vld [vmem:[#allocation4 + $0x480] sm:$0xff] }
0x1284   : > { %8425 = vmatpush1.bf16.msra.mxu0 %v8188_v19  ;;  %8589 = vmatpush1.bf16.msra.mxu1 %v8190_v0  ;;  %v8230_v19 = vld [vmem:[#allocation4 + $0x490] sm:$0xff]  ;;  %v8233_v0 = vld [vmem:[#allocation4 + $0x4a8] sm:$0xff] }
0x1285   : > { %8426 = vmatprep.subr.bf16.mxu0 %v8193_v22  ;;  %8590 = vmatprep.subr.bf16.mxu1 %v8195_v53  ;;  %v8235_v22 = vld [vmem:[#allocation4 + $0x4b8] sm:$0xff]  ;;  %v8232_v53 = vld [vmem:[#allocation4 + $0x4a0] sm:$0xff] }
0x1288   : > { %8427 = vmatpush1.bf16.msra.mxu0 %v8192_v45  ;;  %8591 = vmatpush1.bf16.msra.mxu1 %v8194_v43  ;;  %v8234_v45 = vld [vmem:[#allocation4 + $0x4b0] sm:$0xff]  ;;  %v8237_v43 = vld [vmem:[#allocation4 + $0x4c8] sm:$0xff] }
0x1289   : > { %8428 = vmatprep.subr.bf16.mxu0 %v8197_v63  ;;  %8592 = vmatprep.subr.bf16.mxu1 %v8199_v14  ;;  %v8239_v63 = vld [vmem:[#allocation4 + $0x4d8] sm:$0xff]  ;;  %v8236_v14 = vld [vmem:[#allocation4 + $0x4c0] sm:$0xff] }
0x128c   : > { %8429 = vmatpush1.bf16.msra.mxu0 %v8196_v6  ;;  %8593 = vmatpush1.bf16.msra.mxu1 %v8198_v51  ;;  %v8238_v6 = vld [vmem:[#allocation4 + $0x4d0] sm:$0xff]  ;;  %v8241_v51 = vld [vmem:[#allocation4 + $0x4e8] sm:$0xff] }
0x128d   : > { %8430 = vmatprep.subr.bf16.mxu0 %v8201_v2  ;;  %8594 = vmatprep.subr.bf16.mxu1 %v8203_v36  ;;  %v8243_v2 = vld [vmem:[#allocation4 + $0x4f8] sm:$0xff]  ;;  %v8240_v36 = vld [vmem:[#allocation4 + $0x4e0] sm:$0xff] }
0x1290   : > { %8431 = vmatpush1.bf16.msra.mxu0 %v8200_v18  ;;  %8595 = vmatpush1.bf16.msra.mxu1 %v8202_v37  ;;  %v8247_v18 = vld [vmem:[#allocation4 + $0x518] sm:$0xff]  ;;  %v8244_v37 = vld [vmem:[#allocation4 + $0x500] sm:$0xff] }
0x1291   : > { %8432 = vmatprep.subr.bf16.mxu0 %v8205_v50  ;;  %8596 = vmatprep.subr.bf16.mxu1 %v8207_v32  ;;  %v8246_v50 = vld [vmem:[#allocation4 + $0x510] sm:$0xff]  ;;  %v8249_v32 = vld [vmem:[#allocation4 + $0x528] sm:$0xff] }
0x1292   : > { %v12835_v44 = vpop.f32.mrb[4].mxu0 }
0x1293   : > { %v8022_v1 = vpop.f32.mrb[5].mxu0 }
0x1294   : > { %8433 = vmatpush1.bf16.msra.mxu0 %v8204_v59  ;;  %8597 = vmatpush1.bf16.msra.mxu1 %v8206_v28  ;;  %v8023_v57 = vadd.f32 %v8022_v1, %v7887_v56  ;;  %v8024_v61 = vpop.f32.mrb[6].mxu0  ;;  %v12837_v31 = vpop.f32.mrb[4].mxu1  ;;  %v8248_v56 = vld [vmem:[#allocation4 + $0x520] sm:$0xff]  ;;  %v8250_v59 = vld [vmem:[#allocation4 + $0x530] sm:$0xff]  ;;  %v8253_v28 = vld [vmem:[#allocation4 + $0x548] sm:$0xff] }
0x1295   : > { %8434 = vmatprep.subr.bf16.mxu0 %v8209_v15  ;;  %8598 = vmatprep.subr.bf16.mxu1 %v8211_v58  ;;  %v8025_v5 = vpop.f32.mrb[7].mxu0  ;;  %v12839_v35 = vpop.f32.mrb[5].mxu1  ;;  %v8255_v15 = vld [vmem:[#allocation4 + $0x558] sm:$0xff]  ;;  %v8252_v58 = vld [vmem:[#allocation4 + $0x540] sm:$0xff]  ;;  %v8257_v1 = vld [vmem:[#allocation4 + $0x568] sm:$0xff] }
0x1296   : > { %v8073_v33 = vmax.f32 %v8023_v57, 0.0  ;;  %v8065_v27 = vpop.f32.mrb[6].mxu1  ;;  %v8259_v57 = vld [vmem:[#allocation4 + $0x578] sm:$0xff]  ;;  %v8256_v61 = vld [vmem:[#allocation4 + $0x560] sm:$0xff] }
0x1297   : > { %v8066_v11 = vpop.f32.mrb[7].mxu1  ;;  %v8263_v5 = vld [vmem:[#allocation4 + $0x598] sm:$0xff]  ;;  %v8268_v27 = vld [vmem:[#allocation4 + $0x5c0] sm:$0xff] }
0x1298   : > { %8435 = vmatpush1.bf16.msra.mxu0 %v8208_v25  ;;  %8599 = vmatpush1.bf16.msra.mxu1 %v8210_v38  ;;  %v8081_v49 = vpack.c.bf16 %v8073_v33, %v8073_v33  ;;  %v8258_v25 = vld [vmem:[#allocation4 + $0x570] sm:$0xff]  ;;  %v8261_v38 = vld [vmem:[#allocation4 + $0x588] sm:$0xff] }
0x1299   : > { %8445 = vmatprep.subr.bf16.mxu0 %v8213_v9  ;;  %8609 = vmatprep.subr.bf16.mxu1 %v8215_v47  ;;  %v7882_v9 = vsub.s32 4, %v13002_v3  ;;  %v8260_v47 = vld [vmem:[#allocation4 + $0x580] sm:$0xff]  ;;  %v8262_v33 = vld [vmem:[#allocation4 + $0x590] sm:$0xff] }
0x129a   : > { %v8270_v11 = vld [vmem:[#allocation4 + $0x5d0] sm:$0xff] }
0x129b   : > { %8437 = vmatmul.mubr.bf16.vlgmr.msra.gmra.mrb[8].mxu0 %v8078_v20  ;;  %8601 = vmatmul.mubr.bf16.vlgmr.msra.gmra.mrb[8].mxu1 %v8078_v20  ;;  %v8265_v20 = vld [vmem:[#allocation4 + $0x5a8] sm:$0xff] }
0x129c   : > { %8446 = vmatpush1.bf16.msra.mxu0 %v8212_v12  ;;  %8610 = vmatpush1.bf16.msra.mxu1 %v8214_v24  ;;  %v8267_v12 = vld [vmem:[#allocation4 + $0x5b8] sm:$0xff]  ;;  %v7894_v24 = vsub.s32 7, %v13002_v3 }
0x129d   : > { %8447 = vmatprep.subr.bf16.mxu0 %v8217_v21  ;;  %8611 = vmatprep.subr.bf16.mxu1 %v8219_v46  ;;  %v7883_v21 = vrot.slane %v12820_v30, %v7882_v9  ;;  %v8264_v46 = vld [vmem:[#allocation4 + $0x5a0] sm:$0xff]  ;;  %v8311_v9 = vld [vmem:[#allocation4 + $0x718] sm:$0xff] }
0x129e   : > { %8477 = vmatprep.mubr.bf16.mxu0 %v8081_v49  ;;  %8641 = vmatprep.mubr.bf16.mxu1 %v8081_v49  ;;  %v8266_v49 = vld [vmem:[#allocation4 + $0x5b0] sm:$0xff] }
0x12a0   : > { %8448 = vmatpush1.bf16.msra.mxu0 %v8216_v54  ;;  %8612 = vmatpush1.bf16.msra.mxu1 %v8218_v17  ;;  %v8269_v54 = vld [vmem:[#allocation4 + $0x5c8] sm:$0xff]  ;;  %v8271_v17 = vld [vmem:[#allocation4 + $0x5d8] sm:$0xff] }
0x12a1   : > { %8449 = vmatprep.subr.bf16.mxu0 %v8221_v42  ;;  %8613 = vmatprep.subr.bf16.mxu1 %v8223_v23  ;;  %v7895_v42 = vrot.slane %v12820_v30, %v7894_v24  ;;  %v8021_v23 = vadd.f32 %v12835_v44, %v7883_v21  ;;  %v8312_v24 = vld [vmem:[#allocation4 + $0x720] sm:$0xff]  ;;  %v8314_v21 = vld [vmem:[#allocation4 + $0x730] sm:$0xff] }
0x12a4   : > { %8450 = vmatpush1.bf16.msra.mxu0 %v8220_v34  ;;  %8614 = vmatpush1.bf16.msra.mxu1 %v8222_v8  ;;  %v8273_v34 = vld [vmem:[#allocation4 + $0x5e8] sm:$0xff]  ;;  %v8275_v8 = vld [vmem:[#allocation4 + $0x5f8] sm:$0xff] }
0x12a5   : > { %8451 = vmatprep.subr.bf16.mxu0 %v8225_v40  ;;  %8615 = vmatprep.subr.bf16.mxu1 %v8227_v52  ;;  %v8064_v40 = vadd.f32 %v12839_v35, %v7895_v42  ;;  %v8072_v52 = vmax.f32 %v8021_v23, 0.0  ;;  %v8321_v42 = vld [vmem:[#allocation4 + $0x768] sm:$0xff]  ;;  %v8323_v23 = vld [vmem:[#allocation4 + $0x778] sm:$0xff] }
0x12a7   : > { %v8075_v44 = vmax.f32 %v8064_v40, 0.0  ;;  %v7890_v40 = vsub.s32 6, %v13002_v3 }
0x12a8   : > { %8452 = vmatpush1.bf16.msra.mxu0 %v8224_v16  ;;  %8616 = vmatpush1.bf16.msra.mxu1 %v8226_v29  ;;  %v8272_v16 = vld [vmem:[#allocation4 + $0x5e0] sm:$0xff]  ;;  %v8274_v29 = vld [vmem:[#allocation4 + $0x5f0] sm:$0xff] }
0x12a9   : > { %8453 = vmatprep.subr.bf16.mxu0 %v8229_v62  ;;  %8617 = vmatprep.subr.bf16.mxu1 %v8231_v26  ;;  %v8277_v62 = vld [vmem:[#allocation4 + $0x608] sm:$0xff]  ;;  %v8279_v26 = vld [vmem:[#allocation4 + $0x618] sm:$0xff]  ;;  %v8083_v35 = vpack.c.bf16 %v8075_v44, %v8075_v44  ;;  %v8328_v44 = vld [vmem:[#allocation4 + $0x7a0] sm:$0xff] }
0x12ac   : > { %8454 = vmatpush1.bf16.msra.mxu0 %v8228_v4  ;;  %8618 = vmatpush1.bf16.msra.mxu1 %v8230_v19  ;;  %v8080_v4 = vpack.c.bf16 %v8072_v52, %v8072_v52  ;;  %v8276_v19 = vld [vmem:[#allocation4 + $0x600] sm:$0xff] }
0x12ad   : > { %8455 = vmatprep.subr.bf16.mxu0 %v8233_v0  ;;  %8619 = vmatprep.subr.bf16.mxu1 %v8235_v22  ;;  %v8278_v0 = vld [vmem:[#allocation4 + $0x610] sm:$0xff]  ;;  %v8281_v22 = vld [vmem:[#allocation4 + $0x628] sm:$0xff]  ;;  %v8324_v52 = vld [vmem:[#allocation4 + $0x780] sm:$0xff] }
0x12b0   : > { %8456 = vmatpush1.bf16.msra.mxu0 %v8232_v53  ;;  %8620 = vmatpush1.bf16.msra.mxu1 %v8234_v45  ;;  %v8283_v53 = vld [vmem:[#allocation4 + $0x638] sm:$0xff]  ;;  %v8280_v45 = vld [vmem:[#allocation4 + $0x620] sm:$0xff] }
0x12b1   : > { %8457 = vmatprep.subr.bf16.mxu0 %v8237_v43  ;;  %8621 = vmatprep.subr.bf16.mxu1 %v8239_v63  ;;  %v8282_v43 = vld [vmem:[#allocation4 + $0x630] sm:$0xff]  ;;  %v8285_v63 = vld [vmem:[#allocation4 + $0x648] sm:$0xff] }
0x12b4   : > { %8458 = vmatpush1.bf16.msra.mxu0 %v8236_v14  ;;  %8622 = vmatpush1.bf16.msra.mxu1 %v8238_v6  ;;  %v8287_v14 = vld [vmem:[#allocation4 + $0x658] sm:$0xff]  ;;  %v8284_v6 = vld [vmem:[#allocation4 + $0x640] sm:$0xff] }
0x12b5   : > { %8459 = vmatprep.subr.bf16.mxu0 %v8241_v51  ;;  %8623 = vmatprep.subr.bf16.mxu1 %v8243_v2  ;;  %v8286_v51 = vld [vmem:[#allocation4 + $0x650] sm:$0xff]  ;;  %v8289_v2 = vld [vmem:[#allocation4 + $0x668] sm:$0xff] }
0x12b8   : > { %8460 = vmatpush1.bf16.msra.mxu0 %v8240_v36  ;;  %8624 = vmatpush1.bf16.msra.mxu1 %v8242_v41  ;;  %v8291_v36 = vld [vmem:[#allocation4 + $0x678] sm:$0xff]  ;;  %v8288_v41 = vld [vmem:[#allocation4 + $0x660] sm:$0xff] }
0x12b9   : > { %8461 = vmatprep.subr.bf16.mxu0 %v8245_v55  ;;  %8625 = vmatprep.subr.bf16.mxu1 %v8247_v18  ;;  %v8290_v55 = vld [vmem:[#allocation4 + $0x670] sm:$0xff]  ;;  %v8293_v18 = vld [vmem:[#allocation4 + $0x688] sm:$0xff] }
0x12bc   : > { %8462 = vmatpush1.bf16.msra.mxu0 %v8244_v37  ;;  %8626 = vmatpush1.bf16.msra.mxu1 %v8246_v50  ;;  %v8295_v37 = vld [vmem:[#allocation4 + $0x698] sm:$0xff]  ;;  %v8292_v50 = vld [vmem:[#allocation4 + $0x680] sm:$0xff] }
0x12bd   : > { %8463 = vmatprep.subr.bf16.mxu0 %v8249_v32  ;;  %8627 = vmatprep.subr.bf16.mxu1 %v8251_v48  ;;  %v8294_v32 = vld [vmem:[#allocation4 + $0x690] sm:$0xff]  ;;  %v8297_v48 = vld [vmem:[#allocation4 + $0x6a8] sm:$0xff] }
0x12c0   : > { %8464 = vmatpush1.bf16.msra.mxu0 %v8248_v56  ;;  %8628 = vmatpush1.bf16.msra.mxu1 %v8250_v59  ;;  %v8299_v56 = vld [vmem:[#allocation4 + $0x6b8] sm:$0xff]  ;;  %v8296_v59 = vld [vmem:[#allocation4 + $0x6a0] sm:$0xff] }
0x12c1   : > { %8465 = vmatprep.subr.bf16.mxu0 %v8253_v28  ;;  %8629 = vmatprep.subr.bf16.mxu1 %v8255_v15  ;;  %v8298_v28 = vld [vmem:[#allocation4 + $0x6b0] sm:$0xff]  ;;  %v8301_v15 = vld [vmem:[#allocation4 + $0x6c8] sm:$0xff] }
0x12c4   : > { %8466 = vmatpush1.bf16.msra.mxu0 %v8252_v58  ;;  %8630 = vmatpush1.bf16.msra.mxu1 %v8254_v60  ;;  %v8303_v58 = vld [vmem:[#allocation4 + $0x6d8] sm:$0xff]  ;;  %v8300_v60 = vld [vmem:[#allocation4 + $0x6c0] sm:$0xff] }
0x12c5   : > { %8467 = vmatprep.subr.bf16.mxu0 %v8257_v1  ;;  %8631 = vmatprep.subr.bf16.mxu1 %v8259_v57  ;;  %v8302_v1 = vld [vmem:[#allocation4 + $0x6d0] sm:$0xff]  ;;  %v8305_v57 = vld [vmem:[#allocation4 + $0x6e8] sm:$0xff] }
0x12c8   : > { %8468 = vmatpush1.bf16.msra.mxu0 %v8256_v61  ;;  %8632 = vmatpush1.bf16.msra.mxu1 %v8258_v25  ;;  %v8307_v61 = vld [vmem:[#allocation4 + $0x6f8] sm:$0xff]  ;;  %v8304_v25 = vld [vmem:[#allocation4 + $0x6e0] sm:$0xff] }
0x12c9   : > { %8469 = vmatprep.subr.bf16.mxu0 %v8261_v38  ;;  %8633 = vmatprep.subr.bf16.mxu1 %v8263_v5  ;;  %v8306_v38 = vld [vmem:[#allocation4 + $0x6f0] sm:$0xff]  ;;  %v8309_v5 = vld [vmem:[#allocation4 + $0x708] sm:$0xff] }
0x12cc   : > { %8470 = vmatpush1.bf16.msra.mxu0 %v8260_v47  ;;  %8634 = vmatpush1.bf16.msra.mxu1 %v8262_v33  ;;  %v8308_v47 = vld [vmem:[#allocation4 + $0x700] sm:$0xff]  ;;  %v8310_v33 = vld [vmem:[#allocation4 + $0x710] sm:$0xff] }
0x12cd   : > { %8471 = vmatprep.subr.bf16.mxu0 %v8265_v20  ;;  %8635 = vmatprep.subr.bf16.mxu1 %v8267_v12  ;;  %v8313_v20 = vld [vmem:[#allocation4 + $0x728] sm:$0xff]  ;;  %v8315_v12 = vld [vmem:[#allocation4 + $0x738] sm:$0xff] }
0x12d0   : > { %8472 = vmatpush1.bf16.msra.mxu0 %v8264_v46  ;;  %8636 = vmatpush1.bf16.msra.mxu1 %v8266_v49  ;;  %v8317_v46 = vld [vmem:[#allocation4 + $0x748] sm:$0xff]  ;;  %v8319_v49 = vld [vmem:[#allocation4 + $0x758] sm:$0xff] }
0x12d1   : > { %8473 = vmatprep.subr.bf16.mxu0 %v8269_v54  ;;  %8637 = vmatprep.subr.bf16.mxu1 %v8271_v17  ;;  %v8316_v54 = vld [vmem:[#allocation4 + $0x740] sm:$0xff]  ;;  %v8318_v17 = vld [vmem:[#allocation4 + $0x750] sm:$0xff] }
0x12d4   : > { %8474 = vmatpush1.bf16.msra.mxu0 %v8268_v27  ;;  %8638 = vmatpush1.bf16.msra.mxu1 %v8270_v11  ;;  %v8320_v27 = vld [vmem:[#allocation4 + $0x760] sm:$0xff]  ;;  %v8322_v11 = vld [vmem:[#allocation4 + $0x770] sm:$0xff] }
0x12d5   : > { %8475 = vmatprep.subr.bf16.mxu0 %v8273_v34  ;;  %8639 = vmatprep.subr.bf16.mxu1 %v8275_v8  ;;  %v8325_v34 = vld [vmem:[#allocation4 + $0x788] sm:$0xff]  ;;  %v8327_v8 = vld [vmem:[#allocation4 + $0x798] sm:$0xff] }
0x12d8   : > { %8476 = vmatpush1.bf16.msra.mxu0 %v8272_v16  ;;  %8640 = vmatpush1.bf16.msra.mxu1 %v8274_v29  ;;  %v8326_v16 = vld [vmem:[#allocation4 + $0x790] sm:$0xff]  ;;  %v8329_v29 = vld [vmem:[#allocation4 + $0x7a8] sm:$0xff] }
0x12d9   : > { %8486 = vmatprep.subr.bf16.mxu0 %v8277_v62  ;;  %8650 = vmatprep.subr.bf16.mxu1 %v8279_v26  ;;  %v8331_v62 = vld [vmem:[#allocation4 + $0x7b8] sm:$0xff]  ;;  %v7891_v26 = vrot.slane %v12820_v30, %v7890_v40  ;;  %v8336_v30 = vld [vmem:[#allocation4 + $0x7e0] sm:$0xff] }
0x12db   : > { %8478 = vmatmul.mubr.bf16.vlgmr.msra.gmra.mrb[8].mxu0 %v8080_v4  ;;  %8642 = vmatmul.mubr.bf16.vlgmr.msra.gmra.mrb[8].mxu1 %v8080_v4  ;;  %v8330_v4 = vld [vmem:[#allocation4 + $0x7b0] sm:$0xff]  ;;  %v8062_v3 = vadd.f32 %v12837_v31, %v7891_v26 }
0x12dc   : > { %8487 = vmatpush1.bf16.msra.mxu0 %v8276_v19  ;;  %8651 = vmatpush1.bf16.msra.mxu1 %v8278_v0  ;;  %v8333_v19 = vld [vmem:[#allocation4 + $0x7c8] sm:$0xff]  ;;  %v8335_v0 = vld [vmem:[#allocation4 + $0x7d8] sm:$0xff] }
0x12dd   : > { %8488 = vmatprep.subr.bf16.mxu0 %v8281_v22  ;;  %8652 = vmatprep.subr.bf16.mxu1 %v8283_v53  ;;  %v8332_v22 = vld [vmem:[#allocation4 + $0x7c0] sm:$0xff]  ;;  %v8334_v53 = vld [vmem:[#allocation4 + $0x7d0] sm:$0xff] }
0x12de   : > { %8518 = vmatprep.mubr.bf16.mxu0 %v8083_v35  ;;  %8682 = vmatprep.mubr.bf16.mxu1 %v8083_v35  ;;  %v8337_v35 = vld [vmem:[#allocation4 + $0x7e8] sm:$0xff] }
0x12e0   : > { %8489 = vmatpush1.bf16.msra.mxu0 %v8280_v45  ;;  %8653 = vmatpush1.bf16.msra.mxu1 %v8282_v43  ;;  %v8339_v45 = vld [vmem:[#allocation4 + $0x7f8] sm:$0xff]  ;;  %v8074_v43 = vmax.f32 %v8062_v3, 0.0 }
0x12e1   : > { %8490 = vmatprep.subr.bf16.mxu0 %v8285_v63  ;;  %8654 = vmatprep.subr.bf16.mxu1 %v8287_v14  ;;  %v8338_v63 = vld [vmem:[#allocation4 + $0x7f0] sm:$0xff] }
0x12e2   : > { %v8082_v14 = vpack.c.bf16 %v8074_v43, %v8074_v43 }
0x12e4   : > { %8491 = vmatpush1.bf16.msra.mxu0 %v8284_v6  ;;  %8655 = vmatpush1.bf16.msra.mxu1 %v8286_v51  ;;  %v8341_v6 = vld [vmem:[#allocation16 + $0x1] ss:$4 sm:$0xf] }
0x12e5   : > { %8492 = vmatprep.subr.bf16.mxu0 %v8289_v2  ;;  %8656 = vmatprep.subr.bf16.mxu1 %v8291_v36  ;;  %v8346_v31 = vrot.slane %v8341_v6, %v11044_v13  ;;  %v8354_v51 = vrot.slane %v8341_v6, %v11041_v10  ;;  %v8696_v2 = vld [vmem:[#allocation16 + $0x2] ss:$4 sm:$0xf]  ;;  %v8350_v36 = vrot.slane %v8341_v6, %v11036_v7 }
0x12e8   : > { %8493 = vmatpush1.bf16.msra.mxu0 %v8288_v41  ;;  %8657 = vmatpush1.bf16.msra.mxu1 %v8290_v55  ;;  %v8358_v41 = vrot.slane %v8341_v6, %v11049_v39 }
0x12e9   : > { %8494 = vmatprep.subr.bf16.mxu0 %v8293_v18  ;;  %8658 = vmatprep.subr.bf16.mxu1 %v8295_v37 }
0x12ec   : > { %8495 = vmatpush1.bf16.msra.mxu0 %v8292_v50  ;;  %8659 = vmatpush1.bf16.msra.mxu1 %v8294_v32  ;;  %v8701_v50 = vrot.slane %v8696_v2, %v11044_v13 }
0x12ed   : > { %8496 = vmatprep.subr.bf16.mxu0 %v8297_v48  ;;  %8660 = vmatprep.subr.bf16.mxu1 %v8299_v56 }
0x12f0   : > { %8497 = vmatpush1.bf16.msra.mxu0 %v8296_v59  ;;  %8661 = vmatpush1.bf16.msra.mxu1 %v8298_v28  ;;  %v8709_v59 = vrot.slane %v8696_v2, %v11041_v10 }
0x12f1   : > { %8498 = vmatprep.subr.bf16.mxu0 %v8301_v15  ;;  %8662 = vmatprep.subr.bf16.mxu1 %v8303_v58  ;;  %v8705_v15 = vrot.slane %v8696_v2, %v11036_v7 }
0x12f4   : > { %8499 = vmatpush1.bf16.msra.mxu0 %v8300_v60  ;;  %8663 = vmatpush1.bf16.msra.mxu1 %v8302_v1 }
0x12f5   : > { %8500 = vmatprep.subr.bf16.mxu0 %v8305_v57  ;;  %8664 = vmatprep.subr.bf16.mxu1 %v8307_v61 }
0x12f8   : > { %8501 = vmatpush1.bf16.msra.mxu0 %v8304_v25  ;;  %8665 = vmatpush1.bf16.msra.mxu1 %v8306_v38 }
0x12f9   : > { %8502 = vmatprep.subr.bf16.mxu0 %v8309_v5  ;;  %8666 = vmatprep.subr.bf16.mxu1 %v8311_v9 }
0x12fc   : > { %8503 = vmatpush1.bf16.msra.mxu0 %v8308_v47  ;;  %8667 = vmatpush1.bf16.msra.mxu1 %v8310_v33  ;;  %v8713_v47 = vrot.slane %v8696_v2, %v11049_v39 }
0x12fd   : > { %8504 = vmatprep.subr.bf16.mxu0 %v8313_v20  ;;  %8668 = vmatprep.subr.bf16.mxu1 %v8315_v12 }
0x1300   : > { %8505 = vmatpush1.bf16.msra.mxu0 %v8312_v24  ;;  %8669 = vmatpush1.bf16.msra.mxu1 %v8314_v21 }
0x1301   : > { %8506 = vmatprep.subr.bf16.mxu0 %v8317_v46  ;;  %8670 = vmatprep.subr.bf16.mxu1 %v8319_v49 }
0x1304   : > { %8507 = vmatpush1.bf16.msra.mxu0 %v8316_v54  ;;  %8671 = vmatpush1.bf16.msra.mxu1 %v8318_v17  ;;  %v9355_v17 = vld [vmem:[#allocation16 + $0x3] ss:$0 sm:$0xff] }
0x1305   : > { %8508 = vmatprep.subr.bf16.mxu0 %v8321_v42  ;;  %8672 = vmatprep.subr.bf16.mxu1 %v8323_v23 }
0x1308   : > { %8509 = vmatpush1.bf16.msra.mxu0 %v8320_v27  ;;  %8673 = vmatpush1.bf16.msra.mxu1 %v8322_v11 }
0x1309   : > { %8510 = vmatprep.subr.bf16.mxu0 %v8325_v34  ;;  %8674 = vmatprep.subr.bf16.mxu1 %v8327_v8 }
0x130c   : > { %8511 = vmatpush1.bf16.msra.mxu0 %v8324_v52  ;;  %8675 = vmatpush1.bf16.msra.mxu1 %v8326_v16 }
0x130d   : > { %8512 = vmatprep.subr.bf16.mxu0 %v8329_v29  ;;  %8676 = vmatprep.subr.bf16.mxu1 %v8331_v62 }
0x1310   : > { %8513 = vmatpush1.bf16.msra.mxu0 %v8328_v44  ;;  %8677 = vmatpush1.bf16.msra.mxu1 %v8330_v4 }
0x1311   : > { %8514 = vmatprep.subr.bf16.mxu0 %v8333_v19  ;;  %8678 = vmatprep.subr.bf16.mxu1 %v8335_v0 }
0x1314   : > { %8515 = vmatpush1.bf16.msra.mxu0 %v8332_v22  ;;  %8679 = vmatpush1.bf16.msra.mxu1 %v8334_v53 }
0x1315   : > { %8516 = vmatprep.subr.bf16.mxu0 %v8337_v35  ;;  %8680 = vmatprep.subr.bf16.mxu1 %v8339_v45 }
0x1318   : > { %8517 = vmatpush1.bf16.msra.mxu0 %v8336_v30  ;;  %8681 = vmatpush1.bf16.msra.mxu1 %v8338_v63 }
0x131b   : > { %8519 = vmatmul.mubr.bf16.vlgmr.msra.gmra.mrb[8].mxu0 %v8082_v14  ;;  %8683 = vmatmul.mubr.bf16.vlgmr.msra.gmra.mrb[8].mxu1 %v8082_v14 }
0x13ee   : > { %v8520_v55 = vpop.f32.mrb[8].mxu0  ;;  %v8684_v18 = vpop.f32.mrb[8].mxu1 }
0x13ef   : > { %v9473_v37 = vadd.f32 %v8520_v55, %v8346_v31  ;;  %v9475_v32 = vadd.f32 %v8684_v18, %v8354_v51  ;;  %v8522_v48 = vpop.f32.mrb[9].mxu0  ;;  %v8686_v56 = vpop.f32.mrb[9].mxu1 }
0x13f0   : > { %v9474_v28 = vadd.f32 %v8522_v48, %v8350_v36  ;;  %v9476_v58 = vadd.f32 %v8686_v56, %v8358_v41  ;;  %v8524_v60 = vpop.f32.mrb[10].mxu0  ;;  %v8688_v1 = vpop.f32.mrb[10].mxu1 }
0x13f1   : > { %v8691_v57 = vmax.f32 %v9473_v37, 0.0  ;;  %v8693_v61 = vmax.f32 %v9475_v32, 0.0  ;;  %v8525_v25 = vpop.f32.mrb[11].mxu0  ;;  %v8689_v38 = vpop.f32.mrb[11].mxu1 }
0x13f2   : > { %v8692_v5 = vmax.f32 %v9474_v28, 0.0  ;;  %v8694_v9 = vmax.f32 %v9476_v58, 0.0 }
0x13f3   : > { %v8718_v13 = vmul.f32 %v8701_v50, %v8691_v57  ;;  %v8720_v33 = vmul.f32 %v8709_v59, %v8693_v61 }
0x13f4   : > { %v8719_v20 = vmul.f32 %v8705_v15, %v8692_v5  ;;  %v8721_v10 = vmul.f32 %v8713_v47, %v8694_v9 }
0x13f5   : > { %v8723_v12 = vsel %vm8722_vm0, %v8718_v13, 0.0  ;;  %v8726_v7 = vsel %vm8722_vm0, %v8720_v33, 0.0 }
0x13f6   : > { %v8724_v24 = vsel %vm8722_vm0, %v8719_v20, 0.0  ;;  %v8728_v49 = vsel %vm8722_vm0, %v8721_v10, 0.0 }
0x13f7   : > { %v8725_v21 = vadd.f32 %v8724_v24, %v8723_v12 }
0x13f9   : > { %v8727_v46 = vadd.f32 %v8726_v7, %v8725_v21 }
0x13fb   : > { %v8729_v54 = vadd.f32 %v8728_v49, %v8727_v46 }
0x13fd   : > { %8730 = vadd.xlane.f32.xlu0 %v8729_v54 }
0x148a   : > { %v8731_v42 = vpop.xlane.xlu0 %8730 }
0x148b   : > { %v8737_v23 = vadd.f32 %v9355_v17, %v8731_v42 }
0x148d   : > { %v9356_v27 = vmul.f32 -1.442695, %v8737_v23 }
0x148f   : > { %10231 = vpow2.f32 %v9356_v27 }
0x1499   : > { %v10232_v11 = vpop.eup %10231 }
0x149a   : > { %v8741_v39 = vadd.f32 1.0, %v10232_v11 }
0x149c   : > { %10233 = vrcp.f32 %v8741_v39 }
0x14a6   : > { %v10234_v34 = vpop.eup %10233 }
0x14a7   : > { %8745 = vst.msk [vmem:[%s13003_s9] sm:$0x3] %vm8744_vm2, %v10234_v34 }
0x14a8 PF: > { %s13004_s12 = sld [smem:[#allocation30_spill]]  ;;  %s13005_s18 = sld [smem:[#allocation29_spill]] }
0x14a9   : > { %s13006_s11 = sld [smem:[#allocation31_spill]]  ;;  %s13007_s30 = smov %s10489_s10 }
0x14ae   : > { %p28_p5 = scmp.ge.s32.totalorder %s13004_s12, 4   ;;  %s13008_s10 = smov %s13005_s18 }
0x14b0   :  { %30 = sbr.rel (!%p28_p5) target bundleno = 15 (0xf), region = 193 }
0x14b7   :  { %8757 = vsyncpa [#allocation7], 1 }
0x14b8   :  { %8759 = vsyncpa [#allocation7 + $0x1], 1 }
0x14b9   :  { %8760 = vsyncpa [#allocation9], 1 }
0x14ba   :  { %8762 = vsyncpa [#allocation9 + $0x1], 1 }
0x14bb   :  { %8763 = vsyncpa [#allocation12], 1 }
0x14bc   :  { %8765 = vsyncpa [#allocation12 + $0x1], 1 }
0x14bd   :  { %8766 = vsyncpa [#allocation15], 1 }
0x14be   :  { %8768 = vsyncpa [#allocation15 + $0x1], 1 }
0x14bf   :  { %8769 = vsyncmov [#allocation5] }
0x14c2   :  { %s8770_s29 = vpop.sfrf %8769 }
0x14c3   :  { %p9359_p9 = scmp.ne.s32.totalorder %s8770_s29, 0 }
0x14c5   :  { %8774 = shalt.err (%p9359_p9)  }
0x14c6   :  { %8776 = vsyncmov [#allocation5 + $0x1] }
0x14c9   :  { %s8777_s23 = vpop.sfrf %8776 }
0x14ca   :  { %p9360_p7 = scmp.ne.s32.totalorder %s8777_s23, 0 }
0x14cc   :  { %8781 = shalt.err (%p9360_p7)  }

</bundles_post_ra>
